<compile_context>
chip_gen: v7x
topology: tpu7x:2x2x1
jax: 0.10.0
libtpu: 0.0.40
codegen_flags: <defaults>
</compile_context>

<pallas_src>
import functools

import jax
import jax.numpy as jnp
from jax.experimental import pallas as pl
from jax.experimental.pallas import tpu as pltpu

_VMEM_LIMIT = 32 * 1024 * 1024   # safe budget on v5e/v6e (128 MiB) and v7x (64 MiB)
_EPS = 1e-5                      # nn.BatchNorm2d default
_SLOPE = 0.2                     # LeakyReLU slope
_FUSE_ELEMS = 1 << 20            # fuse BN when M_pad*C_pad <= 1M elems (~6 MiB resident)


def _round_up(x, m):
    return (x + m - 1) // m * m


# ----------------------------- Pallas kernels -------------------------------

def _conv_bias_kernel(p_ref, w_ref, b_ref, o_ref, *, use_act):
    """bf16 matmul on the MXU + bias (+ LeakyReLU), f32 accumulate."""
    y = jnp.dot(p_ref[...], w_ref[...], preferred_element_type=jnp.float32)
    y = y + b_ref[0:1, :]
    if use_act:
        y = jnp.where(y >= 0, y, _SLOPE * y)
    o_ref[...] = y.astype(o_ref.dtype)


def _partial_sums(y):
    """(tile_m, C) f32 -> per-sublane partial (8, C) sums of y and y*y."""
    tm, c = y.shape
    yr = y.reshape(tm // 8, 8, c)
    return jnp.sum(yr, axis=0), jnp.sum(yr * yr, axis=0)


def _conv_bn_act_fused_kernel(p_ref, w_ref, g_ref, o_ref, y_acc, s_sum, s_sq,
                              *, inv_m):
    """Single-pass Conv + train-mode BatchNorm + LeakyReLU.

    The grid iterates over M tiles ("arbitrary"); the full (M_pad, C_pad) f32
    activation stays resident in a VMEM scratch, per-channel sum / sum-of-
    squares accumulate into (8, C_pad) scratches, and the last step folds the
    batch statistics into a per-channel affine and writes the output once.
    Conv bias is omitted: batch-mean subtraction cancels it exactly.  Padded
    patch rows are all-zero and contribute zero to both sums, so dividing by
    the true M yields exact statistics despite M padding.
    """
    m = pl.program_id(0)
    tile_m = p_ref.shape[0]

    @pl.when(m == 0)
    def _init():
        s_sum[...] = jnp.zeros_like(s_sum)
        s_sq[...] = jnp.zeros_like(s_sq)

    y = jnp.dot(p_ref[...], w_ref[...], preferred_element_type=jnp.float32)
    row0 = pl.multiple_of(m * tile_m, 8)
    y_acc[pl.ds(row0, tile_m), :] = y
    ps, pq = _partial_sums(y)
    s_sum[...] += ps
    s_sq[...] += pq

    @pl.when(m == pl.num_programs(0) - 1)
    def _finalize():
        mean = jnp.sum(s_sum[...], axis=0, keepdims=True) * inv_m
        # NOTE: E[x^2]-E[x]^2 in f32; fine at these sizes (guarded to >=0).
        var = jnp.maximum(jnp.sum(s_sq[...], axis=0, keepdims=True) * inv_m
                          - mean * mean, 0.0)
        scale = g_ref[0:1, :] * jax.lax.rsqrt(var + _EPS)
        shift = g_ref[1:2, :] - mean * scale
        z = y_acc[...] * scale + shift
        o_ref[...] = jnp.where(z >= 0, z, _SLOPE * z).astype(o_ref.dtype)


def _conv_stats_kernel(p_ref, w_ref, y_ref, s_sum_ref, s_sq_ref):
    """Two-pass fallback, pass 1: matmul (bf16 out) + per-channel partial sums."""
    @pl.when(pl.program_id(0) == 0)
    def _init():
        s_sum_ref[...] = jnp.zeros_like(s_sum_ref)
        s_sq_ref[...] = jnp.zeros_like(s_sq_ref)

    y = jnp.dot(p_ref[...], w_ref[...], preferred_element_type=jnp.float32)
    y_ref[...] = y.astype(y_ref.dtype)
    ps, pq = _partial_sums(y)
    s_sum_ref[...] += ps
    s_sq_ref[...] += pq


def _bn_act_kernel(y_ref, p_ref, o_ref):
    """Two-pass fallback, pass 2: folded-BN affine + LeakyReLU(0.2)."""
    z = y_ref[...].astype(jnp.float32) * p_ref[0:1, :] + p_ref[1:2, :]
    o_ref[...] = jnp.where(z >= 0, z, _SLOPE * z).astype(o_ref.dtype)


def _avgpool_kernel(xee_ref, xeo_ref, xoe_ref, xoo_ref, inv_ref, o_ref, *, c):
    """3x3 / stride-2 / pad-1 average pool (count_include_pad=False), VPU-only.

    Inputs are the four even/odd polyphase components of the image in an
    (N, OH, OW*C) layout (lane-dense at real widths).  Out-of-image neighbours
    are realised as zero-block concatenations in registers; a single full-block
    store writes the result scaled by the static 1/valid-count map.
    """
    _, oh, owc = o_ref.shape
    ee = xee_ref[...]
    eo = xeo_ref[...]
    oe = xoe_ref[...]
    oo = xoo_ref[...]
    s = ee + eo + oe + oo
    z_col = jnp.zeros((1, oh, c), jnp.float32)
    z_row = jnp.zeros((1, 1, owc), jnp.float32)
    # left neighbour (col 2j-1), valid for j >= 1
    left = jnp.concatenate([z_col, (eo + oo)[:, :, :owc - c]], axis=2)
    # upper neighbour (row 2i-1), valid for i >= 1
    up = jnp.concatenate([z_row, (oe + oo)[:, :oh - 1, :]], axis=1)
    # upper-left diagonal (2i-1, 2j-1)
    ul_c = jnp.concatenate([z_col, oo[:, :, :owc - c]], axis=2)
    ul = jnp.concatenate([z_row, ul_c[:, :oh - 1, :]], axis=1)
    o_ref[...] = (s + left + up + ul) * inv_ref[...]


# ------------------------------- JAX glue -----------------------------------

def _extract_patches(x, k, stride, pad):
    """im2col in bf16: (N,H,W,C) -> (N,OH,OW,k*k*C), tap-major / channel-minor."""
    N, H, W, C = x.shape
    xp = jnp.pad(x.astype(jnp.bfloat16), ((0, 0), (pad, pad), (pad, pad), (0, 0)))
    OH = (H + 2 * pad - k) // stride + 1
    OW = (W + 2 * pad - k) // stride + 1
    cols = []
    for kh in range(k):
        for kw in range(k):
            cols.append(xp[:, kh:kh + stride * (OH - 1) + 1:stride,
                           kw:kw + stride * (OW - 1) + 1:stride, :])
    patches = jnp.stack(cols, axis=3)            # (N, OH, OW, k*k, C) bf16
    return patches.reshape(N, OH, OW, k * k * C), OH, OW


def conv_layer_nhwc(x, lp, out_dtype):
    """Conv2d(k=4, pad=2, stride) [+ train-mode BatchNorm + LeakyReLU] on NHWC."""
    N, H, W, cin = x.shape
    cout = lp["w"].shape[-1]
    patches, OH, OW = _extract_patches(x, 4, lp["stride"], 2)

    M = N * OH * OW
    K = 16 * cin
    K_pad = _round_up(K, 128)                 # lane-dense contraction dim
    C_pad = _round_up(cout, 128)              # lane-dense output dim
    nt = pl.cdiv(M, 512)                      # balanced M tiling (<=512 rows/tile)
    tile_m = _round_up(pl.cdiv(M, nt), 8)
    M_pad = nt * tile_m
    grid = (nt,)

    # bf16 MXU operands, zero-padded to tile / lane friendly shapes.
    p2 = patches.reshape(M, K)                # already bf16
    p2 = jnp.pad(p2, ((0, M_pad - M), (0, K_pad - K)))
    w2 = lp["w"].reshape(K, cout).astype(jnp.bfloat16)
    w2 = jnp.pad(w2, ((0, K_pad - K), (0, C_pad - cout)))

    p_spec = pl.BlockSpec((tile_m, K_pad), lambda m: (m, 0))
    w_spec = pl.BlockSpec((K_pad, C_pad), lambda m: (0, 0))      # resident weights
    y_spec = pl.BlockSpec((tile_m, C_pad), lambda m: (m, 0))
    s_spec = pl.BlockSpec((8, C_pad), lambda m: (0, 0))          # resident stats
    full_spec = pl.BlockSpec((M_pad, C_pad), lambda m: (0, 0))   # resident output

    out_bytes = jnp.dtype(out_dtype).itemsize
    matmul_cost = pl.CostEstimate(
        flops=2 * M_pad * K_pad * C_pad, transcendentals=0,
        bytes_accessed=(M_pad * K_pad * 2 + K_pad * C_pad * 2
                        + M_pad * C_pad * out_bytes))

    if lp["use_bn"]:
        g8 = (jnp.zeros((8, C_pad), jnp.float32)
              .at[0, :cout].set(lp["gamma"]).at[1, :cout].set(lp["beta"]))
        if M_pad * C_pad <= _FUSE_ELEMS:
            # Single fused pass: activation stays VMEM-resident, one HBM write.
            out_pad = pl.pallas_call(
                functools.partial(_conv_bn_act_fused_kernel, inv_m=1.0 / M),
                out_shape=jax.ShapeDtypeStruct((M_pad, C_pad), out_dtype),
                grid=grid,
                in_specs=[p_spec, w_spec, s_spec],
                out_specs=full_spec,
                scratch_shapes=[pltpu.VMEM((M_pad, C_pad), jnp.float32),
                                pltpu.VMEM((8, C_pad), jnp.float32),
                                pltpu.VMEM((8, C_pad), jnp.float32)],
                compiler_params=pltpu.CompilerParams(
                    dimension_semantics=("arbitrary",),
                    vmem_limit_bytes=_VMEM_LIMIT),
                cost_estimate=matmul_cost,
            )(p2, w2, g8)
        else:
            # Fallback for very large layers: pass 1 = matmul + stats (bf16 y),
            # pass 2 = folded affine + LeakyReLU.
            y_pad, s_sum, s_sq = pl.pallas_call(
                _conv_stats_kernel,
                out_shape=(jax.ShapeDtypeStruct((M_pad, C_pad), jnp.bfloat16),
                           jax.ShapeDtypeStruct((8, C_pad), jnp.float32),
                           jax.ShapeDtypeStruct((8, C_pad), jnp.float32)),
                grid=grid,
                in_specs=[p_spec, w_spec],
                out_specs=(y_spec, s_spec, s_spec),
                compiler_params=pltpu.CompilerParams(
                    dimension_semantics=("arbitrary",),
                    vmem_limit_bytes=_VMEM_LIMIT),
                cost_estimate=matmul_cost,
            )(p2, w2)
            mean = jnp.sum(s_sum[:, :cout], axis=0) / M
            var = jnp.maximum(jnp.sum(s_sq[:, :cout], axis=0) / M - mean * mean, 0.0)
            scale = lp["gamma"] * jax.lax.rsqrt(var + _EPS)
            shift = lp["beta"] - mean * scale
            bnp = (jnp.zeros((8, C_pad), jnp.float32)
                   .at[0, :cout].set(scale).at[1, :cout].set(shift))
            out_pad = pl.pallas_call(
                _bn_act_kernel,
                out_shape=jax.ShapeDtypeStruct((M_pad, C_pad), out_dtype),
                grid=grid,
                in_specs=[y_spec, s_spec],
                out_specs=y_spec,
                compiler_params=pltpu.CompilerParams(
                    dimension_semantics=("parallel",),
                    vmem_limit_bytes=_VMEM_LIMIT),
                cost_estimate=pl.CostEstimate(
                    flops=3 * M_pad * C_pad, transcendentals=0,
                    bytes_accessed=M_pad * C_pad * (2 + out_bytes)),
            )(y_pad, bnp)
    else:
        b8 = jnp.zeros((8, C_pad), jnp.float32).at[0, :cout].set(lp["b"])
        out_pad = pl.pallas_call(
            functools.partial(_conv_bias_kernel, use_act=lp["use_act"]),
            out_shape=jax.ShapeDtypeStruct((M_pad, C_pad), out_dtype),
            grid=grid,
            in_specs=[p_spec, w_spec, s_spec],
            out_specs=y_spec,
            compiler_params=pltpu.CompilerParams(
                dimension_semantics=("parallel",),
                vmem_limit_bytes=_VMEM_LIMIT),
            cost_estimate=matmul_cost,
        )(p2, w2, b8)

    return out_pad[:M, :cout].reshape(N, OH, OW, cout)


def downsample_nhwc(x):
    """AvgPool2d(3, stride=2, padding=1, count_include_pad=False) on NHWC."""
    N, H, W, C = x.shape
    # TODO(synk): general odd-size handling; the pix2pixHD pyramid is even-sized.
    assert H % 2 == 0 and W % 2 == 0, "avg-pool kernel assumes even H, W"
    OH, OW = H // 2, W // 2
    OWC = OW * C
    x = x.astype(jnp.float32)
    # Polyphase partition of x (no expansion), flattened to lane-dense (N, OH, OW*C).
    xee = x[:, 0::2, 0::2, :].reshape(N, OH, OWC)
    xeo = x[:, 0::2, 1::2, :].reshape(N, OH, OWC)
    xoe = x[:, 1::2, 0::2, :].reshape(N, OH, OWC)
    xoo = x[:, 1::2, 1::2, :].reshape(N, OH, OWC)
    # Static valid-cell counts: 9 interior, 6 on top row / left col, 4 corner.
    cnt = jnp.full((OH, OW), 9.0, jnp.float32)
    cnt = cnt.at[0, :].set(6.0).at[:, 0].set(6.0).at[0, 0].set(4.0)
    inv = jnp.repeat(1.0 / cnt, C, axis=1).reshape(1, OH, OWC)

    blk = pl.BlockSpec((1, OH, OWC), lambda n: (n, 0, 0))
    cst = pl.BlockSpec((1, OH, OWC), lambda n: (0, 0, 0))
    out = pl.pallas_call(
        functools.partial(_avgpool_kernel, c=C),
        out_shape=jax.ShapeDtypeStruct((N, OH, OWC), jnp.float32),
        grid=(N,),
        in_specs=[blk, blk, blk, blk, cst],
        out_specs=blk,
        compiler_params=pltpu.CompilerParams(
            dimension_semantics=("parallel",),
            vmem_limit_bytes=_VMEM_LIMIT),
        cost_estimate=pl.CostEstimate(
            flops=9 * N * OH * OWC, transcendentals=0,
            bytes_accessed=(4 * N + N + 1) * OH * OWC * 4),
    )(xee, xeo, xoe, xoo, inv)
    return out.reshape(N, OH, OW, C)


def nlayer_forward(x_nhwc, params):
    h = x_nhwc
    last = len(params) - 1
    for idx, lp in enumerate(params):
        out_dtype = jnp.float32 if idx == last else jnp.bfloat16
        h = conv_layer_nhwc(h, lp, out_dtype)
    return h


def multiscale_forward(x_nchw, all_params):
    """Matches MultiscaleDiscriminator.forward (getIntermFeat=False)."""
    x = jnp.transpose(x_nchw, (0, 2, 3, 1)).astype(jnp.float32)   # NCHW -> NHWC
    num_D = len(all_params)
    results = []
    cur = x
    for i in range(num_D):
        params = all_params[num_D - 1 - i]                   # layer{num_D-1-i}
        out = nlayer_forward(cur, params)                    # (N, OH, OW, 1)
        results.append([jnp.transpose(out, (0, 3, 1, 2))])   # back to NCHW
        if i != num_D - 1:
            cur = downsample_nhwc(cur)
    return results


# --------------------------- parameter construction -------------------------

def init_nlayer_params(key, input_nc=3, ndf=16, n_layers=3):
    defs = [(input_nc, ndf, 2, False, True)]        # conv + LeakyReLU
    nf = ndf
    for _ in range(1, n_layers):
        nf_prev, nf = nf, min(nf * 2, 512)
        defs.append((nf_prev, nf, 2, True, True))   # conv + BN + LeakyReLU
    nf_prev, nf = nf, min(nf * 2, 512)
    defs.append((nf_prev, nf, 1, True, True))       # conv + BN + LeakyReLU
    defs.append((nf, 1, 1, False, False))           # final 1-channel conv
    params = []
    for (cin, cout, stride, use_bn, use_act) in defs:
        key, k1, k2, k3, k4 = jax.random.split(key, 5)
        params.append(dict(
            w=0.05 * jax.random.normal(k1, (4, 4, cin, cout), jnp.float32),
            b=0.05 * jax.random.normal(k2, (cout,), jnp.float32),
            gamma=1.0 + 0.1 * jax.random.normal(k3, (cout,), jnp.float32),
            beta=0.1 * jax.random.normal(k4, (cout,), jnp.float32),
            stride=stride, use_bn=use_bn, use_act=use_act,
        ))
    return params, key


# ---------------------------------- main -------------------------------------

if __name__ == "__main__":
    key = jax.random.PRNGKey(0)

    num_D, n_layers, input_nc, ndf = 3, 3, 3, 16
    all_params = []
    for _ in range(num_D):
        p, key = init_nlayer_params(key, input_nc=input_nc, ndf=ndf,
                                    n_layers=n_layers)
        all_params.append(p)

    key, xk = jax.random.split(key)
    x = jax.random.normal(xk, (2, input_nc, 32, 32), jnp.float32)  # NCHW

    fwd = jax.jit(lambda inp: multiscale_forward(inp, all_params))
    results = fwd(x)
    for scale_out in results:
        for t in scale_out:
            jax.block_until_ready(t)

    print("KERNEL_OK")
</pallas_src>

<mosaic_0001>
module attributes {stable_mosaic.version = 11 : i64} {
  func.func @_conv_bias_kernel(%arg0: i32, %arg1: memref<296x128xbf16, #tpu.memory_space<vmem>>, %arg2: memref<128x128xbf16, #tpu.memory_space<vmem>>, %arg3: memref<8x128xf32, #tpu.memory_space<vmem>>, %arg4: memref<296x128xbf16, #tpu.memory_space<vmem>>) attributes {dimension_semantics = [#tpu.dimension_semantics<parallel>], iteration_bounds = array<i64: 2>, scalar_prefetch = 0 : i64, scratch_operands = 0 : i64, tpu.core_type = #tpu.core_type<tc>, window_params = [{transform_indices = @transform_0, window_bounds = array<i64: 296, 128>}, {pipeline_mode = #tpu.pipeline_mode<synchronous>, transform_indices = @transform_1, window_bounds = array<i64: 128, 128>}, {pipeline_mode = #tpu.pipeline_mode<synchronous>, transform_indices = @transform_2, window_bounds = array<i64: 8, 128>}, {transform_indices = @transform_3, window_bounds = array<i64: 296, 128>}]} {
    %c0 = arith.constant 0 : index
    %c0_0 = arith.constant 0 : index
    %0 = vector.load %arg1[%c0, %c0_0] : memref<296x128xbf16, #tpu.memory_space<vmem>>, vector<296x128xbf16>
    %c0_1 = arith.constant 0 : index
    %c0_2 = arith.constant 0 : index
    %1 = vector.load %arg2[%c0_1, %c0_2] : memref<128x128xbf16, #tpu.memory_space<vmem>>, vector<128x128xbf16>
    %cst = arith.constant dense<0.000000e+00> : vector<296x128xf32>
    %2 = tpu.matmul %0, %1, %cst {dimension_numbers = #tpu.dot_dimension_numbers<[1], [0], [0], [1], [0, 0, 1, 1], [], []>} : vector<296x128xbf16>, vector<128x128xbf16>, vector<296x128xf32> -> vector<296x128xf32>
    %c0_3 = arith.constant 0 : index
    %c0_4 = arith.constant 0 : index
    %3 = vector.load %arg3[%c0_3, %c0_4] : memref<8x128xf32, #tpu.memory_space<vmem>>, vector<1x128xf32>
    %4 = vector.broadcast %3 : vector<1x128xf32> to vector<296x128xf32>
    %5 = arith.addf %2, %4 : vector<296x128xf32>
    %cst_5 = arith.constant 0.000000e+00 : f32
    %6 = vector.broadcast %cst_5 : f32 to vector<296x128xf32>
    %7 = arith.cmpf oge, %5, %6 : vector<296x128xf32>
    %cst_6 = arith.constant 2.000000e-01 : f32
    %8 = vector.broadcast %cst_6 : f32 to vector<296x128xf32>
    %9 = arith.mulf %8, %5 : vector<296x128xf32>
    %10 = arith.select %7, %5, %9 : vector<296x128xi1>, vector<296x128xf32>
    %11 = arith.truncf %10 : vector<296x128xf32> to vector<296x128xbf16>
    %c0_7 = arith.constant 0 : index
    %c0_8 = arith.constant 0 : index
    %12 = vector.load %arg4[%c0_7, %c0_8] : memref<296x128xbf16, #tpu.memory_space<vmem>>, vector<296x128xbf16>
    tpu.vector_store %arg4[%c0_7, %c0_8], %11 {strides = array<i32>} : memref<296x128xbf16, #tpu.memory_space<vmem>>, vector<296x128xbf16>,
    return
  }
  func.func @transform_0(%arg0: i32) -> (i32, i32) {
    %c0_i32 = arith.constant 0 : i32
    %c0_i32_0 = arith.constant 0 : i32
    return %arg0, %c0_i32 : i32, i32
  }
  func.func @transform_1(%arg0: i32) -> (i32, i32) {
    %c0_i32 = arith.constant 0 : i32
    %c0_i32_0 = arith.constant 0 : i32
    %c0_i32_1 = arith.constant 0 : i32
    return %c0_i32, %c0_i32_0 : i32, i32
  }
  func.func @transform_2(%arg0: i32) -> (i32, i32) {
    %c0_i32 = arith.constant 0 : i32
    %c0_i32_0 = arith.constant 0 : i32
    %c0_i32_1 = arith.constant 0 : i32
    return %c0_i32, %c0_i32_0 : i32, i32
  }
  func.func @transform_3(%arg0: i32) -> (i32, i32) {
    %c0_i32 = arith.constant 0 : i32
    %c0_i32_0 = arith.constant 0 : i32
    return %arg0, %c0_i32 : i32, i32
  }
}

module attributes {stable_mosaic.version = 11 : i64} {
  func.func @_conv_bn_act_fused_kernel(%arg0: i32, %arg1: memref<168x256xbf16, #tpu.memory_space<vmem>>, %arg2: memref<256x128xbf16, #tpu.memory_space<vmem>>, %arg3: memref<8x128xf32, #tpu.memory_space<vmem>>, %arg4: memref<168x128xbf16, #tpu.memory_space<vmem>>, %arg5: memref<168x128xf32, #tpu.memory_space<vmem>>, %arg6: memref<8x128xf32, #tpu.memory_space<vmem>>, %arg7: memref<8x128xf32, #tpu.memory_space<vmem>>) attributes {dimension_semantics = [#tpu.dimension_semantics<arbitrary>], iteration_bounds = array<i64: 1>, scalar_prefetch = 0 : i64, scratch_operands = 3 : i64, tpu.core_type = #tpu.core_type<tc>, window_params = [{transform_indices = @transform_0, window_bounds = array<i64: 168, 256>}, {pipeline_mode = #tpu.pipeline_mode<synchronous>, transform_indices = @transform_1, window_bounds = array<i64: 256, 128>}, {pipeline_mode = #tpu.pipeline_mode<synchronous>, transform_indices = @transform_2, window_bounds = array<i64: 8, 128>}, {pipeline_mode = #tpu.pipeline_mode<synchronous>, transform_indices = @transform_3, window_bounds = array<i64: 168, 128>}]} {
    %c0_i32 = arith.constant 0 : i32
    %0 = arith.cmpi eq, %arg0, %c0_i32 : i32
    %1 = arith.extui %0 : i1 to i32
    %c0_i32_0 = arith.constant 0 : i32
    %2 = arith.cmpi ne, %1, %c0_i32_0 : i32
    scf.if %2 {
      %cst_17 = arith.constant 0.000000e+00 : f32
      %23 = vector.broadcast %cst_17 : f32 to vector<8x128xf32>
      %c0_18 = arith.constant 0 : index
      %c0_19 = arith.constant 0 : index
      %24 = vector.load %arg6[%c0_18, %c0_19] : memref<8x128xf32, #tpu.memory_space<vmem>>, vector<8x128xf32>
      tpu.vector_store %arg6[%c0_18, %c0_19], %23 {strides = array<i32>} : memref<8x128xf32, #tpu.memory_space<vmem>>, vector<8x128xf32>,
      %cst_20 = arith.constant 0.000000e+00 : f32
      %25 = vector.broadcast %cst_20 : f32 to vector<8x128xf32>
      %c0_21 = arith.constant 0 : index
      %c0_22 = arith.constant 0 : index
      %26 = vector.load %arg7[%c0_21, %c0_22] : memref<8x128xf32, #tpu.memory_space<vmem>>, vector<8x128xf32>
      tpu.vector_store %arg7[%c0_21, %c0_22], %25 {strides = array<i32>} : memref<8x128xf32, #tpu.memory_space<vmem>>, vector<8x128xf32>,
    } else {
    }
    %c0 = arith.constant 0 : index
    %c0_1 = arith.constant 0 : index
    %3 = vector.load %arg1[%c0, %c0_1] : memref<168x256xbf16, #tpu.memory_space<vmem>>, vector<168x256xbf16>
    %c0_2 = arith.constant 0 : index
    %c0_3 = arith.constant 0 : index
    %4 = vector.load %arg2[%c0_2, %c0_3] : memref<256x128xbf16, #tpu.memory_space<vmem>>, vector<256x128xbf16>
    %cst = arith.constant dense<0.000000e+00> : vector<168x128xf32>
    %5 = tpu.matmul %3, %4, %cst {dimension_numbers = #tpu.dot_dimension_numbers<[1], [0], [0], [1], [0, 0, 1, 1], [], []>} : vector<168x256xbf16>, vector<256x128xbf16>, vector<168x128xf32> -> vector<168x128xf32>
    %c168_i32 = arith.constant 168 : i32
    %6 = arith.muli %arg0, %c168_i32 : i32
    %7 = tpu.assume_multiple %6, 8 : i32
    %8 = arith.index_cast %7 : i32 to index
    %c0_4 = arith.constant 0 : index
    %9 = vector.load %arg5[%8, %c0_4] : memref<168x128xf32, #tpu.memory_space<vmem>>, vector<168x128xf32>
    tpu.vector_store %arg5[%8, %c0_4], %5 {strides = array<i32>} : memref<168x128xf32, #tpu.memory_space<vmem>>, vector<168x128xf32>,
    %10 = vector.shape_cast %5 : vector<168x128xf32> to vector<21x8x128xf32>
    %cst_5 = arith.constant dense<0.000000e+00> : vector<8x128xf32>
    %11 = vector.multi_reduction <add>, %10, %cst_5 [0] : vector<21x8x128xf32> to vector<8x128xf32>
    %12 = arith.mulf %10, %10 : vector<21x8x128xf32>
    %cst_6 = arith.constant dense<0.000000e+00> : vector<8x128xf32>
    %13 = vector.multi_reduction <add>, %12, %cst_6 [0] : vector<21x8x128xf32> to vector<8x128xf32>
    %c0_7 = arith.constant 0 : index
    %c0_8 = arith.constant 0 : index
    %14 = vector.load %arg6[%c0_7, %c0_8] : memref<8x128xf32, #tpu.memory_space<vmem>>, vector<8x128xf32>
    %15 = arith.addf %14, %11 : vector<8x128xf32>
    %c0_9 = arith.constant 0 : index
    %c0_10 = arith.constant 0 : index
    %16 = vector.load %arg6[%c0_9, %c0_10] : memref<8x128xf32, #tpu.memory_space<vmem>>, vector<8x128xf32>
    tpu.vector_store %arg6[%c0_9, %c0_10], %15 {strides = array<i32>} : memref<8x128xf32, #tpu.memory_space<vmem>>, vector<8x128xf32>,
    %c0_11 = arith.constant 0 : index
    %c0_12 = arith.constant 0 : index
    %17 = vector.load %arg7[%c0_11, %c0_12] : memref<8x128xf32, #tpu.memory_space<vmem>>, vector<8x128xf32>
    %18 = arith.addf %17, %13 : vector<8x128xf32>
    %c0_13 = arith.constant 0 : index
    %c0_14 = arith.constant 0 : index
    %19 = vector.load %arg7[%c0_13, %c0_14] : memref<8x128xf32, #tpu.memory_space<vmem>>, vector<8x128xf32>
    tpu.vector_store %arg7[%c0_13, %c0_14], %18 {strides = array<i32>} : memref<8x128xf32, #tpu.memory_space<vmem>>, vector<8x128xf32>,
    %c0_i32_15 = arith.constant 0 : i32
    %20 = arith.cmpi eq, %arg0, %c0_i32_15 : i32
    %21 = arith.extui %20 : i1 to i32
    %c0_i32_16 = arith.constant 0 : i32
    %22 = arith.cmpi ne, %21, %c0_i32_16 : i32
    scf.if %22 {
      %c0_17 = arith.constant 0 : index
      %c0_18 = arith.constant 0 : index
      %23 = vector.load %arg6[%c0_17, %c0_18] : memref<8x128xf32, #tpu.memory_space<vmem>>, vector<8x128xf32>
      %cst_19 = arith.constant dense<0.000000e+00> : vector<128xf32>
      %24 = vector.multi_reduction <add>, %23, %cst_19 [0] : vector<8x128xf32> to vector<128xf32>
      %25 = vector.shape_cast %24 : vector<128xf32> to vector<1x128xf32>
      %cst_20 = arith.constant 0.00617283955 : f32
      %26 = vector.broadcast %cst_20 : f32 to vector<1x128xf32>
      %27 = arith.mulf %25, %26 : vector<1x128xf32>
      %c0_21 = arith.constant 0 : index
      %c0_22 = arith.constant 0 : index
      %28 = vector.load %arg7[%c0_21, %c0_22] : memref<8x128xf32, #tpu.memory_space<vmem>>, vector<8x128xf32>
      %cst_23 = arith.constant dense<0.000000e+00> : vector<128xf32>
      %29 = vector.multi_reduction <add>, %28, %cst_23 [0] : vector<8x128xf32> to vector<128xf32>
      %30 = vector.shape_cast %29 : vector<128xf32> to vector<1x128xf32>
      %cst_24 = arith.constant 0.00617283955 : f32
      %31 = vector.broadcast %cst_24 : f32 to vector<1x128xf32>
      %32 = arith.mulf %30, %31 : vector<1x128xf32>
      %33 = arith.mulf %27, %27 : vector<1x128xf32>
      %34 = arith.subf %32, %33 : vector<1x128xf32>
      %cst_25 = arith.constant 0.000000e+00 : f32
      %35 = vector.broadcast %cst_25 : f32 to vector<1x128xf32>
      %36 = arith.maximumf %34, %35 : vector<1x128xf32>
      %c0_26 = arith.constant 0 : index
      %c0_27 = arith.constant 0 : index
      %37 = vector.load %arg3[%c0_26, %c0_27] : memref<8x128xf32, #tpu.memory_space<vmem>>, vector<1x128xf32>
      %cst_28 = arith.constant 9.99999974E-6 : f32
      %38 = vector.broadcast %cst_28 : f32 to vector<1x128xf32>
      %39 = arith.addf %36, %38 : vector<1x128xf32>
      %40 = math.rsqrt %39 : vector<1x128xf32>
      %41 = arith.mulf %37, %40 : vector<1x128xf32>
      %c1 = arith.constant 1 : index
      %c0_29 = arith.constant 0 : index
      %42 = vector.load %arg3[%c1, %c0_29] : memref<8x128xf32, #tpu.memory_space<vmem>>, vector<1x128xf32>
      %43 = arith.mulf %27, %41 : vector<1x128xf32>
      %44 = arith.subf %42, %43 : vector<1x128xf32>
      %c0_30 = arith.constant 0 : index
      %c0_31 = arith.constant 0 : index
      %45 = vector.load %arg5[%c0_30, %c0_31] : memref<168x128xf32, #tpu.memory_space<vmem>>, vector<168x128xf32>
      %46 = vector.broadcast %41 : vector<1x128xf32> to vector<168x128xf32>
      %47 = arith.mulf %45, %46 : vector<168x128xf32>
      %48 = vector.broadcast %44 : vector<1x128xf32> to vector<168x128xf32>
      %49 = arith.addf %47, %48 : vector<168x128xf32>
      %cst_32 = arith.constant 0.000000e+00 : f32
      %50 = vector.broadcast %cst_32 : f32 to vector<168x128xf32>
      %51 = arith.cmpf oge, %49, %50 : vector<168x128xf32>
      %cst_33 = arith.constant 2.000000e-01 : f32
      %52 = vector.broadcast %cst_33 : f32 to vector<168x128xf32>
      %53 = arith.mulf %52, %49 : vector<168x128xf32>
      %54 = arith.select %51, %49, %53 : vector<168x128xi1>, vector<168x128xf32>
      %55 = arith.truncf %54 : vector<168x128xf32> to vector<168x128xbf16>
      %c0_34 = arith.constant 0 : index
      %c0_35 = arith.constant 0 : index
      %56 = vector.load %arg4[%c0_34, %c0_35] : memref<168x128xbf16, #tpu.memory_space<vmem>>, vector<168x128xbf16>
      tpu.vector_store %arg4[%c0_34, %c0_35], %55 {strides = array<i32>} : memref<168x128xbf16, #tpu.memory_space<vmem>>, vector<168x128xbf16>,
    } else {
    }
    return
  }
  func.func @transform_0(%arg0: i32) -> (i32, i32) {
    %c0_i32 = arith.constant 0 : i32
    %c0_i32_0 = arith.constant 0 : i32
    return %arg0, %c0_i32 : i32, i32
  }
  func.func @transform_1(%arg0: i32) -> (i32, i32) {
    %c0_i32 = arith.constant 0 : i32
    %c0_i32_0 = arith.constant 0 : i32
    %c0_i32_1 = arith.constant 0 : i32
    return %c0_i32, %c0_i32_0 : i32, i32
  }
  func.func @transform_2(%arg0: i32) -> (i32, i32) {
    %c0_i32 = arith.constant 0 : i32
    %c0_i32_0 = arith.constant 0 : i32
    %c0_i32_1 = arith.constant 0 : i32
    return %c0_i32, %c0_i32_0 : i32, i32
  }
  func.func @transform_3(%arg0: i32) -> (i32, i32) {
    %c0_i32 = arith.constant 0 : i32
    %c0_i32_0 = arith.constant 0 : i32
    %c0_i32_1 = arith.constant 0 : i32
    return %c0_i32, %c0_i32_0 : i32, i32
  }
}

module attributes {stable_mosaic.version = 11 : i64} {
  func.func @_conv_bn_act_fused_kernel(%arg0: i32, %arg1: memref<56x512xbf16, #tpu.memory_space<vmem>>, %arg2: memref<512x128xbf16, #tpu.memory_space<vmem>>, %arg3: memref<8x128xf32, #tpu.memory_space<vmem>>, %arg4: memref<56x128xbf16, #tpu.memory_space<vmem>>, %arg5: memref<56x128xf32, #tpu.memory_space<vmem>>, %arg6: memref<8x128xf32, #tpu.memory_space<vmem>>, %arg7: memref<8x128xf32, #tpu.memory_space<vmem>>) attributes {dimension_semantics = [#tpu.dimension_semantics<arbitrary>], iteration_bounds = array<i64: 1>, scalar_prefetch = 0 : i64, scratch_operands = 3 : i64, tpu.core_type = #tpu.core_type<tc>, window_params = [{transform_indices = @transform_0, window_bounds = array<i64: 56, 512>}, {pipeline_mode = #tpu.pipeline_mode<synchronous>, transform_indices = @transform_1, window_bounds = array<i64: 512, 128>}, {pipeline_mode = #tpu.pipeline_mode<synchronous>, transform_indices = @transform_2, window_bounds = array<i64: 8, 128>}, {pipeline_mode = #tpu.pipeline_mode<synchronous>, transform_indices = @transform_3, window_bounds = array<i64: 56, 128>}]} {
    %c0_i32 = arith.constant 0 : i32
    %0 = arith.cmpi eq, %arg0, %c0_i32 : i32
    %1 = arith.extui %0 : i1 to i32
    %c0_i32_0 = arith.constant 0 : i32
    %2 = arith.cmpi ne, %1, %c0_i32_0 : i32
    scf.if %2 {
      %cst_17 = arith.constant 0.000000e+00 : f32
      %23 = vector.broadcast %cst_17 : f32 to vector<8x128xf32>
      %c0_18 = arith.constant 0 : index
      %c0_19 = arith.constant 0 : index
      %24 = vector.load %arg6[%c0_18, %c0_19] : memref<8x128xf32, #tpu.memory_space<vmem>>, vector<8x128xf32>
      tpu.vector_store %arg6[%c0_18, %c0_19], %23 {strides = array<i32>} : memref<8x128xf32, #tpu.memory_space<vmem>>, vector<8x128xf32>,
      %cst_20 = arith.constant 0.000000e+00 : f32
      %25 = vector.broadcast %cst_20 : f32 to vector<8x128xf32>
      %c0_21 = arith.constant 0 : index
      %c0_22 = arith.constant 0 : index
      %26 = vector.load %arg7[%c0_21, %c0_22] : memref<8x128xf32, #tpu.memory_space<vmem>>, vector<8x128xf32>
      tpu.vector_store %arg7[%c0_21, %c0_22], %25 {strides = array<i32>} : memref<8x128xf32, #tpu.memory_space<vmem>>, vector<8x128xf32>,
    } else {
    }
    %c0 = arith.constant 0 : index
    %c0_1 = arith.constant 0 : index
    %3 = vector.load %arg1[%c0, %c0_1] : memref<56x512xbf16, #tpu.memory_space<vmem>>, vector<56x512xbf16>
    %c0_2 = arith.constant 0 : index
    %c0_3 = arith.constant 0 : index
    %4 = vector.load %arg2[%c0_2, %c0_3] : memref<512x128xbf16, #tpu.memory_space<vmem>>, vector<512x128xbf16>
    %cst = arith.constant dense<0.000000e+00> : vector<56x128xf32>
    %5 = tpu.matmul %3, %4, %cst {dimension_numbers = #tpu.dot_dimension_numbers<[1], [0], [0], [1], [0, 0, 1, 1], [], []>} : vector<56x512xbf16>, vector<512x128xbf16>, vector<56x128xf32> -> vector<56x128xf32>
    %c56_i32 = arith.constant 56 : i32
    %6 = arith.muli %arg0, %c56_i32 : i32
    %7 = tpu.assume_multiple %6, 8 : i32
    %8 = arith.index_cast %7 : i32 to index
    %c0_4 = arith.constant 0 : index
    %9 = vector.load %arg5[%8, %c0_4] : memref<56x128xf32, #tpu.memory_space<vmem>>, vector<56x128xf32>
    tpu.vector_store %arg5[%8, %c0_4], %5 {strides = array<i32>} : memref<56x128xf32, #tpu.memory_space<vmem>>, vector<56x128xf32>,
    %10 = vector.shape_cast %5 : vector<56x128xf32> to vector<7x8x128xf32>
    %cst_5 = arith.constant dense<0.000000e+00> : vector<8x128xf32>
    %11 = vector.multi_reduction <add>, %10, %cst_5 [0] : vector<7x8x128xf32> to vector<8x128xf32>
    %12 = arith.mulf %10, %10 : vector<7x8x128xf32>
    %cst_6 = arith.constant dense<0.000000e+00> : vector<8x128xf32>
    %13 = vector.multi_reduction <add>, %12, %cst_6 [0] : vector<7x8x128xf32> to vector<8x128xf32>
    %c0_7 = arith.constant 0 : index
    %c0_8 = arith.constant 0 : index
    %14 = vector.load %arg6[%c0_7, %c0_8] : memref<8x128xf32, #tpu.memory_space<vmem>>, vector<8x128xf32>
    %15 = arith.addf %14, %11 : vector<8x128xf32>
    %c0_9 = arith.constant 0 : index
    %c0_10 = arith.constant 0 : index
    %16 = vector.load %arg6[%c0_9, %c0_10] : memref<8x128xf32, #tpu.memory_space<vmem>>, vector<8x128xf32>
    tpu.vector_store %arg6[%c0_9, %c0_10], %15 {strides = array<i32>} : memref<8x128xf32, #tpu.memory_space<vmem>>, vector<8x128xf32>,
    %c0_11 = arith.constant 0 : index
    %c0_12 = arith.constant 0 : index
    %17 = vector.load %arg7[%c0_11, %c0_12] : memref<8x128xf32, #tpu.memory_space<vmem>>, vector<8x128xf32>
    %18 = arith.addf %17, %13 : vector<8x128xf32>
    %c0_13 = arith.constant 0 : index
    %c0_14 = arith.constant 0 : index
    %19 = vector.load %arg7[%c0_13, %c0_14] : memref<8x128xf32, #tpu.memory_space<vmem>>, vector<8x128xf32>
    tpu.vector_store %arg7[%c0_13, %c0_14], %18 {strides = array<i32>} : memref<8x128xf32, #tpu.memory_space<vmem>>, vector<8x128xf32>,
    %c0_i32_15 = arith.constant 0 : i32
    %20 = arith.cmpi eq, %arg0, %c0_i32_15 : i32
    %21 = arith.extui %20 : i1 to i32
    %c0_i32_16 = arith.constant 0 : i32
    %22 = arith.cmpi ne, %21, %c0_i32_16 : i32
    scf.if %22 {
      %c0_17 = arith.constant 0 : index
      %c0_18 = arith.constant 0 : index
      %23 = vector.load %arg6[%c0_17, %c0_18] : memref<8x128xf32, #tpu.memory_space<vmem>>, vector<8x128xf32>
      %cst_19 = arith.constant dense<0.000000e+00> : vector<128xf32>
      %24 = vector.multi_reduction <add>, %23, %cst_19 [0] : vector<8x128xf32> to vector<128xf32>
      %25 = vector.shape_cast %24 : vector<128xf32> to vector<1x128xf32>
      %cst_20 = arith.constant 2.000000e-02 : f32
      %26 = vector.broadcast %cst_20 : f32 to vector<1x128xf32>
      %27 = arith.mulf %25, %26 : vector<1x128xf32>
      %c0_21 = arith.constant 0 : index
      %c0_22 = arith.constant 0 : index
      %28 = vector.load %arg7[%c0_21, %c0_22] : memref<8x128xf32, #tpu.memory_space<vmem>>, vector<8x128xf32>
      %cst_23 = arith.constant dense<0.000000e+00> : vector<128xf32>
      %29 = vector.multi_reduction <add>, %28, %cst_23 [0] : vector<8x128xf32> to vector<128xf32>
      %30 = vector.shape_cast %29 : vector<128xf32> to vector<1x128xf32>
      %cst_24 = arith.constant 2.000000e-02 : f32
      %31 = vector.broadcast %cst_24 : f32 to vector<1x128xf32>
      %32 = arith.mulf %30, %31 : vector<1x128xf32>
      %33 = arith.mulf %27, %27 : vector<1x128xf32>
      %34 = arith.subf %32, %33 : vector<1x128xf32>
      %cst_25 = arith.constant 0.000000e+00 : f32
      %35 = vector.broadcast %cst_25 : f32 to vector<1x128xf32>
      %36 = arith.maximumf %34, %35 : vector<1x128xf32>
      %c0_26 = arith.constant 0 : index
      %c0_27 = arith.constant 0 : index
      %37 = vector.load %arg3[%c0_26, %c0_27] : memref<8x128xf32, #tpu.memory_space<vmem>>, vector<1x128xf32>
      %cst_28 = arith.constant 9.99999974E-6 : f32
      %38 = vector.broadcast %cst_28 : f32 to vector<1x128xf32>
      %39 = arith.addf %36, %38 : vector<1x128xf32>
      %40 = math.rsqrt %39 : vector<1x128xf32>
      %41 = arith.mulf %37, %40 : vector<1x128xf32>
      %c1 = arith.constant 1 : index
      %c0_29 = arith.constant 0 : index
      %42 = vector.load %arg3[%c1, %c0_29] : memref<8x128xf32, #tpu.memory_space<vmem>>, vector<1x128xf32>
      %43 = arith.mulf %27, %41 : vector<1x128xf32>
      %44 = arith.subf %42, %43 : vector<1x128xf32>
      %c0_30 = arith.constant 0 : index
      %c0_31 = arith.constant 0 : index
      %45 = vector.load %arg5[%c0_30, %c0_31] : memref<56x128xf32, #tpu.memory_space<vmem>>, vector<56x128xf32>
      %46 = vector.broadcast %41 : vector<1x128xf32> to vector<56x128xf32>
      %47 = arith.mulf %45, %46 : vector<56x128xf32>
      %48 = vector.broadcast %44 : vector<1x128xf32> to vector<56x128xf32>
      %49 = arith.addf %47, %48 : vector<56x128xf32>
      %cst_32 = arith.constant 0.000000e+00 : f32
      %50 = vector.broadcast %cst_32 : f32 to vector<56x128xf32>
      %51 = arith.cmpf oge, %49, %50 : vector<56x128xf32>
      %cst_33 = arith.constant 2.000000e-01 : f32
      %52 = vector.broadcast %cst_33 : f32 to vector<56x128xf32>
      %53 = arith.mulf %52, %49 : vector<56x128xf32>
      %54 = arith.select %51, %49, %53 : vector<56x128xi1>, vector<56x128xf32>
      %55 = arith.truncf %54 : vector<56x128xf32> to vector<56x128xbf16>
      %c0_34 = arith.constant 0 : index
      %c0_35 = arith.constant 0 : index
      %56 = vector.load %arg4[%c0_34, %c0_35] : memref<56x128xbf16, #tpu.memory_space<vmem>>, vector<56x128xbf16>
      tpu.vector_store %arg4[%c0_34, %c0_35], %55 {strides = array<i32>} : memref<56x128xbf16, #tpu.memory_space<vmem>>, vector<56x128xbf16>,
    } else {
    }
    return
  }
  func.func @transform_0(%arg0: i32) -> (i32, i32) {
    %c0_i32 = arith.constant 0 : i32
    %c0_i32_0 = arith.constant 0 : i32
    return %arg0, %c0_i32 : i32, i32
  }
  func.func @transform_1(%arg0: i32) -> (i32, i32) {
    %c0_i32 = arith.constant 0 : i32
    %c0_i32_0 = arith.constant 0 : i32
    %c0_i32_1 = arith.constant 0 : i32
    return %c0_i32, %c0_i32_0 : i32, i32
  }
  func.func @transform_2(%arg0: i32) -> (i32, i32) {
    %c0_i32 = arith.constant 0 : i32
    %c0_i32_0 = arith.constant 0 : i32
    %c0_i32_1 = arith.constant 0 : i32
    return %c0_i32, %c0_i32_0 : i32, i32
  }
  func.func @transform_3(%arg0: i32) -> (i32, i32) {
    %c0_i32 = arith.constant 0 : i32
    %c0_i32_0 = arith.constant 0 : i32
    %c0_i32_1 = arith.constant 0 : i32
    return %c0_i32, %c0_i32_0 : i32, i32
  }
}

module attributes {stable_mosaic.version = 11 : i64} {
  func.func @_conv_bn_act_fused_kernel(%arg0: i32, %arg1: memref<72x1024xbf16, #tpu.memory_space<vmem>>, %arg2: memref<1024x128xbf16, #tpu.memory_space<vmem>>, %arg3: memref<8x128xf32, #tpu.memory_space<vmem>>, %arg4: memref<72x128xbf16, #tpu.memory_space<vmem>>, %arg5: memref<72x128xf32, #tpu.memory_space<vmem>>, %arg6: memref<8x128xf32, #tpu.memory_space<vmem>>, %arg7: memref<8x128xf32, #tpu.memory_space<vmem>>) attributes {dimension_semantics = [#tpu.dimension_semantics<arbitrary>], iteration_bounds = array<i64: 1>, scalar_prefetch = 0 : i64, scratch_operands = 3 : i64, tpu.core_type = #tpu.core_type<tc>, window_params = [{transform_indices = @transform_0, window_bounds = array<i64: 72, 1024>}, {pipeline_mode = #tpu.pipeline_mode<synchronous>, transform_indices = @transform_1, window_bounds = array<i64: 1024, 128>}, {pipeline_mode = #tpu.pipeline_mode<synchronous>, transform_indices = @transform_2, window_bounds = array<i64: 8, 128>}, {pipeline_mode = #tpu.pipeline_mode<synchronous>, transform_indices = @transform_3, window_bounds = array<i64: 72, 128>}]} {
    %c0_i32 = arith.constant 0 : i32
    %0 = arith.cmpi eq, %arg0, %c0_i32 : i32
    %1 = arith.extui %0 : i1 to i32
    %c0_i32_0 = arith.constant 0 : i32
    %2 = arith.cmpi ne, %1, %c0_i32_0 : i32
    scf.if %2 {
      %cst_17 = arith.constant 0.000000e+00 : f32
      %23 = vector.broadcast %cst_17 : f32 to vector<8x128xf32>
      %c0_18 = arith.constant 0 : index
      %c0_19 = arith.constant 0 : index
      %24 = vector.load %arg6[%c0_18, %c0_19] : memref<8x128xf32, #tpu.memory_space<vmem>>, vector<8x128xf32>
      tpu.vector_store %arg6[%c0_18, %c0_19], %23 {strides = array<i32>} : memref<8x128xf32, #tpu.memory_space<vmem>>, vector<8x128xf32>,
      %cst_20 = arith.constant 0.000000e+00 : f32
      %25 = vector.broadcast %cst_20 : f32 to vector<8x128xf32>
      %c0_21 = arith.constant 0 : index
      %c0_22 = arith.constant 0 : index
      %26 = vector.load %arg7[%c0_21, %c0_22] : memref<8x128xf32, #tpu.memory_space<vmem>>, vector<8x128xf32>
      tpu.vector_store %arg7[%c0_21, %c0_22], %25 {strides = array<i32>} : memref<8x128xf32, #tpu.memory_space<vmem>>, vector<8x128xf32>,
    } else {
    }
    %c0 = arith.constant 0 : index
    %c0_1 = arith.constant 0 : index
    %3 = vector.load %arg1[%c0, %c0_1] : memref<72x1024xbf16, #tpu.memory_space<vmem>>, vector<72x1024xbf16>
    %c0_2 = arith.constant 0 : index
    %c0_3 = arith.constant 0 : index
    %4 = vector.load %arg2[%c0_2, %c0_3] : memref<1024x128xbf16, #tpu.memory_space<vmem>>, vector<1024x128xbf16>
    %cst = arith.constant dense<0.000000e+00> : vector<72x128xf32>
    %5 = tpu.matmul %3, %4, %cst {dimension_numbers = #tpu.dot_dimension_numbers<[1], [0], [0], [1], [0, 0, 1, 1], [], []>} : vector<72x1024xbf16>, vector<1024x128xbf16>, vector<72x128xf32> -> vector<72x128xf32>
    %c72_i32 = arith.constant 72 : i32
    %6 = arith.muli %arg0, %c72_i32 : i32
    %7 = tpu.assume_multiple %6, 8 : i32
    %8 = arith.index_cast %7 : i32 to index
    %c0_4 = arith.constant 0 : index
    %9 = vector.load %arg5[%8, %c0_4] : memref<72x128xf32, #tpu.memory_space<vmem>>, vector<72x128xf32>
    tpu.vector_store %arg5[%8, %c0_4], %5 {strides = array<i32>} : memref<72x128xf32, #tpu.memory_space<vmem>>, vector<72x128xf32>,
    %10 = vector.shape_cast %5 : vector<72x128xf32> to vector<9x8x128xf32>
    %cst_5 = arith.constant dense<0.000000e+00> : vector<8x128xf32>
    %11 = vector.multi_reduction <add>, %10, %cst_5 [0] : vector<9x8x128xf32> to vector<8x128xf32>
    %12 = arith.mulf %10, %10 : vector<9x8x128xf32>
    %cst_6 = arith.constant dense<0.000000e+00> : vector<8x128xf32>
    %13 = vector.multi_reduction <add>, %12, %cst_6 [0] : vector<9x8x128xf32> to vector<8x128xf32>
    %c0_7 = arith.constant 0 : index
    %c0_8 = arith.constant 0 : index
    %14 = vector.load %arg6[%c0_7, %c0_8] : memref<8x128xf32, #tpu.memory_space<vmem>>, vector<8x128xf32>
    %15 = arith.addf %14, %11 : vector<8x128xf32>
    %c0_9 = arith.constant 0 : index
    %c0_10 = arith.constant 0 : index
    %16 = vector.load %arg6[%c0_9, %c0_10] : memref<8x128xf32, #tpu.memory_space<vmem>>, vector<8x128xf32>
    tpu.vector_store %arg6[%c0_9, %c0_10], %15 {strides = array<i32>} : memref<8x128xf32, #tpu.memory_space<vmem>>, vector<8x128xf32>,
    %c0_11 = arith.constant 0 : index
    %c0_12 = arith.constant 0 : index
    %17 = vector.load %arg7[%c0_11, %c0_12] : memref<8x128xf32, #tpu.memory_space<vmem>>, vector<8x128xf32>
    %18 = arith.addf %17, %13 : vector<8x128xf32>
    %c0_13 = arith.constant 0 : index
    %c0_14 = arith.constant 0 : index
    %19 = vector.load %arg7[%c0_13, %c0_14] : memref<8x128xf32, #tpu.memory_space<vmem>>, vector<8x128xf32>
    tpu.vector_store %arg7[%c0_13, %c0_14], %18 {strides = array<i32>} : memref<8x128xf32, #tpu.memory_space<vmem>>, vector<8x128xf32>,
    %c0_i32_15 = arith.constant 0 : i32
    %20 = arith.cmpi eq, %arg0, %c0_i32_15 : i32
    %21 = arith.extui %20 : i1 to i32
    %c0_i32_16 = arith.constant 0 : i32
    %22 = arith.cmpi ne, %21, %c0_i32_16 : i32
    scf.if %22 {
      %c0_17 = arith.constant 0 : index
      %c0_18 = arith.constant 0 : index
      %23 = vector.load %arg6[%c0_17, %c0_18] : memref<8x128xf32, #tpu.memory_space<vmem>>, vector<8x128xf32>
      %cst_19 = arith.constant dense<0.000000e+00> : vector<128xf32>
      %24 = vector.multi_reduction <add>, %23, %cst_19 [0] : vector<8x128xf32> to vector<128xf32>
      %25 = vector.shape_cast %24 : vector<128xf32> to vector<1x128xf32>
      %cst_20 = arith.constant 0.013888889 : f32
      %26 = vector.broadcast %cst_20 : f32 to vector<1x128xf32>
      %27 = arith.mulf %25, %26 : vector<1x128xf32>
      %c0_21 = arith.constant 0 : index
      %c0_22 = arith.constant 0 : index
      %28 = vector.load %arg7[%c0_21, %c0_22] : memref<8x128xf32, #tpu.memory_space<vmem>>, vector<8x128xf32>
      %cst_23 = arith.constant dense<0.000000e+00> : vector<128xf32>
      %29 = vector.multi_reduction <add>, %28, %cst_23 [0] : vector<8x128xf32> to vector<128xf32>
      %30 = vector.shape_cast %29 : vector<128xf32> to vector<1x128xf32>
      %cst_24 = arith.constant 0.013888889 : f32
      %31 = vector.broadcast %cst_24 : f32 to vector<1x128xf32>
      %32 = arith.mulf %30, %31 : vector<1x128xf32>
      %33 = arith.mulf %27, %27 : vector<1x128xf32>
      %34 = arith.subf %32, %33 : vector<1x128xf32>
      %cst_25 = arith.constant 0.000000e+00 : f32
      %35 = vector.broadcast %cst_25 : f32 to vector<1x128xf32>
      %36 = arith.maximumf %34, %35 : vector<1x128xf32>
      %c0_26 = arith.constant 0 : index
      %c0_27 = arith.constant 0 : index
      %37 = vector.load %arg3[%c0_26, %c0_27] : memref<8x128xf32, #tpu.memory_space<vmem>>, vector<1x128xf32>
      %cst_28 = arith.constant 9.99999974E-6 : f32
      %38 = vector.broadcast %cst_28 : f32 to vector<1x128xf32>
      %39 = arith.addf %36, %38 : vector<1x128xf32>
      %40 = math.rsqrt %39 : vector<1x128xf32>
      %41 = arith.mulf %37, %40 : vector<1x128xf32>
      %c1 = arith.constant 1 : index
      %c0_29 = arith.constant 0 : index
      %42 = vector.load %arg3[%c1, %c0_29] : memref<8x128xf32, #tpu.memory_space<vmem>>, vector<1x128xf32>
      %43 = arith.mulf %27, %41 : vector<1x128xf32>
      %44 = arith.subf %42, %43 : vector<1x128xf32>
      %c0_30 = arith.constant 0 : index
      %c0_31 = arith.constant 0 : index
      %45 = vector.load %arg5[%c0_30, %c0_31] : memref<72x128xf32, #tpu.memory_space<vmem>>, vector<72x128xf32>
      %46 = vector.broadcast %41 : vector<1x128xf32> to vector<72x128xf32>
      %47 = arith.mulf %45, %46 : vector<72x128xf32>
      %48 = vector.broadcast %44 : vector<1x128xf32> to vector<72x128xf32>
      %49 = arith.addf %47, %48 : vector<72x128xf32>
      %cst_32 = arith.constant 0.000000e+00 : f32
      %50 = vector.broadcast %cst_32 : f32 to vector<72x128xf32>
      %51 = arith.cmpf oge, %49, %50 : vector<72x128xf32>
      %cst_33 = arith.constant 2.000000e-01 : f32
      %52 = vector.broadcast %cst_33 : f32 to vector<72x128xf32>
      %53 = arith.mulf %52, %49 : vector<72x128xf32>
      %54 = arith.select %51, %49, %53 : vector<72x128xi1>, vector<72x128xf32>
      %55 = arith.truncf %54 : vector<72x128xf32> to vector<72x128xbf16>
      %c0_34 = arith.constant 0 : index
      %c0_35 = arith.constant 0 : index
      %56 = vector.load %arg4[%c0_34, %c0_35] : memref<72x128xbf16, #tpu.memory_space<vmem>>, vector<72x128xbf16>
      tpu.vector_store %arg4[%c0_34, %c0_35], %55 {strides = array<i32>} : memref<72x128xbf16, #tpu.memory_space<vmem>>, vector<72x128xbf16>,
    } else {
    }
    return
  }
  func.func @transform_0(%arg0: i32) -> (i32, i32) {
    %c0_i32 = arith.constant 0 : i32
    %c0_i32_0 = arith.constant 0 : i32
    return %arg0, %c0_i32 : i32, i32
  }
  func.func @transform_1(%arg0: i32) -> (i32, i32) {
    %c0_i32 = arith.constant 0 : i32
    %c0_i32_0 = arith.constant 0 : i32
    %c0_i32_1 = arith.constant 0 : i32
    return %c0_i32, %c0_i32_0 : i32, i32
  }
  func.func @transform_2(%arg0: i32) -> (i32, i32) {
    %c0_i32 = arith.constant 0 : i32
    %c0_i32_0 = arith.constant 0 : i32
    %c0_i32_1 = arith.constant 0 : i32
    return %c0_i32, %c0_i32_0 : i32, i32
  }
  func.func @transform_3(%arg0: i32) -> (i32, i32) {
    %c0_i32 = arith.constant 0 : i32
    %c0_i32_0 = arith.constant 0 : i32
    %c0_i32_1 = arith.constant 0 : i32
    return %c0_i32, %c0_i32_0 : i32, i32
  }
}

module attributes {stable_mosaic.version = 11 : i64} {
  func.func @_conv_bias_kernel(%arg0: i32, %arg1: memref<104x2048xbf16, #tpu.memory_space<vmem>>, %arg2: memref<2048x128xbf16, #tpu.memory_space<vmem>>, %arg3: memref<8x128xf32, #tpu.memory_space<vmem>>, %arg4: memref<104x128xf32, #tpu.memory_space<vmem>>) attributes {dimension_semantics = [#tpu.dimension_semantics<parallel>], iteration_bounds = array<i64: 1>, scalar_prefetch = 0 : i64, scratch_operands = 0 : i64, tpu.core_type = #tpu.core_type<tc>, window_params = [{transform_indices = @transform_0, window_bounds = array<i64: 104, 2048>}, {pipeline_mode = #tpu.pipeline_mode<synchronous>, transform_indices = @transform_1, window_bounds = array<i64: 2048, 128>}, {pipeline_mode = #tpu.pipeline_mode<synchronous>, transform_indices = @transform_2, window_bounds = array<i64: 8, 128>}, {transform_indices = @transform_3, window_bounds = array<i64: 104, 128>}]} {
    %c0 = arith.constant 0 : index
    %c0_0 = arith.constant 0 : index
    %0 = vector.load %arg1[%c0, %c0_0] : memref<104x2048xbf16, #tpu.memory_space<vmem>>, vector<104x2048xbf16>
    %c0_1 = arith.constant 0 : index
    %c0_2 = arith.constant 0 : index
    %1 = vector.load %arg2[%c0_1, %c0_2] : memref<2048x128xbf16, #tpu.memory_space<vmem>>, vector<2048x128xbf16>
    %cst = arith.constant dense<0.000000e+00> : vector<104x128xf32>
    %2 = tpu.matmul %0, %1, %cst {dimension_numbers = #tpu.dot_dimension_numbers<[1], [0], [0], [1], [0, 0, 1, 1], [], []>} : vector<104x2048xbf16>, vector<2048x128xbf16>, vector<104x128xf32> -> vector<104x128xf32>
    %c0_3 = arith.constant 0 : index
    %c0_4 = arith.constant 0 : index
    %3 = vector.load %arg3[%c0_3, %c0_4] : memref<8x128xf32, #tpu.memory_space<vmem>>, vector<1x128xf32>
    %4 = vector.broadcast %3 : vector<1x128xf32> to vector<104x128xf32>
    %5 = arith.addf %2, %4 : vector<104x128xf32>
    %c0_5 = arith.constant 0 : index
    %c0_6 = arith.constant 0 : index
    %6 = vector.load %arg4[%c0_5, %c0_6] : memref<104x128xf32, #tpu.memory_space<vmem>>, vector<104x128xf32>
    tpu.vector_store %arg4[%c0_5, %c0_6], %5 {strides = array<i32>} : memref<104x128xf32, #tpu.memory_space<vmem>>, vector<104x128xf32>,
    return
  }
  func.func @transform_0(%arg0: i32) -> (i32, i32) {
    %c0_i32 = arith.constant 0 : i32
    %c0_i32_0 = arith.constant 0 : i32
    return %arg0, %c0_i32 : i32, i32
  }
  func.func @transform_1(%arg0: i32) -> (i32, i32) {
    %c0_i32 = arith.constant 0 : i32
    %c0_i32_0 = arith.constant 0 : i32
    %c0_i32_1 = arith.constant 0 : i32
    return %c0_i32, %c0_i32_0 : i32, i32
  }
  func.func @transform_2(%arg0: i32) -> (i32, i32) {
    %c0_i32 = arith.constant 0 : i32
    %c0_i32_0 = arith.constant 0 : i32
    %c0_i32_1 = arith.constant 0 : i32
    return %c0_i32, %c0_i32_0 : i32, i32
  }
  func.func @transform_3(%arg0: i32) -> (i32, i32) {
    %c0_i32 = arith.constant 0 : i32
    %c0_i32_0 = arith.constant 0 : i32
    return %arg0, %c0_i32 : i32, i32
  }
}

module attributes {stable_mosaic.version = 11 : i64} {
  func.func @_avgpool_kernel(%arg0: i32, %arg1: memref<1x16x48xf32, #tpu.memory_space<vmem>>, %arg2: memref<1x16x48xf32, #tpu.memory_space<vmem>>, %arg3: memref<1x16x48xf32, #tpu.memory_space<vmem>>, %arg4: memref<1x16x48xf32, #tpu.memory_space<vmem>>, %arg5: memref<1x16x48xf32, #tpu.memory_space<vmem>>, %arg6: memref<1x16x48xf32, #tpu.memory_space<vmem>>) attributes {dimension_semantics = [#tpu.dimension_semantics<parallel>], iteration_bounds = array<i64: 2>, scalar_prefetch = 0 : i64, scratch_operands = 0 : i64, tpu.core_type = #tpu.core_type<tc>, window_params = [{transform_indices = @transform_0, window_bounds = array<i64: 1, 16, 48>}, {transform_indices = @transform_1, window_bounds = array<i64: 1, 16, 48>}, {transform_indices = @transform_2, window_bounds = array<i64: 1, 16, 48>}, {transform_indices = @transform_3, window_bounds = array<i64: 1, 16, 48>}, {pipeline_mode = #tpu.pipeline_mode<synchronous>, transform_indices = @transform_4, window_bounds = array<i64: 1, 16, 48>}, {transform_indices = @transform_5, window_bounds = array<i64: 1, 16, 48>}]} {
    %c0 = arith.constant 0 : index
    %c0_0 = arith.constant 0 : index
    %c0_1 = arith.constant 0 : index
    %0 = vector.load %arg1[%c0, %c0_0, %c0_1] : memref<1x16x48xf32, #tpu.memory_space<vmem>>, vector<1x16x48xf32>
    %c0_2 = arith.constant 0 : index
    %c0_3 = arith.constant 0 : index
    %c0_4 = arith.constant 0 : index
    %1 = vector.load %arg2[%c0_2, %c0_3, %c0_4] : memref<1x16x48xf32, #tpu.memory_space<vmem>>, vector<1x16x48xf32>
    %c0_5 = arith.constant 0 : index
    %c0_6 = arith.constant 0 : index
    %c0_7 = arith.constant 0 : index
    %2 = vector.load %arg3[%c0_5, %c0_6, %c0_7] : memref<1x16x48xf32, #tpu.memory_space<vmem>>, vector<1x16x48xf32>
    %c0_8 = arith.constant 0 : index
    %c0_9 = arith.constant 0 : index
    %c0_10 = arith.constant 0 : index
    %3 = vector.load %arg4[%c0_8, %c0_9, %c0_10] : memref<1x16x48xf32, #tpu.memory_space<vmem>>, vector<1x16x48xf32>
    %4 = arith.addf %0, %1 : vector<1x16x48xf32>
    %5 = arith.addf %4, %2 : vector<1x16x48xf32>
    %6 = arith.addf %5, %3 : vector<1x16x48xf32>
    %cst = arith.constant 0.000000e+00 : f32
    %7 = vector.broadcast %cst : f32 to vector<1x16x3xf32>
    %cst_11 = arith.constant 0.000000e+00 : f32
    %8 = vector.broadcast %cst_11 : f32 to vector<1x1x48xf32>
    %9 = arith.addf %1, %3 : vector<1x16x48xf32>
    %10 = vector.extract_strided_slice %9 {offsets = [0, 0, 0], sizes = [1, 16, 45], strides = [1, 1, 1]} : vector<1x16x48xf32> to vector<1x16x45xf32>
    %11 = tpu.concatenate %7, %10 in 2 : vector<1x16x3xf32>, vector<1x16x45xf32> -> vector<1x16x48xf32>
    %12 = arith.addf %2, %3 : vector<1x16x48xf32>
    %13 = vector.extract_strided_slice %12 {offsets = [0, 0, 0], sizes = [1, 15, 48], strides = [1, 1, 1]} : vector<1x16x48xf32> to vector<1x15x48xf32>
    %14 = tpu.concatenate %8, %13 in 1 : vector<1x1x48xf32>, vector<1x15x48xf32> -> vector<1x16x48xf32>
    %15 = vector.extract_strided_slice %3 {offsets = [0, 0, 0], sizes = [1, 16, 45], strides = [1, 1, 1]} : vector<1x16x48xf32> to vector<1x16x45xf32>
    %16 = tpu.concatenate %7, %15 in 2 : vector<1x16x3xf32>, vector<1x16x45xf32> -> vector<1x16x48xf32>
    %17 = vector.extract_strided_slice %16 {offsets = [0, 0, 0], sizes = [1, 15, 48], strides = [1, 1, 1]} : vector<1x16x48xf32> to vector<1x15x48xf32>
    %18 = tpu.concatenate %8, %17 in 1 : vector<1x1x48xf32>, vector<1x15x48xf32> -> vector<1x16x48xf32>
    %19 = arith.addf %6, %11 : vector<1x16x48xf32>
    %20 = arith.addf %19, %14 : vector<1x16x48xf32>
    %21 = arith.addf %20, %18 : vector<1x16x48xf32>
    %c0_12 = arith.constant 0 : index
    %c0_13 = arith.constant 0 : index
    %c0_14 = arith.constant 0 : index
    %22 = vector.load %arg5[%c0_12, %c0_13, %c0_14] : memref<1x16x48xf32, #tpu.memory_space<vmem>>, vector<1x16x48xf32>
    %23 = arith.mulf %21, %22 : vector<1x16x48xf32>
    %c0_15 = arith.constant 0 : index
    %c0_16 = arith.constant 0 : index
    %c0_17 = arith.constant 0 : index
    %24 = vector.load %arg6[%c0_15, %c0_16, %c0_17] : memref<1x16x48xf32, #tpu.memory_space<vmem>>, vector<1x16x48xf32>
    tpu.vector_store %arg6[%c0_15, %c0_16, %c0_17], %23 {strides = array<i32>} : memref<1x16x48xf32, #tpu.memory_space<vmem>>, vector<1x16x48xf32>,
    return
  }
  func.func @transform_0(%arg0: i32) -> (i32, i32, i32) {
    %c0_i32 = arith.constant 0 : i32
    %c0_i32_0 = arith.constant 0 : i32
    %c0_i32_1 = arith.constant 0 : i32
    return %arg0, %c0_i32, %c0_i32_0 : i32, i32, i32
  }
  func.func @transform_1(%arg0: i32) -> (i32, i32, i32) {
    %c0_i32 = arith.constant 0 : i32
    %c0_i32_0 = arith.constant 0 : i32
    %c0_i32_1 = arith.constant 0 : i32
    return %arg0, %c0_i32, %c0_i32_0 : i32, i32, i32
  }
  func.func @transform_2(%arg0: i32) -> (i32, i32, i32) {
    %c0_i32 = arith.constant 0 : i32
    %c0_i32_0 = arith.constant 0 : i32
    %c0_i32_1 = arith.constant 0 : i32
    return %arg0, %c0_i32, %c0_i32_0 : i32, i32, i32
  }
  func.func @transform_3(%arg0: i32) -> (i32, i32, i32) {
    %c0_i32 = arith.constant 0 : i32
    %c0_i32_0 = arith.constant 0 : i32
    %c0_i32_1 = arith.constant 0 : i32
    return %arg0, %c0_i32, %c0_i32_0 : i32, i32, i32
  }
  func.func @transform_4(%arg0: i32) -> (i32, i32, i32) {
    %c0_i32 = arith.constant 0 : i32
    %c0_i32_0 = arith.constant 0 : i32
    %c0_i32_1 = arith.constant 0 : i32
    %c0_i32_2 = arith.constant 0 : i32
    return %c0_i32, %c0_i32_0, %c0_i32_1 : i32, i32, i32
  }
  func.func @transform_5(%arg0: i32) -> (i32, i32, i32) {
    %c0_i32 = arith.constant 0 : i32
    %c0_i32_0 = arith.constant 0 : i32
    %c0_i32_1 = arith.constant 0 : i32
    return %arg0, %c0_i32, %c0_i32_0 : i32, i32, i32
  }
}

module attributes {stable_mosaic.version = 11 : i64} {
  func.func @_conv_bias_kernel(%arg0: i32, %arg1: memref<168x128xbf16, #tpu.memory_space<vmem>>, %arg2: memref<128x128xbf16, #tpu.memory_space<vmem>>, %arg3: memref<8x128xf32, #tpu.memory_space<vmem>>, %arg4: memref<168x128xbf16, #tpu.memory_space<vmem>>) attributes {dimension_semantics = [#tpu.dimension_semantics<parallel>], iteration_bounds = array<i64: 1>, scalar_prefetch = 0 : i64, scratch_operands = 0 : i64, tpu.core_type = #tpu.core_type<tc>, window_params = [{transform_indices = @transform_0, window_bounds = array<i64: 168, 128>}, {pipeline_mode = #tpu.pipeline_mode<synchronous>, transform_indices = @transform_1, window_bounds = array<i64: 128, 128>}, {pipeline_mode = #tpu.pipeline_mode<synchronous>, transform_indices = @transform_2, window_bounds = array<i64: 8, 128>}, {transform_indices = @transform_3, window_bounds = array<i64: 168, 128>}]} {
    %c0 = arith.constant 0 : index
    %c0_0 = arith.constant 0 : index
    %0 = vector.load %arg1[%c0, %c0_0] : memref<168x128xbf16, #tpu.memory_space<vmem>>, vector<168x128xbf16>
    %c0_1 = arith.constant 0 : index
    %c0_2 = arith.constant 0 : index
    %1 = vector.load %arg2[%c0_1, %c0_2] : memref<128x128xbf16, #tpu.memory_space<vmem>>, vector<128x128xbf16>
    %cst = arith.constant dense<0.000000e+00> : vector<168x128xf32>
    %2 = tpu.matmul %0, %1, %cst {dimension_numbers = #tpu.dot_dimension_numbers<[1], [0], [0], [1], [0, 0, 1, 1], [], []>} : vector<168x128xbf16>, vector<128x128xbf16>, vector<168x128xf32> -> vector<168x128xf32>
    %c0_3 = arith.constant 0 : index
    %c0_4 = arith.constant 0 : index
    %3 = vector.load %arg3[%c0_3, %c0_4] : memref<8x128xf32, #tpu.memory_space<vmem>>, vector<1x128xf32>
    %4 = vector.broadcast %3 : vector<1x128xf32> to vector<168x128xf32>
    %5 = arith.addf %2, %4 : vector<168x128xf32>
    %cst_5 = arith.constant 0.000000e+00 : f32
    %6 = vector.broadcast %cst_5 : f32 to vector<168x128xf32>
    %7 = arith.cmpf oge, %5, %6 : vector<168x128xf32>
    %cst_6 = arith.constant 2.000000e-01 : f32
    %8 = vector.broadcast %cst_6 : f32 to vector<168x128xf32>
    %9 = arith.mulf %8, %5 : vector<168x128xf32>
    %10 = arith.select %7, %5, %9 : vector<168x128xi1>, vector<168x128xf32>
    %11 = arith.truncf %10 : vector<168x128xf32> to vector<168x128xbf16>
    %c0_7 = arith.constant 0 : index
    %c0_8 = arith.constant 0 : index
    %12 = vector.load %arg4[%c0_7, %c0_8] : memref<168x128xbf16, #tpu.memory_space<vmem>>, vector<168x128xbf16>
    tpu.vector_store %arg4[%c0_7, %c0_8], %11 {strides = array<i32>} : memref<168x128xbf16, #tpu.memory_space<vmem>>, vector<168x128xbf16>,
    return
  }
  func.func @transform_0(%arg0: i32) -> (i32, i32) {
    %c0_i32 = arith.constant 0 : i32
    %c0_i32_0 = arith.constant 0 : i32
    return %arg0, %c0_i32 : i32, i32
  }
  func.func @transform_1(%arg0: i32) -> (i32, i32) {
    %c0_i32 = arith.constant 0 : i32
    %c0_i32_0 = arith.constant 0 : i32
    %c0_i32_1 = arith.constant 0 : i32
    return %c0_i32, %c0_i32_0 : i32, i32
  }
  func.func @transform_2(%arg0: i32) -> (i32, i32) {
    %c0_i32 = arith.constant 0 : i32
    %c0_i32_0 = arith.constant 0 : i32
    %c0_i32_1 = arith.constant 0 : i32
    return %c0_i32, %c0_i32_0 : i32, i32
  }
  func.func @transform_3(%arg0: i32) -> (i32, i32) {
    %c0_i32 = arith.constant 0 : i32
    %c0_i32_0 = arith.constant 0 : i32
    return %arg0, %c0_i32 : i32, i32
  }
}

module attributes {stable_mosaic.version = 11 : i64} {
  func.func @_conv_bn_act_fused_kernel(%arg0: i32, %arg1: memref<56x256xbf16, #tpu.memory_space<vmem>>, %arg2: memref<256x128xbf16, #tpu.memory_space<vmem>>, %arg3: memref<8x128xf32, #tpu.memory_space<vmem>>, %arg4: memref<56x128xbf16, #tpu.memory_space<vmem>>, %arg5: memref<56x128xf32, #tpu.memory_space<vmem>>, %arg6: memref<8x128xf32, #tpu.memory_space<vmem>>, %arg7: memref<8x128xf32, #tpu.memory_space<vmem>>) attributes {dimension_semantics = [#tpu.dimension_semantics<arbitrary>], iteration_bounds = array<i64: 1>, scalar_prefetch = 0 : i64, scratch_operands = 3 : i64, tpu.core_type = #tpu.core_type<tc>, window_params = [{transform_indices = @transform_0, window_bounds = array<i64: 56, 256>}, {pipeline_mode = #tpu.pipeline_mode<synchronous>, transform_indices = @transform_1, window_bounds = array<i64: 256, 128>}, {pipeline_mode = #tpu.pipeline_mode<synchronous>, transform_indices = @transform_2, window_bounds = array<i64: 8, 128>}, {pipeline_mode = #tpu.pipeline_mode<synchronous>, transform_indices = @transform_3, window_bounds = array<i64: 56, 128>}]} {
    %c0_i32 = arith.constant 0 : i32
    %0 = arith.cmpi eq, %arg0, %c0_i32 : i32
    %1 = arith.extui %0 : i1 to i32
    %c0_i32_0 = arith.constant 0 : i32
    %2 = arith.cmpi ne, %1, %c0_i32_0 : i32
    scf.if %2 {
      %cst_17 = arith.constant 0.000000e+00 : f32
      %23 = vector.broadcast %cst_17 : f32 to vector<8x128xf32>
      %c0_18 = arith.constant 0 : index
      %c0_19 = arith.constant 0 : index
      %24 = vector.load %arg6[%c0_18, %c0_19] : memref<8x128xf32, #tpu.memory_space<vmem>>, vector<8x128xf32>
      tpu.vector_store %arg6[%c0_18, %c0_19], %23 {strides = array<i32>} : memref<8x128xf32, #tpu.memory_space<vmem>>, vector<8x128xf32>,
      %cst_20 = arith.constant 0.000000e+00 : f32
      %25 = vector.broadcast %cst_20 : f32 to vector<8x128xf32>
      %c0_21 = arith.constant 0 : index
      %c0_22 = arith.constant 0 : index
      %26 = vector.load %arg7[%c0_21, %c0_22] : memref<8x128xf32, #tpu.memory_space<vmem>>, vector<8x128xf32>
      tpu.vector_store %arg7[%c0_21, %c0_22], %25 {strides = array<i32>} : memref<8x128xf32, #tpu.memory_space<vmem>>, vector<8x128xf32>,
    } else {
    }
    %c0 = arith.constant 0 : index
    %c0_1 = arith.constant 0 : index
    %3 = vector.load %arg1[%c0, %c0_1] : memref<56x256xbf16, #tpu.memory_space<vmem>>, vector<56x256xbf16>
    %c0_2 = arith.constant 0 : index
    %c0_3 = arith.constant 0 : index
    %4 = vector.load %arg2[%c0_2, %c0_3] : memref<256x128xbf16, #tpu.memory_space<vmem>>, vector<256x128xbf16>
    %cst = arith.constant dense<0.000000e+00> : vector<56x128xf32>
    %5 = tpu.matmul %3, %4, %cst {dimension_numbers = #tpu.dot_dimension_numbers<[1], [0], [0], [1], [0, 0, 1, 1], [], []>} : vector<56x256xbf16>, vector<256x128xbf16>, vector<56x128xf32> -> vector<56x128xf32>
    %c56_i32 = arith.constant 56 : i32
    %6 = arith.muli %arg0, %c56_i32 : i32
    %7 = tpu.assume_multiple %6, 8 : i32
    %8 = arith.index_cast %7 : i32 to index
    %c0_4 = arith.constant 0 : index
    %9 = vector.load %arg5[%8, %c0_4] : memref<56x128xf32, #tpu.memory_space<vmem>>, vector<56x128xf32>
    tpu.vector_store %arg5[%8, %c0_4], %5 {strides = array<i32>} : memref<56x128xf32, #tpu.memory_space<vmem>>, vector<56x128xf32>,
    %10 = vector.shape_cast %5 : vector<56x128xf32> to vector<7x8x128xf32>
    %cst_5 = arith.constant dense<0.000000e+00> : vector<8x128xf32>
    %11 = vector.multi_reduction <add>, %10, %cst_5 [0] : vector<7x8x128xf32> to vector<8x128xf32>
    %12 = arith.mulf %10, %10 : vector<7x8x128xf32>
    %cst_6 = arith.constant dense<0.000000e+00> : vector<8x128xf32>
    %13 = vector.multi_reduction <add>, %12, %cst_6 [0] : vector<7x8x128xf32> to vector<8x128xf32>
    %c0_7 = arith.constant 0 : index
    %c0_8 = arith.constant 0 : index
    %14 = vector.load %arg6[%c0_7, %c0_8] : memref<8x128xf32, #tpu.memory_space<vmem>>, vector<8x128xf32>
    %15 = arith.addf %14, %11 : vector<8x128xf32>
    %c0_9 = arith.constant 0 : index
    %c0_10 = arith.constant 0 : index
    %16 = vector.load %arg6[%c0_9, %c0_10] : memref<8x128xf32, #tpu.memory_space<vmem>>, vector<8x128xf32>
    tpu.vector_store %arg6[%c0_9, %c0_10], %15 {strides = array<i32>} : memref<8x128xf32, #tpu.memory_space<vmem>>, vector<8x128xf32>,
    %c0_11 = arith.constant 0 : index
    %c0_12 = arith.constant 0 : index
    %17 = vector.load %arg7[%c0_11, %c0_12] : memref<8x128xf32, #tpu.memory_space<vmem>>, vector<8x128xf32>
    %18 = arith.addf %17, %13 : vector<8x128xf32>
    %c0_13 = arith.constant 0 : index
    %c0_14 = arith.constant 0 : index
    %19 = vector.load %arg7[%c0_13, %c0_14] : memref<8x128xf32, #tpu.memory_space<vmem>>, vector<8x128xf32>
    tpu.vector_store %arg7[%c0_13, %c0_14], %18 {strides = array<i32>} : memref<8x128xf32, #tpu.memory_space<vmem>>, vector<8x128xf32>,
    %c0_i32_15 = arith.constant 0 : i32
    %20 = arith.cmpi eq, %arg0, %c0_i32_15 : i32
    %21 = arith.extui %20 : i1 to i32
    %c0_i32_16 = arith.constant 0 : i32
    %22 = arith.cmpi ne, %21, %c0_i32_16 : i32
    scf.if %22 {
      %c0_17 = arith.constant 0 : index
      %c0_18 = arith.constant 0 : index
      %23 = vector.load %arg6[%c0_17, %c0_18] : memref<8x128xf32, #tpu.memory_space<vmem>>, vector<8x128xf32>
      %cst_19 = arith.constant dense<0.000000e+00> : vector<128xf32>
      %24 = vector.multi_reduction <add>, %23, %cst_19 [0] : vector<8x128xf32> to vector<128xf32>
      %25 = vector.shape_cast %24 : vector<128xf32> to vector<1x128xf32>
      %cst_20 = arith.constant 2.000000e-02 : f32
      %26 = vector.broadcast %cst_20 : f32 to vector<1x128xf32>
      %27 = arith.mulf %25, %26 : vector<1x128xf32>
      %c0_21 = arith.constant 0 : index
      %c0_22 = arith.constant 0 : index
      %28 = vector.load %arg7[%c0_21, %c0_22] : memref<8x128xf32, #tpu.memory_space<vmem>>, vector<8x128xf32>
      %cst_23 = arith.constant dense<0.000000e+00> : vector<128xf32>
      %29 = vector.multi_reduction <add>, %28, %cst_23 [0] : vector<8x128xf32> to vector<128xf32>
      %30 = vector.shape_cast %29 : vector<128xf32> to vector<1x128xf32>
      %cst_24 = arith.constant 2.000000e-02 : f32
      %31 = vector.broadcast %cst_24 : f32 to vector<1x128xf32>
      %32 = arith.mulf %30, %31 : vector<1x128xf32>
      %33 = arith.mulf %27, %27 : vector<1x128xf32>
      %34 = arith.subf %32, %33 : vector<1x128xf32>
      %cst_25 = arith.constant 0.000000e+00 : f32
      %35 = vector.broadcast %cst_25 : f32 to vector<1x128xf32>
      %36 = arith.maximumf %34, %35 : vector<1x128xf32>
      %c0_26 = arith.constant 0 : index
      %c0_27 = arith.constant 0 : index
      %37 = vector.load %arg3[%c0_26, %c0_27] : memref<8x128xf32, #tpu.memory_space<vmem>>, vector<1x128xf32>
      %cst_28 = arith.constant 9.99999974E-6 : f32
      %38 = vector.broadcast %cst_28 : f32 to vector<1x128xf32>
      %39 = arith.addf %36, %38 : vector<1x128xf32>
      %40 = math.rsqrt %39 : vector<1x128xf32>
      %41 = arith.mulf %37, %40 : vector<1x128xf32>
      %c1 = arith.constant 1 : index
      %c0_29 = arith.constant 0 : index
      %42 = vector.load %arg3[%c1, %c0_29] : memref<8x128xf32, #tpu.memory_space<vmem>>, vector<1x128xf32>
      %43 = arith.mulf %27, %41 : vector<1x128xf32>
      %44 = arith.subf %42, %43 : vector<1x128xf32>
      %c0_30 = arith.constant 0 : index
      %c0_31 = arith.constant 0 : index
      %45 = vector.load %arg5[%c0_30, %c0_31] : memref<56x128xf32, #tpu.memory_space<vmem>>, vector<56x128xf32>
      %46 = vector.broadcast %41 : vector<1x128xf32> to vector<56x128xf32>
      %47 = arith.mulf %45, %46 : vector<56x128xf32>
      %48 = vector.broadcast %44 : vector<1x128xf32> to vector<56x128xf32>
      %49 = arith.addf %47, %48 : vector<56x128xf32>
      %cst_32 = arith.constant 0.000000e+00 : f32
      %50 = vector.broadcast %cst_32 : f32 to vector<56x128xf32>
      %51 = arith.cmpf oge, %49, %50 : vector<56x128xf32>
      %cst_33 = arith.constant 2.000000e-01 : f32
      %52 = vector.broadcast %cst_33 : f32 to vector<56x128xf32>
      %53 = arith.mulf %52, %49 : vector<56x128xf32>
      %54 = arith.select %51, %49, %53 : vector<56x128xi1>, vector<56x128xf32>
      %55 = arith.truncf %54 : vector<56x128xf32> to vector<56x128xbf16>
      %c0_34 = arith.constant 0 : index
      %c0_35 = arith.constant 0 : index
      %56 = vector.load %arg4[%c0_34, %c0_35] : memref<56x128xbf16, #tpu.memory_space<vmem>>, vector<56x128xbf16>
      tpu.vector_store %arg4[%c0_34, %c0_35], %55 {strides = array<i32>} : memref<56x128xbf16, #tpu.memory_space<vmem>>, vector<56x128xbf16>,
    } else {
    }
    return
  }
  func.func @transform_0(%arg0: i32) -> (i32, i32) {
    %c0_i32 = arith.constant 0 : i32
    %c0_i32_0 = arith.constant 0 : i32
    return %arg0, %c0_i32 : i32, i32
  }
  func.func @transform_1(%arg0: i32) -> (i32, i32) {
    %c0_i32 = arith.constant 0 : i32
    %c0_i32_0 = arith.constant 0 : i32
    %c0_i32_1 = arith.constant 0 : i32
    return %c0_i32, %c0_i32_0 : i32, i32
  }
  func.func @transform_2(%arg0: i32) -> (i32, i32) {
    %c0_i32 = arith.constant 0 : i32
    %c0_i32_0 = arith.constant 0 : i32
    %c0_i32_1 = arith.constant 0 : i32
    return %c0_i32, %c0_i32_0 : i32, i32
  }
  func.func @transform_3(%arg0: i32) -> (i32, i32) {
    %c0_i32 = arith.constant 0 : i32
    %c0_i32_0 = arith.constant 0 : i32
    %c0_i32_1 = arith.constant 0 : i32
    return %c0_i32, %c0_i32_0 : i32, i32
  }
}

module attributes {stable_mosaic.version = 11 : i64} {
  func.func @_conv_bn_act_fused_kernel(%arg0: i32, %arg1: memref<24x512xbf16, #tpu.memory_space<vmem>>, %arg2: memref<512x128xbf16, #tpu.memory_space<vmem>>, %arg3: memref<8x128xf32, #tpu.memory_space<vmem>>, %arg4: memref<24x128xbf16, #tpu.memory_space<vmem>>, %arg5: memref<24x128xf32, #tpu.memory_space<vmem>>, %arg6: memref<8x128xf32, #tpu.memory_space<vmem>>, %arg7: memref<8x128xf32, #tpu.memory_space<vmem>>) attributes {dimension_semantics = [#tpu.dimension_semantics<arbitrary>], iteration_bounds = array<i64: 1>, scalar_prefetch = 0 : i64, scratch_operands = 3 : i64, tpu.core_type = #tpu.core_type<tc>, window_params = [{transform_indices = @transform_0, window_bounds = array<i64: 24, 512>}, {pipeline_mode = #tpu.pipeline_mode<synchronous>, transform_indices = @transform_1, window_bounds = array<i64: 512, 128>}, {pipeline_mode = #tpu.pipeline_mode<synchronous>, transform_indices = @transform_2, window_bounds = array<i64: 8, 128>}, {pipeline_mode = #tpu.pipeline_mode<synchronous>, transform_indices = @transform_3, window_bounds = array<i64: 24, 128>}]} {
    %c0_i32 = arith.constant 0 : i32
    %0 = arith.cmpi eq, %arg0, %c0_i32 : i32
    %1 = arith.extui %0 : i1 to i32
    %c0_i32_0 = arith.constant 0 : i32
    %2 = arith.cmpi ne, %1, %c0_i32_0 : i32
    scf.if %2 {
      %cst_17 = arith.constant 0.000000e+00 : f32
      %23 = vector.broadcast %cst_17 : f32 to vector<8x128xf32>
      %c0_18 = arith.constant 0 : index
      %c0_19 = arith.constant 0 : index
      %24 = vector.load %arg6[%c0_18, %c0_19] : memref<8x128xf32, #tpu.memory_space<vmem>>, vector<8x128xf32>
      tpu.vector_store %arg6[%c0_18, %c0_19], %23 {strides = array<i32>} : memref<8x128xf32, #tpu.memory_space<vmem>>, vector<8x128xf32>,
      %cst_20 = arith.constant 0.000000e+00 : f32
      %25 = vector.broadcast %cst_20 : f32 to vector<8x128xf32>
      %c0_21 = arith.constant 0 : index
      %c0_22 = arith.constant 0 : index
      %26 = vector.load %arg7[%c0_21, %c0_22] : memref<8x128xf32, #tpu.memory_space<vmem>>, vector<8x128xf32>
      tpu.vector_store %arg7[%c0_21, %c0_22], %25 {strides = array<i32>} : memref<8x128xf32, #tpu.memory_space<vmem>>, vector<8x128xf32>,
    } else {
    }
    %c0 = arith.constant 0 : index
    %c0_1 = arith.constant 0 : index
    %3 = vector.load %arg1[%c0, %c0_1] : memref<24x512xbf16, #tpu.memory_space<vmem>>, vector<24x512xbf16>
    %c0_2 = arith.constant 0 : index
    %c0_3 = arith.constant 0 : index
    %4 = vector.load %arg2[%c0_2, %c0_3] : memref<512x128xbf16, #tpu.memory_space<vmem>>, vector<512x128xbf16>
    %cst = arith.constant dense<0.000000e+00> : vector<24x128xf32>
    %5 = tpu.matmul %3, %4, %cst {dimension_numbers = #tpu.dot_dimension_numbers<[1], [0], [0], [1], [0, 0, 1, 1], [], []>} : vector<24x512xbf16>, vector<512x128xbf16>, vector<24x128xf32> -> vector<24x128xf32>
    %c24_i32 = arith.constant 24 : i32
    %6 = arith.muli %arg0, %c24_i32 : i32
    %7 = tpu.assume_multiple %6, 8 : i32
    %8 = arith.index_cast %7 : i32 to index
    %c0_4 = arith.constant 0 : index
    %9 = vector.load %arg5[%8, %c0_4] : memref<24x128xf32, #tpu.memory_space<vmem>>, vector<24x128xf32>
    tpu.vector_store %arg5[%8, %c0_4], %5 {strides = array<i32>} : memref<24x128xf32, #tpu.memory_space<vmem>>, vector<24x128xf32>,
    %10 = vector.shape_cast %5 : vector<24x128xf32> to vector<3x8x128xf32>
    %cst_5 = arith.constant dense<0.000000e+00> : vector<8x128xf32>
    %11 = vector.multi_reduction <add>, %10, %cst_5 [0] : vector<3x8x128xf32> to vector<8x128xf32>
    %12 = arith.mulf %10, %10 : vector<3x8x128xf32>
    %cst_6 = arith.constant dense<0.000000e+00> : vector<8x128xf32>
    %13 = vector.multi_reduction <add>, %12, %cst_6 [0] : vector<3x8x128xf32> to vector<8x128xf32>
    %c0_7 = arith.constant 0 : index
    %c0_8 = arith.constant 0 : index
    %14 = vector.load %arg6[%c0_7, %c0_8] : memref<8x128xf32, #tpu.memory_space<vmem>>, vector<8x128xf32>
    %15 = arith.addf %14, %11 : vector<8x128xf32>
    %c0_9 = arith.constant 0 : index
    %c0_10 = arith.constant 0 : index
    %16 = vector.load %arg6[%c0_9, %c0_10] : memref<8x128xf32, #tpu.memory_space<vmem>>, vector<8x128xf32>
    tpu.vector_store %arg6[%c0_9, %c0_10], %15 {strides = array<i32>} : memref<8x128xf32, #tpu.memory_space<vmem>>, vector<8x128xf32>,
    %c0_11 = arith.constant 0 : index
    %c0_12 = arith.constant 0 : index
    %17 = vector.load %arg7[%c0_11, %c0_12] : memref<8x128xf32, #tpu.memory_space<vmem>>, vector<8x128xf32>
    %18 = arith.addf %17, %13 : vector<8x128xf32>
    %c0_13 = arith.constant 0 : index
    %c0_14 = arith.constant 0 : index
    %19 = vector.load %arg7[%c0_13, %c0_14] : memref<8x128xf32, #tpu.memory_space<vmem>>, vector<8x128xf32>
    tpu.vector_store %arg7[%c0_13, %c0_14], %18 {strides = array<i32>} : memref<8x128xf32, #tpu.memory_space<vmem>>, vector<8x128xf32>,
    %c0_i32_15 = arith.constant 0 : i32
    %20 = arith.cmpi eq, %arg0, %c0_i32_15 : i32
    %21 = arith.extui %20 : i1 to i32
    %c0_i32_16 = arith.constant 0 : i32
    %22 = arith.cmpi ne, %21, %c0_i32_16 : i32
    scf.if %22 {
      %c0_17 = arith.constant 0 : index
      %c0_18 = arith.constant 0 : index
      %23 = vector.load %arg6[%c0_17, %c0_18] : memref<8x128xf32, #tpu.memory_space<vmem>>, vector<8x128xf32>
      %cst_19 = arith.constant dense<0.000000e+00> : vector<128xf32>
      %24 = vector.multi_reduction <add>, %23, %cst_19 [0] : vector<8x128xf32> to vector<128xf32>
      %25 = vector.shape_cast %24 : vector<128xf32> to vector<1x128xf32>
      %cst_20 = arith.constant 0.055555556 : f32
      %26 = vector.broadcast %cst_20 : f32 to vector<1x128xf32>
      %27 = arith.mulf %25, %26 : vector<1x128xf32>
      %c0_21 = arith.constant 0 : index
      %c0_22 = arith.constant 0 : index
      %28 = vector.load %arg7[%c0_21, %c0_22] : memref<8x128xf32, #tpu.memory_space<vmem>>, vector<8x128xf32>
      %cst_23 = arith.constant dense<0.000000e+00> : vector<128xf32>
      %29 = vector.multi_reduction <add>, %28, %cst_23 [0] : vector<8x128xf32> to vector<128xf32>
      %30 = vector.shape_cast %29 : vector<128xf32> to vector<1x128xf32>
      %cst_24 = arith.constant 0.055555556 : f32
      %31 = vector.broadcast %cst_24 : f32 to vector<1x128xf32>
      %32 = arith.mulf %30, %31 : vector<1x128xf32>
      %33 = arith.mulf %27, %27 : vector<1x128xf32>
      %34 = arith.subf %32, %33 : vector<1x128xf32>
      %cst_25 = arith.constant 0.000000e+00 : f32
      %35 = vector.broadcast %cst_25 : f32 to vector<1x128xf32>
      %36 = arith.maximumf %34, %35 : vector<1x128xf32>
      %c0_26 = arith.constant 0 : index
      %c0_27 = arith.constant 0 : index
      %37 = vector.load %arg3[%c0_26, %c0_27] : memref<8x128xf32, #tpu.memory_space<vmem>>, vector<1x128xf32>
      %cst_28 = arith.constant 9.99999974E-6 : f32
      %38 = vector.broadcast %cst_28 : f32 to vector<1x128xf32>
      %39 = arith.addf %36, %38 : vector<1x128xf32>
      %40 = math.rsqrt %39 : vector<1x128xf32>
      %41 = arith.mulf %37, %40 : vector<1x128xf32>
      %c1 = arith.constant 1 : index
      %c0_29 = arith.constant 0 : index
      %42 = vector.load %arg3[%c1, %c0_29] : memref<8x128xf32, #tpu.memory_space<vmem>>, vector<1x128xf32>
      %43 = arith.mulf %27, %41 : vector<1x128xf32>
      %44 = arith.subf %42, %43 : vector<1x128xf32>
      %c0_30 = arith.constant 0 : index
      %c0_31 = arith.constant 0 : index
      %45 = vector.load %arg5[%c0_30, %c0_31] : memref<24x128xf32, #tpu.memory_space<vmem>>, vector<24x128xf32>
      %46 = vector.broadcast %41 : vector<1x128xf32> to vector<24x128xf32>
      %47 = arith.mulf %45, %46 : vector<24x128xf32>
      %48 = vector.broadcast %44 : vector<1x128xf32> to vector<24x128xf32>
      %49 = arith.addf %47, %48 : vector<24x128xf32>
      %cst_32 = arith.constant 0.000000e+00 : f32
      %50 = vector.broadcast %cst_32 : f32 to vector<24x128xf32>
      %51 = arith.cmpf oge, %49, %50 : vector<24x128xf32>
      %cst_33 = arith.constant 2.000000e-01 : f32
      %52 = vector.broadcast %cst_33 : f32 to vector<24x128xf32>
      %53 = arith.mulf %52, %49 : vector<24x128xf32>
      %54 = arith.select %51, %49, %53 : vector<24x128xi1>, vector<24x128xf32>
      %55 = arith.truncf %54 : vector<24x128xf32> to vector<24x128xbf16>
      %c0_34 = arith.constant 0 : index
      %c0_35 = arith.constant 0 : index
      %56 = vector.load %arg4[%c0_34, %c0_35] : memref<24x128xbf16, #tpu.memory_space<vmem>>, vector<24x128xbf16>
      tpu.vector_store %arg4[%c0_34, %c0_35], %55 {strides = array<i32>} : memref<24x128xbf16, #tpu.memory_space<vmem>>, vector<24x128xbf16>,
    } else {
    }
    return
  }
  func.func @transform_0(%arg0: i32) -> (i32, i32) {
    %c0_i32 = arith.constant 0 : i32
    %c0_i32_0 = arith.constant 0 : i32
    return %arg0, %c0_i32 : i32, i32
  }
  func.func @transform_1(%arg0: i32) -> (i32, i32) {
    %c0_i32 = arith.constant 0 : i32
    %c0_i32_0 = arith.constant 0 : i32
    %c0_i32_1 = arith.constant 0 : i32
    return %c0_i32, %c0_i32_0 : i32, i32
  }
  func.func @transform_2(%arg0: i32) -> (i32, i32) {
    %c0_i32 = arith.constant 0 : i32
    %c0_i32_0 = arith.constant 0 : i32
    %c0_i32_1 = arith.constant 0 : i32
    return %c0_i32, %c0_i32_0 : i32, i32
  }
  func.func @transform_3(%arg0: i32) -> (i32, i32) {
    %c0_i32 = arith.constant 0 : i32
    %c0_i32_0 = arith.constant 0 : i32
    %c0_i32_1 = arith.constant 0 : i32
    return %c0_i32, %c0_i32_0 : i32, i32
  }
}

module attributes {stable_mosaic.version = 11 : i64} {
  func.func @_conv_bn_act_fused_kernel(%arg0: i32, %arg1: memref<32x1024xbf16, #tpu.memory_space<vmem>>, %arg2: memref<1024x128xbf16, #tpu.memory_space<vmem>>, %arg3: memref<8x128xf32, #tpu.memory_space<vmem>>, %arg4: memref<32x128xbf16, #tpu.memory_space<vmem>>, %arg5: memref<32x128xf32, #tpu.memory_space<vmem>>, %arg6: memref<8x128xf32, #tpu.memory_space<vmem>>, %arg7: memref<8x128xf32, #tpu.memory_space<vmem>>) attributes {dimension_semantics = [#tpu.dimension_semantics<arbitrary>], iteration_bounds = array<i64: 1>, scalar_prefetch = 0 : i64, scratch_operands = 3 : i64, tpu.core_type = #tpu.core_type<tc>, window_params = [{transform_indices = @transform_0, window_bounds = array<i64: 32, 1024>}, {pipeline_mode = #tpu.pipeline_mode<synchronous>, transform_indices = @transform_1, window_bounds = array<i64: 1024, 128>}, {pipeline_mode = #tpu.pipeline_mode<synchronous>, transform_indices = @transform_2, window_bounds = array<i64: 8, 128>}, {pipeline_mode = #tpu.pipeline_mode<synchronous>, transform_indices = @transform_3, window_bounds = array<i64: 32, 128>}]} {
    %c0_i32 = arith.constant 0 : i32
    %0 = arith.cmpi eq, %arg0, %c0_i32 : i32
    %1 = arith.extui %0 : i1 to i32
    %c0_i32_0 = arith.constant 0 : i32
    %2 = arith.cmpi ne, %1, %c0_i32_0 : i32
    scf.if %2 {
      %cst_17 = arith.constant 0.000000e+00 : f32
      %23 = vector.broadcast %cst_17 : f32 to vector<8x128xf32>
      %c0_18 = arith.constant 0 : index
      %c0_19 = arith.constant 0 : index
      %24 = vector.load %arg6[%c0_18, %c0_19] : memref<8x128xf32, #tpu.memory_space<vmem>>, vector<8x128xf32>
      tpu.vector_store %arg6[%c0_18, %c0_19], %23 {strides = array<i32>} : memref<8x128xf32, #tpu.memory_space<vmem>>, vector<8x128xf32>,
      %cst_20 = arith.constant 0.000000e+00 : f32
      %25 = vector.broadcast %cst_20 : f32 to vector<8x128xf32>
      %c0_21 = arith.constant 0 : index
      %c0_22 = arith.constant 0 : index
      %26 = vector.load %arg7[%c0_21, %c0_22] : memref<8x128xf32, #tpu.memory_space<vmem>>, vector<8x128xf32>
      tpu.vector_store %arg7[%c0_21, %c0_22], %25 {strides = array<i32>} : memref<8x128xf32, #tpu.memory_space<vmem>>, vector<8x128xf32>,
    } else {
    }
    %c0 = arith.constant 0 : index
    %c0_1 = arith.constant 0 : index
    %3 = vector.load %arg1[%c0, %c0_1] : memref<32x1024xbf16, #tpu.memory_space<vmem>>, vector<32x1024xbf16>
    %c0_2 = arith.constant 0 : index
    %c0_3 = arith.constant 0 : index
    %4 = vector.load %arg2[%c0_2, %c0_3] : memref<1024x128xbf16, #tpu.memory_space<vmem>>, vector<1024x128xbf16>
    %cst = arith.constant dense<0.000000e+00> : vector<32x128xf32>
    %5 = tpu.matmul %3, %4, %cst {dimension_numbers = #tpu.dot_dimension_numbers<[1], [0], [0], [1], [0, 0, 1, 1], [], []>} : vector<32x1024xbf16>, vector<1024x128xbf16>, vector<32x128xf32> -> vector<32x128xf32>
    %c32_i32 = arith.constant 32 : i32
    %6 = arith.muli %arg0, %c32_i32 : i32
    %7 = tpu.assume_multiple %6, 8 : i32
    %8 = arith.index_cast %7 : i32 to index
    %c0_4 = arith.constant 0 : index
    %9 = vector.load %arg5[%8, %c0_4] : memref<32x128xf32, #tpu.memory_space<vmem>>, vector<32x128xf32>
    tpu.vector_store %arg5[%8, %c0_4], %5 {strides = array<i32>} : memref<32x128xf32, #tpu.memory_space<vmem>>, vector<32x128xf32>,
    %10 = vector.shape_cast %5 : vector<32x128xf32> to vector<4x8x128xf32>
    %cst_5 = arith.constant dense<0.000000e+00> : vector<8x128xf32>
    %11 = vector.multi_reduction <add>, %10, %cst_5 [0] : vector<4x8x128xf32> to vector<8x128xf32>
    %12 = arith.mulf %10, %10 : vector<4x8x128xf32>
    %cst_6 = arith.constant dense<0.000000e+00> : vector<8x128xf32>
    %13 = vector.multi_reduction <add>, %12, %cst_6 [0] : vector<4x8x128xf32> to vector<8x128xf32>
    %c0_7 = arith.constant 0 : index
    %c0_8 = arith.constant 0 : index
    %14 = vector.load %arg6[%c0_7, %c0_8] : memref<8x128xf32, #tpu.memory_space<vmem>>, vector<8x128xf32>
    %15 = arith.addf %14, %11 : vector<8x128xf32>
    %c0_9 = arith.constant 0 : index
    %c0_10 = arith.constant 0 : index
    %16 = vector.load %arg6[%c0_9, %c0_10] : memref<8x128xf32, #tpu.memory_space<vmem>>, vector<8x128xf32>
    tpu.vector_store %arg6[%c0_9, %c0_10], %15 {strides = array<i32>} : memref<8x128xf32, #tpu.memory_space<vmem>>, vector<8x128xf32>,
    %c0_11 = arith.constant 0 : index
    %c0_12 = arith.constant 0 : index
    %17 = vector.load %arg7[%c0_11, %c0_12] : memref<8x128xf32, #tpu.memory_space<vmem>>, vector<8x128xf32>
    %18 = arith.addf %17, %13 : vector<8x128xf32>
    %c0_13 = arith.constant 0 : index
    %c0_14 = arith.constant 0 : index
    %19 = vector.load %arg7[%c0_13, %c0_14] : memref<8x128xf32, #tpu.memory_space<vmem>>, vector<8x128xf32>
    tpu.vector_store %arg7[%c0_13, %c0_14], %18 {strides = array<i32>} : memref<8x128xf32, #tpu.memory_space<vmem>>, vector<8x128xf32>,
    %c0_i32_15 = arith.constant 0 : i32
    %20 = arith.cmpi eq, %arg0, %c0_i32_15 : i32
    %21 = arith.extui %20 : i1 to i32
    %c0_i32_16 = arith.constant 0 : i32
    %22 = arith.cmpi ne, %21, %c0_i32_16 : i32
    scf.if %22 {
      %c0_17 = arith.constant 0 : index
      %c0_18 = arith.constant 0 : index
      %23 = vector.load %arg6[%c0_17, %c0_18] : memref<8x128xf32, #tpu.memory_space<vmem>>, vector<8x128xf32>
      %cst_19 = arith.constant dense<0.000000e+00> : vector<128xf32>
      %24 = vector.multi_reduction <add>, %23, %cst_19 [0] : vector<8x128xf32> to vector<128xf32>
      %25 = vector.shape_cast %24 : vector<128xf32> to vector<1x128xf32>
      %cst_20 = arith.constant 3.125000e-02 : f32
      %26 = vector.broadcast %cst_20 : f32 to vector<1x128xf32>
      %27 = arith.mulf %25, %26 : vector<1x128xf32>
      %c0_21 = arith.constant 0 : index
      %c0_22 = arith.constant 0 : index
      %28 = vector.load %arg7[%c0_21, %c0_22] : memref<8x128xf32, #tpu.memory_space<vmem>>, vector<8x128xf32>
      %cst_23 = arith.constant dense<0.000000e+00> : vector<128xf32>
      %29 = vector.multi_reduction <add>, %28, %cst_23 [0] : vector<8x128xf32> to vector<128xf32>
      %30 = vector.shape_cast %29 : vector<128xf32> to vector<1x128xf32>
      %cst_24 = arith.constant 3.125000e-02 : f32
      %31 = vector.broadcast %cst_24 : f32 to vector<1x128xf32>
      %32 = arith.mulf %30, %31 : vector<1x128xf32>
      %33 = arith.mulf %27, %27 : vector<1x128xf32>
      %34 = arith.subf %32, %33 : vector<1x128xf32>
      %cst_25 = arith.constant 0.000000e+00 : f32
      %35 = vector.broadcast %cst_25 : f32 to vector<1x128xf32>
      %36 = arith.maximumf %34, %35 : vector<1x128xf32>
      %c0_26 = arith.constant 0 : index
      %c0_27 = arith.constant 0 : index
      %37 = vector.load %arg3[%c0_26, %c0_27] : memref<8x128xf32, #tpu.memory_space<vmem>>, vector<1x128xf32>
      %cst_28 = arith.constant 9.99999974E-6 : f32
      %38 = vector.broadcast %cst_28 : f32 to vector<1x128xf32>
      %39 = arith.addf %36, %38 : vector<1x128xf32>
      %40 = math.rsqrt %39 : vector<1x128xf32>
      %41 = arith.mulf %37, %40 : vector<1x128xf32>
      %c1 = arith.constant 1 : index
      %c0_29 = arith.constant 0 : index
      %42 = vector.load %arg3[%c1, %c0_29] : memref<8x128xf32, #tpu.memory_space<vmem>>, vector<1x128xf32>
      %43 = arith.mulf %27, %41 : vector<1x128xf32>
      %44 = arith.subf %42, %43 : vector<1x128xf32>
      %c0_30 = arith.constant 0 : index
      %c0_31 = arith.constant 0 : index
      %45 = vector.load %arg5[%c0_30, %c0_31] : memref<32x128xf32, #tpu.memory_space<vmem>>, vector<32x128xf32>
      %46 = vector.broadcast %41 : vector<1x128xf32> to vector<32x128xf32>
      %47 = arith.mulf %45, %46 : vector<32x128xf32>
      %48 = vector.broadcast %44 : vector<1x128xf32> to vector<32x128xf32>
      %49 = arith.addf %47, %48 : vector<32x128xf32>
      %cst_32 = arith.constant 0.000000e+00 : f32
      %50 = vector.broadcast %cst_32 : f32 to vector<32x128xf32>
      %51 = arith.cmpf oge, %49, %50 : vector<32x128xf32>
      %cst_33 = arith.constant 2.000000e-01 : f32
      %52 = vector.broadcast %cst_33 : f32 to vector<32x128xf32>
      %53 = arith.mulf %52, %49 : vector<32x128xf32>
      %54 = arith.select %51, %49, %53 : vector<32x128xi1>, vector<32x128xf32>
      %55 = arith.truncf %54 : vector<32x128xf32> to vector<32x128xbf16>
      %c0_34 = arith.constant 0 : index
      %c0_35 = arith.constant 0 : index
      %56 = vector.load %arg4[%c0_34, %c0_35] : memref<32x128xbf16, #tpu.memory_space<vmem>>, vector<32x128xbf16>
      tpu.vector_store %arg4[%c0_34, %c0_35], %55 {strides = array<i32>} : memref<32x128xbf16, #tpu.memory_space<vmem>>, vector<32x128xbf16>,
    } else {
    }
    return
  }
  func.func @transform_0(%arg0: i32) -> (i32, i32) {
    %c0_i32 = arith.constant 0 : i32
    %c0_i32_0 = arith.constant 0 : i32
    return %arg0, %c0_i32 : i32, i32
  }
  func.func @transform_1(%arg0: i32) -> (i32, i32) {
    %c0_i32 = arith.constant 0 : i32
    %c0_i32_0 = arith.constant 0 : i32
    %c0_i32_1 = arith.constant 0 : i32
    return %c0_i32, %c0_i32_0 : i32, i32
  }
  func.func @transform_2(%arg0: i32) -> (i32, i32) {
    %c0_i32 = arith.constant 0 : i32
    %c0_i32_0 = arith.constant 0 : i32
    %c0_i32_1 = arith.constant 0 : i32
    return %c0_i32, %c0_i32_0 : i32, i32
  }
  func.func @transform_3(%arg0: i32) -> (i32, i32) {
    %c0_i32 = arith.constant 0 : i32
    %c0_i32_0 = arith.constant 0 : i32
    %c0_i32_1 = arith.constant 0 : i32
    return %c0_i32, %c0_i32_0 : i32, i32
  }
}

module attributes {stable_mosaic.version = 11 : i64} {
  func.func @_conv_bias_kernel(%arg0: i32, %arg1: memref<56x2048xbf16, #tpu.memory_space<vmem>>, %arg2: memref<2048x128xbf16, #tpu.memory_space<vmem>>, %arg3: memref<8x128xf32, #tpu.memory_space<vmem>>, %arg4: memref<56x128xf32, #tpu.memory_space<vmem>>) attributes {dimension_semantics = [#tpu.dimension_semantics<parallel>], iteration_bounds = array<i64: 1>, scalar_prefetch = 0 : i64, scratch_operands = 0 : i64, tpu.core_type = #tpu.core_type<tc>, window_params = [{transform_indices = @transform_0, window_bounds = array<i64: 56, 2048>}, {pipeline_mode = #tpu.pipeline_mode<synchronous>, transform_indices = @transform_1, window_bounds = array<i64: 2048, 128>}, {pipeline_mode = #tpu.pipeline_mode<synchronous>, transform_indices = @transform_2, window_bounds = array<i64: 8, 128>}, {transform_indices = @transform_3, window_bounds = array<i64: 56, 128>}]} {
    %c0 = arith.constant 0 : index
    %c0_0 = arith.constant 0 : index
    %0 = vector.load %arg1[%c0, %c0_0] : memref<56x2048xbf16, #tpu.memory_space<vmem>>, vector<56x2048xbf16>
    %c0_1 = arith.constant 0 : index
    %c0_2 = arith.constant 0 : index
    %1 = vector.load %arg2[%c0_1, %c0_2] : memref<2048x128xbf16, #tpu.memory_space<vmem>>, vector<2048x128xbf16>
    %cst = arith.constant dense<0.000000e+00> : vector<56x128xf32>
    %2 = tpu.matmul %0, %1, %cst {dimension_numbers = #tpu.dot_dimension_numbers<[1], [0], [0], [1], [0, 0, 1, 1], [], []>} : vector<56x2048xbf16>, vector<2048x128xbf16>, vector<56x128xf32> -> vector<56x128xf32>
    %c0_3 = arith.constant 0 : index
    %c0_4 = arith.constant 0 : index
    %3 = vector.load %arg3[%c0_3, %c0_4] : memref<8x128xf32, #tpu.memory_space<vmem>>, vector<1x128xf32>
    %4 = vector.broadcast %3 : vector<1x128xf32> to vector<56x128xf32>
    %5 = arith.addf %2, %4 : vector<56x128xf32>
    %c0_5 = arith.constant 0 : index
    %c0_6 = arith.constant 0 : index
    %6 = vector.load %arg4[%c0_5, %c0_6] : memref<56x128xf32, #tpu.memory_space<vmem>>, vector<56x128xf32>
    tpu.vector_store %arg4[%c0_5, %c0_6], %5 {strides = array<i32>} : memref<56x128xf32, #tpu.memory_space<vmem>>, vector<56x128xf32>,
    return
  }
  func.func @transform_0(%arg0: i32) -> (i32, i32) {
    %c0_i32 = arith.constant 0 : i32
    %c0_i32_0 = arith.constant 0 : i32
    return %arg0, %c0_i32 : i32, i32
  }
  func.func @transform_1(%arg0: i32) -> (i32, i32) {
    %c0_i32 = arith.constant 0 : i32
    %c0_i32_0 = arith.constant 0 : i32
    %c0_i32_1 = arith.constant 0 : i32
    return %c0_i32, %c0_i32_0 : i32, i32
  }
  func.func @transform_2(%arg0: i32) -> (i32, i32) {
    %c0_i32 = arith.constant 0 : i32
    %c0_i32_0 = arith.constant 0 : i32
    %c0_i32_1 = arith.constant 0 : i32
    return %c0_i32, %c0_i32_0 : i32, i32
  }
  func.func @transform_3(%arg0: i32) -> (i32, i32) {
    %c0_i32 = arith.constant 0 : i32
    %c0_i32_0 = arith.constant 0 : i32
    return %arg0, %c0_i32 : i32, i32
  }
}

module attributes {stable_mosaic.version = 11 : i64} {
  func.func @_avgpool_kernel(%arg0: i32, %arg1: memref<1x8x24xf32, #tpu.memory_space<vmem>>, %arg2: memref<1x8x24xf32, #tpu.memory_space<vmem>>, %arg3: memref<1x8x24xf32, #tpu.memory_space<vmem>>, %arg4: memref<1x8x24xf32, #tpu.memory_space<vmem>>, %arg5: memref<1x8x24xf32, #tpu.memory_space<vmem>>, %arg6: memref<1x8x24xf32, #tpu.memory_space<vmem>>) attributes {dimension_semantics = [#tpu.dimension_semantics<parallel>], iteration_bounds = array<i64: 2>, scalar_prefetch = 0 : i64, scratch_operands = 0 : i64, tpu.core_type = #tpu.core_type<tc>, window_params = [{transform_indices = @transform_0, window_bounds = array<i64: 1, 8, 24>}, {transform_indices = @transform_1, window_bounds = array<i64: 1, 8, 24>}, {transform_indices = @transform_2, window_bounds = array<i64: 1, 8, 24>}, {transform_indices = @transform_3, window_bounds = array<i64: 1, 8, 24>}, {pipeline_mode = #tpu.pipeline_mode<synchronous>, transform_indices = @transform_4, window_bounds = array<i64: 1, 8, 24>}, {transform_indices = @transform_5, window_bounds = array<i64: 1, 8, 24>}]} {
    %c0 = arith.constant 0 : index
    %c0_0 = arith.constant 0 : index
    %c0_1 = arith.constant 0 : index
    %0 = vector.load %arg1[%c0, %c0_0, %c0_1] : memref<1x8x24xf32, #tpu.memory_space<vmem>>, vector<1x8x24xf32>
    %c0_2 = arith.constant 0 : index
    %c0_3 = arith.constant 0 : index
    %c0_4 = arith.constant 0 : index
    %1 = vector.load %arg2[%c0_2, %c0_3, %c0_4] : memref<1x8x24xf32, #tpu.memory_space<vmem>>, vector<1x8x24xf32>
    %c0_5 = arith.constant 0 : index
    %c0_6 = arith.constant 0 : index
    %c0_7 = arith.constant 0 : index
    %2 = vector.load %arg3[%c0_5, %c0_6, %c0_7] : memref<1x8x24xf32, #tpu.memory_space<vmem>>, vector<1x8x24xf32>
    %c0_8 = arith.constant 0 : index
    %c0_9 = arith.constant 0 : index
    %c0_10 = arith.constant 0 : index
    %3 = vector.load %arg4[%c0_8, %c0_9, %c0_10] : memref<1x8x24xf32, #tpu.memory_space<vmem>>, vector<1x8x24xf32>
    %4 = arith.addf %0, %1 : vector<1x8x24xf32>
    %5 = arith.addf %4, %2 : vector<1x8x24xf32>
    %6 = arith.addf %5, %3 : vector<1x8x24xf32>
    %cst = arith.constant 0.000000e+00 : f32
    %7 = vector.broadcast %cst : f32 to vector<1x8x3xf32>
    %cst_11 = arith.constant 0.000000e+00 : f32
    %8 = vector.broadcast %cst_11 : f32 to vector<1x1x24xf32>
    %9 = arith.addf %1, %3 : vector<1x8x24xf32>
    %10 = vector.extract_strided_slice %9 {offsets = [0, 0, 0], sizes = [1, 8, 21], strides = [1, 1, 1]} : vector<1x8x24xf32> to vector<1x8x21xf32>
    %11 = tpu.concatenate %7, %10 in 2 : vector<1x8x3xf32>, vector<1x8x21xf32> -> vector<1x8x24xf32>
    %12 = arith.addf %2, %3 : vector<1x8x24xf32>
    %13 = vector.extract_strided_slice %12 {offsets = [0, 0, 0], sizes = [1, 7, 24], strides = [1, 1, 1]} : vector<1x8x24xf32> to vector<1x7x24xf32>
    %14 = tpu.concatenate %8, %13 in 1 : vector<1x1x24xf32>, vector<1x7x24xf32> -> vector<1x8x24xf32>
    %15 = vector.extract_strided_slice %3 {offsets = [0, 0, 0], sizes = [1, 8, 21], strides = [1, 1, 1]} : vector<1x8x24xf32> to vector<1x8x21xf32>
    %16 = tpu.concatenate %7, %15 in 2 : vector<1x8x3xf32>, vector<1x8x21xf32> -> vector<1x8x24xf32>
    %17 = vector.extract_strided_slice %16 {offsets = [0, 0, 0], sizes = [1, 7, 24], strides = [1, 1, 1]} : vector<1x8x24xf32> to vector<1x7x24xf32>
    %18 = tpu.concatenate %8, %17 in 1 : vector<1x1x24xf32>, vector<1x7x24xf32> -> vector<1x8x24xf32>
    %19 = arith.addf %6, %11 : vector<1x8x24xf32>
    %20 = arith.addf %19, %14 : vector<1x8x24xf32>
    %21 = arith.addf %20, %18 : vector<1x8x24xf32>
    %c0_12 = arith.constant 0 : index
    %c0_13 = arith.constant 0 : index
    %c0_14 = arith.constant 0 : index
    %22 = vector.load %arg5[%c0_12, %c0_13, %c0_14] : memref<1x8x24xf32, #tpu.memory_space<vmem>>, vector<1x8x24xf32>
    %23 = arith.mulf %21, %22 : vector<1x8x24xf32>
    %c0_15 = arith.constant 0 : index
    %c0_16 = arith.constant 0 : index
    %c0_17 = arith.constant 0 : index
    %24 = vector.load %arg6[%c0_15, %c0_16, %c0_17] : memref<1x8x24xf32, #tpu.memory_space<vmem>>, vector<1x8x24xf32>
    tpu.vector_store %arg6[%c0_15, %c0_16, %c0_17], %23 {strides = array<i32>} : memref<1x8x24xf32, #tpu.memory_space<vmem>>, vector<1x8x24xf32>,
    return
  }
  func.func @transform_0(%arg0: i32) -> (i32, i32, i32) {
    %c0_i32 = arith.constant 0 : i32
    %c0_i32_0 = arith.constant 0 : i32
    %c0_i32_1 = arith.constant 0 : i32
    return %arg0, %c0_i32, %c0_i32_0 : i32, i32, i32
  }
  func.func @transform_1(%arg0: i32) -> (i32, i32, i32) {
    %c0_i32 = arith.constant 0 : i32
    %c0_i32_0 = arith.constant 0 : i32
    %c0_i32_1 = arith.constant 0 : i32
    return %arg0, %c0_i32, %c0_i32_0 : i32, i32, i32
  }
  func.func @transform_2(%arg0: i32) -> (i32, i32, i32) {
    %c0_i32 = arith.constant 0 : i32
    %c0_i32_0 = arith.constant 0 : i32
    %c0_i32_1 = arith.constant 0 : i32
    return %arg0, %c0_i32, %c0_i32_0 : i32, i32, i32
  }
  func.func @transform_3(%arg0: i32) -> (i32, i32, i32) {
    %c0_i32 = arith.constant 0 : i32
    %c0_i32_0 = arith.constant 0 : i32
    %c0_i32_1 = arith.constant 0 : i32
    return %arg0, %c0_i32, %c0_i32_0 : i32, i32, i32
  }
  func.func @transform_4(%arg0: i32) -> (i32, i32, i32) {
    %c0_i32 = arith.constant 0 : i32
    %c0_i32_0 = arith.constant 0 : i32
    %c0_i32_1 = arith.constant 0 : i32
    %c0_i32_2 = arith.constant 0 : i32
    return %c0_i32, %c0_i32_0, %c0_i32_1 : i32, i32, i32
  }
  func.func @transform_5(%arg0: i32) -> (i32, i32, i32) {
    %c0_i32 = arith.constant 0 : i32
    %c0_i32_0 = arith.constant 0 : i32
    %c0_i32_1 = arith.constant 0 : i32
    return %arg0, %c0_i32, %c0_i32_0 : i32, i32, i32
  }
}

module attributes {stable_mosaic.version = 11 : i64} {
  func.func @_conv_bias_kernel(%arg0: i32, %arg1: memref<56x128xbf16, #tpu.memory_space<vmem>>, %arg2: memref<128x128xbf16, #tpu.memory_space<vmem>>, %arg3: memref<8x128xf32, #tpu.memory_space<vmem>>, %arg4: memref<56x128xbf16, #tpu.memory_space<vmem>>) attributes {dimension_semantics = [#tpu.dimension_semantics<parallel>], iteration_bounds = array<i64: 1>, scalar_prefetch = 0 : i64, scratch_operands = 0 : i64, tpu.core_type = #tpu.core_type<tc>, window_params = [{transform_indices = @transform_0, window_bounds = array<i64: 56, 128>}, {pipeline_mode = #tpu.pipeline_mode<synchronous>, transform_indices = @transform_1, window_bounds = array<i64: 128, 128>}, {pipeline_mode = #tpu.pipeline_mode<synchronous>, transform_indices = @transform_2, window_bounds = array<i64: 8, 128>}, {transform_indices = @transform_3, window_bounds = array<i64: 56, 128>}]} {
    %c0 = arith.constant 0 : index
    %c0_0 = arith.constant 0 : index
    %0 = vector.load %arg1[%c0, %c0_0] : memref<56x128xbf16, #tpu.memory_space<vmem>>, vector<56x128xbf16>
    %c0_1 = arith.constant 0 : index
    %c0_2 = arith.constant 0 : index
    %1 = vector.load %arg2[%c0_1, %c0_2] : memref<128x128xbf16, #tpu.memory_space<vmem>>, vector<128x128xbf16>
    %cst = arith.constant dense<0.000000e+00> : vector<56x128xf32>
    %2 = tpu.matmul %0, %1, %cst {dimension_numbers = #tpu.dot_dimension_numbers<[1], [0], [0], [1], [0, 0, 1, 1], [], []>} : vector<56x128xbf16>, vector<128x128xbf16>, vector<56x128xf32> -> vector<56x128xf32>
    %c0_3 = arith.constant 0 : index
    %c0_4 = arith.constant 0 : index
    %3 = vector.load %arg3[%c0_3, %c0_4] : memref<8x128xf32, #tpu.memory_space<vmem>>, vector<1x128xf32>
    %4 = vector.broadcast %3 : vector<1x128xf32> to vector<56x128xf32>
    %5 = arith.addf %2, %4 : vector<56x128xf32>
    %cst_5 = arith.constant 0.000000e+00 : f32
    %6 = vector.broadcast %cst_5 : f32 to vector<56x128xf32>
    %7 = arith.cmpf oge, %5, %6 : vector<56x128xf32>
    %cst_6 = arith.constant 2.000000e-01 : f32
    %8 = vector.broadcast %cst_6 : f32 to vector<56x128xf32>
    %9 = arith.mulf %8, %5 : vector<56x128xf32>
    %10 = arith.select %7, %5, %9 : vector<56x128xi1>, vector<56x128xf32>
    %11 = arith.truncf %10 : vector<56x128xf32> to vector<56x128xbf16>
    %c0_7 = arith.constant 0 : index
    %c0_8 = arith.constant 0 : index
    %12 = vector.load %arg4[%c0_7, %c0_8] : memref<56x128xbf16, #tpu.memory_space<vmem>>, vector<56x128xbf16>
    tpu.vector_store %arg4[%c0_7, %c0_8], %11 {strides = array<i32>} : memref<56x128xbf16, #tpu.memory_space<vmem>>, vector<56x128xbf16>,
    return
  }
  func.func @transform_0(%arg0: i32) -> (i32, i32) {
    %c0_i32 = arith.constant 0 : i32
    %c0_i32_0 = arith.constant 0 : i32
    return %arg0, %c0_i32 : i32, i32
  }
  func.func @transform_1(%arg0: i32) -> (i32, i32) {
    %c0_i32 = arith.constant 0 : i32
    %c0_i32_0 = arith.constant 0 : i32
    %c0_i32_1 = arith.constant 0 : i32
    return %c0_i32, %c0_i32_0 : i32, i32
  }
  func.func @transform_2(%arg0: i32) -> (i32, i32) {
    %c0_i32 = arith.constant 0 : i32
    %c0_i32_0 = arith.constant 0 : i32
    %c0_i32_1 = arith.constant 0 : i32
    return %c0_i32, %c0_i32_0 : i32, i32
  }
  func.func @transform_3(%arg0: i32) -> (i32, i32) {
    %c0_i32 = arith.constant 0 : i32
    %c0_i32_0 = arith.constant 0 : i32
    return %arg0, %c0_i32 : i32, i32
  }
}

module attributes {stable_mosaic.version = 11 : i64} {
  func.func @_conv_bn_act_fused_kernel(%arg0: i32, %arg1: memref<24x256xbf16, #tpu.memory_space<vmem>>, %arg2: memref<256x128xbf16, #tpu.memory_space<vmem>>, %arg3: memref<8x128xf32, #tpu.memory_space<vmem>>, %arg4: memref<24x128xbf16, #tpu.memory_space<vmem>>, %arg5: memref<24x128xf32, #tpu.memory_space<vmem>>, %arg6: memref<8x128xf32, #tpu.memory_space<vmem>>, %arg7: memref<8x128xf32, #tpu.memory_space<vmem>>) attributes {dimension_semantics = [#tpu.dimension_semantics<arbitrary>], iteration_bounds = array<i64: 1>, scalar_prefetch = 0 : i64, scratch_operands = 3 : i64, tpu.core_type = #tpu.core_type<tc>, window_params = [{transform_indices = @transform_0, window_bounds = array<i64: 24, 256>}, {pipeline_mode = #tpu.pipeline_mode<synchronous>, transform_indices = @transform_1, window_bounds = array<i64: 256, 128>}, {pipeline_mode = #tpu.pipeline_mode<synchronous>, transform_indices = @transform_2, window_bounds = array<i64: 8, 128>}, {pipeline_mode = #tpu.pipeline_mode<synchronous>, transform_indices = @transform_3, window_bounds = array<i64: 24, 128>}]} {
    %c0_i32 = arith.constant 0 : i32
    %0 = arith.cmpi eq, %arg0, %c0_i32 : i32
    %1 = arith.extui %0 : i1 to i32
    %c0_i32_0 = arith.constant 0 : i32
    %2 = arith.cmpi ne, %1, %c0_i32_0 : i32
    scf.if %2 {
      %cst_17 = arith.constant 0.000000e+00 : f32
      %23 = vector.broadcast %cst_17 : f32 to vector<8x128xf32>
      %c0_18 = arith.constant 0 : index
      %c0_19 = arith.constant 0 : index
      %24 = vector.load %arg6[%c0_18, %c0_19] : memref<8x128xf32, #tpu.memory_space<vmem>>, vector<8x128xf32>
      tpu.vector_store %arg6[%c0_18, %c0_19], %23 {strides = array<i32>} : memref<8x128xf32, #tpu.memory_space<vmem>>, vector<8x128xf32>,
      %cst_20 = arith.constant 0.000000e+00 : f32
      %25 = vector.broadcast %cst_20 : f32 to vector<8x128xf32>
      %c0_21 = arith.constant 0 : index
      %c0_22 = arith.constant 0 : index
      %26 = vector.load %arg7[%c0_21, %c0_22] : memref<8x128xf32, #tpu.memory_space<vmem>>, vector<8x128xf32>
      tpu.vector_store %arg7[%c0_21, %c0_22], %25 {strides = array<i32>} : memref<8x128xf32, #tpu.memory_space<vmem>>, vector<8x128xf32>,
    } else {
    }
    %c0 = arith.constant 0 : index
    %c0_1 = arith.constant 0 : index
    %3 = vector.load %arg1[%c0, %c0_1] : memref<24x256xbf16, #tpu.memory_space<vmem>>, vector<24x256xbf16>
    %c0_2 = arith.constant 0 : index
    %c0_3 = arith.constant 0 : index
    %4 = vector.load %arg2[%c0_2, %c0_3] : memref<256x128xbf16, #tpu.memory_space<vmem>>, vector<256x128xbf16>
    %cst = arith.constant dense<0.000000e+00> : vector<24x128xf32>
    %5 = tpu.matmul %3, %4, %cst {dimension_numbers = #tpu.dot_dimension_numbers<[1], [0], [0], [1], [0, 0, 1, 1], [], []>} : vector<24x256xbf16>, vector<256x128xbf16>, vector<24x128xf32> -> vector<24x128xf32>
    %c24_i32 = arith.constant 24 : i32
    %6 = arith.muli %arg0, %c24_i32 : i32
    %7 = tpu.assume_multiple %6, 8 : i32
    %8 = arith.index_cast %7 : i32 to index
    %c0_4 = arith.constant 0 : index
    %9 = vector.load %arg5[%8, %c0_4] : memref<24x128xf32, #tpu.memory_space<vmem>>, vector<24x128xf32>
    tpu.vector_store %arg5[%8, %c0_4], %5 {strides = array<i32>} : memref<24x128xf32, #tpu.memory_space<vmem>>, vector<24x128xf32>,
    %10 = vector.shape_cast %5 : vector<24x128xf32> to vector<3x8x128xf32>
    %cst_5 = arith.constant dense<0.000000e+00> : vector<8x128xf32>
    %11 = vector.multi_reduction <add>, %10, %cst_5 [0] : vector<3x8x128xf32> to vector<8x128xf32>
    %12 = arith.mulf %10, %10 : vector<3x8x128xf32>
    %cst_6 = arith.constant dense<0.000000e+00> : vector<8x128xf32>
    %13 = vector.multi_reduction <add>, %12, %cst_6 [0] : vector<3x8x128xf32> to vector<8x128xf32>
    %c0_7 = arith.constant 0 : index
    %c0_8 = arith.constant 0 : index
    %14 = vector.load %arg6[%c0_7, %c0_8] : memref<8x128xf32, #tpu.memory_space<vmem>>, vector<8x128xf32>
    %15 = arith.addf %14, %11 : vector<8x128xf32>
    %c0_9 = arith.constant 0 : index
    %c0_10 = arith.constant 0 : index
    %16 = vector.load %arg6[%c0_9, %c0_10] : memref<8x128xf32, #tpu.memory_space<vmem>>, vector<8x128xf32>
    tpu.vector_store %arg6[%c0_9, %c0_10], %15 {strides = array<i32>} : memref<8x128xf32, #tpu.memory_space<vmem>>, vector<8x128xf32>,
    %c0_11 = arith.constant 0 : index
    %c0_12 = arith.constant 0 : index
    %17 = vector.load %arg7[%c0_11, %c0_12] : memref<8x128xf32, #tpu.memory_space<vmem>>, vector<8x128xf32>
    %18 = arith.addf %17, %13 : vector<8x128xf32>
    %c0_13 = arith.constant 0 : index
    %c0_14 = arith.constant 0 : index
    %19 = vector.load %arg7[%c0_13, %c0_14] : memref<8x128xf32, #tpu.memory_space<vmem>>, vector<8x128xf32>
    tpu.vector_store %arg7[%c0_13, %c0_14], %18 {strides = array<i32>} : memref<8x128xf32, #tpu.memory_space<vmem>>, vector<8x128xf32>,
    %c0_i32_15 = arith.constant 0 : i32
    %20 = arith.cmpi eq, %arg0, %c0_i32_15 : i32
    %21 = arith.extui %20 : i1 to i32
    %c0_i32_16 = arith.constant 0 : i32
    %22 = arith.cmpi ne, %21, %c0_i32_16 : i32
    scf.if %22 {
      %c0_17 = arith.constant 0 : index
      %c0_18 = arith.constant 0 : index
      %23 = vector.load %arg6[%c0_17, %c0_18] : memref<8x128xf32, #tpu.memory_space<vmem>>, vector<8x128xf32>
      %cst_19 = arith.constant dense<0.000000e+00> : vector<128xf32>
      %24 = vector.multi_reduction <add>, %23, %cst_19 [0] : vector<8x128xf32> to vector<128xf32>
      %25 = vector.shape_cast %24 : vector<128xf32> to vector<1x128xf32>
      %cst_20 = arith.constant 0.055555556 : f32
      %26 = vector.broadcast %cst_20 : f32 to vector<1x128xf32>
      %27 = arith.mulf %25, %26 : vector<1x128xf32>
      %c0_21 = arith.constant 0 : index
      %c0_22 = arith.constant 0 : index
      %28 = vector.load %arg7[%c0_21, %c0_22] : memref<8x128xf32, #tpu.memory_space<vmem>>, vector<8x128xf32>
      %cst_23 = arith.constant dense<0.000000e+00> : vector<128xf32>
      %29 = vector.multi_reduction <add>, %28, %cst_23 [0] : vector<8x128xf32> to vector<128xf32>
      %30 = vector.shape_cast %29 : vector<128xf32> to vector<1x128xf32>
      %cst_24 = arith.constant 0.055555556 : f32
      %31 = vector.broadcast %cst_24 : f32 to vector<1x128xf32>
      %32 = arith.mulf %30, %31 : vector<1x128xf32>
      %33 = arith.mulf %27, %27 : vector<1x128xf32>
      %34 = arith.subf %32, %33 : vector<1x128xf32>
      %cst_25 = arith.constant 0.000000e+00 : f32
      %35 = vector.broadcast %cst_25 : f32 to vector<1x128xf32>
      %36 = arith.maximumf %34, %35 : vector<1x128xf32>
      %c0_26 = arith.constant 0 : index
      %c0_27 = arith.constant 0 : index
      %37 = vector.load %arg3[%c0_26, %c0_27] : memref<8x128xf32, #tpu.memory_space<vmem>>, vector<1x128xf32>
      %cst_28 = arith.constant 9.99999974E-6 : f32
      %38 = vector.broadcast %cst_28 : f32 to vector<1x128xf32>
      %39 = arith.addf %36, %38 : vector<1x128xf32>
      %40 = math.rsqrt %39 : vector<1x128xf32>
      %41 = arith.mulf %37, %40 : vector<1x128xf32>
      %c1 = arith.constant 1 : index
      %c0_29 = arith.constant 0 : index
      %42 = vector.load %arg3[%c1, %c0_29] : memref<8x128xf32, #tpu.memory_space<vmem>>, vector<1x128xf32>
      %43 = arith.mulf %27, %41 : vector<1x128xf32>
      %44 = arith.subf %42, %43 : vector<1x128xf32>
      %c0_30 = arith.constant 0 : index
      %c0_31 = arith.constant 0 : index
      %45 = vector.load %arg5[%c0_30, %c0_31] : memref<24x128xf32, #tpu.memory_space<vmem>>, vector<24x128xf32>
      %46 = vector.broadcast %41 : vector<1x128xf32> to vector<24x128xf32>
      %47 = arith.mulf %45, %46 : vector<24x128xf32>
      %48 = vector.broadcast %44 : vector<1x128xf32> to vector<24x128xf32>
      %49 = arith.addf %47, %48 : vector<24x128xf32>
      %cst_32 = arith.constant 0.000000e+00 : f32
      %50 = vector.broadcast %cst_32 : f32 to vector<24x128xf32>
      %51 = arith.cmpf oge, %49, %50 : vector<24x128xf32>
      %cst_33 = arith.constant 2.000000e-01 : f32
      %52 = vector.broadcast %cst_33 : f32 to vector<24x128xf32>
      %53 = arith.mulf %52, %49 : vector<24x128xf32>
      %54 = arith.select %51, %49, %53 : vector<24x128xi1>, vector<24x128xf32>
      %55 = arith.truncf %54 : vector<24x128xf32> to vector<24x128xbf16>
      %c0_34 = arith.constant 0 : index
      %c0_35 = arith.constant 0 : index
      %56 = vector.load %arg4[%c0_34, %c0_35] : memref<24x128xbf16, #tpu.memory_space<vmem>>, vector<24x128xbf16>
      tpu.vector_store %arg4[%c0_34, %c0_35], %55 {strides = array<i32>} : memref<24x128xbf16, #tpu.memory_space<vmem>>, vector<24x128xbf16>,
    } else {
    }
    return
  }
  func.func @transform_0(%arg0: i32) -> (i32, i32) {
    %c0_i32 = arith.constant 0 : i32
    %c0_i32_0 = arith.constant 0 : i32
    return %arg0, %c0_i32 : i32, i32
  }
  func.func @transform_1(%arg0: i32) -> (i32, i32) {
    %c0_i32 = arith.constant 0 : i32
    %c0_i32_0 = arith.constant 0 : i32
    %c0_i32_1 = arith.constant 0 : i32
    return %c0_i32, %c0_i32_0 : i32, i32
  }
  func.func @transform_2(%arg0: i32) -> (i32, i32) {
    %c0_i32 = arith.constant 0 : i32
    %c0_i32_0 = arith.constant 0 : i32
    %c0_i32_1 = arith.constant 0 : i32
    return %c0_i32, %c0_i32_0 : i32, i32
  }
  func.func @transform_3(%arg0: i32) -> (i32, i32) {
    %c0_i32 = arith.constant 0 : i32
    %c0_i32_0 = arith.constant 0 : i32
    %c0_i32_1 = arith.constant 0 : i32
    return %c0_i32, %c0_i32_0 : i32, i32
  }
}

module attributes {stable_mosaic.version = 11 : i64} {
  func.func @_conv_bn_act_fused_kernel(%arg0: i32, %arg1: memref<8x512xbf16, #tpu.memory_space<vmem>>, %arg2: memref<512x128xbf16, #tpu.memory_space<vmem>>, %arg3: memref<8x128xf32, #tpu.memory_space<vmem>>, %arg4: memref<8x128xbf16, #tpu.memory_space<vmem>>, %arg5: memref<8x128xf32, #tpu.memory_space<vmem>>, %arg6: memref<8x128xf32, #tpu.memory_space<vmem>>, %arg7: memref<8x128xf32, #tpu.memory_space<vmem>>) attributes {dimension_semantics = [#tpu.dimension_semantics<arbitrary>], iteration_bounds = array<i64: 1>, scalar_prefetch = 0 : i64, scratch_operands = 3 : i64, tpu.core_type = #tpu.core_type<tc>, window_params = [{transform_indices = @transform_0, window_bounds = array<i64: 8, 512>}, {pipeline_mode = #tpu.pipeline_mode<synchronous>, transform_indices = @transform_1, window_bounds = array<i64: 512, 128>}, {pipeline_mode = #tpu.pipeline_mode<synchronous>, transform_indices = @transform_2, window_bounds = array<i64: 8, 128>}, {pipeline_mode = #tpu.pipeline_mode<synchronous>, transform_indices = @transform_3, window_bounds = array<i64: 8, 128>}]} {
    %c0_i32 = arith.constant 0 : i32
    %0 = arith.cmpi eq, %arg0, %c0_i32 : i32
    %1 = arith.extui %0 : i1 to i32
    %c0_i32_0 = arith.constant 0 : i32
    %2 = arith.cmpi ne, %1, %c0_i32_0 : i32
    scf.if %2 {
      %cst_17 = arith.constant 0.000000e+00 : f32
      %23 = vector.broadcast %cst_17 : f32 to vector<8x128xf32>
      %c0_18 = arith.constant 0 : index
      %c0_19 = arith.constant 0 : index
      %24 = vector.load %arg6[%c0_18, %c0_19] : memref<8x128xf32, #tpu.memory_space<vmem>>, vector<8x128xf32>
      tpu.vector_store %arg6[%c0_18, %c0_19], %23 {strides = array<i32>} : memref<8x128xf32, #tpu.memory_space<vmem>>, vector<8x128xf32>,
      %cst_20 = arith.constant 0.000000e+00 : f32
      %25 = vector.broadcast %cst_20 : f32 to vector<8x128xf32>
      %c0_21 = arith.constant 0 : index
      %c0_22 = arith.constant 0 : index
      %26 = vector.load %arg7[%c0_21, %c0_22] : memref<8x128xf32, #tpu.memory_space<vmem>>, vector<8x128xf32>
      tpu.vector_store %arg7[%c0_21, %c0_22], %25 {strides = array<i32>} : memref<8x128xf32, #tpu.memory_space<vmem>>, vector<8x128xf32>,
    } else {
    }
    %c0 = arith.constant 0 : index
    %c0_1 = arith.constant 0 : index
    %3 = vector.load %arg1[%c0, %c0_1] : memref<8x512xbf16, #tpu.memory_space<vmem>>, vector<8x512xbf16>
    %c0_2 = arith.constant 0 : index
    %c0_3 = arith.constant 0 : index
    %4 = vector.load %arg2[%c0_2, %c0_3] : memref<512x128xbf16, #tpu.memory_space<vmem>>, vector<512x128xbf16>
    %cst = arith.constant dense<0.000000e+00> : vector<8x128xf32>
    %5 = tpu.matmul %3, %4, %cst {dimension_numbers = #tpu.dot_dimension_numbers<[1], [0], [0], [1], [0, 0, 1, 1], [], []>} : vector<8x512xbf16>, vector<512x128xbf16>, vector<8x128xf32> -> vector<8x128xf32>
    %c8_i32 = arith.constant 8 : i32
    %6 = arith.muli %arg0, %c8_i32 : i32
    %7 = tpu.assume_multiple %6, 8 : i32
    %8 = arith.index_cast %7 : i32 to index
    %c0_4 = arith.constant 0 : index
    %9 = vector.load %arg5[%8, %c0_4] : memref<8x128xf32, #tpu.memory_space<vmem>>, vector<8x128xf32>
    tpu.vector_store %arg5[%8, %c0_4], %5 {strides = array<i32>} : memref<8x128xf32, #tpu.memory_space<vmem>>, vector<8x128xf32>,
    %10 = vector.shape_cast %5 : vector<8x128xf32> to vector<1x8x128xf32>
    %cst_5 = arith.constant dense<0.000000e+00> : vector<8x128xf32>
    %11 = vector.multi_reduction <add>, %10, %cst_5 [0] : vector<1x8x128xf32> to vector<8x128xf32>
    %12 = arith.mulf %10, %10 : vector<1x8x128xf32>
    %cst_6 = arith.constant dense<0.000000e+00> : vector<8x128xf32>
    %13 = vector.multi_reduction <add>, %12, %cst_6 [0] : vector<1x8x128xf32> to vector<8x128xf32>
    %c0_7 = arith.constant 0 : index
    %c0_8 = arith.constant 0 : index
    %14 = vector.load %arg6[%c0_7, %c0_8] : memref<8x128xf32, #tpu.memory_space<vmem>>, vector<8x128xf32>
    %15 = arith.addf %14, %11 : vector<8x128xf32>
    %c0_9 = arith.constant 0 : index
    %c0_10 = arith.constant 0 : index
    %16 = vector.load %arg6[%c0_9, %c0_10] : memref<8x128xf32, #tpu.memory_space<vmem>>, vector<8x128xf32>
    tpu.vector_store %arg6[%c0_9, %c0_10], %15 {strides = array<i32>} : memref<8x128xf32, #tpu.memory_space<vmem>>, vector<8x128xf32>,
    %c0_11 = arith.constant 0 : index
    %c0_12 = arith.constant 0 : index
    %17 = vector.load %arg7[%c0_11, %c0_12] : memref<8x128xf32, #tpu.memory_space<vmem>>, vector<8x128xf32>
    %18 = arith.addf %17, %13 : vector<8x128xf32>
    %c0_13 = arith.constant 0 : index
    %c0_14 = arith.constant 0 : index
    %19 = vector.load %arg7[%c0_13, %c0_14] : memref<8x128xf32, #tpu.memory_space<vmem>>, vector<8x128xf32>
    tpu.vector_store %arg7[%c0_13, %c0_14], %18 {strides = array<i32>} : memref<8x128xf32, #tpu.memory_space<vmem>>, vector<8x128xf32>,
    %c0_i32_15 = arith.constant 0 : i32
    %20 = arith.cmpi eq, %arg0, %c0_i32_15 : i32
    %21 = arith.extui %20 : i1 to i32
    %c0_i32_16 = arith.constant 0 : i32
    %22 = arith.cmpi ne, %21, %c0_i32_16 : i32
    scf.if %22 {
      %c0_17 = arith.constant 0 : index
      %c0_18 = arith.constant 0 : index
      %23 = vector.load %arg6[%c0_17, %c0_18] : memref<8x128xf32, #tpu.memory_space<vmem>>, vector<8x128xf32>
      %cst_19 = arith.constant dense<0.000000e+00> : vector<128xf32>
      %24 = vector.multi_reduction <add>, %23, %cst_19 [0] : vector<8x128xf32> to vector<128xf32>
      %25 = vector.shape_cast %24 : vector<128xf32> to vector<1x128xf32>
      %cst_20 = arith.constant 1.250000e-01 : f32
      %26 = vector.broadcast %cst_20 : f32 to vector<1x128xf32>
      %27 = arith.mulf %25, %26 : vector<1x128xf32>
      %c0_21 = arith.constant 0 : index
      %c0_22 = arith.constant 0 : index
      %28 = vector.load %arg7[%c0_21, %c0_22] : memref<8x128xf32, #tpu.memory_space<vmem>>, vector<8x128xf32>
      %cst_23 = arith.constant dense<0.000000e+00> : vector<128xf32>
      %29 = vector.multi_reduction <add>, %28, %cst_23 [0] : vector<8x128xf32> to vector<128xf32>
      %30 = vector.shape_cast %29 : vector<128xf32> to vector<1x128xf32>
      %cst_24 = arith.constant 1.250000e-01 : f32
      %31 = vector.broadcast %cst_24 : f32 to vector<1x128xf32>
      %32 = arith.mulf %30, %31 : vector<1x128xf32>
      %33 = arith.mulf %27, %27 : vector<1x128xf32>
      %34 = arith.subf %32, %33 : vector<1x128xf32>
      %cst_25 = arith.constant 0.000000e+00 : f32
      %35 = vector.broadcast %cst_25 : f32 to vector<1x128xf32>
      %36 = arith.maximumf %34, %35 : vector<1x128xf32>
      %c0_26 = arith.constant 0 : index
      %c0_27 = arith.constant 0 : index
      %37 = vector.load %arg3[%c0_26, %c0_27] : memref<8x128xf32, #tpu.memory_space<vmem>>, vector<1x128xf32>
      %cst_28 = arith.constant 9.99999974E-6 : f32
      %38 = vector.broadcast %cst_28 : f32 to vector<1x128xf32>
      %39 = arith.addf %36, %38 : vector<1x128xf32>
      %40 = math.rsqrt %39 : vector<1x128xf32>
      %41 = arith.mulf %37, %40 : vector<1x128xf32>
      %c1 = arith.constant 1 : index
      %c0_29 = arith.constant 0 : index
      %42 = vector.load %arg3[%c1, %c0_29] : memref<8x128xf32, #tpu.memory_space<vmem>>, vector<1x128xf32>
      %43 = arith.mulf %27, %41 : vector<1x128xf32>
      %44 = arith.subf %42, %43 : vector<1x128xf32>
      %c0_30 = arith.constant 0 : index
      %c0_31 = arith.constant 0 : index
      %45 = vector.load %arg5[%c0_30, %c0_31] : memref<8x128xf32, #tpu.memory_space<vmem>>, vector<8x128xf32>
      %46 = vector.broadcast %41 : vector<1x128xf32> to vector<8x128xf32>
      %47 = arith.mulf %45, %46 : vector<8x128xf32>
      %48 = vector.broadcast %44 : vector<1x128xf32> to vector<8x128xf32>
      %49 = arith.addf %47, %48 : vector<8x128xf32>
      %cst_32 = arith.constant 0.000000e+00 : f32
      %50 = vector.broadcast %cst_32 : f32 to vector<8x128xf32>
      %51 = arith.cmpf oge, %49, %50 : vector<8x128xf32>
      %cst_33 = arith.constant 2.000000e-01 : f32
      %52 = vector.broadcast %cst_33 : f32 to vector<8x128xf32>
      %53 = arith.mulf %52, %49 : vector<8x128xf32>
      %54 = arith.select %51, %49, %53 : vector<8x128xi1>, vector<8x128xf32>
      %55 = arith.truncf %54 : vector<8x128xf32> to vector<8x128xbf16>
      %c0_34 = arith.constant 0 : index
      %c0_35 = arith.constant 0 : index
      %56 = vector.load %arg4[%c0_34, %c0_35] : memref<8x128xbf16, #tpu.memory_space<vmem>>, vector<8x128xbf16>
      tpu.vector_store %arg4[%c0_34, %c0_35], %55 {strides = array<i32>} : memref<8x128xbf16, #tpu.memory_space<vmem>>, vector<8x128xbf16>,
    } else {
    }
    return
  }
  func.func @transform_0(%arg0: i32) -> (i32, i32) {
    %c0_i32 = arith.constant 0 : i32
    %c0_i32_0 = arith.constant 0 : i32
    return %arg0, %c0_i32 : i32, i32
  }
  func.func @transform_1(%arg0: i32) -> (i32, i32) {
    %c0_i32 = arith.constant 0 : i32
    %c0_i32_0 = arith.constant 0 : i32
    %c0_i32_1 = arith.constant 0 : i32
    return %c0_i32, %c0_i32_0 : i32, i32
  }
  func.func @transform_2(%arg0: i32) -> (i32, i32) {
    %c0_i32 = arith.constant 0 : i32
    %c0_i32_0 = arith.constant 0 : i32
    %c0_i32_1 = arith.constant 0 : i32
    return %c0_i32, %c0_i32_0 : i32, i32
  }
  func.func @transform_3(%arg0: i32) -> (i32, i32) {
    %c0_i32 = arith.constant 0 : i32
    %c0_i32_0 = arith.constant 0 : i32
    %c0_i32_1 = arith.constant 0 : i32
    return %c0_i32, %c0_i32_0 : i32, i32
  }
}

module attributes {stable_mosaic.version = 11 : i64} {
  func.func @_conv_bn_act_fused_kernel(%arg0: i32, %arg1: memref<24x1024xbf16, #tpu.memory_space<vmem>>, %arg2: memref<1024x128xbf16, #tpu.memory_space<vmem>>, %arg3: memref<8x128xf32, #tpu.memory_space<vmem>>, %arg4: memref<24x128xbf16, #tpu.memory_space<vmem>>, %arg5: memref<24x128xf32, #tpu.memory_space<vmem>>, %arg6: memref<8x128xf32, #tpu.memory_space<vmem>>, %arg7: memref<8x128xf32, #tpu.memory_space<vmem>>) attributes {dimension_semantics = [#tpu.dimension_semantics<arbitrary>], iteration_bounds = array<i64: 1>, scalar_prefetch = 0 : i64, scratch_operands = 3 : i64, tpu.core_type = #tpu.core_type<tc>, window_params = [{transform_indices = @transform_0, window_bounds = array<i64: 24, 1024>}, {pipeline_mode = #tpu.pipeline_mode<synchronous>, transform_indices = @transform_1, window_bounds = array<i64: 1024, 128>}, {pipeline_mode = #tpu.pipeline_mode<synchronous>, transform_indices = @transform_2, window_bounds = array<i64: 8, 128>}, {pipeline_mode = #tpu.pipeline_mode<synchronous>, transform_indices = @transform_3, window_bounds = array<i64: 24, 128>}]} {
    %c0_i32 = arith.constant 0 : i32
    %0 = arith.cmpi eq, %arg0, %c0_i32 : i32
    %1 = arith.extui %0 : i1 to i32
    %c0_i32_0 = arith.constant 0 : i32
    %2 = arith.cmpi ne, %1, %c0_i32_0 : i32
    scf.if %2 {
      %cst_17 = arith.constant 0.000000e+00 : f32
      %23 = vector.broadcast %cst_17 : f32 to vector<8x128xf32>
      %c0_18 = arith.constant 0 : index
      %c0_19 = arith.constant 0 : index
      %24 = vector.load %arg6[%c0_18, %c0_19] : memref<8x128xf32, #tpu.memory_space<vmem>>, vector<8x128xf32>
      tpu.vector_store %arg6[%c0_18, %c0_19], %23 {strides = array<i32>} : memref<8x128xf32, #tpu.memory_space<vmem>>, vector<8x128xf32>,
      %cst_20 = arith.constant 0.000000e+00 : f32
      %25 = vector.broadcast %cst_20 : f32 to vector<8x128xf32>
      %c0_21 = arith.constant 0 : index
      %c0_22 = arith.constant 0 : index
      %26 = vector.load %arg7[%c0_21, %c0_22] : memref<8x128xf32, #tpu.memory_space<vmem>>, vector<8x128xf32>
      tpu.vector_store %arg7[%c0_21, %c0_22], %25 {strides = array<i32>} : memref<8x128xf32, #tpu.memory_space<vmem>>, vector<8x128xf32>,
    } else {
    }
    %c0 = arith.constant 0 : index
    %c0_1 = arith.constant 0 : index
    %3 = vector.load %arg1[%c0, %c0_1] : memref<24x1024xbf16, #tpu.memory_space<vmem>>, vector<24x1024xbf16>
    %c0_2 = arith.constant 0 : index
    %c0_3 = arith.constant 0 : index
    %4 = vector.load %arg2[%c0_2, %c0_3] : memref<1024x128xbf16, #tpu.memory_space<vmem>>, vector<1024x128xbf16>
    %cst = arith.constant dense<0.000000e+00> : vector<24x128xf32>
    %5 = tpu.matmul %3, %4, %cst {dimension_numbers = #tpu.dot_dimension_numbers<[1], [0], [0], [1], [0, 0, 1, 1], [], []>} : vector<24x1024xbf16>, vector<1024x128xbf16>, vector<24x128xf32> -> vector<24x128xf32>
    %c24_i32 = arith.constant 24 : i32
    %6 = arith.muli %arg0, %c24_i32 : i32
    %7 = tpu.assume_multiple %6, 8 : i32
    %8 = arith.index_cast %7 : i32 to index
    %c0_4 = arith.constant 0 : index
    %9 = vector.load %arg5[%8, %c0_4] : memref<24x128xf32, #tpu.memory_space<vmem>>, vector<24x128xf32>
    tpu.vector_store %arg5[%8, %c0_4], %5 {strides = array<i32>} : memref<24x128xf32, #tpu.memory_space<vmem>>, vector<24x128xf32>,
    %10 = vector.shape_cast %5 : vector<24x128xf32> to vector<3x8x128xf32>
    %cst_5 = arith.constant dense<0.000000e+00> : vector<8x128xf32>
    %11 = vector.multi_reduction <add>, %10, %cst_5 [0] : vector<3x8x128xf32> to vector<8x128xf32>
    %12 = arith.mulf %10, %10 : vector<3x8x128xf32>
    %cst_6 = arith.constant dense<0.000000e+00> : vector<8x128xf32>
    %13 = vector.multi_reduction <add>, %12, %cst_6 [0] : vector<3x8x128xf32> to vector<8x128xf32>
    %c0_7 = arith.constant 0 : index
    %c0_8 = arith.constant 0 : index
    %14 = vector.load %arg6[%c0_7, %c0_8] : memref<8x128xf32, #tpu.memory_space<vmem>>, vector<8x128xf32>
    %15 = arith.addf %14, %11 : vector<8x128xf32>
    %c0_9 = arith.constant 0 : index
    %c0_10 = arith.constant 0 : index
    %16 = vector.load %arg6[%c0_9, %c0_10] : memref<8x128xf32, #tpu.memory_space<vmem>>, vector<8x128xf32>
    tpu.vector_store %arg6[%c0_9, %c0_10], %15 {strides = array<i32>} : memref<8x128xf32, #tpu.memory_space<vmem>>, vector<8x128xf32>,
    %c0_11 = arith.constant 0 : index
    %c0_12 = arith.constant 0 : index
    %17 = vector.load %arg7[%c0_11, %c0_12] : memref<8x128xf32, #tpu.memory_space<vmem>>, vector<8x128xf32>
    %18 = arith.addf %17, %13 : vector<8x128xf32>
    %c0_13 = arith.constant 0 : index
    %c0_14 = arith.constant 0 : index
    %19 = vector.load %arg7[%c0_13, %c0_14] : memref<8x128xf32, #tpu.memory_space<vmem>>, vector<8x128xf32>
    tpu.vector_store %arg7[%c0_13, %c0_14], %18 {strides = array<i32>} : memref<8x128xf32, #tpu.memory_space<vmem>>, vector<8x128xf32>,
    %c0_i32_15 = arith.constant 0 : i32
    %20 = arith.cmpi eq, %arg0, %c0_i32_15 : i32
    %21 = arith.extui %20 : i1 to i32
    %c0_i32_16 = arith.constant 0 : i32
    %22 = arith.cmpi ne, %21, %c0_i32_16 : i32
    scf.if %22 {
      %c0_17 = arith.constant 0 : index
      %c0_18 = arith.constant 0 : index
      %23 = vector.load %arg6[%c0_17, %c0_18] : memref<8x128xf32, #tpu.memory_space<vmem>>, vector<8x128xf32>
      %cst_19 = arith.constant dense<0.000000e+00> : vector<128xf32>
      %24 = vector.multi_reduction <add>, %23, %cst_19 [0] : vector<8x128xf32> to vector<128xf32>
      %25 = vector.shape_cast %24 : vector<128xf32> to vector<1x128xf32>
      %cst_20 = arith.constant 0.055555556 : f32
      %26 = vector.broadcast %cst_20 : f32 to vector<1x128xf32>
      %27 = arith.mulf %25, %26 : vector<1x128xf32>
      %c0_21 = arith.constant 0 : index
      %c0_22 = arith.constant 0 : index
      %28 = vector.load %arg7[%c0_21, %c0_22] : memref<8x128xf32, #tpu.memory_space<vmem>>, vector<8x128xf32>
      %cst_23 = arith.constant dense<0.000000e+00> : vector<128xf32>
      %29 = vector.multi_reduction <add>, %28, %cst_23 [0] : vector<8x128xf32> to vector<128xf32>
      %30 = vector.shape_cast %29 : vector<128xf32> to vector<1x128xf32>
      %cst_24 = arith.constant 0.055555556 : f32
      %31 = vector.broadcast %cst_24 : f32 to vector<1x128xf32>
      %32 = arith.mulf %30, %31 : vector<1x128xf32>
      %33 = arith.mulf %27, %27 : vector<1x128xf32>
      %34 = arith.subf %32, %33 : vector<1x128xf32>
      %cst_25 = arith.constant 0.000000e+00 : f32
      %35 = vector.broadcast %cst_25 : f32 to vector<1x128xf32>
      %36 = arith.maximumf %34, %35 : vector<1x128xf32>
      %c0_26 = arith.constant 0 : index
      %c0_27 = arith.constant 0 : index
      %37 = vector.load %arg3[%c0_26, %c0_27] : memref<8x128xf32, #tpu.memory_space<vmem>>, vector<1x128xf32>
      %cst_28 = arith.constant 9.99999974E-6 : f32
      %38 = vector.broadcast %cst_28 : f32 to vector<1x128xf32>
      %39 = arith.addf %36, %38 : vector<1x128xf32>
      %40 = math.rsqrt %39 : vector<1x128xf32>
      %41 = arith.mulf %37, %40 : vector<1x128xf32>
      %c1 = arith.constant 1 : index
      %c0_29 = arith.constant 0 : index
      %42 = vector.load %arg3[%c1, %c0_29] : memref<8x128xf32, #tpu.memory_space<vmem>>, vector<1x128xf32>
      %43 = arith.mulf %27, %41 : vector<1x128xf32>
      %44 = arith.subf %42, %43 : vector<1x128xf32>
      %c0_30 = arith.constant 0 : index
      %c0_31 = arith.constant 0 : index
      %45 = vector.load %arg5[%c0_30, %c0_31] : memref<24x128xf32, #tpu.memory_space<vmem>>, vector<24x128xf32>
      %46 = vector.broadcast %41 : vector<1x128xf32> to vector<24x128xf32>
      %47 = arith.mulf %45, %46 : vector<24x128xf32>
      %48 = vector.broadcast %44 : vector<1x128xf32> to vector<24x128xf32>
      %49 = arith.addf %47, %48 : vector<24x128xf32>
      %cst_32 = arith.constant 0.000000e+00 : f32
      %50 = vector.broadcast %cst_32 : f32 to vector<24x128xf32>
      %51 = arith.cmpf oge, %49, %50 : vector<24x128xf32>
      %cst_33 = arith.constant 2.000000e-01 : f32
      %52 = vector.broadcast %cst_33 : f32 to vector<24x128xf32>
      %53 = arith.mulf %52, %49 : vector<24x128xf32>
      %54 = arith.select %51, %49, %53 : vector<24x128xi1>, vector<24x128xf32>
      %55 = arith.truncf %54 : vector<24x128xf32> to vector<24x128xbf16>
      %c0_34 = arith.constant 0 : index
      %c0_35 = arith.constant 0 : index
      %56 = vector.load %arg4[%c0_34, %c0_35] : memref<24x128xbf16, #tpu.memory_space<vmem>>, vector<24x128xbf16>
      tpu.vector_store %arg4[%c0_34, %c0_35], %55 {strides = array<i32>} : memref<24x128xbf16, #tpu.memory_space<vmem>>, vector<24x128xbf16>,
    } else {
    }
    return
  }
  func.func @transform_0(%arg0: i32) -> (i32, i32) {
    %c0_i32 = arith.constant 0 : i32
    %c0_i32_0 = arith.constant 0 : i32
    return %arg0, %c0_i32 : i32, i32
  }
  func.func @transform_1(%arg0: i32) -> (i32, i32) {
    %c0_i32 = arith.constant 0 : i32
    %c0_i32_0 = arith.constant 0 : i32
    %c0_i32_1 = arith.constant 0 : i32
    return %c0_i32, %c0_i32_0 : i32, i32
  }
  func.func @transform_2(%arg0: i32) -> (i32, i32) {
    %c0_i32 = arith.constant 0 : i32
    %c0_i32_0 = arith.constant 0 : i32
    %c0_i32_1 = arith.constant 0 : i32
    return %c0_i32, %c0_i32_0 : i32, i32
  }
  func.func @transform_3(%arg0: i32) -> (i32, i32) {
    %c0_i32 = arith.constant 0 : i32
    %c0_i32_0 = arith.constant 0 : i32
    %c0_i32_1 = arith.constant 0 : i32
    return %c0_i32, %c0_i32_0 : i32, i32
  }
}

module attributes {stable_mosaic.version = 11 : i64} {
  func.func @_conv_bias_kernel(%arg0: i32, %arg1: memref<32x2048xbf16, #tpu.memory_space<vmem>>, %arg2: memref<2048x128xbf16, #tpu.memory_space<vmem>>, %arg3: memref<8x128xf32, #tpu.memory_space<vmem>>, %arg4: memref<32x128xf32, #tpu.memory_space<vmem>>) attributes {dimension_semantics = [#tpu.dimension_semantics<parallel>], iteration_bounds = array<i64: 1>, scalar_prefetch = 0 : i64, scratch_operands = 0 : i64, tpu.core_type = #tpu.core_type<tc>, window_params = [{transform_indices = @transform_0, window_bounds = array<i64: 32, 2048>}, {pipeline_mode = #tpu.pipeline_mode<synchronous>, transform_indices = @transform_1, window_bounds = array<i64: 2048, 128>}, {pipeline_mode = #tpu.pipeline_mode<synchronous>, transform_indices = @transform_2, window_bounds = array<i64: 8, 128>}, {transform_indices = @transform_3, window_bounds = array<i64: 32, 128>}]} {
    %c0 = arith.constant 0 : index
    %c0_0 = arith.constant 0 : index
    %0 = vector.load %arg1[%c0, %c0_0] : memref<32x2048xbf16, #tpu.memory_space<vmem>>, vector<32x2048xbf16>
    %c0_1 = arith.constant 0 : index
    %c0_2 = arith.constant 0 : index
    %1 = vector.load %arg2[%c0_1, %c0_2] : memref<2048x128xbf16, #tpu.memory_space<vmem>>, vector<2048x128xbf16>
    %cst = arith.constant dense<0.000000e+00> : vector<32x128xf32>
    %2 = tpu.matmul %0, %1, %cst {dimension_numbers = #tpu.dot_dimension_numbers<[1], [0], [0], [1], [0, 0, 1, 1], [], []>} : vector<32x2048xbf16>, vector<2048x128xbf16>, vector<32x128xf32> -> vector<32x128xf32>
    %c0_3 = arith.constant 0 : index
    %c0_4 = arith.constant 0 : index
    %3 = vector.load %arg3[%c0_3, %c0_4] : memref<8x128xf32, #tpu.memory_space<vmem>>, vector<1x128xf32>
    %4 = vector.broadcast %3 : vector<1x128xf32> to vector<32x128xf32>
    %5 = arith.addf %2, %4 : vector<32x128xf32>
    %c0_5 = arith.constant 0 : index
    %c0_6 = arith.constant 0 : index
    %6 = vector.load %arg4[%c0_5, %c0_6] : memref<32x128xf32, #tpu.memory_space<vmem>>, vector<32x128xf32>
    tpu.vector_store %arg4[%c0_5, %c0_6], %5 {strides = array<i32>} : memref<32x128xf32, #tpu.memory_space<vmem>>, vector<32x128xf32>,
    return
  }
  func.func @transform_0(%arg0: i32) -> (i32, i32) {
    %c0_i32 = arith.constant 0 : i32
    %c0_i32_0 = arith.constant 0 : i32
    return %arg0, %c0_i32 : i32, i32
  }
  func.func @transform_1(%arg0: i32) -> (i32, i32) {
    %c0_i32 = arith.constant 0 : i32
    %c0_i32_0 = arith.constant 0 : i32
    %c0_i32_1 = arith.constant 0 : i32
    return %c0_i32, %c0_i32_0 : i32, i32
  }
  func.func @transform_2(%arg0: i32) -> (i32, i32) {
    %c0_i32 = arith.constant 0 : i32
    %c0_i32_0 = arith.constant 0 : i32
    %c0_i32_1 = arith.constant 0 : i32
    return %c0_i32, %c0_i32_0 : i32, i32
  }
  func.func @transform_3(%arg0: i32) -> (i32, i32) {
    %c0_i32 = arith.constant 0 : i32
    %c0_i32_0 = arith.constant 0 : i32
    return %arg0, %c0_i32 : i32, i32
  }
}

</mosaic_0001>

<bundles_post_ra>
// kernel: _lambda_.17
= control target key start
LH: loop header
LB: loop body
LE: loop exit
PB: predicated region body
PF: predicated region fallthrough
CT: control target
= control target key end

     0   :  { %s1350_s12 = smov 0   ;;  %s1536_s0 = inlined_call_operand.vmem [shape: bf16[592,128], index: 0, kind: input, shape index: {}]   ;;  %s1537_s1 = inlined_call_operand.vmem [shape: bf16[128,128], index: 1, kind: input, shape index: {}]   ;;  %s1538_s2 = inlined_call_operand.vmem [shape: f32[8,128], index: 2, kind: input, shape index: {}]   ;;  %s1539_s3 = inlined_call_operand.vmem [shape: bf16[592,128], index: 3, kind: output, shape index: {}]  }
   0x1 LB: > { %s930_s13 = sadd.s32 4294967295, %s1326_s12   ;;  %p934_p0 = scmp.ge.s32.totalorder %s1326_s12, 1  ;;  %s1326_s12 = sphi %s1350_s12, %s13_s12  }
   0x2   : > { %p138_p1 = scmp.lt.s32.totalorder %s1326_s12, 3 }
   0x4   : > { %p139_p2 = pnand %p934_p0, %p138_p1 }
   0x5   : > { %v1293_v0 = vld [vmem:[%s1537_s1] sm:$0xff] (!%p139_p2)   ;;  %v1328_v1 = vmov (!%p139_p2), 0.0   ;;  %v1294_v2 = vld [vmem:[%s1537_s1 + $0x8] sm:$0xff] (!%p139_p2)   ;;  %s162_s18 = smul.u32 (!%p139_p2), 37, %s930_s13  ;;  %vm1329_vm0 = vmmov (!%p139_p2), 0   ;;  %v1295_v3 = vld [vmem:[%s1537_s1 + $0x10] sm:$0xff] (!%p139_p2)  }
   0x6   : > { %142 = sbr.rel (%p139_p2) target bundleno = 332 (0x14c), region = 32  ;;  %1175 = vmatprep.subr.bf16.mxu0 (!%p139_p2), %v1328_v1  ;;  %1267 = vmatprep.subr.bf16.mxu1 (!%p139_p2), %v1328_v1  ;;  %v1296_v4 = vld [vmem:[%s1537_s1 + $0x18] sm:$0xff] (!%p139_p2)   ;;  %v1297_v5 = vld [vmem:[%s1537_s1 + $0x20] sm:$0xff] (!%p139_p2)   ;;  %v1298_v6 = vld [vmem:[%s1537_s1 + $0x28] sm:$0xff] (!%p139_p2)  }
   0x7   : > { %1176 = vmatpush3.bf16.msra.mxu0 (!%p139_p2), %v1293_v0  ;;  %1275 = vmatpush3.bf16.msra.mxu1 (!%p139_p2), %v1293_v0  ;;  %p163_p3 = scmp.lt.s32.totalorder (!%p139_p2), %s162_s18, 73  ;;  %v1299_v7 = vld [vmem:[%s1537_s1 + $0x30] sm:$0xff] (!%p139_p2)   ;;  %v1300_v8 = vld [vmem:[%s1537_s1 + $0x38] sm:$0xff] (!%p139_p2)   ;;  %v1468_v28 = vld [vmem:[%s1538_s2] ss:$0 sm:$0xff] (!%p139_p2) }
   0x8   : > { %1177 = vmatprep.subr.bf16.mxu0 (!%p139_p2), %v1328_v1  ;;  %1268 = vmatprep.subr.bf16.mxu1 (!%p139_p2), %v1328_v1 }
   0x9   : > { %1191 = vmatprep.mubr.msk.bf16.mxu0 (!%p139_p2), %vm1329_vm0, %v1328_v1  ;;  %1231 = vmatprep.mubr.msk.bf16.mxu1 (!%p139_p2), %vm1329_vm0, %v1328_v1 }
   0xb   : > { %1178 = vmatpush3.bf16.msra.mxu0 (!%p139_p2), %v1294_v2  ;;  %1276 = vmatpush3.bf16.msra.mxu1 (!%p139_p2), %v1294_v2 }
   0xc   : > { %1179 = vmatprep.subr.bf16.mxu0 (!%p139_p2), %v1328_v1  ;;  %1269 = vmatprep.subr.bf16.mxu1 (!%p139_p2), %v1328_v1 }
   0xd   : > { %s1541_s18 = smov (!%p163_p3, %s162_s18), 73 }
   0xe   : > { %s935_s21 = sshll.u32 %s1541_s18, 2 }
   0xf   : > { %s1385_s24 = scalar_lea.vmem %s1536_s0, %s935_s21  ;;  %1180 = vmatpush3.bf16.msra.mxu0 %v1295_v3  ;;  %1277 = vmatpush3.bf16.msra.mxu1 %v1295_v3  ;;  %s1479_s13 = scalar_lea.vmem %s1539_s3, %s935_s21 }
  0x10   : > { %1181 = vmatprep.subr.bf16.mxu0 %v1328_v1  ;;  %1270 = vmatprep.subr.bf16.mxu1 %v1328_v1  ;;  %v1301_v9 = vld [vmem:[%s1385_s24] sm:$0xff]   ;;  %v1302_v10 = vld [vmem:[%s1385_s24 + $0x50] sm:$0xff]   ;;  %v1303_v11 = vld [vmem:[%s1385_s24 + $0x8] sm:$0xff]  }
  0x11   : > { %v1304_v12 = vld [vmem:[%s1385_s24 + $0x58] sm:$0xff]   ;;  %v1305_v13 = vld [vmem:[%s1385_s24 + $0x10] sm:$0xff]   ;;  %v1306_v14 = vld [vmem:[%s1385_s24 + $0x60] sm:$0xff]  }
  0x12   : > { %v1307_v15 = vld [vmem:[%s1385_s24 + $0x18] sm:$0xff]   ;;  %v1308_v16 = vld [vmem:[%s1385_s24 + $0x68] sm:$0xff]   ;;  %v1309_v17 = vld [vmem:[%s1385_s24 + $0x20] sm:$0xff]  }
  0x13   : > { %1182 = vmatpush3.bf16.msra.mxu0 %v1296_v4  ;;  %1278 = vmatpush3.bf16.msra.mxu1 %v1296_v4  ;;  %v1310_v18 = vld [vmem:[%s1385_s24 + $0x70] sm:$0xff]   ;;  %v1311_v19 = vld [vmem:[%s1385_s24 + $0x28] sm:$0xff]   ;;  %v1312_v20 = vld [vmem:[%s1385_s24 + $0x78] sm:$0xff]  }
  0x14   : > { %1183 = vmatprep.subr.bf16.mxu0 %v1328_v1  ;;  %1271 = vmatprep.subr.bf16.mxu1 %v1328_v1  ;;  %v1313_v21 = vld [vmem:[%s1385_s24 + $0x30] sm:$0xff]   ;;  %v1314_v22 = vld [vmem:[%s1385_s24 + $0x80] sm:$0xff]   ;;  %v1315_v23 = vld [vmem:[%s1385_s24 + $0x38] sm:$0xff]  }
  0x15   : > { %v1316_v24 = vld [vmem:[%s1385_s24 + $0x88] sm:$0xff]   ;;  %v1317_v25 = vld [vmem:[%s1385_s24 + $0x40] sm:$0xff]   ;;  %v1318_v26 = vld [vmem:[%s1385_s24 + $0x90] ss:$0 sps:$4 sm:$0xff]  }
  0x16   : > { %v1319_v27 = vld [vmem:[%s1385_s24 + $0x48] sm:$0xff]  }
  0x17   : > { %1184 = vmatpush3.bf16.msra.mxu0 %v1297_v5  ;;  %1279 = vmatpush3.bf16.msra.mxu1 %v1297_v5 }
  0x18   : > { %1185 = vmatprep.subr.bf16.mxu0 %v1328_v1  ;;  %1272 = vmatprep.subr.bf16.mxu1 %v1328_v1 }
  0x1b   : > { %1186 = vmatpush3.bf16.msra.mxu0 %v1298_v6  ;;  %1280 = vmatpush3.bf16.msra.mxu1 %v1298_v6 }
  0x1c   : > { %1187 = vmatprep.subr.bf16.mxu0 %v1328_v1  ;;  %1273 = vmatprep.subr.bf16.mxu1 %v1328_v1 }
  0x1f   : > { %1188 = vmatpush3.bf16.msra.mxu0 %v1299_v7  ;;  %1281 = vmatpush3.bf16.msra.mxu1 %v1299_v7 }
  0x20   : > { %1189 = vmatprep.subr.bf16.mxu0 %v1328_v1  ;;  %1274 = vmatprep.subr.bf16.mxu1 %v1328_v1 }
  0x23   : > { %1190 = vmatpush3.bf16.msra.mxu0 %v1300_v8  ;;  %1282 = vmatpush3.bf16.msra.mxu1 %v1300_v8 }
  0x26   : > { %1192 = vmatmul.mubr.bf16.vlgmr.msra.gmra.mrb[0].mxu0 %v1301_v9  ;;  %1232 = vmatmul.mubr.bf16.vlgmr.msra.gmra.mrb[0].mxu1 %v1302_v10 }
  0x27   : > { %1195 = vmatprep.mubr.msk.bf16.mxu0 %vm1329_vm0, %v1328_v1  ;;  %1235 = vmatprep.mubr.msk.bf16.mxu1 %vm1329_vm0, %v1328_v1 }
  0x2e   : > { %1196 = vmatmul.mubr.bf16.gmra.mrb[4].mxu0 %v1303_v11  ;;  %1236 = vmatmul.mubr.bf16.gmra.mrb[4].mxu1 %v1304_v12 }
  0x2f   : > { %1199 = vmatprep.mubr.msk.bf16.mxu0 %vm1329_vm0, %v1328_v1  ;;  %1239 = vmatprep.mubr.msk.bf16.mxu1 %vm1329_vm0, %v1328_v1 }
  0x36   : > { %1200 = vmatmul.mubr.bf16.gmra.mrb[8].mxu0 %v1305_v13  ;;  %1240 = vmatmul.mubr.bf16.gmra.mrb[8].mxu1 %v1306_v14 }
  0x37   : > { %1203 = vmatprep.mubr.msk.bf16.mxu0 %vm1329_vm0, %v1328_v1  ;;  %1243 = vmatprep.mubr.msk.bf16.mxu1 %vm1329_vm0, %v1328_v1 }
  0x3e   : > { %1204 = vmatmul.mubr.bf16.gmra.mrb[12].mxu0 %v1307_v15  ;;  %1244 = vmatmul.mubr.bf16.gmra.mrb[12].mxu1 %v1308_v16 }
  0x3f   : > { %1207 = vmatprep.mubr.msk.bf16.mxu0 %vm1329_vm0, %v1328_v1  ;;  %1247 = vmatprep.mubr.msk.bf16.mxu1 %vm1329_vm0, %v1328_v1 }
  0x46   : > { %1208 = vmatmul.mubr.bf16.gmra.mrb[16].mxu0 %v1309_v17  ;;  %1248 = vmatmul.mubr.bf16.gmra.mrb[16].mxu1 %v1310_v18 }
  0x47   : > { %1211 = vmatprep.mubr.msk.bf16.mxu0 %vm1329_vm0, %v1328_v1  ;;  %1251 = vmatprep.mubr.msk.bf16.mxu1 %vm1329_vm0, %v1328_v1 }
  0x4e   : > { %1212 = vmatmul.mubr.bf16.gmra.mrb[20].mxu0 %v1311_v19  ;;  %1252 = vmatmul.mubr.bf16.gmra.mrb[20].mxu1 %v1312_v20 }
  0x4f   : > { %1215 = vmatprep.mubr.msk.bf16.mxu0 %vm1329_vm0, %v1328_v1  ;;  %1255 = vmatprep.mubr.msk.bf16.mxu1 %vm1329_vm0, %v1328_v1 }
  0x56   : > { %1216 = vmatmul.mubr.bf16.gmra.mrb[24].mxu0 %v1313_v21  ;;  %1256 = vmatmul.mubr.bf16.gmra.mrb[24].mxu1 %v1314_v22 }
  0x57   : > { %1219 = vmatprep.mubr.msk.bf16.mxu0 %vm1329_vm0, %v1328_v1  ;;  %1259 = vmatprep.mubr.msk.bf16.mxu1 %vm1329_vm0, %v1328_v1 }
  0x5e   : > { %1220 = vmatmul.mubr.bf16.gmra.mrb[28].mxu0 %v1315_v23  ;;  %1260 = vmatmul.mubr.bf16.gmra.mrb[28].mxu1 %v1316_v24 }
  0x5f   : > { %1223 = vmatprep.mubr.msk.bf16.mxu0 %vm1329_vm0, %v1328_v1  ;;  %1263 = vmatprep.mubr.msk.bf16.mxu1 %vm1329_vm0, %v1328_v1 }
  0x66   : > { %1224 = vmatmul.mubr.bf16.gmra.mrb[32].mxu0 %v1317_v25  ;;  %1264 = vmatmul.mubr.bf16.gmra.mrb[32].mxu1 %v1318_v26 }
  0x67   : > { %1227 = vmatprep.mubr.msk.bf16.mxu0 %vm1329_vm0, %v1328_v1 }
  0x6e   : > { %1228 = vmatmul.mubr.bf16.gmra.mrb[36].mxu0 %v1319_v27 }
  0xf9   : > { %v427_v29 = vpop.f32.mrb[0].mxu0  ;;  %v507_v30 = vpop.f32.mrb[0].mxu1 }
  0xfa   : > { %v428_v31 = vadd.f32 %v1468_v28, %v427_v29  ;;  %v1193_v32 = vpop.f32.mrb[1].mxu0  ;;  %v508_v33 = vadd.f32 %v1468_v28, %v507_v30  ;;  %v1233_v34 = vpop.f32.mrb[1].mxu1 }
  0xfb   : > { %v430_v35 = vpop.f32.mrb[2].mxu0  ;;  %v510_v36 = vpop.f32.mrb[2].mxu1 }
  0xfc   : > { %v614_v37 = vmul.f32 0.2, %v428_v31  ;;  %v431_v38 = vadd.f32 %v1468_v28, %v430_v35  ;;  %v1194_v39 = vpop.f32.mrb[3].mxu0  ;;  %vm597_vm1 = vcmp.ge.f32.partialorder %v508_v33, 0.0  ;;  %v1234_v40 = vpop.f32.mrb[3].mxu1  ;;  %vm577_vm2 = vcmp.ge.f32.partialorder %v428_v31, 0.0 }
  0xfd   : > { %v634_v41 = vmul.f32 0.2, %v508_v33  ;;  %v511_v42 = vadd.f32 %v1468_v28, %v510_v36 }
  0xfe   : > { %vm578_vm3 = vcmp.ge.f32.partialorder %v431_v38, 0.0  ;;  %v615_v43 = vmul.f32 0.2, %v431_v38  ;;  %v651_v46 = vsel %vm577_vm2, %v428_v31, %v614_v37 }
  0xff   : > { %v671_v44 = vsel %vm597_vm1, %v508_v33, %v634_v41  ;;  %vm598_vm4 = vcmp.ge.f32.partialorder %v511_v42, 0.0  ;;  %v635_v45 = vmul.f32 0.2, %v511_v42 }
 0x100   : > { %v652_v47 = vsel %vm578_vm3, %v431_v38, %v615_v43 }
 0x101   : > { %v1044_v48 = vpack.c.bf16 %v652_v47, %v651_v46  ;;  %v435_v49 = vpop.f32.mrb[4].mxu0  ;;  %v672_v50 = vsel %vm598_vm4, %v511_v42, %v635_v45  ;;  %v515_v51 = vpop.f32.mrb[4].mxu1 }
 0x102   : > { %v436_v52 = vadd.f32 %v1468_v28, %v435_v49  ;;  %v1094_v53 = vpack.c.bf16 %v672_v50, %v671_v44  ;;  %v1197_v54 = vpop.f32.mrb[5].mxu0  ;;  %v516_v55 = vadd.f32 %v1468_v28, %v515_v51  ;;  %v1237_v56 = vpop.f32.mrb[5].mxu1 }
 0x103   : > { %1045 = vst [vmem:[%s1479_s13] sm:$0xff] %v1044_v48   ;;  %v438_v57 = vpop.f32.mrb[6].mxu0  ;;  %v518_v58 = vpop.f32.mrb[6].mxu1 }
 0x104   : > { %v616_v59 = vmul.f32 0.2, %v436_v52  ;;  %1140 = vst [vmem:[%s1479_s13 + $0x50] sm:$0xff] %v1094_v53   ;;  %v439_v60 = vadd.f32 %v1468_v28, %v438_v57  ;;  %v1198_v61 = vpop.f32.mrb[7].mxu0  ;;  %vm599_vm5 = vcmp.ge.f32.partialorder %v516_v55, 0.0  ;;  %v1238_v62 = vpop.f32.mrb[7].mxu1  ;;  %v519_v0 = vadd.f32 %v1468_v28, %v518_v58 }
 0x105   : > { %vm579_vm6 = vcmp.ge.f32.partialorder %v436_v52, 0.0  ;;  %v636_v63 = vmul.f32 0.2, %v516_v55 }
 0x106   : > { %vm580_vm7 = vcmp.ge.f32.partialorder %v439_v60, 0.0  ;;  %v617_v1 = vmul.f32 0.2, %v439_v60  ;;  %vm600_vm8 = vcmp.ge.f32.partialorder %v519_v0, 0.0  ;;  %v637_v3 = vmul.f32 0.2, %v519_v0 }
 0x107   : > { %v673_v2 = vsel %vm599_vm5, %v516_v55, %v636_v63  ;;  %v653_v4 = vsel %vm579_vm6, %v436_v52, %v616_v59 }
 0x108   : > { %v654_v5 = vsel %vm580_vm7, %v439_v60, %v617_v1  ;;  %v674_v8 = vsel %vm600_vm8, %v519_v0, %v637_v3 }
 0x109   : > { %v1049_v6 = vpack.c.bf16 %v654_v5, %v653_v4  ;;  %v443_v7 = vpop.f32.mrb[8].mxu0  ;;  %v523_v9 = vpop.f32.mrb[8].mxu1  ;;  %v1099_v11 = vpack.c.bf16 %v674_v8, %v673_v2 }
 0x10a   : > { %v444_v10 = vadd.f32 %v1468_v28, %v443_v7  ;;  %v1201_v12 = vpop.f32.mrb[9].mxu0  ;;  %v524_v13 = vadd.f32 %v1468_v28, %v523_v9  ;;  %v1241_v14 = vpop.f32.mrb[9].mxu1 }
 0x10b   : > { %1131 = vst [vmem:[%s1479_s13 + $0x8] sm:$0xff] %v1049_v6   ;;  %v446_v15 = vpop.f32.mrb[10].mxu0  ;;  %v526_v16 = vpop.f32.mrb[10].mxu1  ;;  %1141 = vst [vmem:[%s1479_s13 + $0x58] sm:$0xff] %v1099_v11  }
 0x10c   : > { %v618_v17 = vmul.f32 0.2, %v444_v10  ;;  %v447_v18 = vadd.f32 %v1468_v28, %v446_v15  ;;  %v1202_v19 = vpop.f32.mrb[11].mxu0  ;;  %vm601_vm9 = vcmp.ge.f32.partialorder %v524_v13, 0.0  ;;  %v1242_v20 = vpop.f32.mrb[11].mxu1  ;;  %vm581_vm10 = vcmp.ge.f32.partialorder %v444_v10, 0.0 }
 0x10d   : > { %v638_v21 = vmul.f32 0.2, %v524_v13  ;;  %v527_v22 = vadd.f32 %v1468_v28, %v526_v16 }
 0x10e   : > { %vm582_vm11 = vcmp.ge.f32.partialorder %v447_v18, 0.0  ;;  %v619_v23 = vmul.f32 0.2, %v447_v18  ;;  %v655_v26 = vsel %vm581_vm10, %v444_v10, %v618_v17 }
 0x10f   : > { %v675_v24 = vsel %vm601_vm9, %v524_v13, %v638_v21  ;;  %vm602_vm12 = vcmp.ge.f32.partialorder %v527_v22, 0.0  ;;  %v639_v25 = vmul.f32 0.2, %v527_v22 }
 0x110   : > { %v656_v27 = vsel %vm582_vm11, %v447_v18, %v619_v23 }
 0x111   : > { %v1054_v29 = vpack.c.bf16 %v656_v27, %v655_v26  ;;  %v451_v30 = vpop.f32.mrb[12].mxu0  ;;  %v676_v31 = vsel %vm602_vm12, %v527_v22, %v639_v25  ;;  %v531_v32 = vpop.f32.mrb[12].mxu1 }
 0x112   : > { %v452_v33 = vadd.f32 %v1468_v28, %v451_v30  ;;  %v1104_v34 = vpack.c.bf16 %v676_v31, %v675_v24  ;;  %v1205_v35 = vpop.f32.mrb[13].mxu0  ;;  %v532_v36 = vadd.f32 %v1468_v28, %v531_v32  ;;  %v1245_v37 = vpop.f32.mrb[13].mxu1 }
 0x113   : > { %1132 = vst [vmem:[%s1479_s13 + $0x10] sm:$0xff] %v1054_v29   ;;  %v454_v38 = vpop.f32.mrb[14].mxu0  ;;  %v534_v39 = vpop.f32.mrb[14].mxu1 }
 0x114   : > { %v620_v40 = vmul.f32 0.2, %v452_v33  ;;  %1142 = vst [vmem:[%s1479_s13 + $0x60] sm:$0xff] %v1104_v34   ;;  %v455_v41 = vadd.f32 %v1468_v28, %v454_v38  ;;  %v1206_v42 = vpop.f32.mrb[15].mxu0  ;;  %vm603_vm13 = vcmp.ge.f32.partialorder %v532_v36, 0.0  ;;  %v1246_v43 = vpop.f32.mrb[15].mxu1  ;;  %v535_v45 = vadd.f32 %v1468_v28, %v534_v39 }
 0x115   : > { %vm583_vm14 = vcmp.ge.f32.partialorder %v452_v33, 0.0  ;;  %v640_v44 = vmul.f32 0.2, %v532_v36 }
 0x116   : > { %vm584_vm15 = vcmp.ge.f32.partialorder %v455_v41, 0.0  ;;  %v621_v46 = vmul.f32 0.2, %v455_v41  ;;  %vm604_vm0 = vcmp.ge.f32.partialorder %v535_v45, 0.0  ;;  %v641_v48 = vmul.f32 0.2, %v535_v45 }
 0x117   : > { %v677_v47 = vsel %vm603_vm13, %v532_v36, %v640_v44  ;;  %v657_v49 = vsel %vm583_vm14, %v452_v33, %v620_v40 }
 0x118   : > { %v658_v50 = vsel %vm584_vm15, %v455_v41, %v621_v46  ;;  %v678_v53 = vsel %vm604_vm0, %v535_v45, %v641_v48 }
 0x119   : > { %v1059_v51 = vpack.c.bf16 %v658_v50, %v657_v49  ;;  %v459_v52 = vpop.f32.mrb[16].mxu0  ;;  %v539_v54 = vpop.f32.mrb[16].mxu1  ;;  %v1109_v56 = vpack.c.bf16 %v678_v53, %v677_v47 }
 0x11a   : > { %v460_v55 = vadd.f32 %v1468_v28, %v459_v52  ;;  %v1209_v57 = vpop.f32.mrb[17].mxu0  ;;  %v540_v58 = vadd.f32 %v1468_v28, %v539_v54  ;;  %v1249_v59 = vpop.f32.mrb[17].mxu1 }
 0x11b   : > { %1133 = vst [vmem:[%s1479_s13 + $0x18] sm:$0xff] %v1059_v51   ;;  %v462_v60 = vpop.f32.mrb[18].mxu0  ;;  %v542_v61 = vpop.f32.mrb[18].mxu1  ;;  %1143 = vst [vmem:[%s1479_s13 + $0x68] sm:$0xff] %v1109_v56  }
 0x11c   : > { %v622_v62 = vmul.f32 0.2, %v460_v55  ;;  %v463_v63 = vadd.f32 %v1468_v28, %v462_v60  ;;  %v1210_v0 = vpop.f32.mrb[19].mxu0  ;;  %vm605_vm1 = vcmp.ge.f32.partialorder %v540_v58, 0.0  ;;  %v1250_v1 = vpop.f32.mrb[19].mxu1  ;;  %vm585_vm2 = vcmp.ge.f32.partialorder %v460_v55, 0.0 }
 0x11d   : > { %v642_v2 = vmul.f32 0.2, %v540_v58  ;;  %v543_v3 = vadd.f32 %v1468_v28, %v542_v61 }
 0x11e   : > { %vm586_vm3 = vcmp.ge.f32.partialorder %v463_v63, 0.0  ;;  %v623_v4 = vmul.f32 0.2, %v463_v63  ;;  %v659_v7 = vsel %vm585_vm2, %v460_v55, %v622_v62 }
 0x11f   : > { %v679_v5 = vsel %vm605_vm1, %v540_v58, %v642_v2  ;;  %vm606_vm4 = vcmp.ge.f32.partialorder %v543_v3, 0.0  ;;  %v643_v6 = vmul.f32 0.2, %v543_v3 }
 0x120   : > { %v660_v8 = vsel %vm586_vm3, %v463_v63, %v623_v4 }
 0x121   : > { %v1064_v9 = vpack.c.bf16 %v660_v8, %v659_v7  ;;  %v467_v10 = vpop.f32.mrb[20].mxu0  ;;  %v680_v11 = vsel %vm606_vm4, %v543_v3, %v643_v6  ;;  %v547_v12 = vpop.f32.mrb[20].mxu1 }
 0x122   : > { %v468_v13 = vadd.f32 %v1468_v28, %v467_v10  ;;  %v1114_v14 = vpack.c.bf16 %v680_v11, %v679_v5  ;;  %v1213_v15 = vpop.f32.mrb[21].mxu0  ;;  %v548_v16 = vadd.f32 %v1468_v28, %v547_v12  ;;  %v1253_v17 = vpop.f32.mrb[21].mxu1 }
 0x123   : > { %1134 = vst [vmem:[%s1479_s13 + $0x20] sm:$0xff] %v1064_v9   ;;  %v470_v18 = vpop.f32.mrb[22].mxu0  ;;  %v550_v19 = vpop.f32.mrb[22].mxu1 }
 0x124   : > { %v624_v20 = vmul.f32 0.2, %v468_v13  ;;  %1144 = vst [vmem:[%s1479_s13 + $0x70] sm:$0xff] %v1114_v14   ;;  %v471_v21 = vadd.f32 %v1468_v28, %v470_v18  ;;  %v1214_v22 = vpop.f32.mrb[23].mxu0  ;;  %vm607_vm5 = vcmp.ge.f32.partialorder %v548_v16, 0.0  ;;  %v1254_v23 = vpop.f32.mrb[23].mxu1  ;;  %v551_v25 = vadd.f32 %v1468_v28, %v550_v19 }
 0x125   : > { %vm587_vm6 = vcmp.ge.f32.partialorder %v468_v13, 0.0  ;;  %v644_v24 = vmul.f32 0.2, %v548_v16 }
 0x126   : > { %vm588_vm7 = vcmp.ge.f32.partialorder %v471_v21, 0.0  ;;  %v625_v26 = vmul.f32 0.2, %v471_v21  ;;  %vm608_vm8 = vcmp.ge.f32.partialorder %v551_v25, 0.0  ;;  %v645_v29 = vmul.f32 0.2, %v551_v25 }
 0x127   : > { %v681_v27 = vsel %vm607_vm5, %v548_v16, %v644_v24  ;;  %v661_v30 = vsel %vm587_vm6, %v468_v13, %v624_v20 }
 0x128   : > { %v662_v31 = vsel %vm588_vm7, %v471_v21, %v625_v26  ;;  %v682_v34 = vsel %vm608_vm8, %v551_v25, %v645_v29 }
 0x129   : > { %v1069_v32 = vpack.c.bf16 %v662_v31, %v661_v30  ;;  %v475_v33 = vpop.f32.mrb[24].mxu0  ;;  %v555_v35 = vpop.f32.mrb[24].mxu1  ;;  %v1119_v37 = vpack.c.bf16 %v682_v34, %v681_v27 }
 0x12a   : > { %v476_v36 = vadd.f32 %v1468_v28, %v475_v33  ;;  %v1217_v38 = vpop.f32.mrb[25].mxu0  ;;  %v556_v39 = vadd.f32 %v1468_v28, %v555_v35  ;;  %v1257_v40 = vpop.f32.mrb[25].mxu1 }
 0x12b   : > { %1135 = vst [vmem:[%s1479_s13 + $0x28] sm:$0xff] %v1069_v32   ;;  %v478_v41 = vpop.f32.mrb[26].mxu0  ;;  %v558_v42 = vpop.f32.mrb[26].mxu1  ;;  %1145 = vst [vmem:[%s1479_s13 + $0x78] sm:$0xff] %v1119_v37  }
 0x12c   : > { %v626_v43 = vmul.f32 0.2, %v476_v36  ;;  %v479_v44 = vadd.f32 %v1468_v28, %v478_v41  ;;  %v1218_v45 = vpop.f32.mrb[27].mxu0  ;;  %vm609_vm9 = vcmp.ge.f32.partialorder %v556_v39, 0.0  ;;  %v1258_v46 = vpop.f32.mrb[27].mxu1  ;;  %vm589_vm10 = vcmp.ge.f32.partialorder %v476_v36, 0.0 }
 0x12d   : > { %v646_v47 = vmul.f32 0.2, %v556_v39  ;;  %v559_v48 = vadd.f32 %v1468_v28, %v558_v42 }
 0x12e   : > { %vm590_vm11 = vcmp.ge.f32.partialorder %v479_v44, 0.0  ;;  %v627_v49 = vmul.f32 0.2, %v479_v44  ;;  %v663_v52 = vsel %vm589_vm10, %v476_v36, %v626_v43 }
 0x12f   : > { %v683_v50 = vsel %vm609_vm9, %v556_v39, %v646_v47  ;;  %vm610_vm12 = vcmp.ge.f32.partialorder %v559_v48, 0.0  ;;  %v647_v51 = vmul.f32 0.2, %v559_v48 }
 0x130   : > { %v664_v53 = vsel %vm590_vm11, %v479_v44, %v627_v49 }
 0x131   : > { %v1074_v54 = vpack.c.bf16 %v664_v53, %v663_v52  ;;  %v483_v55 = vpop.f32.mrb[28].mxu0  ;;  %v684_v56 = vsel %vm610_vm12, %v559_v48, %v647_v51  ;;  %v563_v57 = vpop.f32.mrb[28].mxu1 }
 0x132   : > { %v484_v58 = vadd.f32 %v1468_v28, %v483_v55  ;;  %v1124_v59 = vpack.c.bf16 %v684_v56, %v683_v50  ;;  %v1221_v60 = vpop.f32.mrb[29].mxu0  ;;  %v564_v61 = vadd.f32 %v1468_v28, %v563_v57  ;;  %v1261_v62 = vpop.f32.mrb[29].mxu1 }
 0x133   : > { %1136 = vst [vmem:[%s1479_s13 + $0x30] sm:$0xff] %v1074_v54   ;;  %v486_v63 = vpop.f32.mrb[30].mxu0  ;;  %v566_v0 = vpop.f32.mrb[30].mxu1 }
 0x134   : > { %v628_v1 = vmul.f32 0.2, %v484_v58  ;;  %1146 = vst [vmem:[%s1479_s13 + $0x80] sm:$0xff] %v1124_v59   ;;  %v487_v2 = vadd.f32 %v1468_v28, %v486_v63  ;;  %v1222_v3 = vpop.f32.mrb[31].mxu0  ;;  %vm611_vm13 = vcmp.ge.f32.partialorder %v564_v61, 0.0  ;;  %v1262_v4 = vpop.f32.mrb[31].mxu1  ;;  %v567_v6 = vadd.f32 %v1468_v28, %v566_v0 }
 0x135   : > { %vm591_vm14 = vcmp.ge.f32.partialorder %v484_v58, 0.0  ;;  %v648_v5 = vmul.f32 0.2, %v564_v61 }
 0x136   : > { %vm592_vm15 = vcmp.ge.f32.partialorder %v487_v2, 0.0  ;;  %v629_v7 = vmul.f32 0.2, %v487_v2  ;;  %vm612_vm0 = vcmp.ge.f32.partialorder %v567_v6, 0.0  ;;  %v649_v9 = vmul.f32 0.2, %v567_v6 }
 0x137   : > { %v685_v8 = vsel %vm611_vm13, %v564_v61, %v648_v5  ;;  %v665_v10 = vsel %vm591_vm14, %v484_v58, %v628_v1 }
 0x138   : > { %v666_v11 = vsel %vm592_vm15, %v487_v2, %v629_v7  ;;  %v686_v14 = vsel %vm612_vm0, %v567_v6, %v649_v9 }
 0x139   : > { %v1079_v12 = vpack.c.bf16 %v666_v11, %v665_v10  ;;  %v491_v13 = vpop.f32.mrb[32].mxu0  ;;  %v571_v15 = vpop.f32.mrb[32].mxu1  ;;  %v1129_v17 = vpack.c.bf16 %v686_v14, %v685_v8 }
 0x13a   : > { %v492_v16 = vadd.f32 %v1468_v28, %v491_v13  ;;  %v1225_v18 = vpop.f32.mrb[33].mxu0  ;;  %v572_v19 = vadd.f32 %v1468_v28, %v571_v15  ;;  %v1265_v20 = vpop.f32.mrb[33].mxu1 }
 0x13b   : > { %1137 = vst [vmem:[%s1479_s13 + $0x38] sm:$0xff] %v1079_v12   ;;  %v494_v21 = vpop.f32.mrb[34].mxu0  ;;  %v574_v22 = vpop.f32.mrb[34].mxu1  ;;  %1147 = vst [vmem:[%s1479_s13 + $0x88] sm:$0xff] %v1129_v17  }
 0x13c   : > { %v630_v23 = vmul.f32 0.2, %v492_v16  ;;  %v495_v24 = vadd.f32 %v1468_v28, %v494_v21  ;;  %v1226_v25 = vpop.f32.mrb[35].mxu0  ;;  %vm613_vm1 = vcmp.ge.f32.partialorder %v572_v19, 0.0  ;;  %v1266_v26 = vpop.f32.mrb[35].mxu1  ;;  %vm593_vm2 = vcmp.ge.f32.partialorder %v492_v16, 0.0 }
 0x13d   : > { %v650_v27 = vmul.f32 0.2, %v572_v19 }
 0x13e   : > { %vm594_vm3 = vcmp.ge.f32.partialorder %v495_v24, 0.0  ;;  %v631_v29 = vmul.f32 0.2, %v495_v24  ;;  %v667_v31 = vsel %vm593_vm2, %v492_v16, %v630_v23 }
 0x13f   : > { %v687_v30 = vsel %vm613_vm1, %v572_v19, %v650_v27 }
 0x140   : > { %v668_v32 = vsel %vm594_vm3, %v495_v24, %v631_v29  ;;  %v1040_v33 = vpack.c.bf16 %v687_v30, %v687_v30 }
 0x141   : > { %v1084_v34 = vpack.c.bf16 %v668_v32, %v667_v31  ;;  %v499_v35 = vpop.f32.mrb[36].mxu0 }
 0x142   : > { %873 = vst [vmem:[%s1479_s13 + $0x90] sm:$0xf] %v1040_v33  ;;  %v500_v36 = vadd.f32 %v1468_v28, %v499_v35  ;;  %v1229_v37 = vpop.f32.mrb[37].mxu0 }
 0x143   : > { %1138 = vst [vmem:[%s1479_s13 + $0x40] sm:$0xff] %v1084_v34   ;;  %v502_v38 = vpop.f32.mrb[38].mxu0 }
 0x144   : > { %v632_v39 = vmul.f32 0.2, %v500_v36  ;;  %v503_v40 = vadd.f32 %v1468_v28, %v502_v38  ;;  %v1230_v41 = vpop.f32.mrb[39].mxu0  ;;  %vm595_vm4 = vcmp.ge.f32.partialorder %v500_v36, 0.0 }
 0x146   : > { %vm596_vm5 = vcmp.ge.f32.partialorder %v503_v40, 0.0  ;;  %v633_v42 = vmul.f32 0.2, %v503_v40  ;;  %v669_v43 = vsel %vm595_vm4, %v500_v36, %v632_v39 }
 0x148   : > { %v670_v44 = vsel %vm596_vm5, %v503_v40, %v633_v42 }
 0x149   : > { %v1089_v45 = vpack.c.bf16 %v670_v44, %v669_v43 }
 0x14b   : > { %1139 = vst [vmem:[%s1479_s13 + $0x48] sm:$0xff] %v1089_v45  }
 0x14c PF: > { %s13_s12 = sadd.s32 1, %s1326_s12  }
 0x14d   : > { %p10_p4 = scmp.ge.s32.totalorder %s13_s12, 4  }
 0x14f   :  { %12 = sbr.rel (!%p10_p4) target bundleno = 1 (0x1), region = 62 }

// kernel: _lambda_.18
= control target key start
LH: loop header
LB: loop body
LE: loop exit
PB: predicated region body
PF: predicated region fallthrough
CT: control target
= control target key end

     0   :  { %s1466_s1 = inlined_call_operand.vmem [shape: bf16[256,128], index: 1, kind: input, shape index: {}]   ;;  %s1467_s0 = inlined_call_operand.vmem [shape: bf16[168,256], index: 0, kind: input, shape index: {}]   ;;  %s1468_s2 = inlined_call_operand.vmem [shape: f32[8,128], index: 2, kind: input, shape index: {}]   ;;  %s1469_s3 = inlined_call_operand.vmem [shape: bf16[168,128], index: 3, kind: output, shape index: {}]  }
   0x1   :  { %v997_v0 = vld [vmem:[%s1466_s1 + $0x40] sm:$0xff]   ;;  %v999_v2 = vld [vmem:[%s1466_s1 + $0x48] sm:$0xff]   ;;  %v1001_v4 = vld [vmem:[%s1466_s1 + $0x50] sm:$0xff]  }
   0x2   :  { %v998_v1 = vld [vmem:[%s1466_s1] sm:$0xff]   ;;  %899 = vmatprep.subr.bf16.mxu0 %v997_v0  ;;  %981 = vmatprep.subr.bf16.mxu1 %v997_v0  ;;  %v1000_v3 = vld [vmem:[%s1466_s1 + $0x8] sm:$0xff]   ;;  %v1002_v5 = vld [vmem:[%s1466_s1 + $0x10] sm:$0xff]  }
   0x3   :  { %900 = vmatpush3.bf16.msra.mxu0 %v998_v1  ;;  %989 = vmatpush3.bf16.msra.mxu1 %v998_v1  ;;  %v1003_v6 = vld [vmem:[%s1466_s1 + $0x58] sm:$0xff]   ;;  %v1005_v8 = vld [vmem:[%s1466_s1 + $0x60] sm:$0xff]   ;;  %v1007_v10 = vld [vmem:[%s1466_s1 + $0x68] sm:$0xff]  }
   0x4   :  { %901 = vmatprep.subr.bf16.mxu0 %v999_v2  ;;  %982 = vmatprep.subr.bf16.mxu1 %v999_v2  ;;  %v1004_v7 = vld [vmem:[%s1466_s1 + $0x18] sm:$0xff]   ;;  %v1006_v9 = vld [vmem:[%s1466_s1 + $0x20] sm:$0xff]   ;;  %v1008_v12 = vld [vmem:[%s1466_s1 + $0x28] sm:$0xff]  }
   0x5   :  { %v1015_v11 = vld [vmem:[%s1467_s0 + $0x4] ss:$8 sps:$4 sm:$0xff]   ;;  %v1009_v13 = vld [vmem:[%s1466_s1 + $0x70] sm:$0xff]   ;;  %v1011_v16 = vld [vmem:[%s1466_s1 + $0x78] sm:$0xff]  }
   0x6   :  { %309 = vmatprep.mubr.bf16.mxu0 %v1015_v11  ;;  %v1027_v14 = vld [vmem:[%s1467_s0 + $0x64] ss:$8 sps:$4 sm:$0xff]   ;;  %v1010_v15 = vld [vmem:[%s1466_s1 + $0x30] sm:$0xff]   ;;  %v1012_v17 = vld [vmem:[%s1466_s1 + $0x38] sm:$0xff]  }
   0x7   :  { %902 = vmatpush3.bf16.msra.mxu0 %v1000_v3  ;;  %990 = vmatpush3.bf16.msra.mxu1 %v1000_v3  ;;  %v1013_v18 = vld [vmem:[%s1467_s0] ss:$8 sps:$4 sm:$0xff]   ;;  %v1016_v19 = vld [vmem:[%s1467_s0 + $0x14] ss:$8 sps:$4 sm:$0xff]   ;;  %v1018_v22 = vld [vmem:[%s1467_s0 + $0x10] ss:$8 sps:$4 sm:$0xff]  }
   0x8   :  { %903 = vmatprep.subr.bf16.mxu0 %v1001_v4  ;;  %983 = vmatprep.subr.bf16.mxu1 %v1001_v4  ;;  %v1025_v20 = vld [vmem:[%s1467_s0 + $0x60] ss:$8 sps:$4 sm:$0xff]   ;;  %v1031_v21 = vld [vmem:[%s1467_s0 + $0x74] ss:$8 sps:$4 sm:$0xff]   ;;  %v1019_v23 = vld [vmem:[%s1467_s0 + $0x24] ss:$8 sps:$4 sm:$0xff]  }
   0x9   :  { %357 = vmatprep.mubr.bf16.mxu1 %v1027_v14  ;;  %v1033_v24 = vld [vmem:[%s1467_s0 + $0x70] ss:$8 sps:$4 sm:$0xff]   ;;  %v1037_v25 = vld [vmem:[%s1467_s0 + $0x84] ss:$8 sps:$4 sm:$0xff]   ;;  %v1021_v26 = vld [vmem:[%s1467_s0 + $0x20] ss:$8 sps:$4 sm:$0xff]  }
   0xa   :  { %v1022_v27 = vld [vmem:[%s1467_s0 + $0x34] ss:$8 sps:$4 sm:$0xff]   ;;  %v1039_v28 = vld [vmem:[%s1467_s0 + $0x80] ss:$8 sps:$4 sm:$0xff]   ;;  %v1024_v31 = vld [vmem:[%s1467_s0 + $0x30] ss:$8 sps:$4 sm:$0xff]  }
   0xb   :  { %904 = vmatpush3.bf16.msra.mxu0 %v1002_v5  ;;  %991 = vmatpush3.bf16.msra.mxu1 %v1002_v5  ;;  %v1040_v29 = vld [vmem:[%s1467_s0 + $0x94] ss:$8 sps:$4 sm:$0xff]   ;;  %v41_v30 = vld [vmem:[%s1467_s0 + $0xa0] sm:$0xff]  ;;  %v1042_v33 = vld [vmem:[%s1467_s0 + $0x90] ss:$8 sps:$4 sm:$0xff]  }
   0xc   :  { %905 = vmatprep.subr.bf16.mxu0 %v1003_v6  ;;  %984 = vmatprep.subr.bf16.mxu1 %v1003_v6  ;;  %v1028_v32 = vld [vmem:[%s1467_s0 + $0x44] ss:$8 sps:$4 sm:$0xff]   ;;  %v781_v34 = vcombine.high %v41_v30, %v41_v30  ;;  %v1030_v35 = vld [vmem:[%s1467_s0 + $0x40] ss:$8 sps:$4 sm:$0xff]   ;;  %v1034_v36 = vld [vmem:[%s1467_s0 + $0x54] ss:$8 sps:$4 sm:$0xff]   ;;  %v780_v37 = vcombine.low %v41_v30, %v41_v30 }
   0xd   :  { %v1036_v38 = vld [vmem:[%s1467_s0 + $0x50] ss:$8 sps:$4 sm:$0xff]  }
   0xf   :  { %906 = vmatpush3.bf16.msra.mxu0 %v1004_v7  ;;  %992 = vmatpush3.bf16.msra.mxu1 %v1004_v7 }
  0x10   :  { %907 = vmatprep.subr.bf16.mxu0 %v1005_v8  ;;  %985 = vmatprep.subr.bf16.mxu1 %v1005_v8 }
  0x13   :  { %908 = vmatpush3.bf16.msra.mxu0 %v1006_v9  ;;  %993 = vmatpush3.bf16.msra.mxu1 %v1006_v9 }
  0x14   :  { %909 = vmatprep.subr.bf16.mxu0 %v1007_v10  ;;  %986 = vmatprep.subr.bf16.mxu1 %v1007_v10 }
  0x17   :  { %910 = vmatpush3.bf16.msra.mxu0 %v1008_v12  ;;  %994 = vmatpush3.bf16.msra.mxu1 %v1008_v12 }
  0x18   :  { %911 = vmatprep.subr.bf16.mxu0 %v1009_v13  ;;  %987 = vmatprep.subr.bf16.mxu1 %v1009_v13 }
  0x1b   :  { %912 = vmatpush3.bf16.msra.mxu0 %v1010_v15  ;;  %995 = vmatpush3.bf16.msra.mxu1 %v1010_v15 }
  0x1c   :  { %913 = vmatprep.subr.bf16.mxu0 %v1011_v16  ;;  %988 = vmatprep.subr.bf16.mxu1 %v1011_v16 }
  0x1f   :  { %914 = vmatpush3.bf16.msra.mxu0 %v1012_v17  ;;  %996 = vmatpush3.bf16.msra.mxu1 %v1012_v17 }
  0x22   :  { %310 = vmatmul.mubr.bf16.vlgmr.msra.gmra.mrb[0].mxu0 %v1013_v18  ;;  %358 = vmatmul.mubr.bf16.vlgmr.msra.gmra.mrb[0].mxu1 %v1025_v20 }
  0x23   :  { %317 = vmatprep.mubr.bf16.mxu0 %v1016_v19  ;;  %365 = vmatprep.mubr.bf16.mxu1 %v1031_v21 }
  0x2a   :  { %318 = vmatmul.mubr.bf16.gmra.mrb[4].mxu0 %v1018_v22  ;;  %366 = vmatmul.mubr.bf16.gmra.mrb[4].mxu1 %v1033_v24 }
  0x2b   :  { %325 = vmatprep.mubr.bf16.mxu0 %v1019_v23  ;;  %373 = vmatprep.mubr.bf16.mxu1 %v1037_v25 }
  0x32   :  { %326 = vmatmul.mubr.bf16.gmra.mrb[8].mxu0 %v1021_v26  ;;  %374 = vmatmul.mubr.bf16.gmra.mrb[8].mxu1 %v1039_v28 }
  0x33   :  { %333 = vmatprep.mubr.bf16.mxu0 %v1022_v27  ;;  %381 = vmatprep.mubr.bf16.mxu1 %v1040_v29 }
  0x3a   :  { %334 = vmatmul.mubr.bf16.gmra.mrb[12].mxu0 %v1024_v31  ;;  %382 = vmatmul.mubr.bf16.gmra.mrb[12].mxu1 %v1042_v33 }
  0x3b   :  { %341 = vmatprep.mubr.bf16.mxu0 %v1028_v32  ;;  %389 = vmatprep.mubr.bf16.mxu1 %v781_v34 }
  0x42   :  { %342 = vmatmul.mubr.bf16.gmra.mrb[16].mxu0 %v1030_v35  ;;  %390 = vmatmul.mubr.bf16.gmra.mrb[16].mxu1 %v780_v37 }
  0x43   :  { %349 = vmatprep.mubr.bf16.mxu0 %v1034_v36 }
  0x4a   :  { %350 = vmatmul.mubr.bf16.gmra.mrb[20].mxu0 %v1036_v38 }
  0xf5   :  { %v915_v39 = vpop.f32.mrb[0].mxu0  ;;  %v951_v41 = vpop.f32.mrb[0].mxu1 }
  0xf6   :  { %v916_v40 = vpop.f32.mrb[1].mxu0  ;;  %v952_v44 = vpop.f32.mrb[1].mxu1 }
  0xf7   :  { %v1178_v42 = vadd.f32 %v916_v40, %v915_v39  ;;  %v918_v43 = vpop.f32.mrb[2].mxu0  ;;  %v1180_v46 = vadd.f32 %v952_v44, %v951_v41  ;;  %v954_v47 = vpop.f32.mrb[2].mxu1 }
  0xf8   :  { %v919_v45 = vpop.f32.mrb[3].mxu0  ;;  %v955_v49 = vpop.f32.mrb[3].mxu1 }
  0xf9   :  { %v1182_v48 = vadd.f32 %v919_v45, %v918_v43  ;;  %v1184_v50 = vadd.f32 %v955_v49, %v954_v47  ;;  %v440_v3 = vmul.f32 %v1178_v42, %v1178_v42 }
  0xfb   :  { %v441_v63 = vmul.f32 %v1182_v48, %v1182_v48  ;;  %v420_v4 = vadd.f32 %v1182_v48, %v1178_v42 }
  0xfd   :  { %v921_v51 = vpop.f32.mrb[4].mxu0  ;;  %v957_v53 = vpop.f32.mrb[4].mxu1  ;;  %v461_v12 = vadd.f32 %v441_v63, %v440_v3 }
  0xfe   :  { %v922_v52 = vpop.f32.mrb[5].mxu0  ;;  %v958_v56 = vpop.f32.mrb[5].mxu1 }
  0xff   :  { %v1186_v54 = vadd.f32 %v922_v52, %v921_v51  ;;  %v924_v55 = vpop.f32.mrb[6].mxu0  ;;  %v1188_v58 = vadd.f32 %v958_v56, %v957_v53  ;;  %v960_v59 = vpop.f32.mrb[6].mxu1 }
 0x100   :  { %v925_v57 = vpop.f32.mrb[7].mxu0  ;;  %v961_v61 = vpop.f32.mrb[7].mxu1 }
 0x101   :  { %v1190_v60 = vadd.f32 %v925_v57, %v924_v55  ;;  %v1192_v62 = vadd.f32 %v961_v61, %v960_v59  ;;  %v442_v5 = vmul.f32 %v1186_v54, %v1186_v54  ;;  %v421_v13 = vadd.f32 %v1186_v54, %v420_v4 }
 0x103   :  { %v462_v17 = vadd.f32 %v461_v12, %v442_v5  ;;  %v443_v18 = vmul.f32 %v1190_v60, %v1190_v60  ;;  %v422_v19 = vadd.f32 %v1190_v60, %v421_v13 }
 0x105   :  { %v927_v0 = vpop.f32.mrb[8].mxu0  ;;  %v963_v2 = vpop.f32.mrb[8].mxu1  ;;  %v463_v24 = vadd.f32 %v462_v17, %v443_v18 }
 0x106   :  { %v928_v1 = vpop.f32.mrb[9].mxu0  ;;  %v964_v8 = vpop.f32.mrb[9].mxu1 }
 0x107   :  { %v1202_v6 = vadd.f32 %v928_v1, %v927_v0  ;;  %v930_v7 = vpop.f32.mrb[10].mxu0  ;;  %v1204_v10 = vadd.f32 %v964_v8, %v963_v2  ;;  %v966_v11 = vpop.f32.mrb[10].mxu1 }
 0x108   :  { %v931_v9 = vpop.f32.mrb[11].mxu0  ;;  %v967_v15 = vpop.f32.mrb[11].mxu1 }
 0x109   :  { %v1207_v14 = vadd.f32 %v931_v9, %v930_v7  ;;  %v1209_v16 = vadd.f32 %v967_v15, %v966_v11  ;;  %v444_v20 = vmul.f32 %v1202_v6, %v1202_v6  ;;  %v423_v25 = vadd.f32 %v1202_v6, %v422_v19 }
 0x10b   :  { %v464_v32 = vadd.f32 %v463_v24, %v444_v20  ;;  %v445_v33 = vmul.f32 %v1207_v14, %v1207_v14  ;;  %v424_v37 = vadd.f32 %v1207_v14, %v423_v25  ;;  %v453_v24 = vmul.f32 %v1184_v50, %v1184_v50 }
 0x10d   :  { %v933_v21 = vpop.f32.mrb[12].mxu0  ;;  %v969_v23 = vpop.f32.mrb[12].mxu1  ;;  %v465_v39 = vadd.f32 %v464_v32, %v445_v33  ;;  %v455_v32 = vmul.f32 %v1192_v62, %v1192_v62 }
 0x10e   :  { %v934_v22 = vpop.f32.mrb[13].mxu0  ;;  %v970_v28 = vpop.f32.mrb[13].mxu1 }
 0x10f   :  { %v1217_v26 = vadd.f32 %v934_v22, %v933_v21  ;;  %v936_v27 = vpop.f32.mrb[14].mxu0  ;;  %v1219_v30 = vadd.f32 %v970_v28, %v969_v23  ;;  %v972_v31 = vpop.f32.mrb[14].mxu1  ;;  %v452_v21 = vmul.f32 %v1180_v46, %v1180_v46  ;;  %v454_v28 = vmul.f32 %v1188_v58, %v1188_v58 }
 0x110   :  { %v937_v29 = vpop.f32.mrb[15].mxu0  ;;  %v973_v35 = vpop.f32.mrb[15].mxu1 }
 0x111   :  { %v1223_v34 = vadd.f32 %v937_v29, %v936_v27  ;;  %v1225_v36 = vadd.f32 %v973_v35, %v972_v31  ;;  %v446_v38 = vmul.f32 %v1217_v26, %v1217_v26  ;;  %v425_v40 = vadd.f32 %v1217_v26, %v424_v37 }
 0x112   :  { %v456_v37 = vmul.f32 %v1204_v10, %v1204_v10 }
 0x113   :  { %v466_v45 = vadd.f32 %v465_v39, %v446_v38  ;;  %v447_v47 = vmul.f32 %v1223_v34, %v1223_v34  ;;  %v426_v57 = vadd.f32 %v1223_v34, %v425_v40 }
 0x115   :  { %v939_v41 = vpop.f32.mrb[16].mxu0  ;;  %v975_v44 = vpop.f32.mrb[16].mxu1  ;;  %v467_v0 = vadd.f32 %v466_v45, %v447_v47  ;;  %v458_v47 = vmul.f32 %v1219_v30, %v1219_v30 }
 0x116   :  { %v940_v43 = vpop.f32.mrb[17].mxu0  ;;  %v976_v52 = vpop.f32.mrb[17].mxu1 }
 0x117   :  { %v1233_v49 = vadd.f32 %v940_v43, %v939_v41  ;;  %v942_v51 = vpop.f32.mrb[18].mxu0  ;;  %v1235_v55 = vadd.f32 %v976_v52, %v975_v44  ;;  %v978_v56 = vpop.f32.mrb[18].mxu1  ;;  %v457_v41 = vmul.f32 %v1209_v16, %v1209_v16 }
 0x118   :  { %v943_v53 = vpop.f32.mrb[19].mxu0  ;;  %v979_v63 = vpop.f32.mrb[19].mxu1 }
 0x119   :  { %v448_v59 = vmul.f32 %v1233_v49, %v1233_v49  ;;  %v1240_v61 = vadd.f32 %v943_v53, %v942_v51  ;;  %v427_v1 = vadd.f32 %v1233_v49, %v426_v57  ;;  %v459_v53 = vmul.f32 %v1225_v36, %v1225_v36 }
 0x11a   :  { %v460_v56 = vmul.f32 %v1235_v55, %v1235_v55 }
 0x11b   :  { %v468_v2 = vadd.f32 %v467_v0, %v448_v59  ;;  %v449_v3 = vmul.f32 %v1240_v61, %v1240_v61  ;;  %v428_v7 = vadd.f32 %v1240_v61, %v427_v1 }
 0x11d   :  { %v945_v4 = vpop.f32.mrb[20].mxu0  ;;  %v469_v12 = vadd.f32 %v468_v2, %v449_v3 }
 0x11e   :  { %v946_v5 = vpop.f32.mrb[21].mxu0 }
 0x11f   :  { %v1246_v8 = vadd.f32 %v946_v5, %v945_v4  ;;  %v948_v9 = vpop.f32.mrb[22].mxu0 }
 0x120   :  { %v949_v11 = vpop.f32.mrb[23].mxu0 }
 0x121   :  { %v429_v13 = vadd.f32 %v1246_v8, %v428_v7  ;;  %v450_v15 = vmul.f32 %v1246_v8, %v1246_v8  ;;  %v1251_v17 = vadd.f32 %v949_v11, %v948_v9 }
 0x123   :  { %v470_v18 = vadd.f32 %v469_v12, %v450_v15  ;;  %v430_v19 = vadd.f32 %v1251_v17, %v429_v13  ;;  %v451_v20 = vmul.f32 %v1251_v17, %v1251_v17 }
 0x125   :  { %v431_v22 = vadd.f32 %v1180_v46, %v430_v19  ;;  %v471_v23 = vadd.f32 %v470_v18, %v451_v20 }
 0x127   :  { %v432_v25 = vadd.f32 %v1184_v50, %v431_v22  ;;  %v472_v27 = vadd.f32 %v471_v23, %v452_v21 }
 0x129   :  { %v473_v29 = vadd.f32 %v472_v27, %v453_v24  ;;  %v433_v31 = vadd.f32 %v1188_v58, %v432_v25  ;;  %v537_v24 = vlaneseq  ;;  %v509_v27 = vld [vmem:[%s1468_s2] sm:$0x1] }
 0x12b   :  { %v434_v33 = vadd.f32 %v1192_v62, %v433_v31  ;;  %v474_v35 = vadd.f32 %v473_v29, %v454_v28  ;;  %v538_v25 = vshrl.u32 %v537_v24, 7 }
 0x12d   :  { %v435_v38 = vadd.f32 %v1204_v10, %v434_v33  ;;  %v475_v39 = vadd.f32 %v474_v35, %v455_v32  ;;  %v539_v28 = vsub.s32 0, %v538_v25  ;;  %v513_v32 = vld [vmem:[%s1468_s2 + $0x1] sm:$0x1] }
 0x12f   :  { %v436_v40 = vadd.f32 %v1209_v16, %v435_v38  ;;  %v476_v43 = vadd.f32 %v475_v39, %v456_v37 }
 0x131   :  { %v477_v44 = vadd.f32 %v476_v43, %v457_v41  ;;  %v437_v45 = vadd.f32 %v1219_v30, %v436_v40 }
 0x133   :  { %v478_v51 = vadd.f32 %v477_v44, %v458_v47  ;;  %v438_v52 = vadd.f32 %v1225_v36, %v437_v45 }
 0x135   :  { %v479_v57 = vadd.f32 %v478_v51, %v459_v53  ;;  %v439_v59 = vadd.f32 %v1235_v55, %v438_v52 }
 0x137   :  { %v480_v63 = vadd.f32 %v479_v57, %v460_v56  ;;  %v491_v0 = vrot.slane %v439_v59, 4 }
 0x139   :  { %v492_v1 = vadd.f32 %v491_v0, %v439_v59  ;;  %v499_v2 = vrot.slane %v480_v63, 4 }
 0x13b   :  { %v493_v3 = vrot.slane %v492_v1, 2  ;;  %v500_v4 = vadd.f32 %v499_v2, %v480_v63 }
 0x13d   :  { %v494_v5 = vadd.f32 %v493_v3, %v492_v1  ;;  %v501_v7 = vrot.slane %v500_v4, 2 }
 0x13f   :  { %v495_v9 = vrot.slane %v494_v5, 1  ;;  %v502_v11 = vadd.f32 %v501_v7, %v500_v4 }
 0x141   :  { %v496_v12 = vadd.f32 %v495_v9, %v494_v5  ;;  %v503_v13 = vrot.slane %v502_v11, 1 }
 0x143   :  { %v497_v15 = vmul.f32 0.0061728396, %v496_v12  ;;  %v504_v18 = vadd.f32 %v503_v13, %v502_v11 }
 0x145   :  { %v505_v19 = vmul.f32 0.0061728396, %v504_v18  ;;  %v506_v20 = vmul.f32 %v497_v15, %v497_v15 }
 0x147   :  { %v507_v21 = vsub.f32 %v505_v19, %v506_v20 }
 0x149   :  { %v508_v22 = vmax.f32 %v507_v21, 0.0 }
 0x14b   :  { %v510_v23 = vadd.f32 1e-05, %v508_v22 }
 0x14d   :  { %1045 = vrsqrt.f32 %v510_v23 }
 0x157   :  { %v1046_v29 = vpop.eup %1045 }
 0x158   :  { %v512_v31 = vmul.f32 %v1046_v29, %v509_v27 }
 0x15a   :  { %v514_v33 = vmul.f32 %v512_v31, %v497_v15  ;;  %v540_v35 = vrot.slane %v512_v31, %v539_v28 }
 0x15c   :  { %v515_v37 = vsub.f32 %v513_v32, %v514_v33  ;;  %v541_v38 = vmul.f32 %v1178_v42, %v540_v35  ;;  %v542_v39 = vmul.f32 %v1182_v48, %v540_v35  ;;  %v543_v40 = vmul.f32 %v1186_v54, %v540_v35 }
 0x15d   :  { %v544_v41 = vmul.f32 %v1190_v60, %v540_v35  ;;  %v550_v43 = vmul.f32 %v1240_v61, %v540_v35  ;;  %v551_v44 = vmul.f32 %v1246_v8, %v540_v35  ;;  %v552_v45 = vmul.f32 %v1251_v17, %v540_v35 }
 0x15e   :  { %v553_v47 = vmul.f32 %v1180_v46, %v540_v35  ;;  %v554_v51 = vmul.f32 %v1184_v50, %v540_v35  ;;  %v555_v52 = vmul.f32 %v1188_v58, %v540_v35  ;;  %v556_v42 = vmul.f32 %v1192_v62, %v540_v35 }
 0x15f   :  { %v557_v48 = vmul.f32 %v1204_v10, %v540_v35  ;;  %v558_v54 = vmul.f32 %v1209_v16, %v540_v35  ;;  %v559_v60 = vmul.f32 %v1219_v30, %v540_v35  ;;  %v545_v61 = vmul.f32 %v1202_v6, %v540_v35 }
 0x160   :  { %v560_v8 = vmul.f32 %v1225_v36, %v540_v35  ;;  %v561_v17 = vmul.f32 %v1235_v55, %v540_v35  ;;  %v565_v53 = vrot.slane %v515_v37, %v539_v28  ;;  %v546_v46 = vmul.f32 %v1207_v14, %v540_v35 }
 0x161   :  { %v547_v50 = vmul.f32 %v1217_v26, %v540_v35  ;;  %v548_v58 = vmul.f32 %v1223_v34, %v540_v35  ;;  %v549_v62 = vmul.f32 %v1233_v49, %v540_v35 }
 0x162   :  { %v566_v10 = vadd.f32 %v565_v53, %v541_v38  ;;  %v567_v56 = vadd.f32 %v565_v53, %v542_v39  ;;  %v568_v16 = vadd.f32 %v565_v53, %v543_v40  ;;  %v569_v57 = vadd.f32 %v565_v53, %v544_v41 }
 0x163   :  { %v1310_v30 = vadd.f32 %v565_v53, %v545_v61  ;;  %v1312_v6 = vadd.f32 %v565_v53, %v546_v46  ;;  %v1314_v36 = vadd.f32 %v565_v53, %v547_v50  ;;  %v1316_v55 = vadd.f32 %v565_v53, %v548_v58 }
 0x164   :  { %v1318_v59 = vadd.f32 %v565_v53, %v549_v62  ;;  %v1320_v14 = vadd.f32 %v565_v53, %v550_v43  ;;  %v1322_v26 = vadd.f32 %v565_v53, %v551_v44  ;;  %v1324_v34 = vadd.f32 %v565_v53, %v552_v45 }
 0x165   :  { %v1326_v49 = vadd.f32 %v565_v53, %v553_v47  ;;  %v1328_v63 = vadd.f32 %v565_v53, %v554_v51  ;;  %v1330_v0 = vadd.f32 %v565_v53, %v555_v52  ;;  %v1332_v1 = vadd.f32 %v565_v53, %v556_v42 }
 0x166   :  { %v1334_v2 = vadd.f32 %v565_v53, %v557_v48  ;;  %v1336_v3 = vadd.f32 %v565_v53, %v558_v54  ;;  %v1338_v4 = vadd.f32 %v565_v53, %v559_v60  ;;  %v1340_v5 = vadd.f32 %v565_v53, %v560_v8 }
 0x167   :  { %v1342_v7 = vadd.f32 %v565_v53, %v561_v17  ;;  %vm587_vm0 = vcmp.ge.f32.partialorder %v566_v10, 0.0  ;;  %vm588_vm1 = vcmp.ge.f32.partialorder %v567_v56, 0.0  ;;  %vm589_vm2 = vcmp.ge.f32.partialorder %v568_v16, 0.0 }
 0x168   :  { %vm590_vm3 = vcmp.ge.f32.partialorder %v569_v57, 0.0  ;;  %vm591_vm4 = vcmp.ge.f32.partialorder %v1310_v30, 0.0  ;;  %vm592_vm5 = vcmp.ge.f32.partialorder %v1312_v6, 0.0  ;;  %vm598_vm11 = vcmp.ge.f32.partialorder %v1324_v34, 0.0 }
 0x169   :  { %vm599_vm12 = vcmp.ge.f32.partialorder %v1326_v49, 0.0  ;;  %vm600_vm13 = vcmp.ge.f32.partialorder %v1328_v63, 0.0  ;;  %vm601_vm14 = vcmp.ge.f32.partialorder %v1330_v0, 0.0  ;;  %vm602_vm15 = vcmp.ge.f32.partialorder %v1332_v1, 0.0 }
 0x16a   :  { %vm603_vm6 = vcmp.ge.f32.partialorder %v1334_v2, 0.0  ;;  %vm604_vm7 = vcmp.ge.f32.partialorder %v1336_v3, 0.0  ;;  %vm605_vm8 = vcmp.ge.f32.partialorder %v1338_v4, 0.0  ;;  %vm606_vm9 = vcmp.ge.f32.partialorder %v1340_v5, 0.0 }
 0x16b   :  { %vm607_vm10 = vcmp.ge.f32.partialorder %v1342_v7, 0.0  ;;  %v608_v9 = vmul.f32 0.2, %v566_v10  ;;  %v609_v11 = vmul.f32 0.2, %v567_v56 }
 0x16c   :  { %v610_v12 = vmul.f32 0.2, %v568_v16  ;;  %v611_v13 = vmul.f32 0.2, %v569_v57  ;;  %v612_v15 = vmul.f32 0.2, %v1310_v30 }
 0x16d   :  { %v613_v18 = vmul.f32 0.2, %v1312_v6  ;;  %v614_v19 = vmul.f32 0.2, %v1314_v36  ;;  %v615_v20 = vmul.f32 0.2, %v1316_v55  ;;  %v629_v21 = vsel %vm587_vm0, %v566_v10, %v608_v9 }
 0x16e   :  { %v616_v22 = vmul.f32 0.2, %v1318_v59  ;;  %v617_v23 = vmul.f32 0.2, %v1320_v14  ;;  %v618_v24 = vmul.f32 0.2, %v1322_v26  ;;  %v630_v25 = vsel %vm588_vm1, %v567_v56, %v609_v11 }
 0x16f   :  { %v619_v27 = vmul.f32 0.2, %v1324_v34  ;;  %v620_v28 = vmul.f32 0.2, %v1326_v49  ;;  %v621_v29 = vmul.f32 0.2, %v1328_v63  ;;  %v631_v31 = vsel %vm589_vm2, %v568_v16, %v610_v12 }
 0x170   :  { %v622_v32 = vmul.f32 0.2, %v1330_v0  ;;  %v623_v33 = vmul.f32 0.2, %v1332_v1  ;;  %v624_v35 = vmul.f32 0.2, %v1334_v2  ;;  %v632_v37 = vsel %vm590_vm3, %v569_v57, %v611_v13 }
 0x171   :  { %v625_v38 = vmul.f32 0.2, %v1336_v3  ;;  %v626_v39 = vmul.f32 0.2, %v1338_v4  ;;  %v627_v40 = vmul.f32 0.2, %v1340_v5  ;;  %v633_v41 = vsel %vm591_vm4, %v1310_v30, %v612_v15 }
 0x172   :  { %v628_v43 = vmul.f32 0.2, %v1342_v7  ;;  %v634_v44 = vsel %vm592_vm5, %v1312_v6, %v613_v18  ;;  %vm1470_vm0 = vcmp.ge.f32.partialorder %v1314_v36, 0.0  ;;  %vm1471_vm1 = vcmp.ge.f32.partialorder %v1316_v55, 0.0 }
 0x173   :  { %v635_v45 = vsel %vm1470_vm0, %v1314_v36, %v614_v19  ;;  %v636_v47 = vsel %vm1471_vm1, %v1316_v55, %v615_v20  ;;  %vm1472_vm2 = vcmp.ge.f32.partialorder %v1318_v59, 0.0  ;;  %vm1473_vm3 = vcmp.ge.f32.partialorder %v1320_v14, 0.0 }
 0x174   :  { %v637_v51 = vsel %vm1472_vm2, %v1318_v59, %v616_v22  ;;  %v638_v52 = vsel %vm1473_vm3, %v1320_v14, %v617_v23  ;;  %vm1474_vm4 = vcmp.ge.f32.partialorder %v1322_v26, 0.0  ;;  %v640_v48 = vsel %vm598_vm11, %v1324_v34, %v619_v27 }
 0x175   :  { %v639_v42 = vsel %vm1474_vm4, %v1322_v26, %v618_v24  ;;  %v641_v54 = vsel %vm599_vm12, %v1326_v49, %v620_v28  ;;  %v642_v60 = vsel %vm600_vm13, %v1328_v63, %v621_v29  ;;  %v643_v61 = vsel %vm601_vm14, %v1330_v0, %v622_v32 }
 0x176   :  { %v644_v8 = vsel %vm602_vm15, %v1332_v1, %v623_v33  ;;  %v645_v17 = vsel %vm603_vm6, %v1334_v2, %v624_v35  ;;  %v646_v53 = vsel %vm604_vm7, %v1336_v3, %v625_v38  ;;  %v647_v46 = vsel %vm605_vm8, %v1338_v4, %v626_v39 }
 0x177   :  { %v648_v50 = vsel %vm606_vm9, %v1340_v5, %v627_v40  ;;  %v649_v58 = vsel %vm607_vm10, %v1342_v7, %v628_v43  ;;  %v843_v62 = vpack.c.bf16 %v630_v25, %v629_v21  ;;  %v848_v10 = vpack.c.bf16 %v632_v37, %v631_v31 }
 0x178   :  { %v853_v56 = vpack.c.bf16 %v634_v44, %v633_v41  ;;  %v839_v16 = vpack.c.bf16 %v649_v58, %v649_v58  ;;  %v858_v57 = vpack.c.bf16 %v636_v47, %v635_v45  ;;  %v863_v30 = vpack.c.bf16 %v638_v52, %v637_v51 }
 0x179   :  { %v868_v6 = vpack.c.bf16 %v640_v48, %v639_v42  ;;  %844 = vst [vmem:[%s1469_s3] sm:$0xff] %v843_v62   ;;  %890 = vst [vmem:[%s1469_s3 + $0x8] sm:$0xff] %v848_v10   ;;  %v873_v36 = vpack.c.bf16 %v642_v60, %v641_v54  ;;  %v878_v55 = vpack.c.bf16 %v644_v8, %v643_v61 }
 0x17a   :  { %891 = vst [vmem:[%s1469_s3 + $0x10] sm:$0xff] %v853_v56   ;;  %v883_v59 = vpack.c.bf16 %v646_v53, %v645_v17  ;;  %v888_v14 = vpack.c.bf16 %v648_v50, %v647_v46  ;;  %892 = vst [vmem:[%s1469_s3 + $0x18] sm:$0xff] %v858_v57  }
 0x17b   :  { %893 = vst [vmem:[%s1469_s3 + $0x20] sm:$0xff] %v863_v30   ;;  %894 = vst [vmem:[%s1469_s3 + $0x28] sm:$0xff] %v868_v6  }
 0x17c   :  { %755 = vst [vmem:[%s1469_s3 + $0x50] sm:$0xf] %v839_v16  ;;  %895 = vst [vmem:[%s1469_s3 + $0x30] sm:$0xff] %v873_v36  }
 0x17d   :  { %896 = vst [vmem:[%s1469_s3 + $0x38] sm:$0xff] %v878_v55   ;;  %897 = vst [vmem:[%s1469_s3 + $0x40] sm:$0xff] %v883_v59  }
 0x17e   :  { %898 = vst [vmem:[%s1469_s3 + $0x48] sm:$0xff] %v888_v14  }

// kernel: _lambda_.19
= control target key start
LH: loop header
LB: loop body
LE: loop exit
PB: predicated region body
PF: predicated region fallthrough
CT: control target
= control target key end

     0   :  { %s1061_s1 = inlined_call_operand.vmem [shape: bf16[512,128], index: 1, kind: input, shape index: {}]   ;;  %s1062_s0 = inlined_call_operand.vmem [shape: bf16[56,512], index: 0, kind: input, shape index: {}]   ;;  %s1063_s2 = inlined_call_operand.vmem [shape: f32[8,128], index: 2, kind: input, shape index: {}]   ;;  %s1064_s3 = inlined_call_operand.vmem [shape: bf16[56,128], index: 3, kind: output, shape index: {}]  }
   0x1   :  { %v805_v0 = vld [vmem:[%s1061_s1 + $0x40] sm:$0xff]   ;;  %v809_v4 = vld [vmem:[%s1061_s1 + $0x48] sm:$0xff]   ;;  %v813_v8 = vld [vmem:[%s1061_s1 + $0x50] sm:$0xff]  }
   0x2   :  { %v806_v1 = vld [vmem:[%s1061_s1 + $0xc0] sm:$0xff]   ;;  %725 = vmatprep.subr.bf16.mxu0 %v805_v0  ;;  %v810_v5 = vld [vmem:[%s1061_s1 + $0xc8] sm:$0xff]   ;;  %v814_v9 = vld [vmem:[%s1061_s1 + $0xd0] sm:$0xff]  }
   0x3   :  { %v807_v2 = vld [vmem:[%s1061_s1] sm:$0xff]   ;;  %765 = vmatprep.subr.bf16.mxu1 %v806_v1  ;;  %v811_v6 = vld [vmem:[%s1061_s1 + $0x8] sm:$0xff]   ;;  %v815_v10 = vld [vmem:[%s1061_s1 + $0x10] sm:$0xff]  }
   0x4   :  { %v808_v3 = vld [vmem:[%s1061_s1 + $0x80] sm:$0xff]   ;;  %726 = vmatpush3.bf16.msra.mxu0 %v807_v2  ;;  %v812_v7 = vld [vmem:[%s1061_s1 + $0x88] sm:$0xff]   ;;  %v816_v11 = vld [vmem:[%s1061_s1 + $0x90] sm:$0xff]  }
   0x5   :  { %766 = vmatpush3.bf16.msra.mxu1 %v808_v3  ;;  %727 = vmatprep.subr.bf16.mxu0 %v809_v4  ;;  %v817_v12 = vld [vmem:[%s1061_s1 + $0x58] sm:$0xff]   ;;  %v821_v16 = vld [vmem:[%s1061_s1 + $0x60] sm:$0xff]   ;;  %v825_v20 = vld [vmem:[%s1061_s1 + $0x68] sm:$0xff]  }
   0x6   :  { %767 = vmatprep.subr.bf16.mxu1 %v810_v5  ;;  %v818_v13 = vld [vmem:[%s1061_s1 + $0xd8] sm:$0xff]   ;;  %v822_v17 = vld [vmem:[%s1061_s1 + $0xe0] sm:$0xff]   ;;  %v826_v21 = vld [vmem:[%s1061_s1 + $0xe8] sm:$0xff]  }
   0x7   :  { %v819_v14 = vld [vmem:[%s1061_s1 + $0x18] sm:$0xff]   ;;  %v823_v18 = vld [vmem:[%s1061_s1 + $0x20] sm:$0xff]   ;;  %v827_v22 = vld [vmem:[%s1061_s1 + $0x28] sm:$0xff]  }
   0x8   :  { %728 = vmatpush3.bf16.msra.mxu0 %v811_v6  ;;  %v820_v15 = vld [vmem:[%s1061_s1 + $0x98] sm:$0xff]   ;;  %v824_v19 = vld [vmem:[%s1061_s1 + $0xa0] sm:$0xff]   ;;  %v828_v23 = vld [vmem:[%s1061_s1 + $0xa8] sm:$0xff]  }
   0x9   :  { %768 = vmatpush3.bf16.msra.mxu1 %v812_v7  ;;  %729 = vmatprep.subr.bf16.mxu0 %v813_v8  ;;  %v829_v24 = vld [vmem:[%s1061_s1 + $0x70] sm:$0xff]   ;;  %v833_v28 = vld [vmem:[%s1061_s1 + $0x78] sm:$0xff]   ;;  %v33_v42 = vld [vmem:[%s1062_s0 + $0x60] sm:$0xff] }
   0xa   :  { %769 = vmatprep.subr.bf16.mxu1 %v814_v9  ;;  %v830_v25 = vld [vmem:[%s1061_s1 + $0xf0] sm:$0xff]   ;;  %v834_v29 = vld [vmem:[%s1061_s1 + $0xf8] sm:$0xff]   ;;  %v34_v43 = vld [vmem:[%s1062_s0 + $0x68] sm:$0xff]  ;;  %v659_v46 = vcombine.high %v33_v42, %v33_v42  ;;  %v658_v48 = vcombine.low %v33_v42, %v33_v42 }
   0xb   :  { %v831_v26 = vld [vmem:[%s1061_s1 + $0x30] sm:$0xff]   ;;  %v835_v30 = vld [vmem:[%s1061_s1 + $0x38] sm:$0xff]   ;;  %v661_v47 = vcombine.high %v34_v43, %v34_v43  ;;  %v660_v49 = vcombine.low %v34_v43, %v34_v43 }
   0xc   :  { %730 = vmatpush3.bf16.msra.mxu0 %v815_v10  ;;  %v832_v27 = vld [vmem:[%s1061_s1 + $0xb0] sm:$0xff]   ;;  %v836_v31 = vld [vmem:[%s1061_s1 + $0xb8] sm:$0xff]  }
   0xd   :  { %770 = vmatpush3.bf16.msra.mxu1 %v816_v11  ;;  %731 = vmatprep.subr.bf16.mxu0 %v817_v12  ;;  %v837_v32 = vld [vmem:[%s1062_s0] ss:$16 sps:$4 sm:$0xff]   ;;  %v839_v33 = vld [vmem:[%s1062_s0 + $0x4] ss:$16 sps:$4 sm:$0xff]   ;;  %v840_v34 = vld [vmem:[%s1062_s0 + $0x8] ss:$16 sps:$4 sm:$0xff]  }
   0xe   :  { %771 = vmatprep.subr.bf16.mxu1 %v818_v13  ;;  %v842_v35 = vld [vmem:[%s1062_s0 + $0xc] ss:$16 sps:$4 sm:$0xff]   ;;  %397 = vmatprep.mubr.bf16.mxu0 %v839_v33  ;;  %v843_v36 = vld [vmem:[%s1062_s0 + $0x24] ss:$16 sps:$4 sm:$0xff]   ;;  %v847_v38 = vld [vmem:[%s1062_s0 + $0x20] ss:$16 sps:$4 sm:$0xff]  }
   0xf   :  { %461 = vmatprep.mubr.bf16.mxu1 %v842_v35  ;;  %v845_v37 = vld [vmem:[%s1062_s0 + $0x2c] ss:$16 sps:$4 sm:$0xff]   ;;  %v848_v39 = vld [vmem:[%s1062_s0 + $0x28] ss:$16 sps:$4 sm:$0xff]   ;;  %v849_v40 = vld [vmem:[%s1062_s0 + $0x44] ss:$16 sps:$4 sm:$0xff]  }
  0x10   :  { %732 = vmatpush3.bf16.msra.mxu0 %v819_v14  ;;  %v851_v41 = vld [vmem:[%s1062_s0 + $0x4c] ss:$16 sps:$4 sm:$0xff]   ;;  %v853_v44 = vld [vmem:[%s1062_s0 + $0x40] ss:$16 sps:$4 sm:$0xff]   ;;  %v854_v45 = vld [vmem:[%s1062_s0 + $0x48] ss:$16 sps:$4 sm:$0xff]  }
  0x11   :  { %772 = vmatpush3.bf16.msra.mxu1 %v820_v15  ;;  %733 = vmatprep.subr.bf16.mxu0 %v821_v16 }
  0x12   :  { %773 = vmatprep.subr.bf16.mxu1 %v822_v17 }
  0x14   :  { %734 = vmatpush3.bf16.msra.mxu0 %v823_v18 }
  0x15   :  { %774 = vmatpush3.bf16.msra.mxu1 %v824_v19  ;;  %735 = vmatprep.subr.bf16.mxu0 %v825_v20 }
  0x16   :  { %775 = vmatprep.subr.bf16.mxu1 %v826_v21 }
  0x18   :  { %736 = vmatpush3.bf16.msra.mxu0 %v827_v22 }
  0x19   :  { %776 = vmatpush3.bf16.msra.mxu1 %v828_v23  ;;  %737 = vmatprep.subr.bf16.mxu0 %v829_v24 }
  0x1a   :  { %777 = vmatprep.subr.bf16.mxu1 %v830_v25 }
  0x1c   :  { %738 = vmatpush3.bf16.msra.mxu0 %v831_v26 }
  0x1d   :  { %778 = vmatpush3.bf16.msra.mxu1 %v832_v27  ;;  %739 = vmatprep.subr.bf16.mxu0 %v833_v28 }
  0x1e   :  { %779 = vmatprep.subr.bf16.mxu1 %v834_v29 }
  0x20   :  { %740 = vmatpush3.bf16.msra.mxu0 %v835_v30 }
  0x21   :  { %780 = vmatpush3.bf16.msra.mxu1 %v836_v31 }
  0x23   :  { %398 = vmatmul.mubr.bf16.vlgmr.msra.gmra.mrb[0].mxu0 %v837_v32 }
  0x24   :  { %462 = vmatmul.mubr.bf16.vlgmr.msra.gmra.mrb[0].mxu1 %v840_v34  ;;  %405 = vmatprep.mubr.bf16.mxu0 %v843_v36 }
  0x25   :  { %469 = vmatprep.mubr.bf16.mxu1 %v845_v37 }
  0x2b   :  { %406 = vmatmul.mubr.bf16.gmra.mrb[4].mxu0 %v847_v38 }
  0x2c   :  { %470 = vmatmul.mubr.bf16.gmra.mrb[4].mxu1 %v848_v39  ;;  %413 = vmatprep.mubr.bf16.mxu0 %v849_v40 }
  0x2d   :  { %477 = vmatprep.mubr.bf16.mxu1 %v851_v41 }
  0x33   :  { %414 = vmatmul.mubr.bf16.gmra.mrb[8].mxu0 %v853_v44 }
  0x34   :  { %478 = vmatmul.mubr.bf16.gmra.mrb[8].mxu1 %v854_v45  ;;  %421 = vmatprep.mubr.bf16.mxu0 %v659_v46 }
  0x35   :  { %485 = vmatprep.mubr.bf16.mxu1 %v661_v47 }
  0x3b   :  { %422 = vmatmul.mubr.bf16.gmra.mrb[12].mxu0 %v658_v48 }
  0x3c   :  { %486 = vmatmul.mubr.bf16.gmra.mrb[12].mxu1 %v660_v49 }
  0xf6   :  { %v741_v50 = vpop.f32.mrb[0].mxu0 }
  0xf7   :  { %v781_v51 = vpop.f32.mrb[0].mxu1  ;;  %v742_v52 = vpop.f32.mrb[1].mxu0 }
  0xf8   :  { %v743_v53 = vadd.f32 %v742_v52, %v741_v50  ;;  %v782_v54 = vpop.f32.mrb[1].mxu1  ;;  %v744_v55 = vpop.f32.mrb[2].mxu0 }
  0xf9   :  { %v783_v56 = vadd.f32 %v782_v54, %v781_v51  ;;  %v784_v57 = vpop.f32.mrb[2].mxu1  ;;  %v745_v58 = vpop.f32.mrb[3].mxu0 }
  0xfa   :  { %v746_v59 = vadd.f32 %v745_v58, %v744_v55  ;;  %v785_v60 = vpop.f32.mrb[3].mxu1 }
  0xfb   :  { %v1019_v61 = vadd.f32 %v783_v56, %v743_v53  ;;  %v786_v62 = vadd.f32 %v785_v60, %v784_v57 }
  0xfd   :  { %v1021_v63 = vadd.f32 %v786_v62, %v746_v59  ;;  %v508_v1 = vmul.f32 %v1019_v61, %v1019_v61 }
  0xfe   :  { %v747_v0 = vpop.f32.mrb[4].mxu0 }
  0xff   :  { %v502_v2 = vadd.f32 %v1021_v63, %v1019_v61  ;;  %v509_v3 = vmul.f32 %v1021_v63, %v1021_v63  ;;  %v787_v4 = vpop.f32.mrb[4].mxu1  ;;  %v748_v5 = vpop.f32.mrb[5].mxu0 }
 0x100   :  { %v749_v6 = vadd.f32 %v748_v5, %v747_v0  ;;  %v788_v7 = vpop.f32.mrb[5].mxu1  ;;  %v750_v8 = vpop.f32.mrb[6].mxu0 }
 0x101   :  { %v515_v9 = vadd.f32 %v509_v3, %v508_v1  ;;  %v789_v10 = vadd.f32 %v788_v7, %v787_v4  ;;  %v790_v11 = vpop.f32.mrb[6].mxu1  ;;  %v751_v12 = vpop.f32.mrb[7].mxu0 }
 0x102   :  { %v752_v13 = vadd.f32 %v751_v12, %v750_v8  ;;  %v791_v14 = vpop.f32.mrb[7].mxu1 }
 0x103   :  { %v1029_v15 = vadd.f32 %v789_v10, %v749_v6  ;;  %v792_v16 = vadd.f32 %v791_v14, %v790_v11  ;;  %v563_v14 = vlaneseq }
 0x105   :  { %v503_v17 = vadd.f32 %v502_v2, %v1029_v15  ;;  %v510_v18 = vmul.f32 %v1029_v15, %v1029_v15  ;;  %v1034_v19 = vadd.f32 %v792_v16, %v752_v13  ;;  %v564_v16 = vshrl.u32 %v563_v14, 7 }
 0x106   :  { %v753_v20 = vpop.f32.mrb[8].mxu0 }
 0x107   :  { %v516_v21 = vadd.f32 %v515_v9, %v510_v18  ;;  %v504_v22 = vadd.f32 %v503_v17, %v1034_v19  ;;  %v511_v23 = vmul.f32 %v1034_v19, %v1034_v19  ;;  %v793_v24 = vpop.f32.mrb[8].mxu1  ;;  %v754_v25 = vpop.f32.mrb[9].mxu0  ;;  %v549_v17 = vld [vmem:[%s1063_s2] sm:$0x1]  ;;  %v565_v18 = vsub.s32 0, %v564_v16 }
 0x108   :  { %v755_v26 = vadd.f32 %v754_v25, %v753_v20  ;;  %v794_v27 = vpop.f32.mrb[9].mxu1  ;;  %v756_v28 = vpop.f32.mrb[10].mxu0 }
 0x109   :  { %v517_v29 = vadd.f32 %v516_v21, %v511_v23  ;;  %v795_v30 = vadd.f32 %v794_v27, %v793_v24  ;;  %v796_v31 = vpop.f32.mrb[10].mxu1  ;;  %v757_v32 = vpop.f32.mrb[11].mxu0 }
 0x10a   :  { %v758_v33 = vadd.f32 %v757_v32, %v756_v28  ;;  %v797_v34 = vpop.f32.mrb[11].mxu1 }
 0x10b   :  { %v480_v35 = vadd.f32 %v795_v30, %v755_v26  ;;  %v798_v36 = vadd.f32 %v797_v34, %v796_v31 }
 0x10d   :  { %v505_v37 = vadd.f32 %v504_v22, %v480_v35  ;;  %v512_v38 = vmul.f32 %v480_v35, %v480_v35  ;;  %v483_v39 = vadd.f32 %v798_v36, %v758_v33  ;;  %v553_v22 = vld [vmem:[%s1063_s2 + $0x1] sm:$0x1] }
 0x10e   :  { %v759_v40 = vpop.f32.mrb[12].mxu0 }
 0x10f   :  { %v518_v41 = vadd.f32 %v517_v29, %v512_v38  ;;  %v506_v42 = vadd.f32 %v505_v37, %v483_v39  ;;  %v513_v43 = vmul.f32 %v483_v39, %v483_v39  ;;  %v799_v44 = vpop.f32.mrb[12].mxu1  ;;  %v760_v45 = vpop.f32.mrb[13].mxu0 }
 0x110   :  { %v761_v46 = vadd.f32 %v760_v45, %v759_v40  ;;  %v800_v47 = vpop.f32.mrb[13].mxu1  ;;  %v762_v48 = vpop.f32.mrb[14].mxu0 }
 0x111   :  { %v519_v49 = vadd.f32 %v518_v41, %v513_v43  ;;  %v801_v50 = vadd.f32 %v800_v47, %v799_v44  ;;  %v802_v51 = vpop.f32.mrb[14].mxu1  ;;  %v763_v52 = vpop.f32.mrb[15].mxu0 }
 0x112   :  { %v803_v53 = vpop.f32.mrb[15].mxu1 }
 0x113   :  { %v488_v54 = vadd.f32 %v801_v50, %v761_v46 }
 0x115   :  { %v507_v55 = vadd.f32 %v506_v42, %v488_v54  ;;  %v514_v56 = vmul.f32 %v488_v54, %v488_v54 }
 0x117   :  { %v520_v57 = vadd.f32 %v519_v49, %v514_v56  ;;  %v531_v58 = vrot.slane %v507_v55, 4 }
 0x119   :  { %v532_v59 = vadd.f32 %v531_v58, %v507_v55  ;;  %v539_v60 = vrot.slane %v520_v57, 4 }
 0x11b   :  { %v533_v62 = vrot.slane %v532_v59, 2  ;;  %v540_v0 = vadd.f32 %v539_v60, %v520_v57 }
 0x11d   :  { %v534_v1 = vadd.f32 %v533_v62, %v532_v59  ;;  %v541_v2 = vrot.slane %v540_v0, 2 }
 0x11f   :  { %v535_v3 = vrot.slane %v534_v1, 1  ;;  %v542_v4 = vadd.f32 %v541_v2, %v540_v0 }
 0x121   :  { %v536_v5 = vadd.f32 %v535_v3, %v534_v1  ;;  %v543_v6 = vrot.slane %v542_v4, 1 }
 0x123   :  { %v537_v7 = vmul.f32 0.02, %v536_v5  ;;  %v544_v8 = vadd.f32 %v543_v6, %v542_v4 }
 0x125   :  { %v545_v9 = vmul.f32 0.02, %v544_v8  ;;  %v546_v10 = vmul.f32 %v537_v7, %v537_v7 }
 0x127   :  { %v547_v11 = vsub.f32 %v545_v9, %v546_v10 }
 0x129   :  { %v548_v12 = vmax.f32 %v547_v11, 0.0 }
 0x12b   :  { %v550_v13 = vadd.f32 1e-05, %v548_v12 }
 0x12d   :  { %859 = vrsqrt.f32 %v550_v13 }
 0x137   :  { %v860_v20 = vpop.eup %859 }
 0x138   :  { %v552_v21 = vmul.f32 %v860_v20, %v549_v17 }
 0x13a   :  { %v554_v23 = vmul.f32 %v552_v21, %v537_v7  ;;  %v566_v24 = vrot.slane %v552_v21, %v565_v18 }
 0x13c   :  { %v555_v25 = vsub.f32 %v553_v22, %v554_v23  ;;  %v567_v26 = vmul.f32 %v566_v24, %v1019_v61  ;;  %v568_v27 = vmul.f32 %v566_v24, %v1021_v63  ;;  %v569_v28 = vmul.f32 %v566_v24, %v1029_v15 }
 0x13d   :  { %v570_v29 = vmul.f32 %v566_v24, %v1034_v19  ;;  %v571_v30 = vmul.f32 %v566_v24, %v480_v35  ;;  %v572_v31 = vmul.f32 %v566_v24, %v483_v39  ;;  %v573_v32 = vmul.f32 %v566_v24, %v488_v54 }
 0x13e   :  { %v577_v33 = vrot.slane %v555_v25, %v565_v18 }
 0x140   :  { %v578_v34 = vadd.f32 %v577_v33, %v567_v26  ;;  %v579_v36 = vadd.f32 %v577_v33, %v568_v27  ;;  %v580_v37 = vadd.f32 %v577_v33, %v569_v28  ;;  %v581_v38 = vadd.f32 %v577_v33, %v570_v29 }
 0x141   :  { %v582_v40 = vadd.f32 %v577_v33, %v571_v30  ;;  %v583_v41 = vadd.f32 %v577_v33, %v572_v31  ;;  %v584_v42 = vadd.f32 %v577_v33, %v573_v32 }
 0x142   :  { %vm585_vm0 = vcmp.ge.f32.partialorder %v578_v34, 0.0  ;;  %vm586_vm1 = vcmp.ge.f32.partialorder %v579_v36, 0.0  ;;  %vm587_vm2 = vcmp.ge.f32.partialorder %v580_v37, 0.0  ;;  %vm588_vm3 = vcmp.ge.f32.partialorder %v581_v38, 0.0 }
 0x143   :  { %vm589_vm4 = vcmp.ge.f32.partialorder %v582_v40, 0.0  ;;  %vm590_vm5 = vcmp.ge.f32.partialorder %v583_v41, 0.0  ;;  %vm591_vm6 = vcmp.ge.f32.partialorder %v584_v42, 0.0  ;;  %v592_v61 = vmul.f32 0.2, %v578_v34 }
 0x144   :  { %v593_v63 = vmul.f32 0.2, %v579_v36  ;;  %v594_v15 = vmul.f32 0.2, %v580_v37  ;;  %v595_v19 = vmul.f32 0.2, %v581_v38 }
 0x145   :  { %v596_v35 = vmul.f32 0.2, %v582_v40  ;;  %v597_v39 = vmul.f32 0.2, %v583_v41  ;;  %v598_v43 = vmul.f32 0.2, %v584_v42  ;;  %v599_v44 = vsel %vm585_vm0, %v578_v34, %v592_v61 }
 0x146   :  { %v600_v45 = vsel %vm586_vm1, %v579_v36, %v593_v63  ;;  %v601_v46 = vsel %vm587_vm2, %v580_v37, %v594_v15  ;;  %v602_v47 = vsel %vm588_vm3, %v581_v38, %v595_v19 }
 0x147   :  { %v603_v48 = vsel %vm589_vm4, %v582_v40, %v596_v35  ;;  %v604_v49 = vsel %vm590_vm5, %v583_v41, %v597_v39  ;;  %v605_v50 = vsel %vm591_vm6, %v584_v42, %v598_v43  ;;  %v711_v51 = vpack.c.bf16 %v600_v45, %v599_v44 }
 0x148   :  { %v707_v52 = vpack.c.bf16 %v605_v50, %v605_v50  ;;  %v716_v53 = vpack.c.bf16 %v602_v47, %v601_v46  ;;  %v721_v54 = vpack.c.bf16 %v604_v49, %v603_v48 }
 0x149   :  { %712 = vst [vmem:[%s1064_s3] sm:$0xff] %v711_v51  }
 0x14a   :  { %723 = vst [vmem:[%s1064_s3 + $0x8] sm:$0xff] %v716_v53   ;;  %724 = vst [vmem:[%s1064_s3 + $0x10] sm:$0xff] %v721_v54  }
 0x14b   :  { %641 = vst [vmem:[%s1064_s3 + $0x18] sm:$0xf] %v707_v52 }

// kernel: _lambda_.20
= control target key start
LH: loop header
LB: loop body
LE: loop exit
PB: predicated region body
PF: predicated region fallthrough
CT: control target
= control target key end

     0   :  { %s2044_s1 = inlined_call_operand.vmem [shape: bf16[1024,128], index: 1, kind: input, shape index: {}]   ;;  %s2045_s0 = inlined_call_operand.vmem [shape: bf16[72,1024], index: 0, kind: input, shape index: {}]   ;;  %s2046_s2 = inlined_call_operand.vmem [shape: f32[8,128], index: 2, kind: input, shape index: {}]   ;;  %s2047_s3 = inlined_call_operand.vmem [shape: bf16[72,128], index: 3, kind: output, shape index: {}]  }
   0x1   :  { %v1557_v0 = vld [vmem:[%s2044_s1 + $0x40] sm:$0xff]   ;;  %v1561_v4 = vld [vmem:[%s2044_s1 + $0x48] sm:$0xff]   ;;  %v1565_v8 = vld [vmem:[%s2044_s1 + $0x50] sm:$0xff]  }
   0x2   :  { %v1558_v1 = vld [vmem:[%s2044_s1 + $0xc0] sm:$0xff]   ;;  %1373 = vmatprep.subr.bf16.mxu0 %v1557_v0  ;;  %v1562_v5 = vld [vmem:[%s2044_s1 + $0xc8] sm:$0xff]   ;;  %v1566_v9 = vld [vmem:[%s2044_s1 + $0xd0] sm:$0xff]  }
   0x3   :  { %v1559_v2 = vld [vmem:[%s2044_s1] sm:$0xff]   ;;  %1419 = vmatprep.subr.bf16.mxu1 %v1558_v1  ;;  %v1563_v6 = vld [vmem:[%s2044_s1 + $0x8] sm:$0xff]   ;;  %v1567_v10 = vld [vmem:[%s2044_s1 + $0x10] sm:$0xff]  }
   0x4   :  { %v1560_v3 = vld [vmem:[%s2044_s1 + $0x80] sm:$0xff]   ;;  %1374 = vmatpush3.bf16.msra.mxu0 %v1559_v2  ;;  %v1564_v7 = vld [vmem:[%s2044_s1 + $0x88] sm:$0xff]   ;;  %v1568_v11 = vld [vmem:[%s2044_s1 + $0x90] sm:$0xff]  }
   0x5   :  { %1420 = vmatpush3.bf16.msra.mxu1 %v1560_v3  ;;  %1375 = vmatprep.subr.bf16.mxu0 %v1561_v4  ;;  %v1569_v12 = vld [vmem:[%s2044_s1 + $0x58] sm:$0xff]   ;;  %v1573_v16 = vld [vmem:[%s2044_s1 + $0x60] sm:$0xff]   ;;  %v1577_v20 = vld [vmem:[%s2044_s1 + $0x68] sm:$0xff]  }
   0x6   :  { %1421 = vmatprep.subr.bf16.mxu1 %v1562_v5  ;;  %v1570_v13 = vld [vmem:[%s2044_s1 + $0xd8] sm:$0xff]   ;;  %v1574_v17 = vld [vmem:[%s2044_s1 + $0xe0] sm:$0xff]   ;;  %v1578_v21 = vld [vmem:[%s2044_s1 + $0xe8] sm:$0xff]  }
   0x7   :  { %v1571_v14 = vld [vmem:[%s2044_s1 + $0x18] sm:$0xff]   ;;  %v1575_v18 = vld [vmem:[%s2044_s1 + $0x20] sm:$0xff]   ;;  %v1579_v22 = vld [vmem:[%s2044_s1 + $0x28] sm:$0xff]  }
   0x8   :  { %1376 = vmatpush3.bf16.msra.mxu0 %v1563_v6  ;;  %v1572_v15 = vld [vmem:[%s2044_s1 + $0x98] sm:$0xff]   ;;  %v1576_v19 = vld [vmem:[%s2044_s1 + $0xa0] sm:$0xff]   ;;  %v1580_v23 = vld [vmem:[%s2044_s1 + $0xa8] sm:$0xff]  }
   0x9   :  { %1422 = vmatpush3.bf16.msra.mxu1 %v1564_v7  ;;  %1377 = vmatprep.subr.bf16.mxu0 %v1565_v8  ;;  %v1581_v24 = vld [vmem:[%s2044_s1 + $0x70] sm:$0xff]   ;;  %v1585_v28 = vld [vmem:[%s2044_s1 + $0x78] sm:$0xff]   ;;  %v21_v32 = vld [vmem:[%s2045_s0] sm:$0xff] }
   0xa   :  { %1423 = vmatprep.subr.bf16.mxu1 %v1566_v9  ;;  %v1582_v25 = vld [vmem:[%s2044_s1 + $0xf0] sm:$0xff]   ;;  %v1586_v29 = vld [vmem:[%s2044_s1 + $0xf8] sm:$0xff]   ;;  %v25_v33 = vld [vmem:[%s2045_s0 + $0x20] sm:$0xff] }
   0xb   :  { %v1583_v26 = vld [vmem:[%s2044_s1 + $0x30] sm:$0xff]   ;;  %v1587_v30 = vld [vmem:[%s2044_s1 + $0x38] sm:$0xff]   ;;  %v22_v34 = vld [vmem:[%s2045_s0 + $0x8] sm:$0xff]  ;;  %v1228_v35 = vcombine.low %v21_v32, %v25_v33  ;;  %v1229_v36 = vcombine.high %v21_v32, %v25_v33 }
   0xc   :  { %1378 = vmatpush3.bf16.msra.mxu0 %v1567_v10  ;;  %v1584_v27 = vld [vmem:[%s2044_s1 + $0xb0] sm:$0xff]   ;;  %v1588_v31 = vld [vmem:[%s2044_s1 + $0xb8] sm:$0xff]   ;;  %v26_v37 = vld [vmem:[%s2045_s0 + $0x28] sm:$0xff] }
   0xd   :  { %1424 = vmatpush3.bf16.msra.mxu1 %v1568_v11  ;;  %1379 = vmatprep.subr.bf16.mxu0 %v1569_v12  ;;  %v1230_v38 = vcombine.low %v22_v34, %v26_v37  ;;  %v1231_v39 = vcombine.high %v22_v34, %v26_v37  ;;  %v1589_v40 = vld [vmem:[%s2044_s1 + $0x140] sm:$0xff]   ;;  %v1593_v44 = vld [vmem:[%s2044_s1 + $0x148] sm:$0xff]   ;;  %v1597_v56 = vld [vmem:[%s2044_s1 + $0x150] sm:$0xff]  }
   0xe   :  { %1425 = vmatprep.subr.bf16.mxu1 %v1570_v13  ;;  %789 = vmatprep.mubr.bf16.mxu0 %v1229_v36  ;;  %v1590_v41 = vld [vmem:[%s2044_s1 + $0x100] sm:$0xff]   ;;  %v1594_v45 = vld [vmem:[%s2044_s1 + $0x108] sm:$0xff]   ;;  %v1598_v57 = vld [vmem:[%s2044_s1 + $0x110] sm:$0xff]  }
   0xf   :  { %861 = vmatprep.mubr.bf16.mxu1 %v1231_v39  ;;  %v1591_v42 = vld [vmem:[%s2044_s1 + $0x1c0] sm:$0xff]   ;;  %v30_v49 = vld [vmem:[%s2045_s0 + $0x48] sm:$0xff]  ;;  %v1599_v58 = vld [vmem:[%s2044_s1 + $0x1d0] sm:$0xff]  }
  0x10   :  { %1380 = vmatpush3.bf16.msra.mxu0 %v1571_v14  ;;  %v1592_v43 = vld [vmem:[%s2044_s1 + $0x180] sm:$0xff]   ;;  %v34_v50 = vld [vmem:[%s2045_s0 + $0x68] sm:$0xff]  ;;  %v1600_v59 = vld [vmem:[%s2044_s1 + $0x190] sm:$0xff]  }
  0x11   :  { %1426 = vmatpush3.bf16.msra.mxu1 %v1572_v15  ;;  %1381 = vmatprep.subr.bf16.mxu0 %v1573_v16  ;;  %v29_v46 = vld [vmem:[%s2045_s0 + $0x40] sm:$0xff]  ;;  %v1239_v52 = vcombine.high %v30_v49, %v34_v50  ;;  %v1595_v53 = vld [vmem:[%s2044_s1 + $0x1c8] sm:$0xff]   ;;  %v1238_v54 = vcombine.low %v30_v49, %v34_v50  ;;  %v1601_v2 = vld [vmem:[%s2044_s1 + $0x158] sm:$0xff]  }
  0x12   :  { %1427 = vmatprep.subr.bf16.mxu1 %v1574_v17  ;;  %v33_v47 = vld [vmem:[%s2045_s0 + $0x60] sm:$0xff]  ;;  %v1596_v55 = vld [vmem:[%s2044_s1 + $0x188] sm:$0xff]   ;;  %v1602_v5 = vld [vmem:[%s2044_s1 + $0x118] sm:$0xff]  }
  0x13   :  { %v1237_v48 = vcombine.high %v29_v46, %v33_v47  ;;  %v1236_v51 = vcombine.low %v29_v46, %v33_v47  ;;  %v37_v60 = vld [vmem:[%s2045_s0 + $0x80] sm:$0xff]  ;;  %v38_v62 = vld [vmem:[%s2045_s0 + $0x88] sm:$0xff]  ;;  %v1603_v6 = vld [vmem:[%s2044_s1 + $0x1d8] sm:$0xff]  }
  0x14   :  { %1382 = vmatpush3.bf16.msra.mxu0 %v1575_v18  ;;  %v41_v61 = vld [vmem:[%s2045_s0 + $0xa0] sm:$0xff]  ;;  %v42_v63 = vld [vmem:[%s2045_s0 + $0xa8] sm:$0xff]  ;;  %v1604_v7 = vld [vmem:[%s2044_s1 + $0x198] sm:$0xff]  }
  0x15   :  { %1428 = vmatpush3.bf16.msra.mxu1 %v1576_v19  ;;  %1383 = vmatprep.subr.bf16.mxu0 %v1577_v20  ;;  %v1245_v0 = vcombine.high %v37_v60, %v41_v61  ;;  %v1247_v1 = vcombine.high %v38_v62, %v42_v63  ;;  %v1244_v3 = vcombine.low %v37_v60, %v41_v61  ;;  %v1605_v8 = vld [vmem:[%s2044_s1 + $0x160] sm:$0xff]   ;;  %v46_v13 = vld [vmem:[%s2045_s0 + $0xc8] sm:$0xff]  ;;  %v1620_v33 = vld [vmem:[%s2044_s1 + $0x1b0] sm:$0xff]  }
  0x16   :  { %1429 = vmatprep.subr.bf16.mxu1 %v1578_v21  ;;  %v1246_v4 = vcombine.low %v38_v62, %v42_v63  ;;  %v1606_v9 = vld [vmem:[%s2044_s1 + $0x120] sm:$0xff]   ;;  %v50_v15 = vld [vmem:[%s2045_s0 + $0xe8] sm:$0xff]  ;;  %v1621_v34 = vld [vmem:[%s2044_s1 + $0x178] sm:$0xff]  }
  0x17   :  { %v1607_v10 = vld [vmem:[%s2044_s1 + $0x1e0] sm:$0xff]   ;;  %v1255_v17 = vcombine.high %v46_v13, %v50_v15  ;;  %v1254_v19 = vcombine.low %v46_v13, %v50_v15  ;;  %v1609_v20 = vld [vmem:[%s2044_s1 + $0x168] sm:$0xff]   ;;  %v1623_v36 = vld [vmem:[%s2044_s1 + $0x1f8] sm:$0xff]  }
  0x18   :  { %1384 = vmatpush3.bf16.msra.mxu0 %v1579_v22  ;;  %v45_v11 = vld [vmem:[%s2045_s0 + $0xc0] sm:$0xff]  ;;  %v1610_v21 = vld [vmem:[%s2044_s1 + $0x128] sm:$0xff]   ;;  %v1624_v37 = vld [vmem:[%s2044_s1 + $0x1b8] sm:$0xff]  }
  0x19   :  { %1430 = vmatpush3.bf16.msra.mxu1 %v1580_v23  ;;  %1385 = vmatprep.subr.bf16.mxu0 %v1581_v24  ;;  %v49_v12 = vld [vmem:[%s2045_s0 + $0xe0] sm:$0xff]  ;;  %v1611_v22 = vld [vmem:[%s2044_s1 + $0x1e8] sm:$0xff]   ;;  %v1613_v24 = vld [vmem:[%s2044_s1 + $0x170] sm:$0xff]  }
  0x1a   :  { %1431 = vmatprep.subr.bf16.mxu1 %v1582_v25  ;;  %v1253_v14 = vcombine.high %v45_v11, %v49_v12  ;;  %v1252_v16 = vcombine.low %v45_v11, %v49_v12  ;;  %v1608_v18 = vld [vmem:[%s2044_s1 + $0x1a0] sm:$0xff]   ;;  %v1612_v23 = vld [vmem:[%s2044_s1 + $0x1a8] sm:$0xff]   ;;  %v27_v39 = vld [vmem:[%s2045_s0 + $0x30] sm:$0xff] }
  0x1b   :  { %v53_v25 = vld [vmem:[%s2045_s0 + $0x100] sm:$0xff]  ;;  %v32_v47 = vld [vmem:[%s2045_s0 + $0x58] sm:$0xff]  ;;  %v47_v60 = vld [vmem:[%s2045_s0 + $0xd0] sm:$0xff] }
  0x1c   :  { %1386 = vmatpush3.bf16.msra.mxu0 %v1583_v26  ;;  %v54_v26 = vld [vmem:[%s2045_s0 + $0x108] sm:$0xff]  ;;  %v51_v61 = vld [vmem:[%s2045_s0 + $0xf0] sm:$0xff]  ;;  %v48_v62 = vld [vmem:[%s2045_s0 + $0xd8] sm:$0xff] }
  0x1d   :  { %1432 = vmatpush3.bf16.msra.mxu1 %v1584_v27  ;;  %1387 = vmatprep.subr.bf16.mxu0 %v1585_v28  ;;  %v1261_v27 = vcombine.high %v53_v25, %v53_v25  ;;  %v1263_v28 = vcombine.high %v54_v26, %v54_v26  ;;  %v1262_v32 = vcombine.low %v54_v26, %v54_v26  ;;  %v52_v63 = vld [vmem:[%s2045_s0 + $0xf8] sm:$0xff] }
  0x1e   :  { %1433 = vmatprep.subr.bf16.mxu1 %v1586_v29  ;;  %v1616_v29 = vld [vmem:[%s2044_s1 + $0x130] sm:$0xff]  }
  0x20   :  { %1388 = vmatpush3.bf16.msra.mxu0 %v1587_v30  ;;  %v1260_v30 = vcombine.low %v53_v25, %v53_v25 }
  0x21   :  { %1434 = vmatpush3.bf16.msra.mxu1 %v1588_v31  ;;  %1465 = vmatprep.subr.bf16.mxu0 %v1589_v40  ;;  %v1619_v31 = vld [vmem:[%s2044_s1 + $0x1f0] sm:$0xff]   ;;  %v24_v40 = vld [vmem:[%s2045_s0 + $0x18] sm:$0xff] }
  0x22   :  { %1511 = vmatprep.subr.bf16.mxu1 %v1591_v42  ;;  %v28_v42 = vld [vmem:[%s2045_s0 + $0x38] sm:$0xff] }
  0x23   :  { %790 = vmatmul.mubr.bf16.vlgmr.msra.gmra.mrb[0].mxu0 %v1228_v35  ;;  %v1622_v35 = vld [vmem:[%s2044_s1 + $0x138] sm:$0xff]   ;;  %v1235_v46 = vcombine.high %v24_v40, %v28_v42  ;;  %v1234_v49 = vcombine.low %v24_v40, %v28_v42 }
  0x24   :  { %862 = vmatmul.mubr.bf16.vlgmr.msra.gmra.mrb[0].mxu1 %v1230_v38  ;;  %1466 = vmatpush3.bf16.msra.mxu0 %v1590_v41  ;;  %v23_v38 = vld [vmem:[%s2045_s0 + $0x10] sm:$0xff] }
  0x25   :  { %1512 = vmatpush3.bf16.msra.mxu1 %v1592_v43  ;;  %1467 = vmatprep.subr.bf16.mxu0 %v1593_v44  ;;  %v1233_v41 = vcombine.high %v23_v38, %v27_v39  ;;  %v31_v43 = vld [vmem:[%s2045_s0 + $0x50] sm:$0xff] }
  0x26   :  { %797 = vmatprep.mubr.bf16.mxu0 %v1237_v48  ;;  %869 = vmatprep.mubr.bf16.mxu1 %v1239_v52  ;;  %v35_v44 = vld [vmem:[%s2045_s0 + $0x70] sm:$0xff]  ;;  %v36_v48 = vld [vmem:[%s2045_s0 + $0x78] sm:$0xff] }
  0x27   :  { %1513 = vmatprep.subr.bf16.mxu1 %v1595_v53  ;;  %v1241_v50 = vcombine.high %v31_v43, %v35_v44  ;;  %v39_v52 = vld [vmem:[%s2045_s0 + $0x90] sm:$0xff] }
  0x28   :  { %1468 = vmatpush3.bf16.msra.mxu0 %v1594_v45  ;;  %v1232_v45 = vcombine.low %v23_v38, %v27_v39  ;;  %v43_v53 = vld [vmem:[%s2045_s0 + $0xb0] sm:$0xff] }
  0x29   :  { %1514 = vmatpush3.bf16.msra.mxu1 %v1596_v55  ;;  %1469 = vmatprep.subr.bf16.mxu0 %v1597_v56  ;;  %v44_v55 = vld [vmem:[%s2045_s0 + $0xb8] sm:$0xff]  ;;  %v1240_v56 = vcombine.low %v31_v43, %v35_v44 }
  0x2a   :  { %1515 = vmatprep.subr.bf16.mxu1 %v1599_v58  ;;  %v1249_v58 = vcombine.high %v39_v52, %v43_v53 }
  0x2b   :  { %798 = vmatmul.mubr.bf16.gmra.mrb[4].mxu0 %v1236_v51  ;;  %v1243_v51 = vcombine.high %v32_v47, %v36_v48 }
  0x2c   :  { %870 = vmatmul.mubr.bf16.gmra.mrb[4].mxu1 %v1238_v54  ;;  %1470 = vmatpush3.bf16.msra.mxu0 %v1598_v57  ;;  %v40_v54 = vld [vmem:[%s2045_s0 + $0x98] sm:$0xff]  ;;  %v1242_v57 = vcombine.low %v32_v47, %v36_v48 }
  0x2d   :  { %1516 = vmatpush3.bf16.msra.mxu1 %v1600_v59  ;;  %805 = vmatprep.mubr.bf16.mxu0 %v1245_v0  ;;  %v1251_v59 = vcombine.high %v40_v54, %v44_v55  ;;  %v1248_v0 = vcombine.low %v39_v52, %v43_v53 }
  0x2e   :  { %877 = vmatprep.mubr.bf16.mxu1 %v1247_v1  ;;  %1471 = vmatprep.subr.bf16.mxu0 %v1601_v2  ;;  %v1250_v1 = vcombine.low %v40_v54, %v44_v55  ;;  %v1257_v2 = vcombine.high %v47_v60, %v51_v61 }
  0x2f   :  { %1517 = vmatprep.subr.bf16.mxu1 %v1603_v6  ;;  %v1256_v6 = vcombine.low %v47_v60, %v51_v61 }
  0x30   :  { %1472 = vmatpush3.bf16.msra.mxu0 %v1602_v5  ;;  %v56_v5 = vld [vmem:[%s2045_s0 + $0x118] sm:$0xff] }
  0x31   :  { %1518 = vmatpush3.bf16.msra.mxu1 %v1604_v7  ;;  %1473 = vmatprep.subr.bf16.mxu0 %v1605_v8  ;;  %v1258_v7 = vcombine.low %v48_v62, %v52_v63  ;;  %v1266_v11 = vcombine.low %v56_v5, %v56_v5 }
  0x32   :  { %1519 = vmatprep.subr.bf16.mxu1 %v1607_v10 }
  0x33   :  { %806 = vmatmul.mubr.bf16.gmra.mrb[8].mxu0 %v1244_v3  ;;  %v1259_v3 = vcombine.high %v48_v62, %v52_v63 }
  0x34   :  { %878 = vmatmul.mubr.bf16.gmra.mrb[8].mxu1 %v1246_v4  ;;  %1474 = vmatpush3.bf16.msra.mxu0 %v1606_v9  ;;  %v55_v4 = vld [vmem:[%s2045_s0 + $0x110] sm:$0xff]  ;;  %v1267_v9 = vcombine.high %v56_v5, %v56_v5 }
  0x35   :  { %813 = vmatprep.mubr.bf16.mxu0 %v1253_v14  ;;  %885 = vmatprep.mubr.bf16.mxu1 %v1255_v17  ;;  %v1265_v8 = vcombine.high %v55_v4, %v55_v4  ;;  %v1264_v10 = vcombine.low %v55_v4, %v55_v4 }
  0x36   :  { %1520 = vmatpush3.bf16.msra.mxu1 %v1608_v18  ;;  %1475 = vmatprep.subr.bf16.mxu0 %v1609_v20 }
  0x37   :  { %1521 = vmatprep.subr.bf16.mxu1 %v1611_v22 }
  0x38   :  { %1476 = vmatpush3.bf16.msra.mxu0 %v1610_v21 }
  0x39   :  { %1477 = vmatprep.subr.bf16.mxu0 %v1613_v24 }
  0x3a   :  { %1522 = vmatpush3.bf16.msra.mxu1 %v1612_v23 }
  0x3b   :  { %814 = vmatmul.mubr.bf16.gmra.mrb[12].mxu0 %v1252_v16  ;;  %1523 = vmatprep.subr.bf16.mxu1 %v1619_v31 }
  0x3c   :  { %886 = vmatmul.mubr.bf16.gmra.mrb[12].mxu1 %v1254_v19  ;;  %821 = vmatprep.mubr.bf16.mxu0 %v1261_v27 }
  0x3d   :  { %893 = vmatprep.mubr.bf16.mxu1 %v1263_v28  ;;  %1478 = vmatpush3.bf16.msra.mxu0 %v1616_v29 }
  0x3e   :  { %1524 = vmatpush3.bf16.msra.mxu1 %v1620_v33  ;;  %1479 = vmatprep.subr.bf16.mxu0 %v1621_v34 }
  0x3f   :  { %1525 = vmatprep.subr.bf16.mxu1 %v1623_v36 }
  0x41   :  { %1480 = vmatpush3.bf16.msra.mxu0 %v1622_v35 }
  0x42   :  { %1526 = vmatpush3.bf16.msra.mxu1 %v1624_v37 }
  0x43   :  { %822 = vmatmul.mubr.bf16.gmra.mrb[16].mxu0 %v1260_v30 }
  0x44   :  { %894 = vmatmul.mubr.bf16.gmra.mrb[16].mxu1 %v1262_v32  ;;  %933 = vmatprep.mubr.bf16.mxu0 %v1233_v41 }
  0x45   :  { %1005 = vmatprep.mubr.bf16.mxu1 %v1235_v46 }
  0x4b   :  { %934 = vmatmul.mubr.bf16.vlgmr.msra.gmra.mrb[20].mxu0 %v1232_v45 }
  0x4c   :  { %1006 = vmatmul.mubr.bf16.vlgmr.msra.gmra.mrb[20].mxu1 %v1234_v49  ;;  %941 = vmatprep.mubr.bf16.mxu0 %v1241_v50 }
  0x4d   :  { %1013 = vmatprep.mubr.bf16.mxu1 %v1243_v51 }
  0x53   :  { %942 = vmatmul.mubr.bf16.gmra.mrb[24].mxu0 %v1240_v56 }
  0x54   :  { %1014 = vmatmul.mubr.bf16.gmra.mrb[24].mxu1 %v1242_v57  ;;  %949 = vmatprep.mubr.bf16.mxu0 %v1249_v58 }
  0x55   :  { %1021 = vmatprep.mubr.bf16.mxu1 %v1251_v59 }
  0x5b   :  { %950 = vmatmul.mubr.bf16.gmra.mrb[28].mxu0 %v1248_v0 }
  0x5c   :  { %1022 = vmatmul.mubr.bf16.gmra.mrb[28].mxu1 %v1250_v1  ;;  %957 = vmatprep.mubr.bf16.mxu0 %v1257_v2 }
  0x5d   :  { %1029 = vmatprep.mubr.bf16.mxu1 %v1259_v3 }
  0x63   :  { %958 = vmatmul.mubr.bf16.gmra.mrb[32].mxu0 %v1256_v6 }
  0x64   :  { %1030 = vmatmul.mubr.bf16.gmra.mrb[32].mxu1 %v1258_v7  ;;  %965 = vmatprep.mubr.bf16.mxu0 %v1265_v8 }
  0x65   :  { %1037 = vmatprep.mubr.bf16.mxu1 %v1267_v9 }
  0x6b   :  { %966 = vmatmul.mubr.bf16.gmra.mrb[36].mxu0 %v1264_v10 }
  0x6c   :  { %1038 = vmatmul.mubr.bf16.gmra.mrb[36].mxu1 %v1266_v11 }
  0xf6   :  { %v1389_v12 = vpop.f32.mrb[0].mxu0 }
  0xf7   :  { %v1435_v13 = vpop.f32.mrb[0].mxu1  ;;  %v1390_v14 = vpop.f32.mrb[1].mxu0 }
  0xf8   :  { %v1391_v15 = vadd.f32 %v1390_v14, %v1389_v12  ;;  %v1436_v16 = vpop.f32.mrb[1].mxu1  ;;  %v1392_v17 = vpop.f32.mrb[2].mxu0 }
  0xf9   :  { %v1437_v18 = vadd.f32 %v1436_v16, %v1435_v13  ;;  %v1438_v19 = vpop.f32.mrb[2].mxu1  ;;  %v1393_v20 = vpop.f32.mrb[3].mxu0 }
  0xfa   :  { %v1394_v21 = vadd.f32 %v1393_v20, %v1392_v17  ;;  %v1439_v22 = vpop.f32.mrb[3].mxu1 }
  0xfb   :  { %v1951_v23 = vadd.f32 %v1437_v18, %v1391_v15  ;;  %v1440_v24 = vadd.f32 %v1439_v22, %v1438_v19 }
  0xfd   :  { %v1953_v25 = vadd.f32 %v1440_v24, %v1394_v21 }
  0xfe   :  { %v1395_v26 = vpop.f32.mrb[4].mxu0 }
  0xff   :  { %v1441_v27 = vpop.f32.mrb[4].mxu1  ;;  %v1396_v28 = vpop.f32.mrb[5].mxu0 }
 0x100   :  { %v1397_v29 = vadd.f32 %v1396_v28, %v1395_v26  ;;  %v1442_v30 = vpop.f32.mrb[5].mxu1  ;;  %v1398_v31 = vpop.f32.mrb[6].mxu0 }
 0x101   :  { %v1443_v32 = vadd.f32 %v1442_v30, %v1441_v27  ;;  %v1444_v33 = vpop.f32.mrb[6].mxu1  ;;  %v1399_v34 = vpop.f32.mrb[7].mxu0 }
 0x102   :  { %v1400_v35 = vadd.f32 %v1399_v34, %v1398_v31  ;;  %v1445_v36 = vpop.f32.mrb[7].mxu1 }
 0x103   :  { %v1955_v37 = vadd.f32 %v1443_v32, %v1397_v29  ;;  %v1446_v38 = vadd.f32 %v1445_v36, %v1444_v33 }
 0x105   :  { %v1957_v39 = vadd.f32 %v1446_v38, %v1400_v35 }
 0x106   :  { %v1401_v40 = vpop.f32.mrb[8].mxu0 }
 0x107   :  { %v1447_v41 = vpop.f32.mrb[8].mxu1  ;;  %v1402_v42 = vpop.f32.mrb[9].mxu0 }
 0x108   :  { %v1403_v43 = vadd.f32 %v1402_v42, %v1401_v40  ;;  %v1448_v44 = vpop.f32.mrb[9].mxu1  ;;  %v1404_v45 = vpop.f32.mrb[10].mxu0 }
 0x109   :  { %v1449_v46 = vadd.f32 %v1448_v44, %v1447_v41  ;;  %v1450_v47 = vpop.f32.mrb[10].mxu1  ;;  %v1405_v48 = vpop.f32.mrb[11].mxu0 }
 0x10a   :  { %v1406_v49 = vadd.f32 %v1405_v48, %v1404_v45  ;;  %v1451_v50 = vpop.f32.mrb[11].mxu1 }
 0x10b   :  { %v1959_v51 = vadd.f32 %v1449_v46, %v1403_v43  ;;  %v1452_v52 = vadd.f32 %v1451_v50, %v1450_v47 }
 0x10d   :  { %v1961_v53 = vadd.f32 %v1452_v52, %v1406_v49 }
 0x10e   :  { %v1407_v54 = vpop.f32.mrb[12].mxu0 }
 0x10f   :  { %v1453_v55 = vpop.f32.mrb[12].mxu1  ;;  %v1408_v56 = vpop.f32.mrb[13].mxu0 }
 0x110   :  { %v1409_v57 = vadd.f32 %v1408_v56, %v1407_v54  ;;  %v1454_v58 = vpop.f32.mrb[13].mxu1  ;;  %v1410_v59 = vpop.f32.mrb[14].mxu0 }
 0x111   :  { %v1455_v60 = vadd.f32 %v1454_v58, %v1453_v55  ;;  %v1456_v61 = vpop.f32.mrb[14].mxu1  ;;  %v1411_v62 = vpop.f32.mrb[15].mxu0 }
 0x112   :  { %v1412_v63 = vadd.f32 %v1411_v62, %v1410_v59  ;;  %v1457_v0 = vpop.f32.mrb[15].mxu1 }
 0x113   :  { %v1963_v1 = vadd.f32 %v1455_v60, %v1409_v57  ;;  %v1458_v2 = vadd.f32 %v1457_v0, %v1456_v61 }
 0x115   :  { %v1965_v3 = vadd.f32 %v1458_v2, %v1412_v63 }
 0x116   :  { %v1413_v4 = vpop.f32.mrb[16].mxu0 }
 0x117   :  { %v1459_v5 = vpop.f32.mrb[16].mxu1  ;;  %v1414_v6 = vpop.f32.mrb[17].mxu0 }
 0x118   :  { %v1415_v7 = vadd.f32 %v1414_v6, %v1413_v4  ;;  %v1460_v8 = vpop.f32.mrb[17].mxu1  ;;  %v1416_v9 = vpop.f32.mrb[18].mxu0 }
 0x119   :  { %v1461_v10 = vadd.f32 %v1460_v8, %v1459_v5  ;;  %v1462_v11 = vpop.f32.mrb[18].mxu1  ;;  %v1417_v12 = vpop.f32.mrb[19].mxu0 }
 0x11a   :  { %v1463_v13 = vpop.f32.mrb[19].mxu1 }
 0x11b   :  { %v1967_v14 = vadd.f32 %v1461_v10, %v1415_v7 }
 0x11e   :  { %v1481_v15 = vpop.f32.mrb[20].mxu0 }
 0x11f   :  { %v1527_v16 = vpop.f32.mrb[20].mxu1  ;;  %v1482_v17 = vpop.f32.mrb[21].mxu0 }
 0x120   :  { %v1483_v18 = vadd.f32 %v1482_v17, %v1481_v15  ;;  %v1528_v19 = vpop.f32.mrb[21].mxu1  ;;  %v1484_v20 = vpop.f32.mrb[22].mxu0 }
 0x121   :  { %v1529_v21 = vadd.f32 %v1528_v19, %v1527_v16  ;;  %v1530_v22 = vpop.f32.mrb[22].mxu1  ;;  %v1485_v24 = vpop.f32.mrb[23].mxu0 }
 0x122   :  { %v936_v26 = vadd.f32 %v1483_v18, %v1951_v23  ;;  %v1486_v27 = vadd.f32 %v1485_v24, %v1484_v20  ;;  %v1531_v28 = vpop.f32.mrb[23].mxu1 }
 0x123   :  { %v1532_v29 = vadd.f32 %v1531_v28, %v1530_v22 }
 0x124   :  { %v1970_v30 = vadd.f32 %v1529_v21, %v936_v26  ;;  %v939_v31 = vadd.f32 %v1486_v27, %v1953_v25 }
 0x126   :  { %v1973_v32 = vadd.f32 %v1532_v29, %v939_v31  ;;  %v1487_v33 = vpop.f32.mrb[24].mxu0  ;;  %v1064_v36 = vmul.f32 %v1970_v30, %v1970_v30 }
 0x127   :  { %v1533_v34 = vpop.f32.mrb[24].mxu1  ;;  %v1488_v35 = vpop.f32.mrb[25].mxu0 }
 0x128   :  { %v1056_v38 = vadd.f32 %v1973_v32, %v1970_v30  ;;  %v1065_v23 = vmul.f32 %v1973_v32, %v1973_v32  ;;  %v1489_v40 = vadd.f32 %v1488_v35, %v1487_v33  ;;  %v1534_v41 = vpop.f32.mrb[25].mxu1  ;;  %v1490_v42 = vpop.f32.mrb[26].mxu0 }
 0x129   :  { %v1535_v43 = vadd.f32 %v1534_v41, %v1533_v34  ;;  %v1536_v44 = vpop.f32.mrb[26].mxu1  ;;  %v1491_v25 = vpop.f32.mrb[27].mxu0 }
 0x12a   :  { %v1073_v45 = vadd.f32 %v1065_v23, %v1064_v36  ;;  %v944_v46 = vadd.f32 %v1489_v40, %v1955_v37  ;;  %v1492_v47 = vadd.f32 %v1491_v25, %v1490_v42  ;;  %v1537_v48 = vpop.f32.mrb[27].mxu1 }
 0x12b   :  { %v1538_v49 = vadd.f32 %v1537_v48, %v1536_v44 }
 0x12c   :  { %v1982_v50 = vadd.f32 %v1535_v43, %v944_v46  ;;  %v947_v52 = vadd.f32 %v1492_v47, %v1957_v39 }
 0x12e   :  { %v1057_v54 = vadd.f32 %v1056_v38, %v1982_v50  ;;  %v1066_v55 = vmul.f32 %v1982_v50, %v1982_v50  ;;  %v1988_v56 = vadd.f32 %v1538_v49, %v947_v52  ;;  %v1493_v57 = vpop.f32.mrb[28].mxu0 }
 0x12f   :  { %v1539_v58 = vpop.f32.mrb[28].mxu1  ;;  %v1494_v59 = vpop.f32.mrb[29].mxu0 }
 0x130   :  { %v1074_v60 = vadd.f32 %v1073_v45, %v1066_v55  ;;  %v1058_v37 = vadd.f32 %v1057_v54, %v1988_v56  ;;  %v1067_v61 = vmul.f32 %v1988_v56, %v1988_v56  ;;  %v1495_v62 = vadd.f32 %v1494_v59, %v1493_v57  ;;  %v1540_v63 = vpop.f32.mrb[29].mxu1  ;;  %v1496_v0 = vpop.f32.mrb[30].mxu0 }
 0x131   :  { %v1541_v39 = vadd.f32 %v1540_v63, %v1539_v58  ;;  %v1542_v2 = vpop.f32.mrb[30].mxu1  ;;  %v1497_v4 = vpop.f32.mrb[31].mxu0 }
 0x132   :  { %v1075_v5 = vadd.f32 %v1074_v60, %v1067_v61  ;;  %v952_v6 = vadd.f32 %v1495_v62, %v1959_v51  ;;  %v1498_v7 = vadd.f32 %v1497_v4, %v1496_v0  ;;  %v1543_v8 = vpop.f32.mrb[31].mxu1 }
 0x133   :  { %v1544_v9 = vadd.f32 %v1543_v8, %v1542_v2 }
 0x134   :  { %v1994_v10 = vadd.f32 %v1541_v39, %v952_v6  ;;  %v955_v11 = vadd.f32 %v1498_v7, %v1961_v53 }
 0x136   :  { %v1059_v12 = vadd.f32 %v1058_v37, %v1994_v10  ;;  %v1068_v13 = vmul.f32 %v1994_v10, %v1994_v10  ;;  %v2000_v15 = vadd.f32 %v1544_v9, %v955_v11  ;;  %v1499_v16 = vpop.f32.mrb[32].mxu0 }
 0x137   :  { %v1545_v17 = vpop.f32.mrb[32].mxu1  ;;  %v1500_v18 = vpop.f32.mrb[33].mxu0 }
 0x138   :  { %v1076_v19 = vadd.f32 %v1075_v5, %v1068_v13  ;;  %v1060_v51 = vadd.f32 %v1059_v12, %v2000_v15  ;;  %v1069_v20 = vmul.f32 %v2000_v15, %v2000_v15  ;;  %v1501_v21 = vadd.f32 %v1500_v18, %v1499_v16  ;;  %v1546_v22 = vpop.f32.mrb[33].mxu1  ;;  %v1502_v24 = vpop.f32.mrb[34].mxu0 }
 0x139   :  { %v1547_v53 = vadd.f32 %v1546_v22, %v1545_v17  ;;  %v1548_v26 = vpop.f32.mrb[34].mxu1  ;;  %v1503_v27 = vpop.f32.mrb[35].mxu0  ;;  %v1125_v17 = vlaneseq  ;;  %v1113_v22 = vld [vmem:[%s2046_s2 + $0x1] sm:$0x1] }
 0x13a   :  { %v1077_v28 = vadd.f32 %v1076_v19, %v1069_v20  ;;  %v960_v29 = vadd.f32 %v1501_v21, %v1963_v1  ;;  %v1504_v31 = vadd.f32 %v1503_v27, %v1502_v24  ;;  %v1549_v33 = vpop.f32.mrb[35].mxu1  ;;  %v1109_v19 = vld [vmem:[%s2046_s2] sm:$0x1] }
 0x13b   :  { %v1550_v34 = vadd.f32 %v1549_v33, %v1548_v26  ;;  %v1126_v18 = vshrl.u32 %v1125_v17, 7 }
 0x13c   :  { %v1032_v35 = vadd.f32 %v1547_v53, %v960_v29  ;;  %v963_v36 = vadd.f32 %v1504_v31, %v1965_v3 }
 0x13e   :  { %v1061_v38 = vadd.f32 %v1060_v51, %v1032_v35  ;;  %v1070_v23 = vmul.f32 %v1032_v35, %v1032_v35  ;;  %v1035_v40 = vadd.f32 %v1550_v34, %v963_v36  ;;  %v1505_v41 = vpop.f32.mrb[36].mxu0  ;;  %v1127_v51 = vsub.s32 0, %v1126_v18 }
 0x13f   :  { %v1551_v42 = vpop.f32.mrb[36].mxu1  ;;  %v1506_v43 = vpop.f32.mrb[37].mxu0 }
 0x140   :  { %v1078_v44 = vadd.f32 %v1077_v28, %v1070_v23  ;;  %v1062_v25 = vadd.f32 %v1061_v38, %v1035_v40  ;;  %v1071_v45 = vmul.f32 %v1035_v40, %v1035_v40  ;;  %v1507_v46 = vadd.f32 %v1506_v43, %v1505_v41  ;;  %v1552_v47 = vpop.f32.mrb[37].mxu1  ;;  %v1508_v48 = vpop.f32.mrb[38].mxu0 }
 0x141   :  { %v1553_v49 = vadd.f32 %v1552_v47, %v1551_v42  ;;  %v1554_v1 = vpop.f32.mrb[38].mxu1  ;;  %v1509_v52 = vpop.f32.mrb[39].mxu0 }
 0x142   :  { %v1079_v54 = vadd.f32 %v1078_v44, %v1071_v45  ;;  %v968_v55 = vadd.f32 %v1507_v46, %v1967_v14  ;;  %v1555_v57 = vpop.f32.mrb[39].mxu1 }
 0x144   :  { %v1040_v3 = vadd.f32 %v1553_v49, %v968_v55 }
 0x146   :  { %v1063_v58 = vadd.f32 %v1062_v25, %v1040_v3  ;;  %v1072_v59 = vmul.f32 %v1040_v3, %v1040_v3 }
 0x148   :  { %v1080_v60 = vadd.f32 %v1079_v54, %v1072_v59  ;;  %v1091_v37 = vrot.slane %v1063_v58, 4 }
 0x14a   :  { %v1092_v61 = vadd.f32 %v1091_v37, %v1063_v58  ;;  %v1099_v62 = vrot.slane %v1080_v60, 4 }
 0x14c   :  { %v1093_v63 = vrot.slane %v1092_v61, 2  ;;  %v1100_v0 = vadd.f32 %v1099_v62, %v1080_v60 }
 0x14e   :  { %v1094_v39 = vadd.f32 %v1093_v63, %v1092_v61  ;;  %v1101_v2 = vrot.slane %v1100_v0, 2 }
 0x150   :  { %v1095_v4 = vrot.slane %v1094_v39, 1  ;;  %v1102_v5 = vadd.f32 %v1101_v2, %v1100_v0 }
 0x152   :  { %v1096_v6 = vadd.f32 %v1095_v4, %v1094_v39  ;;  %v1103_v7 = vrot.slane %v1102_v5, 1 }
 0x154   :  { %v1097_v8 = vmul.f32 0.013888889, %v1096_v6  ;;  %v1104_v9 = vadd.f32 %v1103_v7, %v1102_v5 }
 0x156   :  { %v1105_v11 = vmul.f32 0.013888889, %v1104_v9  ;;  %v1106_v14 = vmul.f32 %v1097_v8, %v1097_v8 }
 0x158   :  { %v1107_v12 = vsub.f32 %v1105_v11, %v1106_v14 }
 0x15a   :  { %v1108_v13 = vmax.f32 %v1107_v12, 0.0 }
 0x15c   :  { %v1110_v16 = vadd.f32 1e-05, %v1108_v13 }
 0x15e   :  { %1629 = vrsqrt.f32 %v1110_v16 }
 0x168   :  { %v1630_v20 = vpop.eup %1629 }
 0x169   :  { %v1112_v21 = vmul.f32 %v1630_v20, %v1109_v19 }
 0x16b   :  { %v1114_v24 = vmul.f32 %v1112_v21, %v1097_v8  ;;  %v1128_v53 = vrot.slane %v1112_v21, %v1127_v51 }
 0x16d   :  { %v1115_v26 = vsub.f32 %v1113_v22, %v1114_v24  ;;  %v1129_v27 = vmul.f32 %v1128_v53, %v1970_v30  ;;  %v1130_v28 = vmul.f32 %v1128_v53, %v1973_v32  ;;  %v1131_v29 = vmul.f32 %v1128_v53, %v1982_v50 }
 0x16e   :  { %v1132_v31 = vmul.f32 %v1128_v53, %v1988_v56  ;;  %v1133_v33 = vmul.f32 %v1128_v53, %v1994_v10  ;;  %v1134_v34 = vmul.f32 %v1128_v53, %v2000_v15  ;;  %v1135_v36 = vmul.f32 %v1128_v53, %v1032_v35 }
 0x16f   :  { %v1136_v38 = vmul.f32 %v1128_v53, %v1035_v40  ;;  %v1137_v23 = vmul.f32 %v1128_v53, %v1040_v3  ;;  %v1141_v41 = vrot.slane %v1115_v26, %v1127_v51 }
 0x171   :  { %v1142_v42 = vadd.f32 %v1141_v41, %v1129_v27  ;;  %v1143_v43 = vadd.f32 %v1141_v41, %v1130_v28  ;;  %v1144_v44 = vadd.f32 %v1141_v41, %v1131_v29  ;;  %v1145_v25 = vadd.f32 %v1141_v41, %v1132_v31 }
 0x172   :  { %v1146_v45 = vadd.f32 %v1141_v41, %v1133_v33  ;;  %v1147_v30 = vadd.f32 %v1141_v41, %v1134_v34  ;;  %v1148_v46 = vadd.f32 %v1141_v41, %v1135_v36  ;;  %v1149_v32 = vadd.f32 %v1141_v41, %v1136_v38 }
 0x173   :  { %v1150_v47 = vadd.f32 %v1141_v41, %v1137_v23  ;;  %vm1151_vm0 = vcmp.ge.f32.partialorder %v1142_v42, 0.0  ;;  %vm1152_vm1 = vcmp.ge.f32.partialorder %v1143_v43, 0.0  ;;  %vm1153_vm2 = vcmp.ge.f32.partialorder %v1144_v44, 0.0 }
 0x174   :  { %vm1154_vm3 = vcmp.ge.f32.partialorder %v1145_v25, 0.0  ;;  %vm1155_vm4 = vcmp.ge.f32.partialorder %v1146_v45, 0.0  ;;  %vm1156_vm5 = vcmp.ge.f32.partialorder %v1147_v30, 0.0  ;;  %vm1157_vm6 = vcmp.ge.f32.partialorder %v1148_v46, 0.0 }
 0x175   :  { %vm1158_vm7 = vcmp.ge.f32.partialorder %v1149_v32, 0.0  ;;  %vm1159_vm8 = vcmp.ge.f32.partialorder %v1150_v47, 0.0  ;;  %v1160_v50 = vmul.f32 0.2, %v1142_v42  ;;  %v1161_v56 = vmul.f32 0.2, %v1143_v43 }
 0x176   :  { %v1162_v10 = vmul.f32 0.2, %v1144_v44  ;;  %v1163_v15 = vmul.f32 0.2, %v1145_v25  ;;  %v1164_v35 = vmul.f32 0.2, %v1146_v45 }
 0x177   :  { %v1165_v40 = vmul.f32 0.2, %v1147_v30  ;;  %v1166_v48 = vmul.f32 0.2, %v1148_v46  ;;  %v1167_v49 = vmul.f32 0.2, %v1149_v32  ;;  %v1169_v1 = vsel %vm1151_vm0, %v1142_v42, %v1160_v50 }
 0x178   :  { %v1168_v52 = vmul.f32 0.2, %v1150_v47  ;;  %v1170_v54 = vsel %vm1152_vm1, %v1143_v43, %v1161_v56  ;;  %v1171_v55 = vsel %vm1153_vm2, %v1144_v44, %v1162_v10  ;;  %v1172_v57 = vsel %vm1154_vm3, %v1145_v25, %v1163_v15 }
 0x179   :  { %v1173_v3 = vsel %vm1155_vm4, %v1146_v45, %v1164_v35  ;;  %v1174_v58 = vsel %vm1156_vm5, %v1147_v30, %v1165_v40  ;;  %v1175_v59 = vsel %vm1157_vm6, %v1148_v46, %v1166_v48  ;;  %v1176_v60 = vsel %vm1158_vm7, %v1149_v32, %v1167_v49 }
 0x17a   :  { %v1177_v37 = vsel %vm1159_vm8, %v1150_v47, %v1168_v52  ;;  %v1353_v61 = vpack.c.bf16 %v1170_v54, %v1169_v1  ;;  %v1358_v62 = vpack.c.bf16 %v1172_v57, %v1171_v55  ;;  %v1363_v63 = vpack.c.bf16 %v1174_v58, %v1173_v3 }
 0x17b   :  { %v1349_v0 = vpack.c.bf16 %v1177_v37, %v1177_v37  ;;  %v1368_v39 = vpack.c.bf16 %v1176_v60, %v1175_v59 }
 0x17c   :  { %1354 = vst [vmem:[%s2047_s3] sm:$0xff] %v1353_v61   ;;  %1370 = vst [vmem:[%s2047_s3 + $0x8] sm:$0xff] %v1358_v62  }
 0x17d   :  { %1371 = vst [vmem:[%s2047_s3 + $0x10] sm:$0xff] %v1363_v63   ;;  %1372 = vst [vmem:[%s2047_s3 + $0x18] sm:$0xff] %v1368_v39  }
 0x17e   :  { %1223 = vst [vmem:[%s2047_s3 + $0x20] sm:$0xf] %v1349_v0 }

// kernel: _lambda_.21
= control target key start
LH: loop header
LB: loop body
LE: loop exit
PB: predicated region body
PF: predicated region fallthrough
CT: control target
= control target key end

     0   :  { %s4144_s1 = inlined_call_operand.vmem [shape: bf16[2048,128], index: 1, kind: input, shape index: {}]   ;;  %s4145_s0 = inlined_call_operand.vmem [shape: bf16[104,2048], index: 0, kind: input, shape index: {}]   ;;  %s4146_s2 = inlined_call_operand.vmem [shape: f32[8,128], index: 2, kind: input, shape index: {}]   ;;  %s4147_s3 = inlined_call_operand.vmem [shape: f32[104,128], index: 3, kind: output, shape index: {}]  }
   0x1   :  { %v3110_v0 = vld [vmem:[%s4144_s1 + $0x40] sm:$0xff]   ;;  %v3114_v4 = vld [vmem:[%s4144_s1 + $0x48] sm:$0xff]   ;;  %v3118_v8 = vld [vmem:[%s4144_s1 + $0x50] sm:$0xff]  }
   0x2   :  { %v3111_v1 = vld [vmem:[%s4144_s1 + $0xc0] sm:$0xff]   ;;  %2646 = vmatprep.subr.bf16.mxu0 %v3110_v0  ;;  %v3115_v5 = vld [vmem:[%s4144_s1 + $0xc8] sm:$0xff]   ;;  %v3119_v9 = vld [vmem:[%s4144_s1 + $0xd0] sm:$0xff]  }
   0x3   :  { %v3112_v2 = vld [vmem:[%s4144_s1] sm:$0xff]   ;;  %2704 = vmatprep.subr.bf16.mxu1 %v3111_v1  ;;  %v3116_v6 = vld [vmem:[%s4144_s1 + $0x8] sm:$0xff]   ;;  %v3120_v10 = vld [vmem:[%s4144_s1 + $0x10] sm:$0xff]  }
   0x4   :  { %v3113_v3 = vld [vmem:[%s4144_s1 + $0x80] sm:$0xff]   ;;  %2647 = vmatpush3.bf16.msra.mxu0 %v3112_v2  ;;  %v3117_v7 = vld [vmem:[%s4144_s1 + $0x88] sm:$0xff]   ;;  %v3121_v11 = vld [vmem:[%s4144_s1 + $0x90] sm:$0xff]  }
   0x5   :  { %2705 = vmatpush3.bf16.msra.mxu1 %v3113_v3  ;;  %2648 = vmatprep.subr.bf16.mxu0 %v3114_v4  ;;  %v3122_v12 = vld [vmem:[%s4144_s1 + $0x58] sm:$0xff]   ;;  %v3126_v16 = vld [vmem:[%s4144_s1 + $0x60] sm:$0xff]   ;;  %v3130_v20 = vld [vmem:[%s4144_s1 + $0x68] sm:$0xff]  }
   0x6   :  { %2706 = vmatprep.subr.bf16.mxu1 %v3115_v5  ;;  %v3123_v13 = vld [vmem:[%s4144_s1 + $0xd8] sm:$0xff]   ;;  %v3127_v17 = vld [vmem:[%s4144_s1 + $0xe0] sm:$0xff]   ;;  %v3131_v21 = vld [vmem:[%s4144_s1 + $0xe8] sm:$0xff]  }
   0x7   :  { %v3124_v14 = vld [vmem:[%s4144_s1 + $0x18] sm:$0xff]   ;;  %v3128_v18 = vld [vmem:[%s4144_s1 + $0x20] sm:$0xff]   ;;  %v3132_v22 = vld [vmem:[%s4144_s1 + $0x28] sm:$0xff]  }
   0x8   :  { %2649 = vmatpush3.bf16.msra.mxu0 %v3116_v6  ;;  %v3125_v15 = vld [vmem:[%s4144_s1 + $0x98] sm:$0xff]   ;;  %v3129_v19 = vld [vmem:[%s4144_s1 + $0xa0] sm:$0xff]   ;;  %v3133_v23 = vld [vmem:[%s4144_s1 + $0xa8] sm:$0xff]  }
   0x9   :  { %2707 = vmatpush3.bf16.msra.mxu1 %v3117_v7  ;;  %2650 = vmatprep.subr.bf16.mxu0 %v3118_v8  ;;  %v3134_v24 = vld [vmem:[%s4144_s1 + $0x70] sm:$0xff]   ;;  %v3138_v28 = vld [vmem:[%s4144_s1 + $0x78] sm:$0xff]   ;;  %v15_v32 = vld [vmem:[%s4145_s0] sm:$0xff] }
   0xa   :  { %2708 = vmatprep.subr.bf16.mxu1 %v3119_v9  ;;  %v3135_v25 = vld [vmem:[%s4144_s1 + $0xf0] sm:$0xff]   ;;  %v3139_v29 = vld [vmem:[%s4144_s1 + $0xf8] sm:$0xff]   ;;  %v23_v33 = vld [vmem:[%s4145_s0 + $0x40] sm:$0xff] }
   0xb   :  { %v3136_v26 = vld [vmem:[%s4144_s1 + $0x30] sm:$0xff]   ;;  %v3140_v30 = vld [vmem:[%s4144_s1 + $0x38] sm:$0xff]   ;;  %v16_v34 = vld [vmem:[%s4145_s0 + $0x8] sm:$0xff]  ;;  %v2406_v35 = vcombine.low %v15_v32, %v23_v33  ;;  %v2407_v36 = vcombine.high %v15_v32, %v23_v33 }
   0xc   :  { %2651 = vmatpush3.bf16.msra.mxu0 %v3120_v10  ;;  %v3137_v27 = vld [vmem:[%s4144_s1 + $0xb0] sm:$0xff]   ;;  %v3141_v31 = vld [vmem:[%s4144_s1 + $0xb8] sm:$0xff]   ;;  %v24_v37 = vld [vmem:[%s4145_s0 + $0x48] sm:$0xff] }
   0xd   :  { %2709 = vmatpush3.bf16.msra.mxu1 %v3121_v11  ;;  %2652 = vmatprep.subr.bf16.mxu0 %v3122_v12  ;;  %v2408_v38 = vcombine.low %v16_v34, %v24_v37  ;;  %v2409_v39 = vcombine.high %v16_v34, %v24_v37  ;;  %v3142_v40 = vld [vmem:[%s4144_s1 + $0x140] sm:$0xff]   ;;  %v32_v47 = vld [vmem:[%s4145_s0 + $0x88] sm:$0xff]  ;;  %v3150_v56 = vld [vmem:[%s4144_s1 + $0x150] sm:$0xff]  }
   0xe   :  { %2710 = vmatprep.subr.bf16.mxu1 %v3123_v13  ;;  %1716 = vmatprep.mubr.bf16.mxu0 %v2407_v36  ;;  %v3143_v41 = vld [vmem:[%s4144_s1 + $0x100] sm:$0xff]   ;;  %v40_v48 = vld [vmem:[%s4145_s0 + $0xc8] sm:$0xff]  ;;  %v3151_v63 = vld [vmem:[%s4144_s1 + $0x110] sm:$0xff]  }
   0xf   :  { %1804 = vmatprep.mubr.bf16.mxu1 %v2409_v39  ;;  %v3144_v42 = vld [vmem:[%s4144_s1 + $0x1c0] sm:$0xff]   ;;  %v2425_v49 = vcombine.high %v32_v47, %v40_v48  ;;  %v3146_v50 = vld [vmem:[%s4144_s1 + $0x148] sm:$0xff]   ;;  %v2424_v53 = vcombine.low %v32_v47, %v40_v48  ;;  %v3152_v0 = vld [vmem:[%s4144_s1 + $0x1d0] sm:$0xff]  }
  0x10   :  { %2653 = vmatpush3.bf16.msra.mxu0 %v3124_v14  ;;  %v3145_v43 = vld [vmem:[%s4144_s1 + $0x180] sm:$0xff]   ;;  %v3147_v52 = vld [vmem:[%s4144_s1 + $0x108] sm:$0xff]   ;;  %v3153_v1 = vld [vmem:[%s4144_s1 + $0x190] sm:$0xff]  }
  0x11   :  { %2711 = vmatpush3.bf16.msra.mxu1 %v3125_v15  ;;  %2654 = vmatprep.subr.bf16.mxu0 %v3126_v16  ;;  %v31_v44 = vld [vmem:[%s4145_s0 + $0x80] sm:$0xff]  ;;  %v3148_v54 = vld [vmem:[%s4144_s1 + $0x1c8] sm:$0xff]   ;;  %v3154_v3 = vld [vmem:[%s4144_s1 + $0x158] sm:$0xff]  }
  0x12   :  { %2712 = vmatprep.subr.bf16.mxu1 %v3127_v17  ;;  %v39_v45 = vld [vmem:[%s4145_s0 + $0xc0] sm:$0xff]  ;;  %v3149_v55 = vld [vmem:[%s4144_s1 + $0x188] sm:$0xff]   ;;  %v3155_v5 = vld [vmem:[%s4144_s1 + $0x118] sm:$0xff]  }
  0x13   :  { %v2423_v46 = vcombine.high %v31_v44, %v39_v45  ;;  %v2422_v51 = vcombine.low %v31_v44, %v39_v45  ;;  %v47_v57 = vld [vmem:[%s4145_s0 + $0x100] sm:$0xff]  ;;  %v48_v59 = vld [vmem:[%s4145_s0 + $0x108] sm:$0xff]  ;;  %v3156_v12 = vld [vmem:[%s4144_s1 + $0x1d8] sm:$0xff]  }
  0x14   :  { %2655 = vmatpush3.bf16.msra.mxu0 %v3128_v18  ;;  %v55_v58 = vld [vmem:[%s4145_s0 + $0x140] sm:$0xff]  ;;  %v56_v60 = vld [vmem:[%s4145_s0 + $0x148] sm:$0xff]  ;;  %v3157_v13 = vld [vmem:[%s4144_s1 + $0x198] sm:$0xff]  }
  0x15   :  { %2713 = vmatpush3.bf16.msra.mxu1 %v3129_v19  ;;  %2656 = vmatprep.subr.bf16.mxu0 %v3130_v20  ;;  %v2439_v61 = vcombine.high %v47_v57, %v55_v58  ;;  %v2441_v62 = vcombine.high %v48_v59, %v56_v60  ;;  %v2438_v2 = vcombine.low %v47_v57, %v55_v58  ;;  %v63_v6 = vld [vmem:[%s4145_s0 + $0x180] sm:$0xff]  ;;  %v64_v8 = vld [vmem:[%s4145_s0 + $0x188] sm:$0xff]  ;;  %v3174_v44 = vld [vmem:[%s4144_s1 + $0x178] sm:$0xff]  }
  0x16   :  { %2714 = vmatprep.subr.bf16.mxu1 %v3131_v21  ;;  %v2440_v4 = vcombine.low %v48_v59, %v56_v60  ;;  %v71_v7 = vld [vmem:[%s4145_s0 + $0x1c0] sm:$0xff]  ;;  %v72_v10 = vld [vmem:[%s4145_s0 + $0x1c8] sm:$0xff]  ;;  %v3175_v45 = vld [vmem:[%s4144_s1 + $0x138] sm:$0xff]  }
  0x17   :  { %v2455_v9 = vcombine.high %v63_v6, %v71_v7  ;;  %v2457_v11 = vcombine.high %v64_v8, %v72_v10  ;;  %v3158_v14 = vld [vmem:[%s4144_s1 + $0x160] sm:$0xff]   ;;  %v2454_v16 = vcombine.low %v63_v6, %v71_v7  ;;  %v2456_v20 = vcombine.low %v64_v8, %v72_v10  ;;  %v96_v32 = vld [vmem:[%s4145_s0 + $0x288] sm:$0xff]  ;;  %v3177_v48 = vld [vmem:[%s4144_s1 + $0x1b8] sm:$0xff]  }
  0x18   :  { %2657 = vmatpush3.bf16.msra.mxu0 %v3132_v22  ;;  %v3159_v15 = vld [vmem:[%s4144_s1 + $0x120] sm:$0xff]   ;;  %v80_v22 = vld [vmem:[%s4145_s0 + $0x208] sm:$0xff]  ;;  %v26_v57 = vld [vmem:[%s4145_s0 + $0x58] sm:$0xff] }
  0x19   :  { %2715 = vmatpush3.bf16.msra.mxu1 %v3133_v23  ;;  %2658 = vmatprep.subr.bf16.mxu0 %v3134_v24  ;;  %v3160_v17 = vld [vmem:[%s4144_s1 + $0x1e0] sm:$0xff]   ;;  %v88_v23 = vld [vmem:[%s4145_s0 + $0x248] sm:$0xff] }
  0x1a   :  { %2716 = vmatprep.subr.bf16.mxu1 %v3135_v25  ;;  %v79_v18 = vld [vmem:[%s4145_s0 + $0x200] sm:$0xff]  ;;  %v2473_v24 = vcombine.high %v80_v22, %v88_v23  ;;  %v104_v33 = vld [vmem:[%s4145_s0 + $0x2c8] sm:$0xff]  ;;  %v2472_v36 = vcombine.low %v80_v22, %v88_v23  ;;  %v3189_v23 = vld [vmem:[%s4144_s1 + $0x290] sm:$0xff]  }
  0x1b   :  { %v87_v19 = vld [vmem:[%s4145_s0 + $0x240] sm:$0xff]  ;;  %v2489_v39 = vcombine.high %v96_v32, %v104_v33  ;;  %v3182_v8 = vld [vmem:[%s4144_s1 + $0x248] sm:$0xff]  }
  0x1c   :  { %2659 = vmatpush3.bf16.msra.mxu0 %v3136_v26  ;;  %v2471_v21 = vcombine.high %v79_v18, %v87_v19  ;;  %v3161_v25 = vld [vmem:[%s4144_s1 + $0x1a0] sm:$0xff]   ;;  %v3162_v26 = vld [vmem:[%s4144_s1 + $0x168] sm:$0xff]   ;;  %v2470_v34 = vcombine.low %v79_v18, %v87_v19 }
  0x1d   :  { %2717 = vmatpush3.bf16.msra.mxu1 %v3137_v27  ;;  %2660 = vmatprep.subr.bf16.mxu0 %v3138_v28  ;;  %v3163_v27 = vld [vmem:[%s4144_s1 + $0x128] sm:$0xff]  }
  0x1e   :  { %2718 = vmatprep.subr.bf16.mxu1 %v3139_v29  ;;  %v3164_v28 = vld [vmem:[%s4144_s1 + $0x1e8] sm:$0xff]  }
  0x1f   :  { %v3165_v29 = vld [vmem:[%s4144_s1 + $0x1a8] sm:$0xff]  }
  0x20   :  { %2661 = vmatpush3.bf16.msra.mxu0 %v3140_v30  ;;  %v95_v30 = vld [vmem:[%s4145_s0 + $0x280] sm:$0xff]  ;;  %v3184_v10 = vld [vmem:[%s4144_s1 + $0x2c8] sm:$0xff]  }
  0x21   :  { %2719 = vmatpush3.bf16.msra.mxu1 %v3141_v31  ;;  %2762 = vmatprep.subr.bf16.mxu0 %v3142_v40  ;;  %v103_v31 = vld [vmem:[%s4145_s0 + $0x2c0] sm:$0xff]  ;;  %v3168_v40 = vld [vmem:[%s4144_s1 + $0x1f0] sm:$0xff]  }
  0x22   :  { %2820 = vmatprep.subr.bf16.mxu1 %v3144_v42  ;;  %v2487_v37 = vcombine.high %v95_v30, %v103_v31  ;;  %v111_v42 = vld [vmem:[%s4145_s0 + $0x300] sm:$0xff]  ;;  %v2486_v47 = vcombine.low %v95_v30, %v103_v31  ;;  %v74_v30 = vld [vmem:[%s4145_s0 + $0x1d8] sm:$0xff] }
  0x23   :  { %1717 = vmatmul.mubr.bf16.vlgmr.msra.gmra.mrb[0].mxu0 %v2406_v35  ;;  %v3166_v35 = vld [vmem:[%s4144_s1 + $0x170] sm:$0xff]   ;;  %v2502_v58 = vcombine.low %v111_v42, %v111_v42  ;;  %v3193_v31 = vld [vmem:[%s4144_s1 + $0x298] sm:$0xff]  }
  0x24   :  { %1805 = vmatmul.mubr.bf16.vlgmr.msra.gmra.mrb[0].mxu1 %v2408_v38  ;;  %2763 = vmatpush3.bf16.msra.mxu0 %v3143_v41  ;;  %v3167_v38 = vld [vmem:[%s4144_s1 + $0x130] sm:$0xff]  }
  0x25   :  { %2821 = vmatpush3.bf16.msra.mxu1 %v3145_v43  ;;  %1724 = vmatprep.mubr.bf16.mxu0 %v2423_v46  ;;  %v3169_v41 = vld [vmem:[%s4144_s1 + $0x1b0] sm:$0xff]   ;;  %v112_v43 = vld [vmem:[%s4145_s0 + $0x308] sm:$0xff]  ;;  %v3176_v46 = vld [vmem:[%s4144_s1 + $0x1f8] sm:$0xff]  }
  0x26   :  { %1812 = vmatprep.mubr.bf16.mxu1 %v2425_v49  ;;  %2764 = vmatprep.subr.bf16.mxu0 %v3146_v50  ;;  %v2488_v49 = vcombine.low %v96_v32, %v104_v33  ;;  %v2503_v50 = vcombine.high %v111_v42, %v111_v42  ;;  %v2504_v59 = vcombine.low %v112_v43, %v112_v43  ;;  %v3194_v32 = vld [vmem:[%s4144_s1 + $0x260] sm:$0xff]   ;;  %v89_v42 = vld [vmem:[%s4145_s0 + $0x250] sm:$0xff] }
  0x27   :  { %2822 = vmatprep.subr.bf16.mxu1 %v3148_v54  ;;  %v17_v54 = vld [vmem:[%s4145_s0 + $0x10] sm:$0xff] }
  0x28   :  { %2765 = vmatpush3.bf16.msra.mxu0 %v3147_v52  ;;  %v3178_v52 = vld [vmem:[%s4144_s1 + $0x240] sm:$0xff]  }
  0x29   :  { %2823 = vmatpush3.bf16.msra.mxu1 %v3149_v55  ;;  %2766 = vmatprep.subr.bf16.mxu0 %v3150_v56  ;;  %v25_v55 = vld [vmem:[%s4145_s0 + $0x50] sm:$0xff]  ;;  %v18_v56 = vld [vmem:[%s4145_s0 + $0x18] sm:$0xff] }
  0x2a   :  { %2824 = vmatprep.subr.bf16.mxu1 %v3152_v0  ;;  %v2411_v60 = vcombine.high %v17_v54, %v25_v55  ;;  %v34_v0 = vld [vmem:[%s4145_s0 + $0x98] sm:$0xff] }
  0x2b   :  { %1725 = vmatmul.mubr.bf16.gmra.mrb[4].mxu0 %v2422_v51  ;;  %v2505_v51 = vcombine.high %v112_v43, %v112_v43  ;;  %v3200_v43 = vld [vmem:[%s4144_s1 + $0x2e8] sm:$0xff]  }
  0x2c   :  { %1813 = vmatmul.mubr.bf16.gmra.mrb[4].mxu1 %v2424_v53  ;;  %1732 = vmatprep.mubr.bf16.mxu0 %v2439_v61  ;;  %v3180_v53 = vld [vmem:[%s4144_s1 + $0x2c0] sm:$0xff]   ;;  %v2413_v61 = vcombine.high %v18_v56, %v26_v57 }
  0x2d   :  { %1820 = vmatprep.mubr.bf16.mxu1 %v2441_v62  ;;  %2767 = vmatpush3.bf16.msra.mxu0 %v3151_v63  ;;  %v33_v62 = vld [vmem:[%s4145_s0 + $0x90] sm:$0xff] }
  0x2e   :  { %2825 = vmatpush3.bf16.msra.mxu1 %v3153_v1  ;;  %2768 = vmatprep.subr.bf16.mxu0 %v3154_v3  ;;  %v41_v63 = vld [vmem:[%s4145_s0 + $0xd0] sm:$0xff]  ;;  %v2410_v1 = vcombine.low %v17_v54, %v25_v55  ;;  %v2412_v3 = vcombine.low %v18_v56, %v26_v57  ;;  %v3210_v56 = vld [vmem:[%s4144_s1 + $0x278] sm:$0xff]  }
  0x2f   :  { %2826 = vmatprep.subr.bf16.mxu1 %v3156_v12  ;;  %v2427_v6 = vcombine.high %v33_v62, %v41_v63  ;;  %v3186_v12 = vld [vmem:[%s4144_s1 + $0x250] sm:$0xff]   ;;  %v2426_v18 = vcombine.low %v33_v62, %v41_v63  ;;  %v106_v62 = vld [vmem:[%s4145_s0 + $0x2d8] sm:$0xff] }
  0x30   :  { %v3203_v54 = vld [vmem:[%s4144_s1 + $0x230] sm:$0xff]   ;;  %v3213_v63 = vld [vmem:[%s4144_s1 + $0x2b8] sm:$0xff]  }
  0x31   :  { %2769 = vmatpush3.bf16.msra.mxu0 %v3155_v5  ;;  %v3181_v5 = vld [vmem:[%s4144_s1 + $0x280] sm:$0xff]   ;;  %v3205_v55 = vld [vmem:[%s4144_s1 + $0x2b0] sm:$0xff]  }
  0x32   :  { %2827 = vmatpush3.bf16.msra.mxu1 %v3157_v13  ;;  %2770 = vmatprep.subr.bf16.mxu0 %v3158_v14  ;;  %v49_v13 = vld [vmem:[%s4145_s0 + $0x110] sm:$0xff] }
  0x33   :  { %1733 = vmatmul.mubr.bf16.gmra.mrb[8].mxu0 %v2438_v2  ;;  %2828 = vmatprep.subr.bf16.mxu1 %v3160_v17  ;;  %v42_v2 = vld [vmem:[%s4145_s0 + $0xd8] sm:$0xff]  ;;  %v57_v14 = vld [vmem:[%s4145_s0 + $0x150] sm:$0xff] }
  0x34   :  { %1821 = vmatmul.mubr.bf16.gmra.mrb[8].mxu1 %v2440_v4  ;;  %1740 = vmatprep.mubr.bf16.mxu0 %v2455_v9  ;;  %v3179_v4 = vld [vmem:[%s4144_s1 + $0x200] sm:$0xff]   ;;  %v2429_v7 = vcombine.high %v34_v0, %v42_v2  ;;  %v3183_v9 = vld [vmem:[%s4144_s1 + $0x208] sm:$0xff]   ;;  %v3188_v17 = vld [vmem:[%s4144_s1 + $0x2d0] sm:$0xff]   ;;  %v2428_v19 = vcombine.low %v34_v0, %v42_v2  ;;  %v2442_v33 = vcombine.low %v49_v13, %v57_v14 }
  0x35   :  { %1828 = vmatprep.mubr.bf16.mxu1 %v2457_v11  ;;  %2771 = vmatpush3.bf16.msra.mxu0 %v3159_v15  ;;  %v3185_v11 = vld [vmem:[%s4144_s1 + $0x288] sm:$0xff]   ;;  %v50_v15 = vld [vmem:[%s4145_s0 + $0x118] sm:$0xff]  ;;  %v97_v57 = vld [vmem:[%s4145_s0 + $0x290] sm:$0xff] }
  0x36   :  { %2829 = vmatpush3.bf16.msra.mxu1 %v3161_v25  ;;  %2772 = vmatprep.subr.bf16.mxu0 %v3162_v26  ;;  %v3191_v25 = vld [vmem:[%s4144_s1 + $0x218] sm:$0xff]   ;;  %v65_v26 = vld [vmem:[%s4145_s0 + $0x190] sm:$0xff]  ;;  %v3214_v0 = vld [vmem:[%s4144_s1 + $0x340] sm:$0xff]  }
  0x37   :  { %2830 = vmatprep.subr.bf16.mxu1 %v3164_v28  ;;  %v73_v28 = vld [vmem:[%s4145_s0 + $0x1d0] sm:$0xff]  ;;  %v3216_v2 = vld [vmem:[%s4144_s1 + $0x3c0] sm:$0xff]  }
  0x39   :  { %2773 = vmatpush3.bf16.msra.mxu0 %v3163_v27  ;;  %v3192_v27 = vld [vmem:[%s4144_s1 + $0x2d8] sm:$0xff]  }
  0x3a   :  { %2831 = vmatpush3.bf16.msra.mxu1 %v3165_v29  ;;  %2774 = vmatprep.subr.bf16.mxu0 %v3166_v35  ;;  %v66_v29 = vld [vmem:[%s4145_s0 + $0x198] sm:$0xff] }
  0x3b   :  { %1741 = vmatmul.mubr.bf16.gmra.mrb[12].mxu0 %v2454_v16  ;;  %2832 = vmatprep.subr.bf16.mxu1 %v3168_v40  ;;  %v58_v16 = vld [vmem:[%s4145_s0 + $0x158] sm:$0xff]  ;;  %v3198_v40 = vld [vmem:[%s4144_s1 + $0x268] sm:$0xff]  }
  0x3c   :  { %1829 = vmatmul.mubr.bf16.gmra.mrb[12].mxu1 %v2456_v20  ;;  %1748 = vmatprep.mubr.bf16.mxu0 %v2471_v21  ;;  %v2443_v20 = vcombine.high %v49_v13, %v57_v14  ;;  %v3187_v21 = vld [vmem:[%s4144_s1 + $0x210] sm:$0xff]   ;;  %v2445_v22 = vcombine.high %v50_v15, %v58_v16  ;;  %v2444_v35 = vcombine.low %v50_v15, %v58_v16  ;;  %v27_v13 = vld [vmem:[%s4145_s0 + $0x60] sm:$0xff]  ;;  %v20_v14 = vld [vmem:[%s4145_s0 + $0x28] sm:$0xff] }
  0x3d   :  { %1836 = vmatprep.mubr.bf16.mxu1 %v2473_v24  ;;  %2775 = vmatpush3.bf16.msra.mxu0 %v3167_v38  ;;  %v3190_v24 = vld [vmem:[%s4144_s1 + $0x258] sm:$0xff]   ;;  %v2461_v38 = vcombine.high %v66_v29, %v74_v30  ;;  %v28_v15 = vld [vmem:[%s4145_s0 + $0x68] sm:$0xff] }
  0x3e   :  { %2833 = vmatpush3.bf16.msra.mxu1 %v3169_v41  ;;  %2776 = vmatprep.subr.bf16.mxu0 %v3174_v44  ;;  %v81_v41 = vld [vmem:[%s4145_s0 + $0x210] sm:$0xff]  ;;  %v82_v44 = vld [vmem:[%s4145_s0 + $0x218] sm:$0xff] }
  0x3f   :  { %2834 = vmatprep.subr.bf16.mxu1 %v3176_v46  ;;  %v3199_v46 = vld [vmem:[%s4144_s1 + $0x228] sm:$0xff]  }
  0x41   :  { %2777 = vmatpush3.bf16.msra.mxu0 %v3175_v45  ;;  %v90_v45 = vld [vmem:[%s4145_s0 + $0x258] sm:$0xff] }
  0x42   :  { %2835 = vmatpush3.bf16.msra.mxu1 %v3177_v48  ;;  %2878 = vmatprep.subr.bf16.mxu0 %v3178_v52  ;;  %v3202_v48 = vld [vmem:[%s4144_s1 + $0x270] sm:$0xff]   ;;  %v2475_v52 = vcombine.high %v81_v41, %v89_v42 }
  0x43   :  { %1749 = vmatmul.mubr.bf16.gmra.mrb[16].mxu0 %v2470_v34  ;;  %2936 = vmatprep.subr.bf16.mxu1 %v3180_v53  ;;  %v3196_v34 = vld [vmem:[%s4144_s1 + $0x2e0] sm:$0xff]   ;;  %v2477_v53 = vcombine.high %v82_v44, %v90_v45 }
  0x44   :  { %1837 = vmatmul.mubr.bf16.gmra.mrb[16].mxu1 %v2472_v36  ;;  %1756 = vmatprep.mubr.bf16.mxu0 %v2487_v37  ;;  %v2459_v36 = vcombine.high %v65_v26, %v73_v28  ;;  %v3195_v37 = vld [vmem:[%s4144_s1 + $0x220] sm:$0xff]  }
  0x45   :  { %1844 = vmatprep.mubr.bf16.mxu1 %v2489_v39  ;;  %v3197_v39 = vld [vmem:[%s4144_s1 + $0x2a0] sm:$0xff]  }
  0x4b   :  { %1757 = vmatmul.mubr.bf16.gmra.mrb[20].mxu0 %v2486_v47  ;;  %v3201_v47 = vld [vmem:[%s4144_s1 + $0x2a8] sm:$0xff]  }
  0x4c   :  { %1845 = vmatmul.mubr.bf16.gmra.mrb[20].mxu1 %v2488_v49  ;;  %1764 = vmatprep.mubr.bf16.mxu0 %v2503_v50  ;;  %v2458_v49 = vcombine.low %v65_v26, %v73_v28  ;;  %v3204_v50 = vld [vmem:[%s4144_s1 + $0x2f0] sm:$0xff]   ;;  %v2416_v26 = vcombine.low %v20_v14, %v28_v15 }
  0x4d   :  { %1852 = vmatprep.mubr.bf16.mxu1 %v2505_v51  ;;  %v2460_v51 = vcombine.low %v66_v29, %v74_v30  ;;  %v3218_v29 = vld [vmem:[%s4144_s1 + $0x348] sm:$0xff]  }
  0x53   :  { %1765 = vmatmul.mubr.bf16.gmra.mrb[24].mxu0 %v2502_v58  ;;  %v3212_v58 = vld [vmem:[%s4144_s1 + $0x2f8] sm:$0xff]  }
  0x54   :  { %1853 = vmatmul.mubr.bf16.gmra.mrb[24].mxu1 %v2504_v59  ;;  %1892 = vmatprep.mubr.bf16.mxu0 %v2411_v60  ;;  %v105_v59 = vld [vmem:[%s4145_s0 + $0x2d0] sm:$0xff]  ;;  %v98_v60 = vld [vmem:[%s4145_s0 + $0x298] sm:$0xff] }
  0x55   :  { %1980 = vmatprep.mubr.bf16.mxu1 %v2413_v61  ;;  %v3211_v61 = vld [vmem:[%s4144_s1 + $0x238] sm:$0xff]  }
  0x5b   :  { %1893 = vmatmul.mubr.bf16.vlgmr.msra.gmra.mrb[28].mxu0 %v2410_v1  ;;  %v2474_v1 = vcombine.low %v81_v41, %v89_v42 }
  0x5c   :  { %1981 = vmatmul.mubr.bf16.vlgmr.msra.gmra.mrb[28].mxu1 %v2412_v3  ;;  %2879 = vmatpush3.bf16.msra.mxu0 %v3179_v4  ;;  %v2476_v3 = vcombine.low %v82_v44, %v90_v45  ;;  %v2491_v4 = vcombine.high %v97_v57, %v105_v59  ;;  %v3223_v44 = vld [vmem:[%s4144_s1 + $0x310] sm:$0xff]  }
  0x5d   :  { %2937 = vmatpush3.bf16.msra.mxu1 %v3181_v5  ;;  %1900 = vmatprep.mubr.bf16.mxu0 %v2427_v6  ;;  %v2493_v5 = vcombine.high %v98_v60, %v106_v62  ;;  %v113_v6 = vld [vmem:[%s4145_s0 + $0x310] sm:$0xff] }
  0x5e   :  { %1988 = vmatprep.mubr.bf16.mxu1 %v2429_v7  ;;  %2880 = vmatprep.subr.bf16.mxu0 %v3182_v8  ;;  %v114_v7 = vld [vmem:[%s4145_s0 + $0x318] sm:$0xff]  ;;  %v2490_v8 = vcombine.low %v97_v57, %v105_v59  ;;  %v2506_v16 = vcombine.low %v113_v6, %v113_v6  ;;  %v3225_v45 = vld [vmem:[%s4144_s1 + $0x390] sm:$0xff]  }
  0x5f   :  { %2938 = vmatprep.subr.bf16.mxu1 %v3184_v10  ;;  %v2507_v10 = vcombine.high %v113_v6, %v113_v6  ;;  %v3238_v6 = vld [vmem:[%s4144_s1 + $0x370] sm:$0xff]  }
  0x60   :  { %2881 = vmatpush3.bf16.msra.mxu0 %v3183_v9  ;;  %v2492_v9 = vcombine.low %v98_v60, %v106_v62  ;;  %v3231_v60 = vld [vmem:[%s4144_s1 + $0x320] sm:$0xff]   ;;  %v3234_v62 = vld [vmem:[%s4144_s1 + $0x368] sm:$0xff]  }
  0x61   :  { %2939 = vmatpush3.bf16.msra.mxu1 %v3185_v11  ;;  %2882 = vmatprep.subr.bf16.mxu0 %v3186_v12  ;;  %v2509_v11 = vcombine.high %v114_v7, %v114_v7  ;;  %v19_v12 = vld [vmem:[%s4145_s0 + $0x20] sm:$0xff] }
  0x62   :  { %2940 = vmatprep.subr.bf16.mxu1 %v3188_v17  ;;  %v2508_v17 = vcombine.low %v114_v7, %v114_v7 }
  0x63   :  { %1901 = vmatmul.mubr.bf16.gmra.mrb[32].mxu0 %v2426_v18  ;;  %v2415_v18 = vcombine.high %v19_v12, %v27_v13 }
  0x64   :  { %1989 = vmatmul.mubr.bf16.gmra.mrb[32].mxu1 %v2428_v19  ;;  %1908 = vmatprep.mubr.bf16.mxu0 %v2443_v20  ;;  %v2417_v19 = vcombine.high %v20_v14, %v28_v15  ;;  %v35_v20 = vld [vmem:[%s4145_s0 + $0xa0] sm:$0xff]  ;;  %v3246_v14 = vld [vmem:[%s4144_s1 + $0x378] sm:$0xff]  }
  0x65   :  { %1996 = vmatprep.mubr.bf16.mxu1 %v2445_v22  ;;  %2883 = vmatpush3.bf16.msra.mxu0 %v3187_v21  ;;  %v43_v21 = vld [vmem:[%s4145_s0 + $0xe0] sm:$0xff]  ;;  %v2414_v22 = vcombine.low %v19_v12, %v27_v13  ;;  %v3239_v12 = vld [vmem:[%s4144_s1 + $0x330] sm:$0xff]   ;;  %v3248_v15 = vld [vmem:[%s4144_s1 + $0x3f8] sm:$0xff]  }
  0x66   :  { %2941 = vmatpush3.bf16.msra.mxu1 %v3189_v23  ;;  %2884 = vmatprep.subr.bf16.mxu0 %v3190_v24  ;;  %v3215_v23 = vld [vmem:[%s4144_s1 + $0x300] sm:$0xff]   ;;  %v36_v24 = vld [vmem:[%s4145_s0 + $0xa8] sm:$0xff]  ;;  %v2431_v28 = vcombine.high %v35_v20, %v43_v21  ;;  %v3241_v13 = vld [vmem:[%s4144_s1 + $0x3b0] sm:$0xff]  }
  0x67   :  { %2942 = vmatprep.subr.bf16.mxu1 %v3192_v27  ;;  %v3217_v27 = vld [vmem:[%s4144_s1 + $0x380] sm:$0xff]  }
  0x69   :  { %2885 = vmatpush3.bf16.msra.mxu0 %v3191_v25  ;;  %v44_v25 = vld [vmem:[%s4145_s0 + $0xe8] sm:$0xff] }
  0x6a   :  { %2943 = vmatpush3.bf16.msra.mxu1 %v3193_v31  ;;  %2886 = vmatprep.subr.bf16.mxu0 %v3194_v32  ;;  %v2433_v30 = vcombine.high %v36_v24, %v44_v25  ;;  %v3219_v31 = vld [vmem:[%s4144_s1 + $0x308] sm:$0xff]   ;;  %v2432_v41 = vcombine.low %v36_v24, %v44_v25 }
  0x6b   :  { %1909 = vmatmul.mubr.bf16.gmra.mrb[36].mxu0 %v2442_v33  ;;  %2944 = vmatprep.subr.bf16.mxu1 %v3196_v34  ;;  %v3220_v32 = vld [vmem:[%s4144_s1 + $0x3c8] sm:$0xff]   ;;  %v3222_v34 = vld [vmem:[%s4144_s1 + $0x350] sm:$0xff]  }
  0x6c   :  { %1997 = vmatmul.mubr.bf16.gmra.mrb[36].mxu1 %v2444_v35  ;;  %1916 = vmatprep.mubr.bf16.mxu0 %v2459_v36  ;;  %v3221_v33 = vld [vmem:[%s4144_s1 + $0x388] sm:$0xff]   ;;  %v51_v35 = vld [vmem:[%s4145_s0 + $0x120] sm:$0xff] }
  0x6d   :  { %2004 = vmatprep.mubr.bf16.mxu1 %v2461_v38  ;;  %2887 = vmatpush3.bf16.msra.mxu0 %v3195_v37  ;;  %v59_v36 = vld [vmem:[%s4145_s0 + $0x160] sm:$0xff]  ;;  %v52_v37 = vld [vmem:[%s4145_s0 + $0x128] sm:$0xff] }
  0x6e   :  { %2945 = vmatpush3.bf16.msra.mxu1 %v3197_v39  ;;  %2888 = vmatprep.subr.bf16.mxu0 %v3198_v40  ;;  %v60_v38 = vld [vmem:[%s4145_s0 + $0x168] sm:$0xff]  ;;  %v3224_v39 = vld [vmem:[%s4144_s1 + $0x3d0] sm:$0xff]   ;;  %v2430_v40 = vcombine.low %v35_v20, %v43_v21  ;;  %v2447_v42 = vcombine.high %v51_v35, %v59_v36  ;;  %v3249_v21 = vld [vmem:[%s4144_s1 + $0x3b8] sm:$0xff]  }
  0x6f   :  { %2946 = vmatprep.subr.bf16.mxu1 %v3200_v43  ;;  %v2449_v43 = vcombine.high %v52_v37, %v60_v38  ;;  %v2448_v57 = vcombine.low %v52_v37, %v60_v38  ;;  %v108_v20 = vld [vmem:[%s4145_s0 + $0x2e8] sm:$0xff] }
  0x71   :  { %2889 = vmatpush3.bf16.msra.mxu0 %v3199_v46  ;;  %v3226_v46 = vld [vmem:[%s4144_s1 + $0x358] sm:$0xff]  }
  0x72   :  { %2947 = vmatpush3.bf16.msra.mxu1 %v3201_v47  ;;  %2890 = vmatprep.subr.bf16.mxu0 %v3202_v48  ;;  %v3228_v47 = vld [vmem:[%s4144_s1 + $0x3d8] sm:$0xff]  }
  0x73   :  { %1917 = vmatmul.mubr.bf16.gmra.mrb[40].mxu0 %v2458_v49  ;;  %2948 = vmatprep.subr.bf16.mxu1 %v3204_v50  ;;  %v3227_v48 = vld [vmem:[%s4144_s1 + $0x318] sm:$0xff]   ;;  %v67_v49 = vld [vmem:[%s4145_s0 + $0x1a0] sm:$0xff] }
  0x74   :  { %2005 = vmatmul.mubr.bf16.gmra.mrb[40].mxu1 %v2460_v51  ;;  %1924 = vmatprep.mubr.bf16.mxu0 %v2475_v52  ;;  %v75_v50 = vld [vmem:[%s4145_s0 + $0x1e0] sm:$0xff]  ;;  %v68_v51 = vld [vmem:[%s4145_s0 + $0x1a8] sm:$0xff] }
  0x75   :  { %2012 = vmatprep.mubr.bf16.mxu1 %v2477_v53  ;;  %2891 = vmatpush3.bf16.msra.mxu0 %v3203_v54  ;;  %v76_v52 = vld [vmem:[%s4145_s0 + $0x1e8] sm:$0xff]  ;;  %v3229_v53 = vld [vmem:[%s4144_s1 + $0x398] sm:$0xff]   ;;  %v3230_v54 = vld [vmem:[%s4144_s1 + $0x360] sm:$0xff]   ;;  %v2462_v7 = vcombine.low %v67_v49, %v75_v50 }
  0x76   :  { %2949 = vmatpush3.bf16.msra.mxu1 %v3205_v55  ;;  %2892 = vmatprep.subr.bf16.mxu0 %v3210_v56  ;;  %v2446_v55 = vcombine.low %v51_v35, %v59_v36  ;;  %v3232_v56 = vld [vmem:[%s4144_s1 + $0x3e0] sm:$0xff]   ;;  %v2465_v59 = vcombine.high %v68_v51, %v76_v52  ;;  %v30_v35 = vld [vmem:[%s4145_s0 + $0x78] sm:$0xff] }
  0x77   :  { %2950 = vmatprep.subr.bf16.mxu1 %v3212_v58  ;;  %v2463_v58 = vcombine.high %v67_v49, %v75_v50  ;;  %v61_v49 = vld [vmem:[%s4145_s0 + $0x170] sm:$0xff]  ;;  %v54_v50 = vld [vmem:[%s4145_s0 + $0x138] sm:$0xff] }
  0x79   :  { %2893 = vmatpush3.bf16.msra.mxu0 %v3211_v61  ;;  %v3233_v61 = vld [vmem:[%s4144_s1 + $0x3a0] sm:$0xff]  }
  0x7a   :  { %2951 = vmatpush3.bf16.msra.mxu1 %v3213_v63  ;;  %2994 = vmatprep.subr.bf16.mxu0 %v3214_v0  ;;  %v3236_v63 = vld [vmem:[%s4144_s1 + $0x3e8] sm:$0xff]   ;;  %v83_v0 = vld [vmem:[%s4145_s0 + $0x220] sm:$0xff] }
  0x7b   :  { %1925 = vmatmul.mubr.bf16.gmra.mrb[44].mxu0 %v2474_v1  ;;  %3052 = vmatprep.subr.bf16.mxu1 %v3216_v2  ;;  %v91_v1 = vld [vmem:[%s4145_s0 + $0x260] sm:$0xff]  ;;  %v84_v2 = vld [vmem:[%s4145_s0 + $0x228] sm:$0xff] }
  0x7c   :  { %2013 = vmatmul.mubr.bf16.gmra.mrb[44].mxu1 %v2476_v3  ;;  %1932 = vmatprep.mubr.bf16.mxu0 %v2491_v4  ;;  %v3235_v3 = vld [vmem:[%s4144_s1 + $0x328] sm:$0xff]  }
  0x7d   :  { %2020 = vmatprep.mubr.bf16.mxu1 %v2493_v5  ;;  %v92_v4 = vld [vmem:[%s4145_s0 + $0x268] sm:$0xff] }
  0x7e   :  { %v3237_v5 = vld [vmem:[%s4144_s1 + $0x3a8] sm:$0xff]  }
  0x83   :  { %1933 = vmatmul.mubr.bf16.gmra.mrb[48].mxu0 %v2490_v8  ;;  %v3240_v8 = vld [vmem:[%s4144_s1 + $0x3f0] sm:$0xff]  }
  0x84   :  { %2021 = vmatmul.mubr.bf16.gmra.mrb[48].mxu1 %v2492_v9  ;;  %1940 = vmatprep.mubr.bf16.mxu0 %v2507_v10  ;;  %v2464_v9 = vcombine.low %v68_v51, %v76_v52  ;;  %v2479_v10 = vcombine.high %v83_v0, %v91_v1  ;;  %v62_v51 = vld [vmem:[%s4145_s0 + $0x178] sm:$0xff] }
  0x85   :  { %2028 = vmatprep.mubr.bf16.mxu1 %v2509_v11  ;;  %v2481_v11 = vcombine.high %v84_v2, %v92_v4 }
  0x8b   :  { %1941 = vmatmul.mubr.bf16.gmra.mrb[52].mxu0 %v2506_v16  ;;  %v99_v16 = vld [vmem:[%s4145_s0 + $0x2a0] sm:$0xff] }
  0x8c   :  { %2029 = vmatmul.mubr.bf16.gmra.mrb[52].mxu1 %v2508_v17  ;;  %2068 = vmatprep.mubr.bf16.mxu0 %v2415_v18  ;;  %v107_v17 = vld [vmem:[%s4145_s0 + $0x2e0] sm:$0xff]  ;;  %v3247_v18 = vld [vmem:[%s4144_s1 + $0x338] sm:$0xff]  }
  0x8d   :  { %2156 = vmatprep.mubr.bf16.mxu1 %v2417_v19  ;;  %v100_v19 = vld [vmem:[%s4145_s0 + $0x2a8] sm:$0xff]  ;;  %v2495_v24 = vcombine.high %v99_v16, %v107_v17 }
  0x8e   :  { %v2497_v25 = vcombine.high %v100_v19, %v108_v20 }
  0x93   :  { %2069 = vmatmul.mubr.bf16.vlgmr.msra.gmra.mrb[56].mxu0 %v2414_v22  ;;  %v2478_v22 = vcombine.low %v83_v0, %v91_v1  ;;  %v85_v0 = vld [vmem:[%s4145_s0 + $0x230] sm:$0xff] }
  0x94   :  { %2157 = vmatmul.mubr.bf16.vlgmr.msra.gmra.mrb[56].mxu1 %v2416_v26  ;;  %2995 = vmatpush3.bf16.msra.mxu0 %v3215_v23  ;;  %v2480_v23 = vcombine.low %v84_v2, %v92_v4  ;;  %v115_v26 = vld [vmem:[%s4145_s0 + $0x320] sm:$0xff]  ;;  %v93_v1 = vld [vmem:[%s4145_s0 + $0x270] sm:$0xff]  ;;  %v86_v2 = vld [vmem:[%s4145_s0 + $0x238] sm:$0xff] }
  0x95   :  { %3053 = vmatpush3.bf16.msra.mxu1 %v3217_v27  ;;  %2076 = vmatprep.mubr.bf16.mxu0 %v2431_v28  ;;  %v116_v27 = vld [vmem:[%s4145_s0 + $0x328] sm:$0xff]  ;;  %v2494_v28 = vcombine.low %v99_v16, %v107_v17  ;;  %v2510_v36 = vcombine.low %v115_v26, %v115_v26  ;;  %v117_v16 = vld [vmem:[%s4145_s0 + $0x330] sm:$0xff]  ;;  %v118_v17 = vld [vmem:[%s4145_s0 + $0x338] sm:$0xff] }
  0x96   :  { %2164 = vmatprep.mubr.bf16.mxu1 %v2433_v30  ;;  %2996 = vmatprep.subr.bf16.mxu0 %v3218_v29  ;;  %v2496_v29 = vcombine.low %v100_v19, %v108_v20  ;;  %v2511_v30 = vcombine.high %v115_v26, %v115_v26  ;;  %v2512_v37 = vcombine.low %v116_v27, %v116_v27 }
  0x97   :  { %3054 = vmatprep.subr.bf16.mxu1 %v3220_v32  ;;  %v21_v32 = vld [vmem:[%s4145_s0 + $0x30] sm:$0xff]  ;;  %v2515_v20 = vcombine.high %v117_v16, %v117_v16  ;;  %v2514_v26 = vcombine.low %v117_v16, %v117_v16 }
  0x98   :  { %2997 = vmatpush3.bf16.msra.mxu0 %v3219_v31  ;;  %v2513_v31 = vcombine.high %v116_v27, %v116_v27 }
  0x99   :  { %3055 = vmatpush3.bf16.msra.mxu1 %v3221_v33  ;;  %2998 = vmatprep.subr.bf16.mxu0 %v3222_v34  ;;  %v29_v33 = vld [vmem:[%s4145_s0 + $0x70] sm:$0xff]  ;;  %v22_v34 = vld [vmem:[%s4145_s0 + $0x38] sm:$0xff] }
  0x9a   :  { %3056 = vmatprep.subr.bf16.mxu1 %v3224_v39  ;;  %v2419_v38 = vcombine.high %v21_v32, %v29_v33  ;;  %v2421_v39 = vcombine.high %v22_v34, %v30_v35 }
  0x9b   :  { %2077 = vmatmul.mubr.bf16.gmra.mrb[60].mxu0 %v2430_v40  ;;  %v37_v40 = vld [vmem:[%s4145_s0 + $0xb0] sm:$0xff] }
  0x9c   :  { %2165 = vmatmul.mubr.bf16.gmra.mrb[60].mxu1 %v2432_v41  ;;  %2084 = vmatprep.mubr.bf16.mxu0 %v2447_v42  ;;  %v45_v41 = vld [vmem:[%s4145_s0 + $0xf0] sm:$0xff]  ;;  %v38_v42 = vld [vmem:[%s4145_s0 + $0xb8] sm:$0xff] }
  0x9d   :  { %2172 = vmatprep.mubr.bf16.mxu1 %v2449_v43  ;;  %2999 = vmatpush3.bf16.msra.mxu0 %v3223_v44  ;;  %v46_v43 = vld [vmem:[%s4145_s0 + $0xf8] sm:$0xff]  ;;  %v2418_v44 = vcombine.low %v21_v32, %v29_v33  ;;  %v2434_v52 = vcombine.low %v37_v40, %v45_v41 }
  0x9e   :  { %3057 = vmatpush3.bf16.msra.mxu1 %v3225_v45  ;;  %3000 = vmatprep.subr.bf16.mxu0 %v3226_v46  ;;  %v2420_v45 = vcombine.low %v22_v34, %v30_v35  ;;  %v2435_v46 = vcombine.high %v37_v40, %v45_v41 }
  0x9f   :  { %3058 = vmatprep.subr.bf16.mxu1 %v3228_v47  ;;  %v2437_v47 = vcombine.high %v38_v42, %v46_v43 }
  0xa1   :  { %3001 = vmatpush3.bf16.msra.mxu0 %v3227_v48  ;;  %v53_v48 = vld [vmem:[%s4145_s0 + $0x130] sm:$0xff] }
  0xa2   :  { %3059 = vmatpush3.bf16.msra.mxu1 %v3229_v53  ;;  %3002 = vmatprep.subr.bf16.mxu0 %v3230_v54  ;;  %v2436_v53 = vcombine.low %v38_v42, %v46_v43  ;;  %v2451_v54 = vcombine.high %v53_v48, %v61_v49 }
  0xa3   :  { %2085 = vmatmul.mubr.bf16.gmra.mrb[64].mxu0 %v2446_v55  ;;  %3060 = vmatprep.subr.bf16.mxu1 %v3232_v56  ;;  %v2453_v55 = vcombine.high %v54_v50, %v62_v51  ;;  %v69_v56 = vld [vmem:[%s4145_s0 + $0x1b0] sm:$0xff] }
  0xa4   :  { %2173 = vmatmul.mubr.bf16.gmra.mrb[64].mxu1 %v2448_v57  ;;  %2092 = vmatprep.mubr.bf16.mxu0 %v2463_v58  ;;  %v77_v57 = vld [vmem:[%s4145_s0 + $0x1f0] sm:$0xff]  ;;  %v70_v58 = vld [vmem:[%s4145_s0 + $0x1b8] sm:$0xff] }
  0xa5   :  { %2180 = vmatprep.mubr.bf16.mxu1 %v2465_v59  ;;  %3003 = vmatpush3.bf16.msra.mxu0 %v3231_v60  ;;  %v78_v59 = vld [vmem:[%s4145_s0 + $0x1f8] sm:$0xff]  ;;  %v2450_v60 = vcombine.low %v53_v48, %v61_v49  ;;  %v2466_v4 = vcombine.low %v69_v56, %v77_v57 }
  0xa6   :  { %3061 = vmatpush3.bf16.msra.mxu1 %v3233_v61  ;;  %3004 = vmatprep.subr.bf16.mxu0 %v3234_v62  ;;  %v2452_v61 = vcombine.low %v54_v50, %v62_v51  ;;  %v2467_v62 = vcombine.high %v69_v56, %v77_v57 }
  0xa7   :  { %3062 = vmatprep.subr.bf16.mxu1 %v3236_v63  ;;  %v2469_v63 = vcombine.high %v70_v58, %v78_v59 }
  0xa9   :  { %3005 = vmatpush3.bf16.msra.mxu0 %v3235_v3  ;;  %v94_v3 = vld [vmem:[%s4145_s0 + $0x278] sm:$0xff] }
  0xaa   :  { %3063 = vmatpush3.bf16.msra.mxu1 %v3237_v5  ;;  %3006 = vmatprep.subr.bf16.mxu0 %v3238_v6  ;;  %v2468_v5 = vcombine.low %v70_v58, %v78_v59  ;;  %v2483_v6 = vcombine.high %v85_v0, %v93_v1 }
  0xab   :  { %2093 = vmatmul.mubr.bf16.gmra.mrb[68].mxu0 %v2462_v7  ;;  %3064 = vmatprep.subr.bf16.mxu1 %v3240_v8  ;;  %v2485_v7 = vcombine.high %v86_v2, %v94_v3  ;;  %v101_v8 = vld [vmem:[%s4145_s0 + $0x2b0] sm:$0xff] }
  0xac   :  { %2181 = vmatmul.mubr.bf16.gmra.mrb[68].mxu1 %v2464_v9  ;;  %2100 = vmatprep.mubr.bf16.mxu0 %v2479_v10  ;;  %v109_v9 = vld [vmem:[%s4145_s0 + $0x2f0] sm:$0xff]  ;;  %v102_v10 = vld [vmem:[%s4145_s0 + $0x2b8] sm:$0xff] }
  0xad   :  { %2188 = vmatprep.mubr.bf16.mxu1 %v2481_v11  ;;  %3007 = vmatpush3.bf16.msra.mxu0 %v3239_v12  ;;  %v110_v11 = vld [vmem:[%s4145_s0 + $0x2f8] sm:$0xff]  ;;  %v2482_v12 = vcombine.low %v85_v0, %v93_v1 }
  0xae   :  { %3065 = vmatpush3.bf16.msra.mxu1 %v3241_v13  ;;  %3008 = vmatprep.subr.bf16.mxu0 %v3246_v14  ;;  %v2484_v13 = vcombine.low %v86_v2, %v94_v3  ;;  %v2499_v14 = vcombine.high %v101_v8, %v109_v9  ;;  %v2500_v19 = vcombine.low %v102_v10, %v110_v11 }
  0xaf   :  { %3066 = vmatprep.subr.bf16.mxu1 %v3248_v15  ;;  %v2501_v15 = vcombine.high %v102_v10, %v110_v11 }
  0xb1   :  { %3009 = vmatpush3.bf16.msra.mxu0 %v3247_v18  ;;  %v2498_v18 = vcombine.low %v101_v8, %v109_v9 }
  0xb2   :  { %3067 = vmatpush3.bf16.msra.mxu1 %v3249_v21  ;;  %v2517_v21 = vcombine.high %v118_v17, %v118_v17 }
  0xb3   :  { %2101 = vmatmul.mubr.bf16.gmra.mrb[72].mxu0 %v2478_v22 }
  0xb4   :  { %2189 = vmatmul.mubr.bf16.gmra.mrb[72].mxu1 %v2480_v23  ;;  %2108 = vmatprep.mubr.bf16.mxu0 %v2495_v24  ;;  %v3973_v24 = vld [vmem:[%s4146_s2] ss:$0 sm:$0xff] }
  0xb5   :  { %2196 = vmatprep.mubr.bf16.mxu1 %v2497_v25 }
  0xbb   :  { %2109 = vmatmul.mubr.bf16.gmra.mrb[76].mxu0 %v2494_v28 }
  0xbc   :  { %2197 = vmatmul.mubr.bf16.gmra.mrb[76].mxu1 %v2496_v29  ;;  %2116 = vmatprep.mubr.bf16.mxu0 %v2511_v30  ;;  %v2516_v30 = vcombine.low %v118_v17, %v118_v17 }
  0xbd   :  { %2204 = vmatprep.mubr.bf16.mxu1 %v2513_v31 }
  0xc3   :  { %2117 = vmatmul.mubr.bf16.gmra.mrb[80].mxu0 %v2510_v36 }
  0xc4   :  { %2205 = vmatmul.mubr.bf16.gmra.mrb[80].mxu1 %v2512_v37  ;;  %2244 = vmatprep.mubr.bf16.mxu0 %v2419_v38 }
  0xc5   :  { %2332 = vmatprep.mubr.bf16.mxu1 %v2421_v39 }
  0xcb   :  { %2245 = vmatmul.mubr.bf16.vlgmr.msra.gmra.mrb[84].mxu0 %v2418_v44 }
  0xcc   :  { %2333 = vmatmul.mubr.bf16.vlgmr.msra.gmra.mrb[84].mxu1 %v2420_v45  ;;  %2252 = vmatprep.mubr.bf16.mxu0 %v2435_v46 }
  0xcd   :  { %2340 = vmatprep.mubr.bf16.mxu1 %v2437_v47 }
  0xd3   :  { %2253 = vmatmul.mubr.bf16.gmra.mrb[88].mxu0 %v2434_v52 }
  0xd4   :  { %2341 = vmatmul.mubr.bf16.gmra.mrb[88].mxu1 %v2436_v53  ;;  %2260 = vmatprep.mubr.bf16.mxu0 %v2451_v54 }
  0xd5   :  { %2348 = vmatprep.mubr.bf16.mxu1 %v2453_v55 }
  0xdb   :  { %2261 = vmatmul.mubr.bf16.gmra.mrb[92].mxu0 %v2450_v60 }
  0xdc   :  { %2349 = vmatmul.mubr.bf16.gmra.mrb[92].mxu1 %v2452_v61  ;;  %2268 = vmatprep.mubr.bf16.mxu0 %v2467_v62 }
  0xdd   :  { %2356 = vmatprep.mubr.bf16.mxu1 %v2469_v63 }
  0xe3   :  { %2269 = vmatmul.mubr.bf16.gmra.mrb[96].mxu0 %v2466_v4 }
  0xe4   :  { %2357 = vmatmul.mubr.bf16.gmra.mrb[96].mxu1 %v2468_v5  ;;  %2276 = vmatprep.mubr.bf16.mxu0 %v2483_v6 }
  0xe5   :  { %2364 = vmatprep.mubr.bf16.mxu1 %v2485_v7 }
  0xeb   :  { %2277 = vmatmul.mubr.bf16.gmra.mrb[100].mxu0 %v2482_v12 }
  0xec   :  { %2365 = vmatmul.mubr.bf16.gmra.mrb[100].mxu1 %v2484_v13  ;;  %2284 = vmatprep.mubr.bf16.mxu0 %v2499_v14 }
  0xed   :  { %2372 = vmatprep.mubr.bf16.mxu1 %v2501_v15 }
  0xf3   :  { %2285 = vmatmul.mubr.bf16.gmra.mrb[104].mxu0 %v2498_v18 }
  0xf4   :  { %2373 = vmatmul.mubr.bf16.gmra.mrb[104].mxu1 %v2500_v19  ;;  %2292 = vmatprep.mubr.bf16.mxu0 %v2515_v20 }
  0xf5   :  { %2380 = vmatprep.mubr.bf16.mxu1 %v2517_v21 }
  0xf6   :  { %v2662_v22 = vpop.f32.mrb[0].mxu0 }
  0xf7   :  { %v2720_v23 = vpop.f32.mrb[0].mxu1  ;;  %v2663_v25 = vpop.f32.mrb[1].mxu0 }
  0xf8   :  { %v2664_v27 = vadd.f32 %v2663_v25, %v2662_v22  ;;  %v2721_v28 = vpop.f32.mrb[1].mxu1  ;;  %v2665_v29 = vpop.f32.mrb[2].mxu0 }
  0xf9   :  { %v2722_v31 = vadd.f32 %v2721_v28, %v2720_v23  ;;  %v2723_v32 = vpop.f32.mrb[2].mxu1  ;;  %v2666_v33 = vpop.f32.mrb[3].mxu0 }
  0xfa   :  { %v1719_v34 = vadd.f32 %v2664_v27, %v3973_v24  ;;  %v2667_v35 = vadd.f32 %v2666_v33, %v2665_v29  ;;  %v2724_v36 = vpop.f32.mrb[3].mxu1 }
  0xfb   :  { %v2725_v37 = vadd.f32 %v2724_v36, %v2723_v32  ;;  %2293 = vmatmul.mubr.bf16.gmra.mrb[108].mxu0 %v2514_v26 }
  0xfc   :  { %v3976_v38 = vadd.f32 %v2722_v31, %v1719_v34  ;;  %v1722_v39 = vadd.f32 %v2667_v35, %v3973_v24  ;;  %2381 = vmatmul.mubr.bf16.gmra.mrb[108].mxu1 %v2516_v30 }
  0xfe   :  { %v3979_v40 = vadd.f32 %v2725_v37, %v1722_v39  ;;  %v2668_v41 = vpop.f32.mrb[4].mxu0 }
  0xff   :  { %v2726_v42 = vpop.f32.mrb[4].mxu1  ;;  %v2669_v43 = vpop.f32.mrb[5].mxu0 }
 0x100   :  { %v2670_v44 = vadd.f32 %v2669_v43, %v2668_v41  ;;  %v2727_v45 = vpop.f32.mrb[5].mxu1  ;;  %v2671_v46 = vpop.f32.mrb[6].mxu0 }
 0x101   :  { %v2728_v47 = vadd.f32 %v2727_v45, %v2726_v42  ;;  %v2729_v48 = vpop.f32.mrb[6].mxu1  ;;  %v2672_v49 = vpop.f32.mrb[7].mxu0 }
 0x102   :  { %v1727_v50 = vadd.f32 %v2670_v44, %v3973_v24  ;;  %v2673_v51 = vadd.f32 %v2672_v49, %v2671_v46  ;;  %v2730_v52 = vpop.f32.mrb[7].mxu1 }
 0x103   :  { %v2731_v53 = vadd.f32 %v2730_v52, %v2729_v48 }
 0x104   :  { %v3982_v54 = vadd.f32 %v2728_v47, %v1727_v50  ;;  %v1730_v55 = vadd.f32 %v2673_v51, %v3973_v24 }
 0x106   :  { %v3985_v56 = vadd.f32 %v2731_v53, %v1730_v55  ;;  %v2674_v57 = vpop.f32.mrb[8].mxu0 }
 0x107   :  { %v2732_v58 = vpop.f32.mrb[8].mxu1  ;;  %v2675_v59 = vpop.f32.mrb[9].mxu0 }
 0x108   :  { %v2676_v60 = vadd.f32 %v2675_v59, %v2674_v57  ;;  %v2733_v61 = vpop.f32.mrb[9].mxu1  ;;  %v2677_v62 = vpop.f32.mrb[10].mxu0 }
 0x109   :  { %v2734_v63 = vadd.f32 %v2733_v61, %v2732_v58  ;;  %v2735_v0 = vpop.f32.mrb[10].mxu1  ;;  %v2678_v1 = vpop.f32.mrb[11].mxu0 }
 0x10a   :  { %v1735_v2 = vadd.f32 %v2676_v60, %v3973_v24  ;;  %v2679_v3 = vadd.f32 %v2678_v1, %v2677_v62  ;;  %v2736_v4 = vpop.f32.mrb[11].mxu1 }
 0x10b   :  { %v2737_v5 = vadd.f32 %v2736_v4, %v2735_v0 }
 0x10c   :  { %v3988_v6 = vadd.f32 %v2734_v63, %v1735_v2  ;;  %v1738_v7 = vadd.f32 %v2679_v3, %v3973_v24 }
 0x10e   :  { %v3991_v8 = vadd.f32 %v2737_v5, %v1738_v7  ;;  %v2680_v9 = vpop.f32.mrb[12].mxu0 }
 0x10f   :  { %v2738_v10 = vpop.f32.mrb[12].mxu1  ;;  %v2681_v11 = vpop.f32.mrb[13].mxu0 }
 0x110   :  { %v2682_v12 = vadd.f32 %v2681_v11, %v2680_v9  ;;  %v2739_v13 = vpop.f32.mrb[13].mxu1  ;;  %v2683_v14 = vpop.f32.mrb[14].mxu0 }
 0x111   :  { %v2740_v15 = vadd.f32 %v2739_v13, %v2738_v10  ;;  %v2741_v16 = vpop.f32.mrb[14].mxu1  ;;  %v2684_v17 = vpop.f32.mrb[15].mxu0 }
 0x112   :  { %v1743_v18 = vadd.f32 %v2682_v12, %v3973_v24  ;;  %v2685_v19 = vadd.f32 %v2684_v17, %v2683_v14  ;;  %v2742_v20 = vpop.f32.mrb[15].mxu1 }
 0x113   :  { %v2743_v21 = vadd.f32 %v2742_v20, %v2741_v16 }
 0x114   :  { %v3994_v22 = vadd.f32 %v2740_v15, %v1743_v18  ;;  %v1746_v23 = vadd.f32 %v2685_v19, %v3973_v24 }
 0x116   :  { %v3997_v25 = vadd.f32 %v2743_v21, %v1746_v23  ;;  %v2686_v26 = vpop.f32.mrb[16].mxu0 }
 0x117   :  { %v2744_v27 = vpop.f32.mrb[16].mxu1  ;;  %v2687_v28 = vpop.f32.mrb[17].mxu0 }
 0x118   :  { %v2688_v29 = vadd.f32 %v2687_v28, %v2686_v26  ;;  %v2745_v30 = vpop.f32.mrb[17].mxu1  ;;  %v2689_v31 = vpop.f32.mrb[18].mxu0 }
 0x119   :  { %v2746_v32 = vadd.f32 %v2745_v30, %v2744_v27  ;;  %v2747_v33 = vpop.f32.mrb[18].mxu1  ;;  %v2690_v34 = vpop.f32.mrb[19].mxu0 }
 0x11a   :  { %v1751_v35 = vadd.f32 %v2688_v29, %v3973_v24  ;;  %v2691_v36 = vadd.f32 %v2690_v34, %v2689_v31  ;;  %v2748_v37 = vpop.f32.mrb[19].mxu1 }
 0x11b   :  { %v2749_v39 = vadd.f32 %v2748_v37, %v2747_v33 }
 0x11c   :  { %v4000_v41 = vadd.f32 %v2746_v32, %v1751_v35  ;;  %v1754_v42 = vadd.f32 %v2691_v36, %v3973_v24 }
 0x11e   :  { %v4003_v43 = vadd.f32 %v2749_v39, %v1754_v42  ;;  %v2692_v44 = vpop.f32.mrb[20].mxu0 }
 0x11f   :  { %v2750_v45 = vpop.f32.mrb[20].mxu1  ;;  %v2693_v46 = vpop.f32.mrb[21].mxu0 }
 0x120   :  { %v2694_v47 = vadd.f32 %v2693_v46, %v2692_v44  ;;  %v2751_v48 = vpop.f32.mrb[21].mxu1  ;;  %v2695_v49 = vpop.f32.mrb[22].mxu0 }
 0x121   :  { %v2752_v50 = vadd.f32 %v2751_v48, %v2750_v45  ;;  %v2753_v51 = vpop.f32.mrb[22].mxu1  ;;  %v2696_v52 = vpop.f32.mrb[23].mxu0 }
 0x122   :  { %v1759_v53 = vadd.f32 %v2694_v47, %v3973_v24  ;;  %v2697_v55 = vadd.f32 %v2696_v52, %v2695_v49  ;;  %v2754_v57 = vpop.f32.mrb[23].mxu1 }
 0x123   :  { %v2755_v58 = vadd.f32 %v2754_v57, %v2753_v51 }
 0x124   :  { %v4006_v59 = vadd.f32 %v2752_v50, %v1759_v53  ;;  %v1762_v60 = vadd.f32 %v2697_v55, %v3973_v24 }
 0x126   :  { %v4009_v61 = vadd.f32 %v2755_v58, %v1762_v60  ;;  %v2698_v62 = vpop.f32.mrb[24].mxu0 }
 0x127   :  { %v2756_v63 = vpop.f32.mrb[24].mxu1  ;;  %v2699_v0 = vpop.f32.mrb[25].mxu0 }
 0x128   :  { %v2700_v1 = vadd.f32 %v2699_v0, %v2698_v62  ;;  %v2757_v2 = vpop.f32.mrb[25].mxu1  ;;  %v2701_v3 = vpop.f32.mrb[26].mxu0 }
 0x129   :  { %v2758_v4 = vadd.f32 %v2757_v2, %v2756_v63  ;;  %v2759_v5 = vpop.f32.mrb[26].mxu1  ;;  %v2702_v7 = vpop.f32.mrb[27].mxu0 }
 0x12a   :  { %v1767_v9 = vadd.f32 %v2700_v1, %v3973_v24  ;;  %v2760_v10 = vpop.f32.mrb[27].mxu1 }
 0x12c   :  { %v4012_v11 = vadd.f32 %v2758_v4, %v1767_v9 }
 0x12e   :  { %v2778_v12 = vpop.f32.mrb[28].mxu0 }
 0x12f   :  { %v2836_v13 = vpop.f32.mrb[28].mxu1  ;;  %v2779_v14 = vpop.f32.mrb[29].mxu0 }
 0x130   :  { %v2780_v15 = vadd.f32 %v2779_v14, %v2778_v12  ;;  %v2837_v16 = vpop.f32.mrb[29].mxu1  ;;  %v2781_v17 = vpop.f32.mrb[30].mxu0 }
 0x131   :  { %v2838_v18 = vadd.f32 %v2837_v16, %v2836_v13  ;;  %v2839_v19 = vpop.f32.mrb[30].mxu1  ;;  %v2782_v20 = vpop.f32.mrb[31].mxu0 }
 0x132   :  { %v1895_v21 = vadd.f32 %v2780_v15, %v3976_v38  ;;  %v2783_v23 = vadd.f32 %v2782_v20, %v2781_v17  ;;  %v2840_v26 = vpop.f32.mrb[31].mxu1 }
 0x133   :  { %v2841_v27 = vadd.f32 %v2840_v26, %v2839_v19 }
 0x134   :  { %v4015_v28 = vadd.f32 %v2838_v18, %v1895_v21  ;;  %v1898_v24 = vadd.f32 %v2783_v23, %v3979_v40 }
 0x136   :  { %v4018_v29 = vadd.f32 %v2841_v27, %v1898_v24  ;;  %v2784_v30 = vpop.f32.mrb[32].mxu0 }
 0x137   :  { %v2842_v31 = vpop.f32.mrb[32].mxu1  ;;  %v2785_v32 = vpop.f32.mrb[33].mxu0 }
 0x138   :  { %v2786_v33 = vadd.f32 %v2785_v32, %v2784_v30  ;;  %v2843_v34 = vpop.f32.mrb[33].mxu1  ;;  %v2787_v35 = vpop.f32.mrb[34].mxu0 }
 0x139   :  { %v2844_v36 = vadd.f32 %v2843_v34, %v2842_v31  ;;  %v2845_v37 = vpop.f32.mrb[34].mxu1  ;;  %v2788_v39 = vpop.f32.mrb[35].mxu0 }
 0x13a   :  { %v1903_v38 = vadd.f32 %v2786_v33, %v3982_v54  ;;  %v2789_v42 = vadd.f32 %v2788_v39, %v2787_v35  ;;  %v2846_v44 = vpop.f32.mrb[35].mxu1 }
 0x13b   :  { %v2847_v45 = vadd.f32 %v2846_v44, %v2845_v37 }
 0x13c   :  { %v4021_v46 = vadd.f32 %v2844_v36, %v1903_v38  ;;  %v1906_v40 = vadd.f32 %v2789_v42, %v3985_v56 }
 0x13e   :  { %v4024_v47 = vadd.f32 %v2847_v45, %v1906_v40  ;;  %v2790_v48 = vpop.f32.mrb[36].mxu0 }
 0x13f   :  { %v2848_v49 = vpop.f32.mrb[36].mxu1  ;;  %v2791_v50 = vpop.f32.mrb[37].mxu0 }
 0x140   :  { %v2792_v51 = vadd.f32 %v2791_v50, %v2790_v48  ;;  %v2849_v52 = vpop.f32.mrb[37].mxu1  ;;  %v2793_v53 = vpop.f32.mrb[38].mxu0 }
 0x141   :  { %v2850_v55 = vadd.f32 %v2849_v52, %v2848_v49  ;;  %v2851_v57 = vpop.f32.mrb[38].mxu1  ;;  %v2794_v58 = vpop.f32.mrb[39].mxu0 }
 0x142   :  { %v1911_v54 = vadd.f32 %v2792_v51, %v3988_v6  ;;  %v2795_v60 = vadd.f32 %v2794_v58, %v2793_v53  ;;  %v2852_v62 = vpop.f32.mrb[39].mxu1 }
 0x143   :  { %v2853_v63 = vadd.f32 %v2852_v62, %v2851_v57 }
 0x144   :  { %v4027_v0 = vadd.f32 %v2850_v55, %v1911_v54  ;;  %v1914_v56 = vadd.f32 %v2795_v60, %v3991_v8 }
 0x146   :  { %v4030_v1 = vadd.f32 %v2853_v63, %v1914_v56  ;;  %v2796_v2 = vpop.f32.mrb[40].mxu0 }
 0x147   :  { %v2854_v3 = vpop.f32.mrb[40].mxu1  ;;  %v2797_v4 = vpop.f32.mrb[41].mxu0 }
 0x148   :  { %v2798_v5 = vadd.f32 %v2797_v4, %v2796_v2  ;;  %v2855_v7 = vpop.f32.mrb[41].mxu1  ;;  %v2799_v9 = vpop.f32.mrb[42].mxu0 }
 0x149   :  { %v2856_v10 = vadd.f32 %v2855_v7, %v2854_v3  ;;  %v2857_v12 = vpop.f32.mrb[42].mxu1  ;;  %v2800_v13 = vpop.f32.mrb[43].mxu0 }
 0x14a   :  { %v1919_v6 = vadd.f32 %v2798_v5, %v3994_v22  ;;  %v2801_v14 = vadd.f32 %v2800_v13, %v2799_v9  ;;  %v2858_v15 = vpop.f32.mrb[43].mxu1 }
 0x14b   :  { %v2859_v16 = vadd.f32 %v2858_v15, %v2857_v12 }
 0x14c   :  { %v4033_v17 = vadd.f32 %v2856_v10, %v1919_v6  ;;  %v1922_v8 = vadd.f32 %v2801_v14, %v3997_v25 }
 0x14e   :  { %v4036_v18 = vadd.f32 %v2859_v16, %v1922_v8  ;;  %v2802_v19 = vpop.f32.mrb[44].mxu0 }
 0x14f   :  { %v2860_v20 = vpop.f32.mrb[44].mxu1  ;;  %v2803_v21 = vpop.f32.mrb[45].mxu0 }
 0x150   :  { %v2804_v23 = vadd.f32 %v2803_v21, %v2802_v19  ;;  %v2861_v26 = vpop.f32.mrb[45].mxu1  ;;  %v2805_v27 = vpop.f32.mrb[46].mxu0 }
 0x151   :  { %v2862_v24 = vadd.f32 %v2861_v26, %v2860_v20  ;;  %v2863_v30 = vpop.f32.mrb[46].mxu1  ;;  %v2806_v31 = vpop.f32.mrb[47].mxu0 }
 0x152   :  { %v1927_v22 = vadd.f32 %v2804_v23, %v4000_v41  ;;  %v2807_v32 = vadd.f32 %v2806_v31, %v2805_v27  ;;  %v2864_v33 = vpop.f32.mrb[47].mxu1 }
 0x153   :  { %v2865_v34 = vadd.f32 %v2864_v33, %v2863_v30 }
 0x154   :  { %v4039_v35 = vadd.f32 %v2862_v24, %v1927_v22  ;;  %v1930_v25 = vadd.f32 %v2807_v32, %v4003_v43 }
 0x156   :  { %v4042_v36 = vadd.f32 %v2865_v34, %v1930_v25  ;;  %v2808_v37 = vpop.f32.mrb[48].mxu0 }
 0x157   :  { %v2866_v39 = vpop.f32.mrb[48].mxu1  ;;  %v2809_v38 = vpop.f32.mrb[49].mxu0 }
 0x158   :  { %v2810_v42 = vadd.f32 %v2809_v38, %v2808_v37  ;;  %v2867_v44 = vpop.f32.mrb[49].mxu1  ;;  %v2811_v45 = vpop.f32.mrb[50].mxu0 }
 0x159   :  { %v2868_v40 = vadd.f32 %v2867_v44, %v2866_v39  ;;  %v2869_v48 = vpop.f32.mrb[50].mxu1  ;;  %v2812_v49 = vpop.f32.mrb[51].mxu0 }
 0x15a   :  { %v1935_v41 = vadd.f32 %v2810_v42, %v4006_v59  ;;  %v2813_v50 = vadd.f32 %v2812_v49, %v2811_v45  ;;  %v2870_v51 = vpop.f32.mrb[51].mxu1 }
 0x15b   :  { %v2871_v52 = vadd.f32 %v2870_v51, %v2869_v48 }
 0x15c   :  { %v4045_v53 = vadd.f32 %v2868_v40, %v1935_v41  ;;  %v1938_v43 = vadd.f32 %v2813_v50, %v4009_v61 }
 0x15e   :  { %v4048_v55 = vadd.f32 %v2871_v52, %v1938_v43  ;;  %v2814_v57 = vpop.f32.mrb[52].mxu0 }
 0x15f   :  { %v2872_v58 = vpop.f32.mrb[52].mxu1  ;;  %v2815_v54 = vpop.f32.mrb[53].mxu0 }
 0x160   :  { %v2816_v60 = vadd.f32 %v2815_v54, %v2814_v57  ;;  %v2873_v62 = vpop.f32.mrb[53].mxu1  ;;  %v2817_v63 = vpop.f32.mrb[54].mxu0 }
 0x161   :  { %v2874_v56 = vadd.f32 %v2873_v62, %v2872_v58  ;;  %v2875_v2 = vpop.f32.mrb[54].mxu1  ;;  %v2818_v3 = vpop.f32.mrb[55].mxu0 }
 0x162   :  { %v1943_v59 = vadd.f32 %v2816_v60, %v4012_v11  ;;  %v2876_v4 = vpop.f32.mrb[55].mxu1 }
 0x164   :  { %v4051_v5 = vadd.f32 %v2874_v56, %v1943_v59 }
 0x166   :  { %v2894_v7 = vpop.f32.mrb[56].mxu0 }
 0x167   :  { %v2952_v9 = vpop.f32.mrb[56].mxu1  ;;  %v2895_v10 = vpop.f32.mrb[57].mxu0 }
 0x168   :  { %v2896_v61 = vadd.f32 %v2895_v10, %v2894_v7  ;;  %v2953_v12 = vpop.f32.mrb[57].mxu1  ;;  %v2897_v13 = vpop.f32.mrb[58].mxu0 }
 0x169   :  { %v2954_v6 = vadd.f32 %v2953_v12, %v2952_v9  ;;  %v2955_v14 = vpop.f32.mrb[58].mxu1  ;;  %v2898_v15 = vpop.f32.mrb[59].mxu0 }
 0x16a   :  { %v2071_v16 = vadd.f32 %v2896_v61, %v4015_v28  ;;  %v2899_v8 = vadd.f32 %v2898_v15, %v2897_v13  ;;  %v2956_v19 = vpop.f32.mrb[59].mxu1 }
 0x16b   :  { %v2957_v20 = vadd.f32 %v2956_v19, %v2955_v14 }
 0x16c   :  { %v4054_v21 = vadd.f32 %v2954_v6, %v2071_v16  ;;  %v2074_v11 = vadd.f32 %v2899_v8, %v4018_v29 }
 0x16e   :  { %v4057_v23 = vadd.f32 %v2957_v20, %v2074_v11  ;;  %v2900_v26 = vpop.f32.mrb[60].mxu0 }
 0x16f   :  { %v2958_v27 = vpop.f32.mrb[60].mxu1  ;;  %v2901_v24 = vpop.f32.mrb[61].mxu0 }
 0x170   :  { %v2902_v30 = vadd.f32 %v2901_v24, %v2900_v26  ;;  %v2959_v31 = vpop.f32.mrb[61].mxu1  ;;  %v2903_v22 = vpop.f32.mrb[62].mxu0 }
 0x171   :  { %v2960_v32 = vadd.f32 %v2959_v31, %v2958_v27  ;;  %v2961_v33 = vpop.f32.mrb[62].mxu1  ;;  %v2904_v34 = vpop.f32.mrb[63].mxu0 }
 0x172   :  { %v2079_v28 = vadd.f32 %v2902_v30, %v4021_v46  ;;  %v2905_v25 = vadd.f32 %v2904_v34, %v2903_v22  ;;  %v2962_v37 = vpop.f32.mrb[63].mxu1 }
 0x173   :  { %v2963_v39 = vadd.f32 %v2962_v37, %v2961_v33 }
 0x174   :  { %v4060_v38 = vadd.f32 %v2960_v32, %v2079_v28  ;;  %v2082_v29 = vadd.f32 %v2905_v25, %v4024_v47 }
 0x176   :  { %v4063_v42 = vadd.f32 %v2963_v39, %v2082_v29  ;;  %v2906_v44 = vpop.f32.mrb[64].mxu0 }
 0x177   :  { %v2964_v45 = vpop.f32.mrb[64].mxu1  ;;  %v2907_v40 = vpop.f32.mrb[65].mxu0 }
 0x178   :  { %v2908_v48 = vadd.f32 %v2907_v40, %v2906_v44  ;;  %v2965_v49 = vpop.f32.mrb[65].mxu1  ;;  %v2909_v41 = vpop.f32.mrb[66].mxu0 }
 0x179   :  { %v2966_v50 = vadd.f32 %v2965_v49, %v2964_v45  ;;  %v2967_v51 = vpop.f32.mrb[66].mxu1  ;;  %v2910_v52 = vpop.f32.mrb[67].mxu0 }
 0x17a   :  { %v2087_v46 = vadd.f32 %v2908_v48, %v4027_v0  ;;  %v2911_v43 = vadd.f32 %v2910_v52, %v2909_v41  ;;  %v2968_v57 = vpop.f32.mrb[67].mxu1 }
 0x17b   :  { %v2969_v58 = vadd.f32 %v2968_v57, %v2967_v51 }
 0x17c   :  { %v4066_v54 = vadd.f32 %v2966_v50, %v2087_v46  ;;  %v2090_v47 = vadd.f32 %v2911_v43, %v4030_v1 }
 0x17e   :  { %v4069_v60 = vadd.f32 %v2969_v58, %v2090_v47  ;;  %v2912_v62 = vpop.f32.mrb[68].mxu0 }
 0x17f   :  { %v2970_v63 = vpop.f32.mrb[68].mxu1  ;;  %v2913_v56 = vpop.f32.mrb[69].mxu0 }
 0x180   :  { %v2914_v2 = vadd.f32 %v2913_v56, %v2912_v62  ;;  %v2971_v3 = vpop.f32.mrb[69].mxu1  ;;  %v2915_v59 = vpop.f32.mrb[70].mxu0 }
 0x181   :  { %v2972_v4 = vadd.f32 %v2971_v3, %v2970_v63  ;;  %v2973_v7 = vpop.f32.mrb[70].mxu1  ;;  %v2916_v9 = vpop.f32.mrb[71].mxu0 }
 0x182   :  { %v2095_v0 = vadd.f32 %v2914_v2, %v4033_v17  ;;  %v2917_v10 = vadd.f32 %v2916_v9, %v2915_v59  ;;  %v2974_v61 = vpop.f32.mrb[71].mxu1 }
 0x183   :  { %v2975_v12 = vadd.f32 %v2974_v61, %v2973_v7 }
 0x184   :  { %v4072_v13 = vadd.f32 %v2972_v4, %v2095_v0  ;;  %v2098_v1 = vadd.f32 %v2917_v10, %v4036_v18 }
 0x186   :  { %v4075_v6 = vadd.f32 %v2975_v12, %v2098_v1  ;;  %v2918_v14 = vpop.f32.mrb[72].mxu0 }
 0x187   :  { %v2976_v15 = vpop.f32.mrb[72].mxu1  ;;  %v2919_v16 = vpop.f32.mrb[73].mxu0 }
 0x188   :  { %v2920_v8 = vadd.f32 %v2919_v16, %v2918_v14  ;;  %v2977_v19 = vpop.f32.mrb[73].mxu1  ;;  %v2921_v20 = vpop.f32.mrb[74].mxu0 }
 0x189   :  { %v2978_v11 = vadd.f32 %v2977_v19, %v2976_v15  ;;  %v2979_v26 = vpop.f32.mrb[74].mxu1  ;;  %v2922_v27 = vpop.f32.mrb[75].mxu0 }
 0x18a   :  { %v2103_v17 = vadd.f32 %v2920_v8, %v4039_v35  ;;  %v2923_v24 = vadd.f32 %v2922_v27, %v2921_v20  ;;  %v2980_v30 = vpop.f32.mrb[75].mxu1 }
 0x18b   :  { %v2981_v31 = vadd.f32 %v2980_v30, %v2979_v26 }
 0x18c   :  { %v4078_v22 = vadd.f32 %v2978_v11, %v2103_v17  ;;  %v2106_v18 = vadd.f32 %v2923_v24, %v4042_v36 }
 0x18e   :  { %v4081_v32 = vadd.f32 %v2981_v31, %v2106_v18  ;;  %v2924_v33 = vpop.f32.mrb[76].mxu0 }
 0x18f   :  { %v2982_v34 = vpop.f32.mrb[76].mxu1  ;;  %v2925_v28 = vpop.f32.mrb[77].mxu0 }
 0x190   :  { %v2926_v25 = vadd.f32 %v2925_v28, %v2924_v33  ;;  %v2983_v37 = vpop.f32.mrb[77].mxu1  ;;  %v2927_v39 = vpop.f32.mrb[78].mxu0 }
 0x191   :  { %v2984_v29 = vadd.f32 %v2983_v37, %v2982_v34  ;;  %v2985_v44 = vpop.f32.mrb[78].mxu1  ;;  %v2928_v45 = vpop.f32.mrb[79].mxu0 }
 0x192   :  { %v2111_v35 = vadd.f32 %v2926_v25, %v4045_v53  ;;  %v2929_v40 = vadd.f32 %v2928_v45, %v2927_v39  ;;  %v2986_v48 = vpop.f32.mrb[79].mxu1 }
 0x193   :  { %v2987_v49 = vadd.f32 %v2986_v48, %v2985_v44 }
 0x194   :  { %v4084_v41 = vadd.f32 %v2984_v29, %v2111_v35  ;;  %v2114_v36 = vadd.f32 %v2929_v40, %v4048_v55 }
 0x196   :  { %v4087_v50 = vadd.f32 %v2987_v49, %v2114_v36  ;;  %v2930_v51 = vpop.f32.mrb[80].mxu0 }
 0x197   :  { %v2988_v52 = vpop.f32.mrb[80].mxu1  ;;  %v2931_v46 = vpop.f32.mrb[81].mxu0 }
 0x198   :  { %v2932_v43 = vadd.f32 %v2931_v46, %v2930_v51  ;;  %v2989_v57 = vpop.f32.mrb[81].mxu1  ;;  %v2933_v58 = vpop.f32.mrb[82].mxu0 }
 0x199   :  { %v2990_v47 = vadd.f32 %v2989_v57, %v2988_v52  ;;  %v2991_v62 = vpop.f32.mrb[82].mxu1  ;;  %v2934_v63 = vpop.f32.mrb[83].mxu0 }
 0x19a   :  { %v2119_v53 = vadd.f32 %v2932_v43, %v4051_v5  ;;  %v2992_v56 = vpop.f32.mrb[83].mxu1 }
 0x19c   :  { %v4090_v2 = vadd.f32 %v2990_v47, %v2119_v53 }
 0x19e   :  { %v3010_v3 = vpop.f32.mrb[84].mxu0 }
 0x19f   :  { %v3068_v59 = vpop.f32.mrb[84].mxu1  ;;  %v3011_v4 = vpop.f32.mrb[85].mxu0 }
 0x1a0   :  { %v3012_v55 = vadd.f32 %v3011_v4, %v3010_v3  ;;  %v3069_v7 = vpop.f32.mrb[85].mxu1  ;;  %v3013_v9 = vpop.f32.mrb[86].mxu0 }
 0x1a1   :  { %v3070_v0 = vadd.f32 %v3069_v7, %v3068_v59  ;;  %v3071_v10 = vpop.f32.mrb[86].mxu1  ;;  %v3014_v61 = vpop.f32.mrb[87].mxu0 }
 0x1a2   :  { %v2247_v12 = vadd.f32 %v3012_v55, %v4054_v21  ;;  %v3015_v1 = vadd.f32 %v3014_v61, %v3013_v9  ;;  %v3072_v14 = vpop.f32.mrb[87].mxu1 }
 0x1a3   :  { %v3073_v15 = vadd.f32 %v3072_v14, %v3071_v10 }
 0x1a4   :  { %v2335_v16 = vadd.f32 %v3070_v0, %v2247_v12  ;;  %v2250_v5 = vadd.f32 %v3015_v1, %v4057_v23 }
 0x1a6   :  { %2388 = vst [vmem:[%s4147_s3] sm:$0xff] %v2335_v16  ;;  %v2338_v8 = vadd.f32 %v3073_v15, %v2250_v5  ;;  %v3016_v19 = vpop.f32.mrb[88].mxu0 }
 0x1a7   :  { %v3074_v20 = vpop.f32.mrb[88].mxu1  ;;  %v3017_v11 = vpop.f32.mrb[89].mxu0 }
 0x1a8   :  { %2389 = vst [vmem:[%s4147_s3 + $0x8] sm:$0xff] %v2338_v8  ;;  %v3018_v26 = vadd.f32 %v3017_v11, %v3016_v19  ;;  %v3075_v21 = vpop.f32.mrb[89].mxu1  ;;  %v3019_v27 = vpop.f32.mrb[90].mxu0 }
 0x1a9   :  { %v3076_v17 = vadd.f32 %v3075_v21, %v3074_v20  ;;  %v3077_v24 = vpop.f32.mrb[90].mxu1  ;;  %v3020_v30 = vpop.f32.mrb[91].mxu0 }
 0x1aa   :  { %v2255_v23 = vadd.f32 %v3018_v26, %v4060_v38  ;;  %v3021_v31 = vadd.f32 %v3020_v30, %v3019_v27  ;;  %v3078_v18 = vpop.f32.mrb[91].mxu1 }
 0x1ab   :  { %v3079_v33 = vadd.f32 %v3078_v18, %v3077_v24 }
 0x1ac   :  { %v2343_v34 = vadd.f32 %v3076_v17, %v2255_v23  ;;  %v2258_v28 = vadd.f32 %v3021_v31, %v4063_v42 }
 0x1ae   :  { %2390 = vst [vmem:[%s4147_s3 + $0x10] sm:$0xff] %v2343_v34  ;;  %v2346_v25 = vadd.f32 %v3079_v33, %v2258_v28  ;;  %v3022_v37 = vpop.f32.mrb[92].mxu0 }
 0x1af   :  { %v3080_v39 = vpop.f32.mrb[92].mxu1  ;;  %v3023_v29 = vpop.f32.mrb[93].mxu0 }
 0x1b0   :  { %2391 = vst [vmem:[%s4147_s3 + $0x18] sm:$0xff] %v2346_v25  ;;  %v3024_v44 = vadd.f32 %v3023_v29, %v3022_v37  ;;  %v3081_v38 = vpop.f32.mrb[93].mxu1  ;;  %v3025_v45 = vpop.f32.mrb[94].mxu0 }
 0x1b1   :  { %v3082_v35 = vadd.f32 %v3081_v38, %v3080_v39  ;;  %v3083_v40 = vpop.f32.mrb[94].mxu1  ;;  %v3026_v48 = vpop.f32.mrb[95].mxu0 }
 0x1b2   :  { %v2263_v42 = vadd.f32 %v3024_v44, %v4066_v54  ;;  %v3027_v49 = vadd.f32 %v3026_v48, %v3025_v45  ;;  %v3084_v36 = vpop.f32.mrb[95].mxu1 }
 0x1b3   :  { %v3085_v51 = vadd.f32 %v3084_v36, %v3083_v40 }
 0x1b4   :  { %v2351_v52 = vadd.f32 %v3082_v35, %v2263_v42  ;;  %v2266_v46 = vadd.f32 %v3027_v49, %v4069_v60 }
 0x1b6   :  { %2392 = vst [vmem:[%s4147_s3 + $0x20] sm:$0xff] %v2351_v52  ;;  %v2354_v43 = vadd.f32 %v3085_v51, %v2266_v46  ;;  %v3028_v57 = vpop.f32.mrb[96].mxu0 }
 0x1b7   :  { %v3086_v58 = vpop.f32.mrb[96].mxu1  ;;  %v3029_v47 = vpop.f32.mrb[97].mxu0 }
 0x1b8   :  { %2393 = vst [vmem:[%s4147_s3 + $0x28] sm:$0xff] %v2354_v43  ;;  %v3030_v62 = vadd.f32 %v3029_v47, %v3028_v57  ;;  %v3087_v54 = vpop.f32.mrb[97].mxu1  ;;  %v3031_v63 = vpop.f32.mrb[98].mxu0 }
 0x1b9   :  { %v3088_v53 = vadd.f32 %v3087_v54, %v3086_v58  ;;  %v3089_v56 = vpop.f32.mrb[98].mxu1  ;;  %v3032_v3 = vpop.f32.mrb[99].mxu0 }
 0x1ba   :  { %v2271_v60 = vadd.f32 %v3030_v62, %v4072_v13  ;;  %v3033_v59 = vadd.f32 %v3032_v3, %v3031_v63  ;;  %v3090_v4 = vpop.f32.mrb[99].mxu1 }
 0x1bb   :  { %v3091_v55 = vadd.f32 %v3090_v4, %v3089_v56 }
 0x1bc   :  { %v2359_v7 = vadd.f32 %v3088_v53, %v2271_v60  ;;  %v2274_v9 = vadd.f32 %v3033_v59, %v4075_v6 }
 0x1be   :  { %2394 = vst [vmem:[%s4147_s3 + $0x30] sm:$0xff] %v2359_v7  ;;  %v2362_v0 = vadd.f32 %v3091_v55, %v2274_v9  ;;  %v3034_v10 = vpop.f32.mrb[100].mxu0 }
 0x1bf   :  { %v3092_v61 = vpop.f32.mrb[100].mxu1  ;;  %v3035_v12 = vpop.f32.mrb[101].mxu0 }
 0x1c0   :  { %2395 = vst [vmem:[%s4147_s3 + $0x38] sm:$0xff] %v2362_v0  ;;  %v3036_v1 = vadd.f32 %v3035_v12, %v3034_v10  ;;  %v3093_v13 = vpop.f32.mrb[101].mxu1  ;;  %v3037_v14 = vpop.f32.mrb[102].mxu0 }
 0x1c1   :  { %v3094_v15 = vadd.f32 %v3093_v13, %v3092_v61  ;;  %v3095_v16 = vpop.f32.mrb[102].mxu1  ;;  %v3038_v5 = vpop.f32.mrb[103].mxu0 }
 0x1c2   :  { %v2279_v6 = vadd.f32 %v3036_v1, %v4078_v22  ;;  %v3039_v8 = vadd.f32 %v3038_v5, %v3037_v14  ;;  %v3096_v19 = vpop.f32.mrb[103].mxu1 }
 0x1c3   :  { %v3097_v20 = vadd.f32 %v3096_v19, %v3095_v16 }
 0x1c4   :  { %v2367_v11 = vadd.f32 %v3094_v15, %v2279_v6  ;;  %v2282_v26 = vadd.f32 %v3039_v8, %v4081_v32 }
 0x1c6   :  { %2396 = vst [vmem:[%s4147_s3 + $0x40] sm:$0xff] %v2367_v11  ;;  %v2370_v21 = vadd.f32 %v3097_v20, %v2282_v26  ;;  %v3040_v27 = vpop.f32.mrb[104].mxu0 }
 0x1c7   :  { %v3098_v17 = vpop.f32.mrb[104].mxu1  ;;  %v3041_v24 = vpop.f32.mrb[105].mxu0 }
 0x1c8   :  { %2397 = vst [vmem:[%s4147_s3 + $0x48] sm:$0xff] %v2370_v21  ;;  %v3042_v30 = vadd.f32 %v3041_v24, %v3040_v27  ;;  %v3099_v22 = vpop.f32.mrb[105].mxu1  ;;  %v3043_v23 = vpop.f32.mrb[106].mxu0 }
 0x1c9   :  { %v3100_v31 = vadd.f32 %v3099_v22, %v3098_v17  ;;  %v3101_v18 = vpop.f32.mrb[106].mxu1  ;;  %v3044_v33 = vpop.f32.mrb[107].mxu0 }
 0x1ca   :  { %v2287_v32 = vadd.f32 %v3042_v30, %v4084_v41  ;;  %v3045_v34 = vadd.f32 %v3044_v33, %v3043_v23  ;;  %v3102_v28 = vpop.f32.mrb[107].mxu1 }
 0x1cb   :  { %v3103_v25 = vadd.f32 %v3102_v28, %v3101_v18 }
 0x1cc   :  { %v2375_v37 = vadd.f32 %v3100_v31, %v2287_v32  ;;  %v2290_v39 = vadd.f32 %v3045_v34, %v4087_v50 }
 0x1ce   :  { %2398 = vst [vmem:[%s4147_s3 + $0x50] sm:$0xff] %v2375_v37  ;;  %v2378_v29 = vadd.f32 %v3103_v25, %v2290_v39  ;;  %v3046_v44 = vpop.f32.mrb[108].mxu0 }
 0x1cf   :  { %v3104_v38 = vpop.f32.mrb[108].mxu1  ;;  %v3047_v45 = vpop.f32.mrb[109].mxu0 }
 0x1d0   :  { %2399 = vst [vmem:[%s4147_s3 + $0x58] sm:$0xff] %v2378_v29  ;;  %v3048_v35 = vadd.f32 %v3047_v45, %v3046_v44  ;;  %v3105_v41 = vpop.f32.mrb[109].mxu1  ;;  %v3049_v40 = vpop.f32.mrb[110].mxu0 }
 0x1d1   :  { %v3106_v48 = vadd.f32 %v3105_v41, %v3104_v38  ;;  %v3107_v42 = vpop.f32.mrb[110].mxu1  ;;  %v3050_v49 = vpop.f32.mrb[111].mxu0 }
 0x1d2   :  { %v2295_v50 = vadd.f32 %v3048_v35, %v4090_v2  ;;  %v3108_v36 = vpop.f32.mrb[111].mxu1 }
 0x1d4   :  { %v2383_v51 = vadd.f32 %v3106_v48, %v2295_v50 }
 0x1d6   :  { %2400 = vst [vmem:[%s4147_s3 + $0x60] sm:$0xff] %v2383_v51 }

// kernel: _lambda_.22
= control target key start
LH: loop header
LB: loop body
LE: loop exit
PB: predicated region body
PF: predicated region fallthrough
CT: control target
= control target key end

     0   :  { %s515_s18 = smov 0   ;;  %s558_s0 = inlined_call_operand.vmem [shape: f32[2,16,48], index: 0, kind: input, shape index: {}]   ;;  %s559_s1 = inlined_call_operand.vmem [shape: f32[2,16,48], index: 1, kind: input, shape index: {}]   ;;  %s560_s2 = inlined_call_operand.vmem [shape: f32[2,16,48], index: 2, kind: input, shape index: {}]   ;;  %s561_s3 = inlined_call_operand.vmem [shape: f32[2,16,48], index: 3, kind: input, shape index: {}]   ;;  %s562_s4 = inlined_call_operand.vmem [shape: f32[1,16,48], index: 4, kind: input, shape index: {}]   ;;  %s563_s5 = inlined_call_operand.vmem [shape: f32[2,16,48], index: 5, kind: output, shape index: {}]  }
   0x1 LB: > { %s445_s19 = sadd.s32 4294967295, %s482_s18   ;;  %p449_p0 = scmp.ge.s32.totalorder %s482_s18, 1  ;;  %s482_s18 = sphi %s515_s18, %s15_s18  }
   0x2   : > { %p217_p1 = scmp.lt.s32.totalorder %s482_s18, 3 }
   0x4   : > { %p218_p2 = pnand %p449_p0, %p217_p1 }
   0x5   : > { %p260_p3 = scmp.lt.s32.totalorder (!%p218_p2), %s445_s19, 1  ;;  %s484_s8 = smov (!%p218_p2), 3   ;;  %vm316_vm0 = vcmask (!%p218_p2), 1040384   ;;  %vm309_vm1 = vcmask (!%p218_p2), 23552   ;;  %v347_v33 = vld [vmem:[%s562_s4] sm:$0xff] (!%p218_p2)  ;;  %vm351_vm2 = vcmask (!%p218_p2), 392192  }
   0x6   : > { %221 = sbr.rel (%p218_p2) target bundleno = 149 (0x95), region = 40  ;;  %v348_v41 = vld [vmem:[%s562_s4 + $0x8] sm:$0xff] (!%p218_p2) }
   0xd   : > { %s565_s19 = smov (!%p260_p3, %s445_s19), 1 }
   0xe   : > { %s523_s20 = sshll.u32 %s565_s19, 4 }
   0xf   : > { %s279_s23 = scalar_lea.vmem %s561_s3, %s523_s20  ;;  %s269_s26 = scalar_lea.vmem %s559_s1, %s523_s20 }
  0x10   : > { %v291_v0 = vld [vmem:[%s279_s23] sm:$0xff]  ;;  %v288_v2 = vld [vmem:[%s269_s26 + $0x8] sm:$0xff]  ;;  %s264_s29 = scalar_lea.vmem %s558_s0, %s523_s20  ;;  %s274_s7 = scalar_lea.vmem %s560_s2, %s523_s20 }
  0x11   : > { %v287_v1 = vld [vmem:[%s269_s26] sm:$0xff]  ;;  %325 = vrot.lane.b32.xlu1 %v291_v0, %s484_s8  ;;  %v286_v5 = vld [vmem:[%s264_s29 + $0x8] sm:$0xff]  ;;  %s284_s13 = scalar_lea.vmem %s563_s5, %s523_s20 }
  0x12   : > { %v299_v3 = vadd.f32 %v291_v0, %v287_v1  ;;  %v285_v4 = vld [vmem:[%s264_s29] sm:$0xff]  ;;  %v292_v6 = vld [vmem:[%s279_s23 + $0x8] sm:$0xff]  ;;  %v294_v8 = vadd.f32 %v288_v2, %v286_v5 }
  0x13   : > { %v293_v7 = vadd.f32 %v287_v1, %v285_v4  ;;  %v289_v9 = vld [vmem:[%s274_s7] sm:$0xff]  ;;  %v290_v10 = vld [vmem:[%s274_s7 + $0x8] sm:$0xff]  ;;  %v300_v11 = vadd.f32 %v292_v6, %v288_v2 }
  0x14   : > { %303 = vrot.lane.b32.xlu0 %v299_v3, %s484_s8  ;;  %v312_v12 = vadd.f32 %v291_v0, %v289_v9  ;;  %v313_v13 = vadd.f32 %v292_v6, %v290_v10  ;;  %v296_v15 = vadd.f32 %v294_v8, %v290_v10 }
  0x15   : > { %v295_v14 = vadd.f32 %v293_v7, %v289_v9  ;;  %327 = vrot.lane.b32.xlu1 %v292_v6, %s484_s8 }
  0x16   : > { %v317_v16 = vrot.slane %v312_v12, 7  ;;  %v318_v17 = vrot.slane %v313_v13, 7  ;;  %v298_v19 = vadd.f32 %v296_v15, %v292_v6 }
  0x17   : > { %v297_v18 = vadd.f32 %v295_v14, %v291_v0 }
  0x18   : > { %305 = vrot.lane.b32.xlu0 %v300_v11, %s484_s8  ;;  %v319_v20 = vsel %vm316_vm0, %v317_v16, %v318_v17  ;;  %v322_v25 = vsel %vm316_vm0, 0.0, %v317_v16 }
  0x83   : > { %v326_v21 = vpop.permute.xlu1 %325 }
  0x84   : > { %v331_v22 = vsel %vm309_vm1, 0.0, %v326_v21 }
  0x85   : > { %v335_v23 = vrot.slane %v331_v22, 7 }
  0x86   : > { %v304_v24 = vpop.permute.xlu0 %303 }
  0x87   : > { %v310_v26 = vsel %vm309_vm1, 0.0, %v304_v24  ;;  %v328_v28 = vpop.permute.xlu1 %327  ;;  %v340_v29 = vsel %vm316_vm0, 0.0, %v335_v23 }
  0x88   : > { %v341_v27 = vadd.f32 %v310_v26, %v297_v18  ;;  %v332_v30 = vsel %vm309_vm1, 0.0, %v328_v28 }
  0x89   : > { %v336_v34 = vrot.slane %v332_v30, 7 }
  0x8a   : > { %v343_v31 = vadd.f32 %v341_v27, %v322_v25  ;;  %v306_v32 = vpop.permute.xlu0 %305 }
  0x8b   : > { %v311_v35 = vsel %vm309_vm1, 0.0, %v306_v32  ;;  %v337_v40 = vsel %vm316_vm0, %v335_v23, %v336_v34 }
  0x8c   : > { %v345_v36 = vadd.f32 %v343_v31, %v340_v29  ;;  %v342_v37 = vadd.f32 %v311_v35, %v298_v19 }
  0x8e   : > { %v349_v38 = vmul.f32 %v347_v33, %v345_v36  ;;  %v344_v39 = vadd.f32 %v342_v37, %v319_v20 }
  0x90   : > { %352 = vst.msk [vmem:[%s284_s13] sm:$0xff] %vm351_vm2, %v349_v38  ;;  %v346_v42 = vadd.f32 %v344_v39, %v337_v40 }
  0x92   : > { %v350_v43 = vmul.f32 %v348_v41, %v346_v42 }
  0x94   : > { %353 = vst.msk [vmem:[%s284_s13 + $0x8] sm:$0xff] %vm351_vm2, %v350_v43 }
  0x95 PF: > { %s15_s18 = sadd.s32 1, %s482_s18  }
  0x96   : > { %p12_p4 = scmp.ge.s32.totalorder %s15_s18, 4  }
  0x98   :  { %14 = sbr.rel (!%p12_p4) target bundleno = 1 (0x1), region = 79 }

// kernel: _lambda_.23
= control target key start
LH: loop header
LB: loop body
LE: loop exit
PB: predicated region body
PF: predicated region fallthrough
CT: control target
= control target key end

     0   :  { %v699_v0 = vmov 0.0   ;;  %vm700_vm0 = vmmov 0   ;;  %s875_s1 = inlined_call_operand.vmem [shape: bf16[128,128], index: 1, kind: input, shape index: {}]   ;;  %s876_s0 = inlined_call_operand.vmem [shape: bf16[168,128], index: 0, kind: input, shape index: {}]   ;;  %s877_s2 = inlined_call_operand.vmem [shape: f32[8,128], index: 2, kind: input, shape index: {}]   ;;  %s878_s3 = inlined_call_operand.vmem [shape: bf16[168,128], index: 3, kind: output, shape index: {}]  }
   0x1   :  { %602 = vmatprep.subr.bf16.mxu0 %v699_v0  ;;  %v680_v1 = vld [vmem:[%s875_s1] sm:$0xff]   ;;  %662 = vmatprep.subr.bf16.mxu1 %v699_v0  ;;  %v681_v2 = vld [vmem:[%s875_s1 + $0x8] sm:$0xff]   ;;  %v682_v3 = vld [vmem:[%s875_s1 + $0x10] sm:$0xff]  }
   0x2   :  { %618 = vmatprep.mubr.msk.bf16.mxu0 %vm700_vm0, %v699_v0  ;;  %642 = vmatprep.mubr.msk.bf16.mxu1 %vm700_vm0, %v699_v0  ;;  %v683_v4 = vld [vmem:[%s875_s1 + $0x18] sm:$0xff]   ;;  %v684_v5 = vld [vmem:[%s875_s1 + $0x20] sm:$0xff]   ;;  %v685_v6 = vld [vmem:[%s875_s1 + $0x28] sm:$0xff]  }
   0x3   :  { %603 = vmatpush3.bf16.msra.mxu0 %v680_v1  ;;  %670 = vmatpush3.bf16.msra.mxu1 %v680_v1  ;;  %v686_v7 = vld [vmem:[%s875_s1 + $0x30] sm:$0xff]   ;;  %v687_v8 = vld [vmem:[%s875_s1 + $0x38] sm:$0xff]   ;;  %v688_v9 = vld [vmem:[%s876_s0] sm:$0xff]  }
   0x4   :  { %604 = vmatprep.subr.bf16.mxu0 %v699_v0  ;;  %663 = vmatprep.subr.bf16.mxu1 %v699_v0  ;;  %v689_v10 = vld [vmem:[%s876_s0 + $0x30] sm:$0xff]   ;;  %v690_v11 = vld [vmem:[%s876_s0 + $0x8] sm:$0xff]   ;;  %v691_v12 = vld [vmem:[%s876_s0 + $0x38] sm:$0xff]  }
   0x5   :  { %v692_v13 = vld [vmem:[%s876_s0 + $0x10] sm:$0xff]   ;;  %v693_v14 = vld [vmem:[%s876_s0 + $0x40] sm:$0xff]   ;;  %v694_v15 = vld [vmem:[%s876_s0 + $0x18] sm:$0xff]  }
   0x6   :  { %v695_v16 = vld [vmem:[%s876_s0 + $0x48] sm:$0xff]   ;;  %v696_v17 = vld [vmem:[%s876_s0 + $0x20] sm:$0xff]   ;;  %v697_v18 = vld [vmem:[%s876_s0 + $0x50] ss:$0 sps:$4 sm:$0xff]  }
   0x7   :  { %605 = vmatpush3.bf16.msra.mxu0 %v681_v2  ;;  %671 = vmatpush3.bf16.msra.mxu1 %v681_v2  ;;  %v698_v19 = vld [vmem:[%s876_s0 + $0x28] sm:$0xff]   ;;  %v819_v20 = vld [vmem:[%s877_s2] ss:$0 sm:$0xff] }
   0x8   :  { %606 = vmatprep.subr.bf16.mxu0 %v699_v0  ;;  %664 = vmatprep.subr.bf16.mxu1 %v699_v0 }
   0xb   :  { %607 = vmatpush3.bf16.msra.mxu0 %v682_v3  ;;  %672 = vmatpush3.bf16.msra.mxu1 %v682_v3 }
   0xc   :  { %608 = vmatprep.subr.bf16.mxu0 %v699_v0  ;;  %665 = vmatprep.subr.bf16.mxu1 %v699_v0 }
   0xf   :  { %609 = vmatpush3.bf16.msra.mxu0 %v683_v4  ;;  %673 = vmatpush3.bf16.msra.mxu1 %v683_v4 }
  0x10   :  { %610 = vmatprep.subr.bf16.mxu0 %v699_v0  ;;  %666 = vmatprep.subr.bf16.mxu1 %v699_v0 }
  0x13   :  { %611 = vmatpush3.bf16.msra.mxu0 %v684_v5  ;;  %674 = vmatpush3.bf16.msra.mxu1 %v684_v5 }
  0x14   :  { %612 = vmatprep.subr.bf16.mxu0 %v699_v0  ;;  %667 = vmatprep.subr.bf16.mxu1 %v699_v0 }
  0x17   :  { %613 = vmatpush3.bf16.msra.mxu0 %v685_v6  ;;  %675 = vmatpush3.bf16.msra.mxu1 %v685_v6 }
  0x18   :  { %614 = vmatprep.subr.bf16.mxu0 %v699_v0  ;;  %668 = vmatprep.subr.bf16.mxu1 %v699_v0 }
  0x1b   :  { %615 = vmatpush3.bf16.msra.mxu0 %v686_v7  ;;  %676 = vmatpush3.bf16.msra.mxu1 %v686_v7 }
  0x1c   :  { %616 = vmatprep.subr.bf16.mxu0 %v699_v0  ;;  %669 = vmatprep.subr.bf16.mxu1 %v699_v0 }
  0x1f   :  { %617 = vmatpush3.bf16.msra.mxu0 %v687_v8  ;;  %677 = vmatpush3.bf16.msra.mxu1 %v687_v8 }
  0x22   :  { %619 = vmatmul.mubr.bf16.vlgmr.msra.gmra.mrb[0].mxu0 %v688_v9  ;;  %643 = vmatmul.mubr.bf16.vlgmr.msra.gmra.mrb[0].mxu1 %v689_v10 }
  0x23   :  { %622 = vmatprep.mubr.msk.bf16.mxu0 %vm700_vm0, %v699_v0  ;;  %646 = vmatprep.mubr.msk.bf16.mxu1 %vm700_vm0, %v699_v0 }
  0x2a   :  { %623 = vmatmul.mubr.bf16.gmra.mrb[4].mxu0 %v690_v11  ;;  %647 = vmatmul.mubr.bf16.gmra.mrb[4].mxu1 %v691_v12 }
  0x2b   :  { %626 = vmatprep.mubr.msk.bf16.mxu0 %vm700_vm0, %v699_v0  ;;  %650 = vmatprep.mubr.msk.bf16.mxu1 %vm700_vm0, %v699_v0 }
  0x32   :  { %627 = vmatmul.mubr.bf16.gmra.mrb[8].mxu0 %v692_v13  ;;  %651 = vmatmul.mubr.bf16.gmra.mrb[8].mxu1 %v693_v14 }
  0x33   :  { %630 = vmatprep.mubr.msk.bf16.mxu0 %vm700_vm0, %v699_v0  ;;  %654 = vmatprep.mubr.msk.bf16.mxu1 %vm700_vm0, %v699_v0 }
  0x3a   :  { %631 = vmatmul.mubr.bf16.gmra.mrb[12].mxu0 %v694_v15  ;;  %655 = vmatmul.mubr.bf16.gmra.mrb[12].mxu1 %v695_v16 }
  0x3b   :  { %634 = vmatprep.mubr.msk.bf16.mxu0 %vm700_vm0, %v699_v0  ;;  %658 = vmatprep.mubr.msk.bf16.mxu1 %vm700_vm0, %v699_v0 }
  0x42   :  { %635 = vmatmul.mubr.bf16.gmra.mrb[16].mxu0 %v696_v17  ;;  %659 = vmatmul.mubr.bf16.gmra.mrb[16].mxu1 %v697_v18 }
  0x43   :  { %638 = vmatprep.mubr.msk.bf16.mxu0 %vm700_vm0, %v699_v0 }
  0x4a   :  { %639 = vmatmul.mubr.bf16.gmra.mrb[20].mxu0 %v698_v19 }
  0xf5   :  { %v203_v21 = vpop.f32.mrb[0].mxu0  ;;  %v251_v22 = vpop.f32.mrb[0].mxu1 }
  0xf6   :  { %v204_v23 = vadd.f32 %v819_v20, %v203_v21  ;;  %v620_v24 = vpop.f32.mrb[1].mxu0  ;;  %v252_v25 = vadd.f32 %v819_v20, %v251_v22  ;;  %v644_v26 = vpop.f32.mrb[1].mxu1 }
  0xf7   :  { %v206_v27 = vpop.f32.mrb[2].mxu0  ;;  %v254_v28 = vpop.f32.mrb[2].mxu1 }
  0xf8   :  { %v310_v29 = vmul.f32 0.2, %v204_v23  ;;  %v207_v30 = vadd.f32 %v819_v20, %v206_v27  ;;  %v621_v31 = vpop.f32.mrb[3].mxu0  ;;  %vm301_vm1 = vcmp.ge.f32.partialorder %v252_v25, 0.0  ;;  %v645_v32 = vpop.f32.mrb[3].mxu1  ;;  %vm289_vm2 = vcmp.ge.f32.partialorder %v204_v23, 0.0 }
  0xf9   :  { %v322_v33 = vmul.f32 0.2, %v252_v25  ;;  %v255_v34 = vadd.f32 %v819_v20, %v254_v28 }
  0xfa   :  { %vm290_vm3 = vcmp.ge.f32.partialorder %v207_v30, 0.0  ;;  %v311_v35 = vmul.f32 0.2, %v207_v30  ;;  %v331_v38 = vsel %vm289_vm2, %v204_v23, %v310_v29 }
  0xfb   :  { %v343_v36 = vsel %vm301_vm1, %v252_v25, %v322_v33  ;;  %vm302_vm4 = vcmp.ge.f32.partialorder %v255_v34, 0.0  ;;  %v323_v37 = vmul.f32 0.2, %v255_v34 }
  0xfc   :  { %v332_v39 = vsel %vm290_vm3, %v207_v30, %v311_v35 }
  0xfd   :  { %v527_v40 = vpack.c.bf16 %v332_v39, %v331_v38  ;;  %v211_v41 = vpop.f32.mrb[4].mxu0  ;;  %v344_v42 = vsel %vm302_vm4, %v255_v34, %v323_v37  ;;  %v259_v43 = vpop.f32.mrb[4].mxu1 }
  0xfe   :  { %v212_v44 = vadd.f32 %v819_v20, %v211_v41  ;;  %v557_v45 = vpack.c.bf16 %v344_v42, %v343_v36  ;;  %v624_v46 = vpop.f32.mrb[5].mxu0  ;;  %v260_v47 = vadd.f32 %v819_v20, %v259_v43  ;;  %v648_v48 = vpop.f32.mrb[5].mxu1 }
  0xff   :  { %528 = vst [vmem:[%s878_s3] sm:$0xff] %v527_v40   ;;  %v214_v49 = vpop.f32.mrb[6].mxu0  ;;  %v262_v50 = vpop.f32.mrb[6].mxu1 }
 0x100   :  { %v312_v51 = vmul.f32 0.2, %v212_v44  ;;  %579 = vst [vmem:[%s878_s3 + $0x30] sm:$0xff] %v557_v45   ;;  %v215_v52 = vadd.f32 %v819_v20, %v214_v49  ;;  %v625_v53 = vpop.f32.mrb[7].mxu0  ;;  %vm303_vm5 = vcmp.ge.f32.partialorder %v260_v47, 0.0  ;;  %v649_v54 = vpop.f32.mrb[7].mxu1  ;;  %v263_v56 = vadd.f32 %v819_v20, %v262_v50 }
 0x101   :  { %vm291_vm6 = vcmp.ge.f32.partialorder %v212_v44, 0.0  ;;  %v324_v55 = vmul.f32 0.2, %v260_v47 }
 0x102   :  { %vm292_vm7 = vcmp.ge.f32.partialorder %v215_v52, 0.0  ;;  %v313_v57 = vmul.f32 0.2, %v215_v52  ;;  %vm304_vm8 = vcmp.ge.f32.partialorder %v263_v56, 0.0  ;;  %v325_v59 = vmul.f32 0.2, %v263_v56 }
 0x103   :  { %v345_v58 = vsel %vm303_vm5, %v260_v47, %v324_v55  ;;  %v333_v60 = vsel %vm291_vm6, %v212_v44, %v312_v51 }
 0x104   :  { %v334_v61 = vsel %vm292_vm7, %v215_v52, %v313_v57  ;;  %v346_v0 = vsel %vm304_vm8, %v263_v56, %v325_v59 }
 0x105   :  { %v532_v62 = vpack.c.bf16 %v334_v61, %v333_v60  ;;  %v219_v63 = vpop.f32.mrb[8].mxu0  ;;  %v267_v1 = vpop.f32.mrb[8].mxu1  ;;  %v562_v3 = vpack.c.bf16 %v346_v0, %v345_v58 }
 0x106   :  { %v220_v2 = vadd.f32 %v819_v20, %v219_v63  ;;  %v628_v4 = vpop.f32.mrb[9].mxu0  ;;  %v268_v5 = vadd.f32 %v819_v20, %v267_v1  ;;  %v652_v6 = vpop.f32.mrb[9].mxu1 }
 0x107   :  { %574 = vst [vmem:[%s878_s3 + $0x8] sm:$0xff] %v532_v62   ;;  %v222_v7 = vpop.f32.mrb[10].mxu0  ;;  %v270_v8 = vpop.f32.mrb[10].mxu1  ;;  %580 = vst [vmem:[%s878_s3 + $0x38] sm:$0xff] %v562_v3  }
 0x108   :  { %v314_v9 = vmul.f32 0.2, %v220_v2  ;;  %v223_v10 = vadd.f32 %v819_v20, %v222_v7  ;;  %v629_v11 = vpop.f32.mrb[11].mxu0  ;;  %vm305_vm9 = vcmp.ge.f32.partialorder %v268_v5, 0.0  ;;  %v653_v12 = vpop.f32.mrb[11].mxu1  ;;  %vm293_vm10 = vcmp.ge.f32.partialorder %v220_v2, 0.0 }
 0x109   :  { %v326_v13 = vmul.f32 0.2, %v268_v5  ;;  %v271_v14 = vadd.f32 %v819_v20, %v270_v8 }
 0x10a   :  { %vm294_vm11 = vcmp.ge.f32.partialorder %v223_v10, 0.0  ;;  %v315_v15 = vmul.f32 0.2, %v223_v10  ;;  %v335_v18 = vsel %vm293_vm10, %v220_v2, %v314_v9 }
 0x10b   :  { %v347_v16 = vsel %vm305_vm9, %v268_v5, %v326_v13  ;;  %vm306_vm12 = vcmp.ge.f32.partialorder %v271_v14, 0.0  ;;  %v327_v17 = vmul.f32 0.2, %v271_v14 }
 0x10c   :  { %v336_v19 = vsel %vm294_vm11, %v223_v10, %v315_v15 }
 0x10d   :  { %v537_v21 = vpack.c.bf16 %v336_v19, %v335_v18  ;;  %v227_v22 = vpop.f32.mrb[12].mxu0  ;;  %v348_v23 = vsel %vm306_vm12, %v271_v14, %v327_v17  ;;  %v275_v24 = vpop.f32.mrb[12].mxu1 }
 0x10e   :  { %v228_v25 = vadd.f32 %v819_v20, %v227_v22  ;;  %v567_v26 = vpack.c.bf16 %v348_v23, %v347_v16  ;;  %v632_v27 = vpop.f32.mrb[13].mxu0  ;;  %v276_v28 = vadd.f32 %v819_v20, %v275_v24  ;;  %v656_v29 = vpop.f32.mrb[13].mxu1 }
 0x10f   :  { %575 = vst [vmem:[%s878_s3 + $0x10] sm:$0xff] %v537_v21   ;;  %v230_v30 = vpop.f32.mrb[14].mxu0  ;;  %v278_v31 = vpop.f32.mrb[14].mxu1 }
 0x110   :  { %v316_v32 = vmul.f32 0.2, %v228_v25  ;;  %581 = vst [vmem:[%s878_s3 + $0x40] sm:$0xff] %v567_v26   ;;  %v231_v33 = vadd.f32 %v819_v20, %v230_v30  ;;  %v633_v34 = vpop.f32.mrb[15].mxu0  ;;  %vm307_vm13 = vcmp.ge.f32.partialorder %v276_v28, 0.0  ;;  %v657_v35 = vpop.f32.mrb[15].mxu1  ;;  %v279_v37 = vadd.f32 %v819_v20, %v278_v31 }
 0x111   :  { %vm295_vm14 = vcmp.ge.f32.partialorder %v228_v25, 0.0  ;;  %v328_v36 = vmul.f32 0.2, %v276_v28 }
 0x112   :  { %vm296_vm15 = vcmp.ge.f32.partialorder %v231_v33, 0.0  ;;  %v317_v38 = vmul.f32 0.2, %v231_v33  ;;  %vm308_vm0 = vcmp.ge.f32.partialorder %v279_v37, 0.0  ;;  %v329_v40 = vmul.f32 0.2, %v279_v37 }
 0x113   :  { %v349_v39 = vsel %vm307_vm13, %v276_v28, %v328_v36  ;;  %v337_v41 = vsel %vm295_vm14, %v228_v25, %v316_v32 }
 0x114   :  { %v338_v42 = vsel %vm296_vm15, %v231_v33, %v317_v38  ;;  %v350_v45 = vsel %vm308_vm0, %v279_v37, %v329_v40 }
 0x115   :  { %v542_v43 = vpack.c.bf16 %v338_v42, %v337_v41  ;;  %v235_v44 = vpop.f32.mrb[16].mxu0  ;;  %v283_v46 = vpop.f32.mrb[16].mxu1  ;;  %v572_v48 = vpack.c.bf16 %v350_v45, %v349_v39 }
 0x116   :  { %v236_v47 = vadd.f32 %v819_v20, %v235_v44  ;;  %v636_v49 = vpop.f32.mrb[17].mxu0  ;;  %v284_v50 = vadd.f32 %v819_v20, %v283_v46  ;;  %v660_v51 = vpop.f32.mrb[17].mxu1 }
 0x117   :  { %576 = vst [vmem:[%s878_s3 + $0x18] sm:$0xff] %v542_v43   ;;  %v238_v52 = vpop.f32.mrb[18].mxu0  ;;  %v286_v53 = vpop.f32.mrb[18].mxu1  ;;  %582 = vst [vmem:[%s878_s3 + $0x48] sm:$0xff] %v572_v48  }
 0x118   :  { %v318_v54 = vmul.f32 0.2, %v236_v47  ;;  %v239_v55 = vadd.f32 %v819_v20, %v238_v52  ;;  %v637_v56 = vpop.f32.mrb[19].mxu0  ;;  %vm309_vm1 = vcmp.ge.f32.partialorder %v284_v50, 0.0  ;;  %v661_v57 = vpop.f32.mrb[19].mxu1  ;;  %vm297_vm2 = vcmp.ge.f32.partialorder %v236_v47, 0.0 }
 0x119   :  { %v330_v58 = vmul.f32 0.2, %v284_v50 }
 0x11a   :  { %vm298_vm3 = vcmp.ge.f32.partialorder %v239_v55, 0.0  ;;  %v319_v59 = vmul.f32 0.2, %v239_v55  ;;  %v339_v61 = vsel %vm297_vm2, %v236_v47, %v318_v54 }
 0x11b   :  { %v351_v60 = vsel %vm309_vm1, %v284_v50, %v330_v58 }
 0x11c   :  { %v340_v62 = vsel %vm298_vm3, %v239_v55, %v319_v59  ;;  %v523_v63 = vpack.c.bf16 %v351_v60, %v351_v60 }
 0x11d   :  { %v547_v0 = vpack.c.bf16 %v340_v62, %v339_v61  ;;  %v243_v1 = vpop.f32.mrb[20].mxu0 }
 0x11e   :  { %457 = vst [vmem:[%s878_s3 + $0x50] sm:$0xf] %v523_v63  ;;  %v244_v2 = vadd.f32 %v819_v20, %v243_v1  ;;  %v640_v3 = vpop.f32.mrb[21].mxu0 }
 0x11f   :  { %577 = vst [vmem:[%s878_s3 + $0x20] sm:$0xff] %v547_v0   ;;  %v246_v4 = vpop.f32.mrb[22].mxu0 }
 0x120   :  { %v320_v5 = vmul.f32 0.2, %v244_v2  ;;  %v247_v6 = vadd.f32 %v819_v20, %v246_v4  ;;  %v641_v7 = vpop.f32.mrb[23].mxu0  ;;  %vm299_vm4 = vcmp.ge.f32.partialorder %v244_v2, 0.0 }
 0x122   :  { %vm300_vm5 = vcmp.ge.f32.partialorder %v247_v6, 0.0  ;;  %v321_v8 = vmul.f32 0.2, %v247_v6  ;;  %v341_v9 = vsel %vm299_vm4, %v244_v2, %v320_v5 }
 0x124   :  { %v342_v10 = vsel %vm300_vm5, %v247_v6, %v321_v8 }
 0x125   :  { %v552_v11 = vpack.c.bf16 %v342_v10, %v341_v9 }
 0x127   :  { %578 = vst [vmem:[%s878_s3 + $0x28] sm:$0xff] %v552_v11  }

// kernel: _lambda_.24
= control target key start
LH: loop header
LB: loop body
LE: loop exit
PB: predicated region body
PF: predicated region fallthrough
CT: control target
= control target key end

     0   :  { %s681_s1 = inlined_call_operand.vmem [shape: bf16[256,128], index: 1, kind: input, shape index: {}]   ;;  %s682_s0 = inlined_call_operand.vmem [shape: bf16[56,256], index: 0, kind: input, shape index: {}]   ;;  %s683_s2 = inlined_call_operand.vmem [shape: f32[8,128], index: 2, kind: input, shape index: {}]   ;;  %s684_s3 = inlined_call_operand.vmem [shape: bf16[56,128], index: 3, kind: output, shape index: {}]  }
   0x1   :  { %v521_v0 = vld [vmem:[%s681_s1 + $0x40] sm:$0xff]   ;;  %v523_v2 = vld [vmem:[%s681_s1 + $0x48] sm:$0xff]   ;;  %v525_v4 = vld [vmem:[%s681_s1 + $0x50] sm:$0xff]  }
   0x2   :  { %v522_v1 = vld [vmem:[%s681_s1] sm:$0xff]   ;;  %465 = vmatprep.subr.bf16.mxu0 %v521_v0  ;;  %505 = vmatprep.subr.bf16.mxu1 %v521_v0  ;;  %v524_v3 = vld [vmem:[%s681_s1 + $0x8] sm:$0xff]   ;;  %v526_v5 = vld [vmem:[%s681_s1 + $0x10] sm:$0xff]  }
   0x3   :  { %466 = vmatpush3.bf16.msra.mxu0 %v522_v1  ;;  %513 = vmatpush3.bf16.msra.mxu1 %v522_v1  ;;  %v527_v6 = vld [vmem:[%s681_s1 + $0x58] sm:$0xff]   ;;  %v529_v8 = vld [vmem:[%s681_s1 + $0x60] sm:$0xff]   ;;  %v531_v10 = vld [vmem:[%s681_s1 + $0x68] sm:$0xff]  }
   0x4   :  { %467 = vmatprep.subr.bf16.mxu0 %v523_v2  ;;  %506 = vmatprep.subr.bf16.mxu1 %v523_v2  ;;  %v528_v7 = vld [vmem:[%s681_s1 + $0x18] sm:$0xff]   ;;  %v530_v9 = vld [vmem:[%s681_s1 + $0x20] sm:$0xff]   ;;  %v532_v13 = vld [vmem:[%s681_s1 + $0x28] sm:$0xff]  }
   0x5   :  { %v539_v11 = vld [vmem:[%s682_s0 + $0x4] ss:$8 sps:$4 sm:$0xff]   ;;  %v533_v14 = vld [vmem:[%s681_s1 + $0x70] sm:$0xff]   ;;  %v535_v16 = vld [vmem:[%s681_s1 + $0x78] sm:$0xff]  }
   0x6   :  { %v542_v12 = vld [vmem:[%s682_s0 + $0x24] ss:$8 sps:$4 sm:$0xff]   ;;  %225 = vmatprep.mubr.bf16.mxu0 %v539_v11  ;;  %v534_v15 = vld [vmem:[%s681_s1 + $0x30] sm:$0xff]   ;;  %v536_v17 = vld [vmem:[%s681_s1 + $0x38] sm:$0xff]  }
   0x7   :  { %468 = vmatpush3.bf16.msra.mxu0 %v524_v3  ;;  %514 = vmatpush3.bf16.msra.mxu1 %v524_v3  ;;  %v27_v18 = vld [vmem:[%s682_s0 + $0x30] sm:$0xff]  ;;  %v537_v19 = vld [vmem:[%s682_s0] ss:$8 sps:$4 sm:$0xff]  }
   0x8   :  { %469 = vmatprep.subr.bf16.mxu0 %v525_v4  ;;  %507 = vmatprep.subr.bf16.mxu1 %v525_v4  ;;  %v540_v20 = vld [vmem:[%s682_s0 + $0x20] ss:$8 sps:$4 sm:$0xff]   ;;  %v543_v21 = vld [vmem:[%s682_s0 + $0x14] ss:$8 sps:$4 sm:$0xff]   ;;  %v417_v22 = vcombine.high %v27_v18, %v27_v18  ;;  %v545_v23 = vld [vmem:[%s682_s0 + $0x10] ss:$8 sps:$4 sm:$0xff]   ;;  %v416_v24 = vcombine.low %v27_v18, %v27_v18 }
   0x9   :  { %241 = vmatprep.mubr.bf16.mxu1 %v542_v12 }
   0xb   :  { %470 = vmatpush3.bf16.msra.mxu0 %v526_v5  ;;  %515 = vmatpush3.bf16.msra.mxu1 %v526_v5 }
   0xc   :  { %471 = vmatprep.subr.bf16.mxu0 %v527_v6  ;;  %508 = vmatprep.subr.bf16.mxu1 %v527_v6 }
   0xf   :  { %472 = vmatpush3.bf16.msra.mxu0 %v528_v7  ;;  %516 = vmatpush3.bf16.msra.mxu1 %v528_v7 }
  0x10   :  { %473 = vmatprep.subr.bf16.mxu0 %v529_v8  ;;  %509 = vmatprep.subr.bf16.mxu1 %v529_v8 }
  0x13   :  { %474 = vmatpush3.bf16.msra.mxu0 %v530_v9  ;;  %517 = vmatpush3.bf16.msra.mxu1 %v530_v9 }
  0x14   :  { %475 = vmatprep.subr.bf16.mxu0 %v531_v10  ;;  %510 = vmatprep.subr.bf16.mxu1 %v531_v10 }
  0x17   :  { %476 = vmatpush3.bf16.msra.mxu0 %v532_v13  ;;  %518 = vmatpush3.bf16.msra.mxu1 %v532_v13 }
  0x18   :  { %477 = vmatprep.subr.bf16.mxu0 %v533_v14  ;;  %511 = vmatprep.subr.bf16.mxu1 %v533_v14 }
  0x1b   :  { %478 = vmatpush3.bf16.msra.mxu0 %v534_v15  ;;  %519 = vmatpush3.bf16.msra.mxu1 %v534_v15 }
  0x1c   :  { %479 = vmatprep.subr.bf16.mxu0 %v535_v16  ;;  %512 = vmatprep.subr.bf16.mxu1 %v535_v16 }
  0x1f   :  { %480 = vmatpush3.bf16.msra.mxu0 %v536_v17  ;;  %520 = vmatpush3.bf16.msra.mxu1 %v536_v17 }
  0x22   :  { %226 = vmatmul.mubr.bf16.vlgmr.msra.gmra.mrb[0].mxu0 %v537_v19  ;;  %242 = vmatmul.mubr.bf16.vlgmr.msra.gmra.mrb[0].mxu1 %v540_v20 }
  0x23   :  { %233 = vmatprep.mubr.bf16.mxu0 %v543_v21  ;;  %249 = vmatprep.mubr.bf16.mxu1 %v417_v22  ;;  %v327_v21 = vlaneseq }
  0x25   :  { %v328_v22 = vshrl.u32 %v327_v21, 7 }
  0x2a   :  { %234 = vmatmul.mubr.bf16.gmra.mrb[4].mxu0 %v545_v23  ;;  %250 = vmatmul.mubr.bf16.gmra.mrb[4].mxu1 %v416_v24  ;;  %v313_v23 = vld [vmem:[%s683_s2] sm:$0x1]  ;;  %v329_v24 = vsub.s32 0, %v328_v22 }
  0xf5   :  { %v481_v25 = vpop.f32.mrb[0].mxu0  ;;  %v493_v26 = vpop.f32.mrb[0].mxu1 }
  0xf6   :  { %v482_v27 = vpop.f32.mrb[1].mxu0  ;;  %v494_v28 = vpop.f32.mrb[1].mxu1 }
  0xf7   :  { %v639_v29 = vadd.f32 %v482_v27, %v481_v25  ;;  %v484_v30 = vpop.f32.mrb[2].mxu0  ;;  %v641_v31 = vadd.f32 %v494_v28, %v493_v26  ;;  %v496_v32 = vpop.f32.mrb[2].mxu1  ;;  %v317_v27 = vld [vmem:[%s683_s2 + $0x1] sm:$0x1] }
  0xf8   :  { %v485_v33 = vpop.f32.mrb[3].mxu0  ;;  %v497_v34 = vpop.f32.mrb[3].mxu1 }
  0xf9   :  { %v643_v35 = vadd.f32 %v485_v33, %v484_v30  ;;  %v645_v36 = vadd.f32 %v497_v34, %v496_v32  ;;  %v272_v37 = vmul.f32 %v639_v29, %v639_v29  ;;  %v276_v57 = vmul.f32 %v641_v31, %v641_v31 }
  0xfb   :  { %v266_v38 = vadd.f32 %v643_v35, %v639_v29  ;;  %v273_v39 = vmul.f32 %v643_v35, %v643_v35  ;;  %v277_v60 = vmul.f32 %v645_v36, %v645_v36 }
  0xfd   :  { %v279_v40 = vadd.f32 %v273_v39, %v272_v37  ;;  %v487_v41 = vpop.f32.mrb[4].mxu0  ;;  %v499_v42 = vpop.f32.mrb[4].mxu1 }
  0xfe   :  { %v488_v43 = vpop.f32.mrb[5].mxu0  ;;  %v500_v44 = vpop.f32.mrb[5].mxu1 }
  0xff   :  { %v489_v45 = vadd.f32 %v488_v43, %v487_v41  ;;  %v490_v46 = vpop.f32.mrb[6].mxu0  ;;  %v501_v47 = vadd.f32 %v500_v44, %v499_v42  ;;  %v502_v48 = vpop.f32.mrb[6].mxu1 }
 0x100   :  { %v491_v49 = vpop.f32.mrb[7].mxu0  ;;  %v503_v50 = vpop.f32.mrb[7].mxu1 }
 0x101   :  { %v267_v51 = vadd.f32 %v489_v45, %v266_v38  ;;  %v274_v52 = vmul.f32 %v489_v45, %v489_v45  ;;  %v492_v53 = vadd.f32 %v491_v49, %v490_v46  ;;  %v278_v63 = vmul.f32 %v501_v47, %v501_v47 }
 0x103   :  { %v280_v54 = vadd.f32 %v279_v40, %v274_v52  ;;  %v268_v55 = vadd.f32 %v492_v53, %v267_v51  ;;  %v275_v56 = vmul.f32 %v492_v53, %v492_v53 }
 0x105   :  { %v269_v58 = vadd.f32 %v641_v31, %v268_v55  ;;  %v281_v59 = vadd.f32 %v280_v54, %v275_v56 }
 0x107   :  { %v282_v61 = vadd.f32 %v281_v59, %v276_v57  ;;  %v270_v62 = vadd.f32 %v645_v36, %v269_v58 }
 0x109   :  { %v271_v0 = vadd.f32 %v501_v47, %v270_v62  ;;  %v283_v1 = vadd.f32 %v282_v61, %v277_v60 }
 0x10b   :  { %v284_v2 = vadd.f32 %v283_v1, %v278_v63  ;;  %v295_v3 = vrot.slane %v271_v0, 4 }
 0x10d   :  { %v296_v4 = vadd.f32 %v295_v3, %v271_v0  ;;  %v303_v5 = vrot.slane %v284_v2, 4 }
 0x10f   :  { %v297_v6 = vrot.slane %v296_v4, 2  ;;  %v304_v7 = vadd.f32 %v303_v5, %v284_v2 }
 0x111   :  { %v298_v8 = vadd.f32 %v297_v6, %v296_v4  ;;  %v305_v9 = vrot.slane %v304_v7, 2 }
 0x113   :  { %v299_v10 = vrot.slane %v298_v8, 1  ;;  %v306_v11 = vadd.f32 %v305_v9, %v304_v7 }
 0x115   :  { %v300_v12 = vadd.f32 %v299_v10, %v298_v8  ;;  %v307_v13 = vrot.slane %v306_v11, 1 }
 0x117   :  { %v301_v14 = vmul.f32 0.02, %v300_v12  ;;  %v308_v15 = vadd.f32 %v307_v13, %v306_v11 }
 0x119   :  { %v309_v16 = vmul.f32 0.02, %v308_v15  ;;  %v310_v17 = vmul.f32 %v301_v14, %v301_v14 }
 0x11b   :  { %v311_v18 = vsub.f32 %v309_v16, %v310_v17 }
 0x11d   :  { %v312_v19 = vmax.f32 %v311_v18, 0.0 }
 0x11f   :  { %v314_v20 = vadd.f32 1e-05, %v312_v19 }
 0x121   :  { %548 = vrsqrt.f32 %v314_v20 }
 0x12b   :  { %v549_v25 = vpop.eup %548 }
 0x12c   :  { %v316_v26 = vmul.f32 %v549_v25, %v313_v23 }
 0x12e   :  { %v318_v28 = vmul.f32 %v316_v26, %v301_v14  ;;  %v330_v30 = vrot.slane %v316_v26, %v329_v24 }
 0x130   :  { %v319_v32 = vsub.f32 %v317_v27, %v318_v28  ;;  %v331_v33 = vmul.f32 %v639_v29, %v330_v30  ;;  %v332_v34 = vmul.f32 %v643_v35, %v330_v30  ;;  %v333_v37 = vmul.f32 %v489_v45, %v330_v30 }
 0x131   :  { %v334_v38 = vmul.f32 %v492_v53, %v330_v30  ;;  %v335_v39 = vmul.f32 %v641_v31, %v330_v30  ;;  %v336_v40 = vmul.f32 %v645_v36, %v330_v30  ;;  %v337_v41 = vmul.f32 %v501_v47, %v330_v30 }
 0x132   :  { %v341_v42 = vrot.slane %v319_v32, %v329_v24 }
 0x134   :  { %v342_v43 = vadd.f32 %v341_v42, %v331_v33  ;;  %v343_v44 = vadd.f32 %v341_v42, %v332_v34  ;;  %v344_v46 = vadd.f32 %v341_v42, %v333_v37  ;;  %v345_v48 = vadd.f32 %v341_v42, %v334_v38 }
 0x135   :  { %v346_v49 = vadd.f32 %v341_v42, %v335_v39  ;;  %v347_v50 = vadd.f32 %v341_v42, %v336_v40  ;;  %v348_v51 = vadd.f32 %v341_v42, %v337_v41 }
 0x136   :  { %vm349_vm0 = vcmp.ge.f32.partialorder %v342_v43, 0.0  ;;  %vm350_vm1 = vcmp.ge.f32.partialorder %v343_v44, 0.0  ;;  %vm351_vm2 = vcmp.ge.f32.partialorder %v344_v46, 0.0  ;;  %vm352_vm3 = vcmp.ge.f32.partialorder %v345_v48, 0.0 }
 0x137   :  { %vm353_vm4 = vcmp.ge.f32.partialorder %v346_v49, 0.0  ;;  %vm354_vm5 = vcmp.ge.f32.partialorder %v347_v50, 0.0  ;;  %vm355_vm6 = vcmp.ge.f32.partialorder %v348_v51, 0.0  ;;  %v356_v29 = vmul.f32 0.2, %v342_v43 }
 0x138   :  { %v357_v31 = vmul.f32 0.2, %v343_v44  ;;  %v358_v35 = vmul.f32 0.2, %v344_v46  ;;  %v359_v36 = vmul.f32 0.2, %v345_v48 }
 0x139   :  { %v360_v45 = vmul.f32 0.2, %v346_v49  ;;  %v361_v47 = vmul.f32 0.2, %v347_v50  ;;  %v362_v52 = vmul.f32 0.2, %v348_v51  ;;  %v363_v53 = vsel %vm349_vm0, %v342_v43, %v356_v29 }
 0x13a   :  { %v364_v54 = vsel %vm350_vm1, %v343_v44, %v357_v31  ;;  %v365_v55 = vsel %vm351_vm2, %v344_v46, %v358_v35  ;;  %v366_v56 = vsel %vm352_vm3, %v345_v48, %v359_v36 }
 0x13b   :  { %v367_v57 = vsel %vm353_vm4, %v346_v49, %v360_v45  ;;  %v368_v58 = vsel %vm354_vm5, %v347_v50, %v361_v47  ;;  %v369_v59 = vsel %vm355_vm6, %v348_v51, %v362_v52  ;;  %v451_v60 = vpack.c.bf16 %v364_v54, %v363_v53 }
 0x13c   :  { %v447_v61 = vpack.c.bf16 %v369_v59, %v369_v59  ;;  %v456_v62 = vpack.c.bf16 %v366_v56, %v365_v55  ;;  %v461_v63 = vpack.c.bf16 %v368_v58, %v367_v57 }
 0x13d   :  { %452 = vst [vmem:[%s684_s3] sm:$0xff] %v451_v60  }
 0x13e   :  { %463 = vst [vmem:[%s684_s3 + $0x8] sm:$0xff] %v456_v62   ;;  %464 = vst [vmem:[%s684_s3 + $0x10] sm:$0xff] %v461_v63  }
 0x13f   :  { %405 = vst [vmem:[%s684_s3 + $0x18] sm:$0xf] %v447_v61 }

// kernel: _lambda_.25
= control target key start
LH: loop header
LB: loop body
LE: loop exit
PB: predicated region body
PF: predicated region fallthrough
CT: control target
= control target key end

     0   :  { %s803_s1 = inlined_call_operand.vmem [shape: bf16[512,128], index: 1, kind: input, shape index: {}]   ;;  %s804_s0 = inlined_call_operand.vmem [shape: bf16[24,512], index: 0, kind: input, shape index: {}]   ;;  %s805_s2 = inlined_call_operand.vmem [shape: f32[8,128], index: 2, kind: input, shape index: {}]   ;;  %s806_s3 = inlined_call_operand.vmem [shape: bf16[24,128], index: 3, kind: output, shape index: {}]  }
   0x1   :  { %v613_v0 = vld [vmem:[%s803_s1 + $0x40] sm:$0xff]   ;;  %v617_v4 = vld [vmem:[%s803_s1 + $0x48] sm:$0xff]   ;;  %v621_v8 = vld [vmem:[%s803_s1 + $0x50] sm:$0xff]  }
   0x2   :  { %v614_v1 = vld [vmem:[%s803_s1 + $0xc0] sm:$0xff]   ;;  %557 = vmatprep.subr.bf16.mxu0 %v613_v0  ;;  %v618_v5 = vld [vmem:[%s803_s1 + $0xc8] sm:$0xff]   ;;  %v622_v9 = vld [vmem:[%s803_s1 + $0xd0] sm:$0xff]  }
   0x3   :  { %v615_v2 = vld [vmem:[%s803_s1] sm:$0xff]   ;;  %585 = vmatprep.subr.bf16.mxu1 %v614_v1  ;;  %v619_v6 = vld [vmem:[%s803_s1 + $0x8] sm:$0xff]   ;;  %v623_v10 = vld [vmem:[%s803_s1 + $0x10] sm:$0xff]  }
   0x4   :  { %v616_v3 = vld [vmem:[%s803_s1 + $0x80] sm:$0xff]   ;;  %558 = vmatpush3.bf16.msra.mxu0 %v615_v2  ;;  %v620_v7 = vld [vmem:[%s803_s1 + $0x88] sm:$0xff]   ;;  %v624_v11 = vld [vmem:[%s803_s1 + $0x90] sm:$0xff]  }
   0x5   :  { %586 = vmatpush3.bf16.msra.mxu1 %v616_v3  ;;  %559 = vmatprep.subr.bf16.mxu0 %v617_v4  ;;  %v625_v12 = vld [vmem:[%s803_s1 + $0x58] sm:$0xff]   ;;  %v629_v16 = vld [vmem:[%s803_s1 + $0x60] sm:$0xff]   ;;  %v633_v20 = vld [vmem:[%s803_s1 + $0x68] sm:$0xff]  }
   0x6   :  { %587 = vmatprep.subr.bf16.mxu1 %v618_v5  ;;  %v626_v13 = vld [vmem:[%s803_s1 + $0xd8] sm:$0xff]   ;;  %v630_v17 = vld [vmem:[%s803_s1 + $0xe0] sm:$0xff]   ;;  %v634_v21 = vld [vmem:[%s803_s1 + $0xe8] sm:$0xff]  }
   0x7   :  { %v627_v14 = vld [vmem:[%s803_s1 + $0x18] sm:$0xff]   ;;  %v631_v18 = vld [vmem:[%s803_s1 + $0x20] sm:$0xff]   ;;  %v635_v22 = vld [vmem:[%s803_s1 + $0x28] sm:$0xff]  }
   0x8   :  { %560 = vmatpush3.bf16.msra.mxu0 %v619_v6  ;;  %v628_v15 = vld [vmem:[%s803_s1 + $0x98] sm:$0xff]   ;;  %v632_v19 = vld [vmem:[%s803_s1 + $0xa0] sm:$0xff]   ;;  %v636_v23 = vld [vmem:[%s803_s1 + $0xa8] sm:$0xff]  }
   0x9   :  { %588 = vmatpush3.bf16.msra.mxu1 %v620_v7  ;;  %561 = vmatprep.subr.bf16.mxu0 %v621_v8  ;;  %v637_v24 = vld [vmem:[%s803_s1 + $0x70] sm:$0xff]   ;;  %v641_v28 = vld [vmem:[%s803_s1 + $0x78] sm:$0xff]   ;;  %v25_v36 = vld [vmem:[%s804_s0 + $0x20] sm:$0xff] }
   0xa   :  { %589 = vmatprep.subr.bf16.mxu1 %v622_v9  ;;  %v638_v25 = vld [vmem:[%s803_s1 + $0xf0] sm:$0xff]   ;;  %v642_v29 = vld [vmem:[%s803_s1 + $0xf8] sm:$0xff]   ;;  %v511_v37 = vcombine.high %v25_v36, %v25_v36  ;;  %v26_v38 = vld [vmem:[%s804_s0 + $0x28] sm:$0xff]  ;;  %v510_v40 = vcombine.low %v25_v36, %v25_v36 }
   0xb   :  { %v639_v26 = vld [vmem:[%s803_s1 + $0x30] sm:$0xff]   ;;  %v643_v30 = vld [vmem:[%s803_s1 + $0x38] sm:$0xff]   ;;  %v513_v39 = vcombine.high %v26_v38, %v26_v38  ;;  %v512_v41 = vcombine.low %v26_v38, %v26_v38 }
   0xc   :  { %562 = vmatpush3.bf16.msra.mxu0 %v623_v10  ;;  %v640_v27 = vld [vmem:[%s803_s1 + $0xb0] sm:$0xff]   ;;  %v644_v31 = vld [vmem:[%s803_s1 + $0xb8] sm:$0xff]  }
   0xd   :  { %590 = vmatpush3.bf16.msra.mxu1 %v624_v11  ;;  %563 = vmatprep.subr.bf16.mxu0 %v625_v12  ;;  %v645_v32 = vld [vmem:[%s804_s0] ss:$16 sps:$4 sm:$0xff]   ;;  %v647_v33 = vld [vmem:[%s804_s0 + $0x4] ss:$16 sps:$4 sm:$0xff]   ;;  %v648_v34 = vld [vmem:[%s804_s0 + $0x8] ss:$16 sps:$4 sm:$0xff]  }
   0xe   :  { %591 = vmatprep.subr.bf16.mxu1 %v626_v13  ;;  %v650_v35 = vld [vmem:[%s804_s0 + $0xc] ss:$16 sps:$4 sm:$0xff]   ;;  %349 = vmatprep.mubr.bf16.mxu0 %v647_v33 }
   0xf   :  { %397 = vmatprep.mubr.bf16.mxu1 %v650_v35 }
  0x10   :  { %564 = vmatpush3.bf16.msra.mxu0 %v627_v14 }
  0x11   :  { %592 = vmatpush3.bf16.msra.mxu1 %v628_v15  ;;  %565 = vmatprep.subr.bf16.mxu0 %v629_v16 }
  0x12   :  { %593 = vmatprep.subr.bf16.mxu1 %v630_v17 }
  0x14   :  { %566 = vmatpush3.bf16.msra.mxu0 %v631_v18 }
  0x15   :  { %594 = vmatpush3.bf16.msra.mxu1 %v632_v19  ;;  %567 = vmatprep.subr.bf16.mxu0 %v633_v20 }
  0x16   :  { %595 = vmatprep.subr.bf16.mxu1 %v634_v21 }
  0x18   :  { %568 = vmatpush3.bf16.msra.mxu0 %v635_v22 }
  0x19   :  { %596 = vmatpush3.bf16.msra.mxu1 %v636_v23  ;;  %569 = vmatprep.subr.bf16.mxu0 %v637_v24 }
  0x1a   :  { %597 = vmatprep.subr.bf16.mxu1 %v638_v25 }
  0x1c   :  { %570 = vmatpush3.bf16.msra.mxu0 %v639_v26 }
  0x1d   :  { %598 = vmatpush3.bf16.msra.mxu1 %v640_v27  ;;  %571 = vmatprep.subr.bf16.mxu0 %v641_v28  ;;  %v463_v28 = vlaneseq }
  0x1e   :  { %599 = vmatprep.subr.bf16.mxu1 %v642_v29 }
  0x1f   :  { %v464_v29 = vshrl.u32 %v463_v28, 7 }
  0x20   :  { %572 = vmatpush3.bf16.msra.mxu0 %v643_v30  ;;  %v453_v30 = vld [vmem:[%s805_s2] sm:$0x1] }
  0x21   :  { %600 = vmatpush3.bf16.msra.mxu1 %v644_v31  ;;  %v465_v31 = vsub.s32 0, %v464_v29 }
  0x23   :  { %350 = vmatmul.mubr.bf16.vlgmr.msra.gmra.mrb[0].mxu0 %v645_v32 }
  0x24   :  { %398 = vmatmul.mubr.bf16.vlgmr.msra.gmra.mrb[0].mxu1 %v648_v34  ;;  %357 = vmatprep.mubr.bf16.mxu0 %v511_v37  ;;  %v457_v34 = vld [vmem:[%s805_s2 + $0x1] sm:$0x1] }
  0x25   :  { %405 = vmatprep.mubr.bf16.mxu1 %v513_v39 }
  0x2b   :  { %358 = vmatmul.mubr.bf16.gmra.mrb[4].mxu0 %v510_v40 }
  0x2c   :  { %406 = vmatmul.mubr.bf16.gmra.mrb[4].mxu1 %v512_v41 }
  0xf6   :  { %v573_v42 = vpop.f32.mrb[0].mxu0 }
  0xf7   :  { %v601_v43 = vpop.f32.mrb[0].mxu1  ;;  %v574_v44 = vpop.f32.mrb[1].mxu0 }
  0xf8   :  { %v575_v45 = vadd.f32 %v574_v44, %v573_v42  ;;  %v602_v46 = vpop.f32.mrb[1].mxu1  ;;  %v576_v47 = vpop.f32.mrb[2].mxu0 }
  0xf9   :  { %v603_v48 = vadd.f32 %v602_v46, %v601_v43  ;;  %v604_v49 = vpop.f32.mrb[2].mxu1  ;;  %v577_v50 = vpop.f32.mrb[3].mxu0 }
  0xfa   :  { %v578_v51 = vadd.f32 %v577_v50, %v576_v47  ;;  %v605_v52 = vpop.f32.mrb[3].mxu1 }
  0xfb   :  { %v400_v53 = vadd.f32 %v603_v48, %v575_v45  ;;  %v606_v54 = vadd.f32 %v605_v52, %v604_v49 }
  0xfd   :  { %v403_v55 = vadd.f32 %v606_v54, %v578_v51  ;;  %v420_v57 = vmul.f32 %v400_v53, %v400_v53 }
  0xfe   :  { %v579_v56 = vpop.f32.mrb[4].mxu0 }
  0xff   :  { %v418_v58 = vadd.f32 %v403_v55, %v400_v53  ;;  %v421_v59 = vmul.f32 %v403_v55, %v403_v55  ;;  %v607_v60 = vpop.f32.mrb[4].mxu1  ;;  %v580_v61 = vpop.f32.mrb[5].mxu0 }
 0x100   :  { %v581_v62 = vadd.f32 %v580_v61, %v579_v56  ;;  %v608_v63 = vpop.f32.mrb[5].mxu1  ;;  %v582_v0 = vpop.f32.mrb[6].mxu0 }
 0x101   :  { %v423_v1 = vadd.f32 %v421_v59, %v420_v57  ;;  %v609_v2 = vadd.f32 %v608_v63, %v607_v60  ;;  %v610_v3 = vpop.f32.mrb[6].mxu1  ;;  %v583_v4 = vpop.f32.mrb[7].mxu0 }
 0x102   :  { %v611_v5 = vpop.f32.mrb[7].mxu1 }
 0x103   :  { %v408_v6 = vadd.f32 %v609_v2, %v581_v62 }
 0x105   :  { %v419_v7 = vadd.f32 %v418_v58, %v408_v6  ;;  %v422_v8 = vmul.f32 %v408_v6, %v408_v6 }
 0x107   :  { %v424_v9 = vadd.f32 %v423_v1, %v422_v8  ;;  %v435_v10 = vrot.slane %v419_v7, 4 }
 0x109   :  { %v436_v11 = vadd.f32 %v435_v10, %v419_v7  ;;  %v443_v12 = vrot.slane %v424_v9, 4 }
 0x10b   :  { %v437_v13 = vrot.slane %v436_v11, 2  ;;  %v444_v14 = vadd.f32 %v443_v12, %v424_v9 }
 0x10d   :  { %v438_v15 = vadd.f32 %v437_v13, %v436_v11  ;;  %v445_v16 = vrot.slane %v444_v14, 2 }
 0x10f   :  { %v439_v17 = vrot.slane %v438_v15, 1  ;;  %v446_v18 = vadd.f32 %v445_v16, %v444_v14 }
 0x111   :  { %v440_v19 = vadd.f32 %v439_v17, %v438_v15  ;;  %v447_v20 = vrot.slane %v446_v18, 1 }
 0x113   :  { %v441_v21 = vmul.f32 0.055555556, %v440_v19  ;;  %v448_v22 = vadd.f32 %v447_v20, %v446_v18 }
 0x115   :  { %v449_v23 = vmul.f32 0.055555556, %v448_v22  ;;  %v450_v24 = vmul.f32 %v441_v21, %v441_v21 }
 0x117   :  { %v451_v25 = vsub.f32 %v449_v23, %v450_v24 }
 0x119   :  { %v452_v26 = vmax.f32 %v451_v25, 0.0 }
 0x11b   :  { %v454_v27 = vadd.f32 1e-05, %v452_v26 }
 0x11d   :  { %655 = vrsqrt.f32 %v454_v27 }
 0x127   :  { %v656_v32 = vpop.eup %655 }
 0x128   :  { %v456_v33 = vmul.f32 %v656_v32, %v453_v30 }
 0x12a   :  { %v458_v35 = vmul.f32 %v456_v33, %v441_v21  ;;  %v466_v36 = vrot.slane %v456_v33, %v465_v31 }
 0x12c   :  { %v459_v37 = vsub.f32 %v457_v34, %v458_v35  ;;  %v467_v38 = vmul.f32 %v466_v36, %v400_v53  ;;  %v468_v39 = vmul.f32 %v466_v36, %v403_v55  ;;  %v469_v40 = vmul.f32 %v466_v36, %v408_v6 }
 0x12e   :  { %v473_v41 = vrot.slane %v459_v37, %v465_v31 }
 0x130   :  { %v474_v42 = vadd.f32 %v473_v41, %v467_v38  ;;  %v475_v43 = vadd.f32 %v473_v41, %v468_v39  ;;  %v476_v44 = vadd.f32 %v473_v41, %v469_v40 }
 0x132   :  { %vm477_vm0 = vcmp.ge.f32.partialorder %v474_v42, 0.0  ;;  %vm478_vm1 = vcmp.ge.f32.partialorder %v475_v43, 0.0  ;;  %vm479_vm2 = vcmp.ge.f32.partialorder %v476_v44, 0.0  ;;  %v480_v45 = vmul.f32 0.2, %v474_v42 }
 0x133   :  { %v481_v46 = vmul.f32 0.2, %v475_v43  ;;  %v482_v47 = vmul.f32 0.2, %v476_v44 }
 0x134   :  { %v483_v48 = vsel %vm477_vm0, %v474_v42, %v480_v45 }
 0x135   :  { %v484_v49 = vsel %vm478_vm1, %v475_v43, %v481_v46  ;;  %v485_v50 = vsel %vm479_vm2, %v476_v44, %v482_v47 }
 0x136   :  { %v551_v51 = vpack.c.bf16 %v485_v50, %v485_v50  ;;  %v555_v52 = vpack.c.bf16 %v484_v49, %v483_v48 }
 0x138   :  { %556 = vst [vmem:[%s806_s3] sm:$0xff] %v555_v52   ;;  %501 = vst [vmem:[%s806_s3 + $0x8] sm:$0xf] %v551_v51 }

// kernel: _lambda_.26
= control target key start
LH: loop header
LB: loop body
LE: loop exit
PB: predicated region body
PF: predicated region fallthrough
CT: control target
= control target key end

     0   :  { %s1481_s1 = inlined_call_operand.vmem [shape: bf16[1024,128], index: 1, kind: input, shape index: {}]   ;;  %s1482_s0 = inlined_call_operand.vmem [shape: bf16[32,1024], index: 0, kind: input, shape index: {}]   ;;  %s1483_s2 = inlined_call_operand.vmem [shape: f32[8,128], index: 2, kind: input, shape index: {}]   ;;  %s1484_s3 = inlined_call_operand.vmem [shape: bf16[32,128], index: 3, kind: output, shape index: {}]  }
   0x1   :  { %v1143_v0 = vld [vmem:[%s1481_s1 + $0x40] sm:$0xff]   ;;  %v1147_v4 = vld [vmem:[%s1481_s1 + $0x48] sm:$0xff]   ;;  %v1151_v8 = vld [vmem:[%s1481_s1 + $0x50] sm:$0xff]  }
   0x2   :  { %v1144_v1 = vld [vmem:[%s1481_s1 + $0xc0] sm:$0xff]   ;;  %1031 = vmatprep.subr.bf16.mxu0 %v1143_v0  ;;  %v1148_v5 = vld [vmem:[%s1481_s1 + $0xc8] sm:$0xff]   ;;  %v1152_v9 = vld [vmem:[%s1481_s1 + $0xd0] sm:$0xff]  }
   0x3   :  { %v1145_v2 = vld [vmem:[%s1481_s1] sm:$0xff]   ;;  %1059 = vmatprep.subr.bf16.mxu1 %v1144_v1  ;;  %v1149_v6 = vld [vmem:[%s1481_s1 + $0x8] sm:$0xff]   ;;  %v1153_v10 = vld [vmem:[%s1481_s1 + $0x10] sm:$0xff]  }
   0x4   :  { %v1146_v3 = vld [vmem:[%s1481_s1 + $0x80] sm:$0xff]   ;;  %1032 = vmatpush3.bf16.msra.mxu0 %v1145_v2  ;;  %v1150_v7 = vld [vmem:[%s1481_s1 + $0x88] sm:$0xff]   ;;  %v1154_v11 = vld [vmem:[%s1481_s1 + $0x90] sm:$0xff]  }
   0x5   :  { %1060 = vmatpush3.bf16.msra.mxu1 %v1146_v3  ;;  %1033 = vmatprep.subr.bf16.mxu0 %v1147_v4  ;;  %v1155_v12 = vld [vmem:[%s1481_s1 + $0x58] sm:$0xff]   ;;  %v1159_v16 = vld [vmem:[%s1481_s1 + $0x60] sm:$0xff]   ;;  %v1163_v20 = vld [vmem:[%s1481_s1 + $0x68] sm:$0xff]  }
   0x6   :  { %1061 = vmatprep.subr.bf16.mxu1 %v1148_v5  ;;  %v1156_v13 = vld [vmem:[%s1481_s1 + $0xd8] sm:$0xff]   ;;  %v1160_v17 = vld [vmem:[%s1481_s1 + $0xe0] sm:$0xff]   ;;  %v1164_v21 = vld [vmem:[%s1481_s1 + $0xe8] sm:$0xff]  }
   0x7   :  { %v1157_v14 = vld [vmem:[%s1481_s1 + $0x18] sm:$0xff]   ;;  %v1161_v18 = vld [vmem:[%s1481_s1 + $0x20] sm:$0xff]   ;;  %v1165_v22 = vld [vmem:[%s1481_s1 + $0x28] sm:$0xff]  }
   0x8   :  { %1034 = vmatpush3.bf16.msra.mxu0 %v1149_v6  ;;  %v1158_v15 = vld [vmem:[%s1481_s1 + $0x98] sm:$0xff]   ;;  %v1162_v19 = vld [vmem:[%s1481_s1 + $0xa0] sm:$0xff]   ;;  %v1166_v23 = vld [vmem:[%s1481_s1 + $0xa8] sm:$0xff]  }
   0x9   :  { %1062 = vmatpush3.bf16.msra.mxu1 %v1150_v7  ;;  %1035 = vmatprep.subr.bf16.mxu0 %v1151_v8  ;;  %v1167_v24 = vld [vmem:[%s1481_s1 + $0x70] sm:$0xff]   ;;  %v1171_v28 = vld [vmem:[%s1481_s1 + $0x78] sm:$0xff]   ;;  %v21_v32 = vld [vmem:[%s1482_s0] sm:$0xff] }
   0xa   :  { %1063 = vmatprep.subr.bf16.mxu1 %v1152_v9  ;;  %v1168_v25 = vld [vmem:[%s1481_s1 + $0xf0] sm:$0xff]   ;;  %v1172_v29 = vld [vmem:[%s1481_s1 + $0xf8] sm:$0xff]   ;;  %v25_v33 = vld [vmem:[%s1482_s0 + $0x20] sm:$0xff] }
   0xb   :  { %v1169_v26 = vld [vmem:[%s1481_s1 + $0x30] sm:$0xff]   ;;  %v1173_v30 = vld [vmem:[%s1481_s1 + $0x38] sm:$0xff]   ;;  %v22_v34 = vld [vmem:[%s1482_s0 + $0x8] sm:$0xff]  ;;  %v932_v35 = vcombine.low %v21_v32, %v25_v33  ;;  %v933_v36 = vcombine.high %v21_v32, %v25_v33 }
   0xc   :  { %1036 = vmatpush3.bf16.msra.mxu0 %v1153_v10  ;;  %v1170_v27 = vld [vmem:[%s1481_s1 + $0xb0] sm:$0xff]   ;;  %v1174_v31 = vld [vmem:[%s1481_s1 + $0xb8] sm:$0xff]   ;;  %v26_v37 = vld [vmem:[%s1482_s0 + $0x28] sm:$0xff] }
   0xd   :  { %1064 = vmatpush3.bf16.msra.mxu1 %v1154_v11  ;;  %1037 = vmatprep.subr.bf16.mxu0 %v1155_v12  ;;  %v934_v38 = vcombine.low %v22_v34, %v26_v37  ;;  %v935_v39 = vcombine.high %v22_v34, %v26_v37  ;;  %v1175_v40 = vld [vmem:[%s1481_s1 + $0x140] sm:$0xff]   ;;  %v1179_v44 = vld [vmem:[%s1481_s1 + $0x148] sm:$0xff]   ;;  %v1183_v48 = vld [vmem:[%s1481_s1 + $0x150] sm:$0xff]  }
   0xe   :  { %1065 = vmatprep.subr.bf16.mxu1 %v1156_v13  ;;  %661 = vmatprep.mubr.bf16.mxu0 %v933_v36  ;;  %v1176_v41 = vld [vmem:[%s1481_s1 + $0x1c0] sm:$0xff]   ;;  %v1180_v45 = vld [vmem:[%s1481_s1 + $0x1c8] sm:$0xff]   ;;  %v1184_v49 = vld [vmem:[%s1481_s1 + $0x1d0] sm:$0xff]  }
   0xf   :  { %710 = vmatprep.mubr.bf16.mxu1 %v935_v39  ;;  %v1177_v42 = vld [vmem:[%s1481_s1 + $0x100] sm:$0xff]   ;;  %v1181_v46 = vld [vmem:[%s1481_s1 + $0x108] sm:$0xff]   ;;  %v1185_v50 = vld [vmem:[%s1481_s1 + $0x110] sm:$0xff]  }
  0x10   :  { %1038 = vmatpush3.bf16.msra.mxu0 %v1157_v14  ;;  %v1178_v43 = vld [vmem:[%s1481_s1 + $0x180] sm:$0xff]   ;;  %v1182_v47 = vld [vmem:[%s1481_s1 + $0x188] sm:$0xff]   ;;  %v1186_v51 = vld [vmem:[%s1481_s1 + $0x190] sm:$0xff]  }
  0x11   :  { %1066 = vmatpush3.bf16.msra.mxu1 %v1158_v15  ;;  %1039 = vmatprep.subr.bf16.mxu0 %v1159_v16  ;;  %v1187_v52 = vld [vmem:[%s1481_s1 + $0x158] sm:$0xff]   ;;  %v1191_v56 = vld [vmem:[%s1481_s1 + $0x160] sm:$0xff]   ;;  %v30_v63 = vld [vmem:[%s1482_s0 + $0x48] sm:$0xff] }
  0x12   :  { %1067 = vmatprep.subr.bf16.mxu1 %v1160_v17  ;;  %v1188_v53 = vld [vmem:[%s1481_s1 + $0x1d8] sm:$0xff]   ;;  %v1192_v57 = vld [vmem:[%s1481_s1 + $0x1e0] sm:$0xff]   ;;  %v34_v0 = vld [vmem:[%s1482_s0 + $0x68] sm:$0xff] }
  0x13   :  { %v1189_v54 = vld [vmem:[%s1481_s1 + $0x118] sm:$0xff]   ;;  %v1193_v58 = vld [vmem:[%s1481_s1 + $0x120] sm:$0xff]   ;;  %v943_v2 = vcombine.high %v30_v63, %v34_v0  ;;  %v1195_v3 = vld [vmem:[%s1481_s1 + $0x168] sm:$0xff]   ;;  %v942_v4 = vcombine.low %v30_v63, %v34_v0 }
  0x14   :  { %1040 = vmatpush3.bf16.msra.mxu0 %v1161_v18  ;;  %v1190_v55 = vld [vmem:[%s1481_s1 + $0x198] sm:$0xff]   ;;  %v1194_v59 = vld [vmem:[%s1481_s1 + $0x1a0] sm:$0xff]   ;;  %v1196_v5 = vld [vmem:[%s1481_s1 + $0x1e8] sm:$0xff]  }
  0x15   :  { %1068 = vmatpush3.bf16.msra.mxu1 %v1162_v19  ;;  %1041 = vmatprep.subr.bf16.mxu0 %v1163_v20  ;;  %v29_v60 = vld [vmem:[%s1482_s0 + $0x40] sm:$0xff]  ;;  %v1197_v6 = vld [vmem:[%s1481_s1 + $0x128] sm:$0xff]   ;;  %v1199_v8 = vld [vmem:[%s1481_s1 + $0x170] sm:$0xff]  }
  0x16   :  { %1069 = vmatprep.subr.bf16.mxu1 %v1164_v21  ;;  %v33_v61 = vld [vmem:[%s1482_s0 + $0x60] sm:$0xff]  ;;  %v1198_v7 = vld [vmem:[%s1481_s1 + $0x1a8] sm:$0xff]   ;;  %v1200_v9 = vld [vmem:[%s1481_s1 + $0x1f0] sm:$0xff]  }
  0x17   :  { %v941_v62 = vcombine.high %v29_v60, %v33_v61  ;;  %v940_v1 = vcombine.low %v29_v60, %v33_v61  ;;  %v1201_v10 = vld [vmem:[%s1481_s1 + $0x130] sm:$0xff]   ;;  %v1203_v12 = vld [vmem:[%s1481_s1 + $0x178] sm:$0xff]  }
  0x18   :  { %1042 = vmatpush3.bf16.msra.mxu0 %v1165_v22  ;;  %v1202_v11 = vld [vmem:[%s1481_s1 + $0x1b0] sm:$0xff]   ;;  %v1204_v13 = vld [vmem:[%s1481_s1 + $0x1f8] sm:$0xff]  }
  0x19   :  { %1070 = vmatpush3.bf16.msra.mxu1 %v1166_v23  ;;  %1043 = vmatprep.subr.bf16.mxu0 %v1167_v24  ;;  %v1205_v14 = vld [vmem:[%s1481_s1 + $0x138] sm:$0xff]   ;;  %v23_v16 = vld [vmem:[%s1482_s0 + $0x10] sm:$0xff] }
  0x1a   :  { %1071 = vmatprep.subr.bf16.mxu1 %v1168_v25  ;;  %v1206_v15 = vld [vmem:[%s1481_s1 + $0x1b8] sm:$0xff]   ;;  %v27_v17 = vld [vmem:[%s1482_s0 + $0x30] sm:$0xff] }
  0x1b   :  { %v24_v18 = vld [vmem:[%s1482_s0 + $0x18] sm:$0xff]  ;;  %v936_v20 = vcombine.low %v23_v16, %v27_v17  ;;  %v937_v21 = vcombine.high %v23_v16, %v27_v17  ;;  %v31_v24 = vld [vmem:[%s1482_s0 + $0x50] sm:$0xff] }
  0x1c   :  { %1044 = vmatpush3.bf16.msra.mxu0 %v1169_v26  ;;  %v28_v19 = vld [vmem:[%s1482_s0 + $0x38] sm:$0xff]  ;;  %v35_v25 = vld [vmem:[%s1482_s0 + $0x70] sm:$0xff] }
  0x1d   :  { %1072 = vmatpush3.bf16.msra.mxu1 %v1170_v27  ;;  %1045 = vmatprep.subr.bf16.mxu0 %v1171_v28  ;;  %v938_v22 = vcombine.low %v24_v18, %v28_v19  ;;  %v939_v23 = vcombine.high %v24_v18, %v28_v19  ;;  %v32_v26 = vld [vmem:[%s1482_s0 + $0x58] sm:$0xff]  ;;  %v945_v27 = vcombine.high %v31_v24, %v35_v25 }
  0x1e   :  { %1073 = vmatprep.subr.bf16.mxu1 %v1172_v29  ;;  %v36_v28 = vld [vmem:[%s1482_s0 + $0x78] sm:$0xff] }
  0x1f   :  { %v947_v29 = vcombine.high %v32_v26, %v36_v28 }
  0x20   :  { %1046 = vmatpush3.bf16.msra.mxu0 %v1173_v30  ;;  %v944_v30 = vcombine.low %v31_v24, %v35_v25 }
  0x21   :  { %1074 = vmatpush3.bf16.msra.mxu1 %v1174_v31  ;;  %1087 = vmatprep.subr.bf16.mxu0 %v1175_v40  ;;  %v946_v31 = vcombine.low %v32_v26, %v36_v28 }
  0x22   :  { %1115 = vmatprep.subr.bf16.mxu1 %v1176_v41 }
  0x23   :  { %662 = vmatmul.mubr.bf16.vlgmr.msra.gmra.mrb[0].mxu0 %v932_v35 }
  0x24   :  { %711 = vmatmul.mubr.bf16.vlgmr.msra.gmra.mrb[0].mxu1 %v934_v38  ;;  %1088 = vmatpush3.bf16.msra.mxu0 %v1177_v42 }
  0x25   :  { %1116 = vmatpush3.bf16.msra.mxu1 %v1178_v43  ;;  %1089 = vmatprep.subr.bf16.mxu0 %v1179_v44 }
  0x26   :  { %1117 = vmatprep.subr.bf16.mxu1 %v1180_v45  ;;  %669 = vmatprep.mubr.bf16.mxu0 %v941_v62 }
  0x27   :  { %718 = vmatprep.mubr.bf16.mxu1 %v943_v2 }
  0x28   :  { %1090 = vmatpush3.bf16.msra.mxu0 %v1181_v46 }
  0x29   :  { %1118 = vmatpush3.bf16.msra.mxu1 %v1182_v47  ;;  %1091 = vmatprep.subr.bf16.mxu0 %v1183_v48 }
  0x2a   :  { %1119 = vmatprep.subr.bf16.mxu1 %v1184_v49 }
  0x2b   :  { %670 = vmatmul.mubr.bf16.gmra.mrb[4].mxu0 %v940_v1 }
  0x2c   :  { %1092 = vmatpush3.bf16.msra.mxu0 %v1185_v50  ;;  %719 = vmatmul.mubr.bf16.gmra.mrb[4].mxu1 %v942_v4 }
  0x2d   :  { %1120 = vmatpush3.bf16.msra.mxu1 %v1186_v51  ;;  %1093 = vmatprep.subr.bf16.mxu0 %v1187_v52 }
  0x2e   :  { %1121 = vmatprep.subr.bf16.mxu1 %v1188_v53  ;;  %759 = vmatprep.mubr.bf16.mxu0 %v937_v21 }
  0x2f   :  { %808 = vmatprep.mubr.bf16.mxu1 %v939_v23 }
  0x30   :  { %1094 = vmatpush3.bf16.msra.mxu0 %v1189_v54 }
  0x31   :  { %1122 = vmatpush3.bf16.msra.mxu1 %v1190_v55  ;;  %1095 = vmatprep.subr.bf16.mxu0 %v1191_v56 }
  0x32   :  { %1123 = vmatprep.subr.bf16.mxu1 %v1192_v57 }
  0x34   :  { %1096 = vmatpush3.bf16.msra.mxu0 %v1193_v58 }
  0x35   :  { %1124 = vmatpush3.bf16.msra.mxu1 %v1194_v59  ;;  %1097 = vmatprep.subr.bf16.mxu0 %v1195_v3 }
  0x36   :  { %1125 = vmatprep.subr.bf16.mxu1 %v1196_v5 }
  0x38   :  { %1098 = vmatpush3.bf16.msra.mxu0 %v1197_v6 }
  0x39   :  { %1126 = vmatpush3.bf16.msra.mxu1 %v1198_v7  ;;  %1099 = vmatprep.subr.bf16.mxu0 %v1199_v8 }
  0x3a   :  { %1127 = vmatprep.subr.bf16.mxu1 %v1200_v9 }
  0x3c   :  { %1100 = vmatpush3.bf16.msra.mxu0 %v1201_v10 }
  0x3d   :  { %1128 = vmatpush3.bf16.msra.mxu1 %v1202_v11  ;;  %1101 = vmatprep.subr.bf16.mxu0 %v1203_v12 }
  0x3e   :  { %1129 = vmatprep.subr.bf16.mxu1 %v1204_v13 }
  0x40   :  { %1102 = vmatpush3.bf16.msra.mxu0 %v1205_v14 }
  0x41   :  { %1130 = vmatpush3.bf16.msra.mxu1 %v1206_v15 }
  0x43   :  { %760 = vmatmul.mubr.bf16.vlgmr.msra.gmra.mrb[8].mxu0 %v936_v20 }
  0x44   :  { %809 = vmatmul.mubr.bf16.vlgmr.msra.gmra.mrb[8].mxu1 %v938_v22  ;;  %767 = vmatprep.mubr.bf16.mxu0 %v945_v27 }
  0x45   :  { %816 = vmatprep.mubr.bf16.mxu1 %v947_v29 }
  0x4b   :  { %768 = vmatmul.mubr.bf16.gmra.mrb[12].mxu0 %v944_v30 }
  0x4c   :  { %817 = vmatmul.mubr.bf16.gmra.mrb[12].mxu1 %v946_v31 }
  0xf6   :  { %v1047_v32 = vpop.f32.mrb[0].mxu0 }
  0xf7   :  { %v1075_v33 = vpop.f32.mrb[0].mxu1  ;;  %v1048_v34 = vpop.f32.mrb[1].mxu0 }
  0xf8   :  { %v1049_v35 = vadd.f32 %v1048_v34, %v1047_v32  ;;  %v1076_v36 = vpop.f32.mrb[1].mxu1  ;;  %v1050_v37 = vpop.f32.mrb[2].mxu0 }
  0xf9   :  { %v1077_v38 = vadd.f32 %v1076_v36, %v1075_v33  ;;  %v1078_v39 = vpop.f32.mrb[2].mxu1  ;;  %v1051_v40 = vpop.f32.mrb[3].mxu0 }
  0xfa   :  { %v1052_v41 = vadd.f32 %v1051_v40, %v1050_v37  ;;  %v1079_v42 = vpop.f32.mrb[3].mxu1 }
  0xfb   :  { %v713_v43 = vadd.f32 %v1077_v38, %v1049_v35  ;;  %v1080_v44 = vadd.f32 %v1079_v42, %v1078_v39 }
  0xfd   :  { %v716_v45 = vadd.f32 %v1080_v44, %v1052_v41 }
  0xfe   :  { %v1053_v46 = vpop.f32.mrb[4].mxu0 }
  0xff   :  { %v1081_v47 = vpop.f32.mrb[4].mxu1  ;;  %v1054_v48 = vpop.f32.mrb[5].mxu0 }
 0x100   :  { %v1055_v49 = vadd.f32 %v1054_v48, %v1053_v46  ;;  %v1082_v50 = vpop.f32.mrb[5].mxu1  ;;  %v1056_v51 = vpop.f32.mrb[6].mxu0 }
 0x101   :  { %v1083_v52 = vadd.f32 %v1082_v50, %v1081_v47  ;;  %v1084_v53 = vpop.f32.mrb[6].mxu1  ;;  %v1057_v54 = vpop.f32.mrb[7].mxu0 }
 0x102   :  { %v1058_v55 = vadd.f32 %v1057_v54, %v1056_v51  ;;  %v1085_v56 = vpop.f32.mrb[7].mxu1 }
 0x103   :  { %v721_v57 = vadd.f32 %v1083_v52, %v1055_v49  ;;  %v1086_v58 = vadd.f32 %v1085_v56, %v1084_v53  ;;  %v880_v56 = vlaneseq }
 0x105   :  { %v724_v59 = vadd.f32 %v1086_v58, %v1058_v55  ;;  %v869_v58 = vld [vmem:[%s1483_s2] sm:$0x1] }
 0x116   :  { %v1103_v60 = vpop.f32.mrb[8].mxu0 }
 0x117   :  { %v1131_v61 = vpop.f32.mrb[8].mxu1  ;;  %v1104_v62 = vpop.f32.mrb[9].mxu0 }
 0x118   :  { %v1132_v63 = vpop.f32.mrb[9].mxu1  ;;  %v1105_v0 = vadd.f32 %v1104_v62, %v1103_v60  ;;  %v1106_v2 = vpop.f32.mrb[10].mxu0  ;;  %v873_v62 = vld [vmem:[%s1483_s2 + $0x1] sm:$0x1] }
 0x119   :  { %v1133_v1 = vadd.f32 %v1132_v63, %v1131_v61  ;;  %v1134_v3 = vpop.f32.mrb[10].mxu1  ;;  %v1107_v4 = vpop.f32.mrb[11].mxu0 }
 0x11a   :  { %v1135_v5 = vpop.f32.mrb[11].mxu1  ;;  %v762_v6 = vadd.f32 %v1105_v0, %v713_v43  ;;  %v1108_v7 = vadd.f32 %v1107_v4, %v1106_v2 }
 0x11b   :  { %v1136_v8 = vadd.f32 %v1135_v5, %v1134_v3 }
 0x11c   :  { %v811_v9 = vadd.f32 %v1133_v1, %v762_v6  ;;  %v765_v10 = vadd.f32 %v1108_v7, %v716_v45 }
 0x11e   :  { %v814_v11 = vadd.f32 %v1136_v8, %v765_v10  ;;  %v1109_v12 = vpop.f32.mrb[12].mxu0  ;;  %v834_v14 = vmul.f32 %v811_v9, %v811_v9 }
 0x11f   :  { %v1137_v13 = vpop.f32.mrb[12].mxu1  ;;  %v1110_v15 = vpop.f32.mrb[13].mxu0 }
 0x120   :  { %v1138_v16 = vpop.f32.mrb[13].mxu1  ;;  %v831_v17 = vadd.f32 %v814_v11, %v811_v9  ;;  %v835_v18 = vmul.f32 %v814_v11, %v814_v11  ;;  %v1111_v19 = vadd.f32 %v1110_v15, %v1109_v12  ;;  %v1112_v21 = vpop.f32.mrb[14].mxu0 }
 0x121   :  { %v1139_v20 = vadd.f32 %v1138_v16, %v1137_v13  ;;  %v1140_v22 = vpop.f32.mrb[14].mxu1  ;;  %v1113_v23 = vpop.f32.mrb[15].mxu0 }
 0x122   :  { %v1141_v24 = vpop.f32.mrb[15].mxu1  ;;  %v838_v25 = vadd.f32 %v835_v18, %v834_v14  ;;  %v770_v26 = vadd.f32 %v1111_v19, %v721_v57  ;;  %v1114_v27 = vadd.f32 %v1113_v23, %v1112_v21  ;;  %v881_v57 = vshrl.u32 %v880_v56, 7 }
 0x123   :  { %v1142_v28 = vadd.f32 %v1141_v24, %v1140_v22 }
 0x124   :  { %v819_v29 = vadd.f32 %v1139_v20, %v770_v26  ;;  %v773_v30 = vadd.f32 %v1114_v27, %v724_v59  ;;  %v882_v59 = vsub.s32 0, %v881_v57 }
 0x126   :  { %v832_v31 = vadd.f32 %v831_v17, %v819_v29  ;;  %v836_v32 = vmul.f32 %v819_v29, %v819_v29  ;;  %v822_v33 = vadd.f32 %v1142_v28, %v773_v30 }
 0x128   :  { %v839_v34 = vadd.f32 %v838_v25, %v836_v32  ;;  %v833_v35 = vadd.f32 %v832_v31, %v822_v33  ;;  %v837_v36 = vmul.f32 %v822_v33, %v822_v33 }
 0x12a   :  { %v840_v37 = vadd.f32 %v839_v34, %v837_v36  ;;  %v851_v38 = vrot.slane %v833_v35, 4 }
 0x12c   :  { %v852_v39 = vadd.f32 %v851_v38, %v833_v35  ;;  %v859_v40 = vrot.slane %v840_v37, 4 }
 0x12e   :  { %v853_v41 = vrot.slane %v852_v39, 2  ;;  %v860_v42 = vadd.f32 %v859_v40, %v840_v37 }
 0x130   :  { %v854_v43 = vadd.f32 %v853_v41, %v852_v39  ;;  %v861_v44 = vrot.slane %v860_v42, 2 }
 0x132   :  { %v855_v45 = vrot.slane %v854_v43, 1  ;;  %v862_v46 = vadd.f32 %v861_v44, %v860_v42 }
 0x134   :  { %v856_v47 = vadd.f32 %v855_v45, %v854_v43  ;;  %v863_v48 = vrot.slane %v862_v46, 1 }
 0x136   :  { %v857_v49 = vmul.f32 0.03125, %v856_v47  ;;  %v864_v50 = vadd.f32 %v863_v48, %v862_v46 }
 0x138   :  { %v865_v51 = vmul.f32 0.03125, %v864_v50  ;;  %v866_v52 = vmul.f32 %v857_v49, %v857_v49 }
 0x13a   :  { %v867_v53 = vsub.f32 %v865_v51, %v866_v52 }
 0x13c   :  { %v868_v54 = vmax.f32 %v867_v53, 0.0 }
 0x13e   :  { %v870_v55 = vadd.f32 1e-05, %v868_v54 }
 0x140   :  { %1207 = vrsqrt.f32 %v870_v55 }
 0x14a   :  { %v1208_v60 = vpop.eup %1207 }
 0x14b   :  { %v872_v61 = vmul.f32 %v1208_v60, %v869_v58 }
 0x14d   :  { %v874_v63 = vmul.f32 %v872_v61, %v857_v49  ;;  %v883_v0 = vrot.slane %v872_v61, %v882_v59 }
 0x14f   :  { %v875_v1 = vsub.f32 %v873_v62, %v874_v63  ;;  %v884_v2 = vmul.f32 %v883_v0, %v811_v9  ;;  %v885_v3 = vmul.f32 %v883_v0, %v814_v11  ;;  %v886_v4 = vmul.f32 %v883_v0, %v819_v29 }
 0x150   :  { %v887_v5 = vmul.f32 %v883_v0, %v822_v33 }
 0x151   :  { %v891_v6 = vrot.slane %v875_v1, %v882_v59 }
 0x153   :  { %v892_v7 = vadd.f32 %v891_v6, %v884_v2  ;;  %v893_v8 = vadd.f32 %v891_v6, %v885_v3  ;;  %v894_v10 = vadd.f32 %v891_v6, %v886_v4  ;;  %v895_v12 = vadd.f32 %v891_v6, %v887_v5 }
 0x155   :  { %vm896_vm0 = vcmp.ge.f32.partialorder %v892_v7, 0.0  ;;  %vm897_vm1 = vcmp.ge.f32.partialorder %v893_v8, 0.0  ;;  %vm898_vm2 = vcmp.ge.f32.partialorder %v894_v10, 0.0  ;;  %vm899_vm3 = vcmp.ge.f32.partialorder %v895_v12, 0.0 }
 0x156   :  { %v900_v13 = vmul.f32 0.2, %v892_v7  ;;  %v901_v14 = vmul.f32 0.2, %v893_v8  ;;  %v902_v15 = vmul.f32 0.2, %v894_v10 }
 0x157   :  { %v903_v16 = vmul.f32 0.2, %v895_v12 }
 0x158   :  { %v904_v17 = vsel %vm896_vm0, %v892_v7, %v900_v13  ;;  %v905_v18 = vsel %vm897_vm1, %v893_v8, %v901_v14  ;;  %v906_v19 = vsel %vm898_vm2, %v894_v10, %v902_v15 }
 0x159   :  { %v907_v9 = vsel %vm899_vm3, %v895_v12, %v903_v16  ;;  %v1023_v11 = vpack.c.bf16 %v905_v18, %v904_v17 }
 0x15a   :  { %v1028_v20 = vpack.c.bf16 %v907_v9, %v906_v19 }
 0x15b   :  { %1024 = vst [vmem:[%s1484_s3] sm:$0xff] %v1023_v11  }
 0x15c   :  { %1030 = vst [vmem:[%s1484_s3 + $0x8] sm:$0xff] %v1028_v20  }

// kernel: _lambda_.28
= control target key start
LH: loop header
LB: loop body
LE: loop exit
PB: predicated region body
PF: predicated region fallthrough
CT: control target
= control target key end

     0   :  { %s456_s18 = smov 0   ;;  %s492_s0 = inlined_call_operand.vmem [shape: f32[2,8,24], index: 0, kind: input, shape index: {}]   ;;  %s493_s1 = inlined_call_operand.vmem [shape: f32[2,8,24], index: 1, kind: input, shape index: {}]   ;;  %s494_s2 = inlined_call_operand.vmem [shape: f32[2,8,24], index: 2, kind: input, shape index: {}]   ;;  %s495_s3 = inlined_call_operand.vmem [shape: f32[2,8,24], index: 3, kind: input, shape index: {}]   ;;  %s496_s4 = inlined_call_operand.vmem [shape: f32[1,8,24], index: 4, kind: input, shape index: {}]   ;;  %s497_s5 = inlined_call_operand.vmem [shape: f32[2,8,24], index: 5, kind: output, shape index: {}]  }
   0x1 LB: > { %s396_s19 = sadd.s32 4294967295, %s423_s18   ;;  %p400_p0 = scmp.ge.s32.totalorder %s423_s18, 1  ;;  %s423_s18 = sphi %s456_s18, %s15_s18  }
   0x2   : > { %p213_p1 = scmp.lt.s32.totalorder %s423_s18, 3 }
   0x4   : > { %p214_p2 = pnand %p400_p0, %p213_p1 }
   0x5   : > { %p251_p3 = scmp.lt.s32.totalorder (!%p214_p2), %s396_s19, 1  ;;  %s425_s8 = smov (!%p214_p2), 3   ;;  %vm283_vm0 = vcmask (!%p214_p2), 23552   ;;  %vm289_vm1 = vcmask (!%p214_p2), 1040384   ;;  %v303_v18 = vld [vmem:[%s496_s4] sm:$0xff] (!%p214_p2)  ;;  %vm305_vm2 = vcmask (!%p214_p2), 195584  }
   0x6   : > { %217 = sbr.rel (%p214_p2) target bundleno = 148 (0x94), region = 40 }
   0xd   : > { %s499_s19 = smov (!%p251_p3, %s396_s19), 1 }
   0xe   : > { %s464_s20 = sshll.u32 %s499_s19, 3 }
   0xf   : > { %s258_s23 = scalar_lea.vmem %s493_s1, %s464_s20  ;;  %s266_s26 = scalar_lea.vmem %s495_s3, %s464_s20 }
  0x10   : > { %v272_v0 = vld [vmem:[%s258_s23] sm:$0xff]  ;;  %s254_s29 = scalar_lea.vmem %s492_s0, %s464_s20  ;;  %s262_s7 = scalar_lea.vmem %s494_s2, %s464_s20 }
  0x11   : > { %v274_v1 = vld [vmem:[%s266_s26] sm:$0xff]  ;;  %s270_s13 = scalar_lea.vmem %s497_s5, %s464_s20 }
  0x12   : > { %v278_v2 = vadd.f32 %v274_v1, %v272_v0  ;;  %v271_v3 = vld [vmem:[%s254_s29] sm:$0xff] }
  0x13   : > { %v273_v4 = vld [vmem:[%s262_s7] sm:$0xff]  ;;  %v275_v5 = vadd.f32 %v272_v0, %v271_v3 }
  0x14   : > { %v285_v6 = vadd.f32 %v274_v1, %v273_v4  ;;  %280 = vrot.lane.b32.xlu0 %v278_v2, %s425_s8 }
  0x15   : > { %v276_v7 = vadd.f32 %v275_v5, %v273_v4 }
  0x16   : > { %v287_v9 = vrot.slane %v285_v6, 7 }
  0x17   : > { %v277_v8 = vadd.f32 %v276_v7, %v274_v1 }
  0x18   : > { %292 = vrot.lane.b32.xlu0 %v274_v1, %s425_s8  ;;  %v290_v11 = vsel %vm289_vm1, 0.0, %v287_v9 }
  0x86   : > { %v281_v10 = vpop.permute.xlu0 %280 }
  0x87   : > { %v284_v12 = vsel %vm283_vm0, 0.0, %v281_v10 }
  0x88   : > { %v300_v13 = vadd.f32 %v284_v12, %v277_v8 }
  0x8a   : > { %v301_v14 = vadd.f32 %v300_v13, %v290_v11  ;;  %v293_v15 = vpop.permute.xlu0 %292 }
  0x8b   : > { %v295_v16 = vsel %vm283_vm0, 0.0, %v293_v15 }
  0x8c   : > { %v297_v17 = vrot.slane %v295_v16, 7 }
  0x8e   : > { %v299_v19 = vsel %vm289_vm1, 0.0, %v297_v17 }
  0x8f   : > { %v302_v20 = vadd.f32 %v301_v14, %v299_v19 }
  0x91   : > { %v304_v21 = vmul.f32 %v303_v18, %v302_v20 }
  0x93   : > { %306 = vst.msk [vmem:[%s270_s13] sm:$0xff] %vm305_vm2, %v304_v21 }
  0x94 PF: > { %s15_s18 = sadd.s32 1, %s423_s18  }
  0x95   : > { %p12_p4 = scmp.ge.s32.totalorder %s15_s18, 4  }
  0x97   :  { %14 = sbr.rel (!%p12_p4) target bundleno = 1 (0x1), region = 79 }

// kernel: _lambda_.27
= control target key start
LH: loop header
LB: loop body
LE: loop exit
PB: predicated region body
PF: predicated region fallthrough
CT: control target
= control target key end

     0   :  { %s3178_s1 = inlined_call_operand.vmem [shape: bf16[2048,128], index: 1, kind: input, shape index: {}]   ;;  %s3179_s0 = inlined_call_operand.vmem [shape: bf16[56,2048], index: 0, kind: input, shape index: {}]   ;;  %s3180_s2 = inlined_call_operand.vmem [shape: f32[8,128], index: 2, kind: input, shape index: {}]   ;;  %s3181_s3 = inlined_call_operand.vmem [shape: f32[56,128], index: 3, kind: output, shape index: {}]  }
   0x1   :  { %v2432_v0 = vld [vmem:[%s3178_s1 + $0x40] sm:$0xff]   ;;  %v2436_v4 = vld [vmem:[%s3178_s1 + $0x48] sm:$0xff]   ;;  %v2440_v8 = vld [vmem:[%s3178_s1 + $0x50] sm:$0xff]  }
   0x2   :  { %v2433_v1 = vld [vmem:[%s3178_s1 + $0xc0] sm:$0xff]   ;;  %2112 = vmatprep.subr.bf16.mxu0 %v2432_v0  ;;  %v2437_v5 = vld [vmem:[%s3178_s1 + $0xc8] sm:$0xff]   ;;  %v2441_v9 = vld [vmem:[%s3178_s1 + $0xd0] sm:$0xff]  }
   0x3   :  { %v2434_v2 = vld [vmem:[%s3178_s1] sm:$0xff]   ;;  %2152 = vmatprep.subr.bf16.mxu1 %v2433_v1  ;;  %v2438_v6 = vld [vmem:[%s3178_s1 + $0x8] sm:$0xff]   ;;  %v2442_v10 = vld [vmem:[%s3178_s1 + $0x10] sm:$0xff]  }
   0x4   :  { %v2435_v3 = vld [vmem:[%s3178_s1 + $0x80] sm:$0xff]   ;;  %2113 = vmatpush3.bf16.msra.mxu0 %v2434_v2  ;;  %v2439_v7 = vld [vmem:[%s3178_s1 + $0x88] sm:$0xff]   ;;  %v2443_v11 = vld [vmem:[%s3178_s1 + $0x90] sm:$0xff]  }
   0x5   :  { %2153 = vmatpush3.bf16.msra.mxu1 %v2435_v3  ;;  %2114 = vmatprep.subr.bf16.mxu0 %v2436_v4  ;;  %v2444_v12 = vld [vmem:[%s3178_s1 + $0x58] sm:$0xff]   ;;  %v2448_v16 = vld [vmem:[%s3178_s1 + $0x60] sm:$0xff]   ;;  %v2452_v20 = vld [vmem:[%s3178_s1 + $0x68] sm:$0xff]  }
   0x6   :  { %2154 = vmatprep.subr.bf16.mxu1 %v2437_v5  ;;  %v2445_v13 = vld [vmem:[%s3178_s1 + $0xd8] sm:$0xff]   ;;  %v2449_v17 = vld [vmem:[%s3178_s1 + $0xe0] sm:$0xff]   ;;  %v2453_v21 = vld [vmem:[%s3178_s1 + $0xe8] sm:$0xff]  }
   0x7   :  { %v2446_v14 = vld [vmem:[%s3178_s1 + $0x18] sm:$0xff]   ;;  %v2450_v18 = vld [vmem:[%s3178_s1 + $0x20] sm:$0xff]   ;;  %v2454_v22 = vld [vmem:[%s3178_s1 + $0x28] sm:$0xff]  }
   0x8   :  { %2115 = vmatpush3.bf16.msra.mxu0 %v2438_v6  ;;  %v2447_v15 = vld [vmem:[%s3178_s1 + $0x98] sm:$0xff]   ;;  %v2451_v19 = vld [vmem:[%s3178_s1 + $0xa0] sm:$0xff]   ;;  %v2455_v23 = vld [vmem:[%s3178_s1 + $0xa8] sm:$0xff]  }
   0x9   :  { %2155 = vmatpush3.bf16.msra.mxu1 %v2439_v7  ;;  %2116 = vmatprep.subr.bf16.mxu0 %v2440_v8  ;;  %v2456_v24 = vld [vmem:[%s3178_s1 + $0x70] sm:$0xff]   ;;  %v2460_v28 = vld [vmem:[%s3178_s1 + $0x78] sm:$0xff]   ;;  %v15_v32 = vld [vmem:[%s3179_s0] sm:$0xff] }
   0xa   :  { %2156 = vmatprep.subr.bf16.mxu1 %v2441_v9  ;;  %v2457_v25 = vld [vmem:[%s3178_s1 + $0xf0] sm:$0xff]   ;;  %v2461_v29 = vld [vmem:[%s3178_s1 + $0xf8] sm:$0xff]   ;;  %v23_v33 = vld [vmem:[%s3179_s0 + $0x40] sm:$0xff] }
   0xb   :  { %v2458_v26 = vld [vmem:[%s3178_s1 + $0x30] sm:$0xff]   ;;  %v2462_v30 = vld [vmem:[%s3178_s1 + $0x38] sm:$0xff]   ;;  %v16_v34 = vld [vmem:[%s3179_s0 + $0x8] sm:$0xff]  ;;  %v1920_v35 = vcombine.low %v15_v32, %v23_v33  ;;  %v1921_v36 = vcombine.high %v15_v32, %v23_v33 }
   0xc   :  { %2117 = vmatpush3.bf16.msra.mxu0 %v2442_v10  ;;  %v2459_v27 = vld [vmem:[%s3178_s1 + $0xb0] sm:$0xff]   ;;  %v2463_v31 = vld [vmem:[%s3178_s1 + $0xb8] sm:$0xff]   ;;  %v24_v37 = vld [vmem:[%s3179_s0 + $0x48] sm:$0xff] }
   0xd   :  { %2157 = vmatpush3.bf16.msra.mxu1 %v2443_v11  ;;  %2118 = vmatprep.subr.bf16.mxu0 %v2444_v12  ;;  %v1922_v38 = vcombine.low %v16_v34, %v24_v37  ;;  %v1923_v39 = vcombine.high %v16_v34, %v24_v37  ;;  %v2464_v40 = vld [vmem:[%s3178_s1 + $0x140] sm:$0xff]   ;;  %v2468_v44 = vld [vmem:[%s3178_s1 + $0x148] sm:$0xff]   ;;  %v2472_v56 = vld [vmem:[%s3178_s1 + $0x150] sm:$0xff]  }
   0xe   :  { %2158 = vmatprep.subr.bf16.mxu1 %v2445_v13  ;;  %1428 = vmatprep.mubr.bf16.mxu0 %v1921_v36  ;;  %v2465_v41 = vld [vmem:[%s3178_s1 + $0x1c0] sm:$0xff]   ;;  %v2469_v45 = vld [vmem:[%s3178_s1 + $0x1c8] sm:$0xff]   ;;  %v2473_v57 = vld [vmem:[%s3178_s1 + $0x1d0] sm:$0xff]  }
   0xf   :  { %1492 = vmatprep.mubr.bf16.mxu1 %v1923_v39  ;;  %v2466_v42 = vld [vmem:[%s3178_s1 + $0x100] sm:$0xff]   ;;  %v2470_v46 = vld [vmem:[%s3178_s1 + $0x108] sm:$0xff]   ;;  %v2474_v58 = vld [vmem:[%s3178_s1 + $0x110] sm:$0xff]  }
  0x10   :  { %2119 = vmatpush3.bf16.msra.mxu0 %v2446_v14  ;;  %v2467_v43 = vld [vmem:[%s3178_s1 + $0x180] sm:$0xff]   ;;  %v2471_v47 = vld [vmem:[%s3178_s1 + $0x188] sm:$0xff]   ;;  %v2475_v59 = vld [vmem:[%s3178_s1 + $0x190] sm:$0xff]  }
  0x11   :  { %2159 = vmatpush3.bf16.msra.mxu1 %v2447_v15  ;;  %2120 = vmatprep.subr.bf16.mxu0 %v2448_v16  ;;  %v31_v48 = vld [vmem:[%s3179_s0 + $0x80] sm:$0xff]  ;;  %v32_v51 = vld [vmem:[%s3179_s0 + $0x88] sm:$0xff]  ;;  %v2476_v60 = vld [vmem:[%s3178_s1 + $0x158] sm:$0xff]  }
  0x12   :  { %2160 = vmatprep.subr.bf16.mxu1 %v2449_v17  ;;  %v39_v49 = vld [vmem:[%s3179_s0 + $0xc0] sm:$0xff]  ;;  %v40_v52 = vld [vmem:[%s3179_s0 + $0xc8] sm:$0xff]  ;;  %v2477_v61 = vld [vmem:[%s3178_s1 + $0x1d8] sm:$0xff]  }
  0x13   :  { %v1937_v50 = vcombine.high %v31_v48, %v39_v49  ;;  %v1936_v53 = vcombine.low %v31_v48, %v39_v49  ;;  %v1939_v54 = vcombine.high %v32_v51, %v40_v52  ;;  %v1938_v55 = vcombine.low %v32_v51, %v40_v52  ;;  %v2478_v62 = vld [vmem:[%s3178_s1 + $0x118] sm:$0xff]   ;;  %v47_v0 = vld [vmem:[%s3179_s0 + $0x100] sm:$0xff]  ;;  %v48_v2 = vld [vmem:[%s3179_s0 + $0x108] sm:$0xff] }
  0x14   :  { %2121 = vmatpush3.bf16.msra.mxu0 %v2450_v18  ;;  %v2479_v63 = vld [vmem:[%s3178_s1 + $0x198] sm:$0xff]   ;;  %v55_v1 = vld [vmem:[%s3179_s0 + $0x140] sm:$0xff]  ;;  %v56_v3 = vld [vmem:[%s3179_s0 + $0x148] sm:$0xff] }
  0x15   :  { %2161 = vmatpush3.bf16.msra.mxu1 %v2451_v19  ;;  %2122 = vmatprep.subr.bf16.mxu0 %v2452_v20  ;;  %v1953_v4 = vcombine.high %v47_v0, %v55_v1  ;;  %v1955_v5 = vcombine.high %v48_v2, %v56_v3  ;;  %v1952_v6 = vcombine.low %v47_v0, %v55_v1  ;;  %v2480_v8 = vld [vmem:[%s3178_s1 + $0x160] sm:$0xff]   ;;  %v2484_v12 = vld [vmem:[%s3178_s1 + $0x168] sm:$0xff]   ;;  %v18_v32 = vld [vmem:[%s3179_s0 + $0x18] sm:$0xff] }
  0x16   :  { %2162 = vmatprep.subr.bf16.mxu1 %v2453_v21  ;;  %v1954_v7 = vcombine.low %v48_v2, %v56_v3  ;;  %v2481_v9 = vld [vmem:[%s3178_s1 + $0x1e0] sm:$0xff]   ;;  %v2485_v13 = vld [vmem:[%s3178_s1 + $0x1e8] sm:$0xff]   ;;  %v2492_v21 = vld [vmem:[%s3178_s1 + $0x170] sm:$0xff]  }
  0x17   :  { %v2482_v10 = vld [vmem:[%s3178_s1 + $0x120] sm:$0xff]   ;;  %v2486_v14 = vld [vmem:[%s3178_s1 + $0x128] sm:$0xff]   ;;  %v26_v33 = vld [vmem:[%s3179_s0 + $0x58] sm:$0xff] }
  0x18   :  { %2123 = vmatpush3.bf16.msra.mxu0 %v2454_v22  ;;  %v2483_v11 = vld [vmem:[%s3178_s1 + $0x1a0] sm:$0xff]   ;;  %v2487_v15 = vld [vmem:[%s3178_s1 + $0x1a8] sm:$0xff]   ;;  %v1926_v36 = vcombine.low %v18_v32, %v26_v33  ;;  %v34_v48 = vld [vmem:[%s3179_s0 + $0x98] sm:$0xff] }
  0x19   :  { %2163 = vmatpush3.bf16.msra.mxu1 %v2455_v23  ;;  %2124 = vmatprep.subr.bf16.mxu0 %v2456_v24  ;;  %v63_v16 = vld [vmem:[%s3179_s0 + $0x180] sm:$0xff]  ;;  %v64_v17 = vld [vmem:[%s3179_s0 + $0x188] sm:$0xff]  ;;  %v2493_v23 = vld [vmem:[%s3178_s1 + $0x1f0] sm:$0xff]  }
  0x1a   :  { %2164 = vmatprep.subr.bf16.mxu1 %v2457_v25  ;;  %v1969_v18 = vcombine.high %v63_v16, %v63_v16  ;;  %v1971_v19 = vcombine.high %v64_v17, %v64_v17  ;;  %v1968_v20 = vcombine.low %v63_v16, %v63_v16  ;;  %v1970_v22 = vcombine.low %v64_v17, %v64_v17  ;;  %v2494_v24 = vld [vmem:[%s3178_s1 + $0x130] sm:$0xff]   ;;  %v2500_v37 = vld [vmem:[%s3178_s1 + $0x240] sm:$0xff]   ;;  %v50_v1 = vld [vmem:[%s3179_s0 + $0x118] sm:$0xff] }
  0x1b   :  { %v2495_v25 = vld [vmem:[%s3178_s1 + $0x1b0] sm:$0xff]   ;;  %v2501_v39 = vld [vmem:[%s3178_s1 + $0x2c0] sm:$0xff]   ;;  %v58_v2 = vld [vmem:[%s3179_s0 + $0x158] sm:$0xff] }
  0x1c   :  { %2125 = vmatpush3.bf16.msra.mxu0 %v2458_v26  ;;  %v2496_v26 = vld [vmem:[%s3178_s1 + $0x178] sm:$0xff]  }
  0x1d   :  { %2165 = vmatpush3.bf16.msra.mxu1 %v2459_v27  ;;  %2126 = vmatprep.subr.bf16.mxu0 %v2460_v28  ;;  %v2497_v27 = vld [vmem:[%s3178_s1 + $0x1f8] sm:$0xff]  }
  0x1e   :  { %2166 = vmatprep.subr.bf16.mxu1 %v2461_v29  ;;  %v2498_v28 = vld [vmem:[%s3178_s1 + $0x138] sm:$0xff]  }
  0x1f   :  { %v2499_v29 = vld [vmem:[%s3178_s1 + $0x1b8] sm:$0xff]  }
  0x20   :  { %2127 = vmatpush3.bf16.msra.mxu0 %v2462_v30  ;;  %v17_v30 = vld [vmem:[%s3179_s0 + $0x10] sm:$0xff]  ;;  %v66_v16 = vld [vmem:[%s3179_s0 + $0x198] sm:$0xff] }
  0x21   :  { %2167 = vmatpush3.bf16.msra.mxu1 %v2463_v31  ;;  %2192 = vmatprep.subr.bf16.mxu0 %v2464_v40  ;;  %v25_v31 = vld [vmem:[%s3179_s0 + $0x50] sm:$0xff]  ;;  %v2502_v40 = vld [vmem:[%s3178_s1 + $0x200] sm:$0xff]  }
  0x22   :  { %2232 = vmatprep.subr.bf16.mxu1 %v2465_v41  ;;  %v1924_v34 = vcombine.low %v17_v30, %v25_v31  ;;  %v2503_v41 = vld [vmem:[%s3178_s1 + $0x280] sm:$0xff]  }
  0x23   :  { %1429 = vmatmul.mubr.bf16.vlgmr.msra.gmra.mrb[0].mxu0 %v1920_v35  ;;  %v1925_v35 = vcombine.high %v17_v30, %v25_v31 }
  0x24   :  { %1493 = vmatmul.mubr.bf16.vlgmr.msra.gmra.mrb[0].mxu1 %v1922_v38  ;;  %2193 = vmatpush3.bf16.msra.mxu0 %v2466_v42  ;;  %v1927_v38 = vcombine.high %v18_v32, %v26_v33  ;;  %v2504_v42 = vld [vmem:[%s3178_s1 + $0x248] sm:$0xff]  }
  0x25   :  { %2233 = vmatpush3.bf16.msra.mxu1 %v2467_v43  ;;  %2194 = vmatprep.subr.bf16.mxu0 %v2468_v44  ;;  %v2505_v43 = vld [vmem:[%s3178_s1 + $0x2c8] sm:$0xff]  }
  0x26   :  { %2234 = vmatprep.subr.bf16.mxu1 %v2469_v45  ;;  %1436 = vmatprep.mubr.bf16.mxu0 %v1937_v50  ;;  %v2506_v44 = vld [vmem:[%s3178_s1 + $0x208] sm:$0xff]   ;;  %v42_v50 = vld [vmem:[%s3179_s0 + $0xd8] sm:$0xff] }
  0x27   :  { %1500 = vmatprep.mubr.bf16.mxu1 %v1939_v54  ;;  %v2507_v45 = vld [vmem:[%s3178_s1 + $0x288] sm:$0xff]   ;;  %v1943_v52 = vcombine.high %v34_v48, %v42_v50  ;;  %v2508_v54 = vld [vmem:[%s3178_s1 + $0x250] sm:$0xff]  }
  0x28   :  { %2195 = vmatpush3.bf16.msra.mxu0 %v2470_v46  ;;  %v33_v46 = vld [vmem:[%s3179_s0 + $0x90] sm:$0xff]  ;;  %v20_v32 = vld [vmem:[%s3179_s0 + $0x28] sm:$0xff] }
  0x29   :  { %2235 = vmatpush3.bf16.msra.mxu1 %v2471_v47  ;;  %2196 = vmatprep.subr.bf16.mxu0 %v2472_v56  ;;  %v41_v47 = vld [vmem:[%s3179_s0 + $0xd0] sm:$0xff]  ;;  %v28_v33 = vld [vmem:[%s3179_s0 + $0x68] sm:$0xff] }
  0x2a   :  { %2236 = vmatprep.subr.bf16.mxu1 %v2473_v57  ;;  %v1941_v49 = vcombine.high %v33_v46, %v41_v47  ;;  %v1940_v51 = vcombine.low %v33_v46, %v41_v47  ;;  %v2510_v56 = vld [vmem:[%s3178_s1 + $0x210] sm:$0xff]   ;;  %v36_v46 = vld [vmem:[%s3179_s0 + $0xa8] sm:$0xff] }
  0x2b   :  { %1437 = vmatmul.mubr.bf16.gmra.mrb[4].mxu0 %v1936_v53  ;;  %v1942_v53 = vcombine.low %v34_v48, %v42_v50  ;;  %v2511_v57 = vld [vmem:[%s3178_s1 + $0x290] sm:$0xff]   ;;  %v44_v47 = vld [vmem:[%s3179_s0 + $0xe8] sm:$0xff] }
  0x2c   :  { %1501 = vmatmul.mubr.bf16.gmra.mrb[4].mxu1 %v1938_v55  ;;  %2197 = vmatpush3.bf16.msra.mxu0 %v2474_v58  ;;  %v2509_v55 = vld [vmem:[%s3178_s1 + $0x2d0] sm:$0xff]   ;;  %v2512_v58 = vld [vmem:[%s3178_s1 + $0x258] sm:$0xff]  }
  0x2d   :  { %2237 = vmatpush3.bf16.msra.mxu1 %v2475_v59  ;;  %2198 = vmatprep.subr.bf16.mxu0 %v2476_v60  ;;  %v2513_v59 = vld [vmem:[%s3178_s1 + $0x2d8] sm:$0xff]  }
  0x2e   :  { %2238 = vmatprep.subr.bf16.mxu1 %v2477_v61  ;;  %1444 = vmatprep.mubr.bf16.mxu0 %v1953_v4  ;;  %v2514_v60 = vld [vmem:[%s3178_s1 + $0x218] sm:$0xff]   ;;  %v1959_v4 = vcombine.high %v50_v1, %v58_v2 }
  0x2f   :  { %1508 = vmatprep.mubr.bf16.mxu1 %v1955_v5  ;;  %v2515_v61 = vld [vmem:[%s3178_s1 + $0x298] sm:$0xff]   ;;  %v1958_v5 = vcombine.low %v50_v1, %v58_v2 }
  0x30   :  { %2199 = vmatpush3.bf16.msra.mxu0 %v2478_v62  ;;  %v49_v62 = vld [vmem:[%s3179_s0 + $0x110] sm:$0xff] }
  0x31   :  { %2239 = vmatpush3.bf16.msra.mxu1 %v2479_v63  ;;  %2200 = vmatprep.subr.bf16.mxu0 %v2480_v8  ;;  %v57_v63 = vld [vmem:[%s3179_s0 + $0x150] sm:$0xff]  ;;  %v2518_v8 = vld [vmem:[%s3178_s1 + $0x220] sm:$0xff]  }
  0x32   :  { %2240 = vmatprep.subr.bf16.mxu1 %v2481_v9  ;;  %v1957_v0 = vcombine.high %v49_v62, %v57_v63  ;;  %v1956_v3 = vcombine.low %v49_v62, %v57_v63  ;;  %v2519_v9 = vld [vmem:[%s3178_s1 + $0x2a0] sm:$0xff]   ;;  %v52_v62 = vld [vmem:[%s3179_s0 + $0x128] sm:$0xff] }
  0x33   :  { %1445 = vmatmul.mubr.bf16.gmra.mrb[8].mxu0 %v1952_v6  ;;  %v2516_v6 = vld [vmem:[%s3178_s1 + $0x260] sm:$0xff]  }
  0x34   :  { %1509 = vmatmul.mubr.bf16.gmra.mrb[8].mxu1 %v1954_v7  ;;  %2201 = vmatpush3.bf16.msra.mxu0 %v2482_v10  ;;  %v2517_v7 = vld [vmem:[%s3178_s1 + $0x2e0] sm:$0xff]   ;;  %v2520_v10 = vld [vmem:[%s3178_s1 + $0x268] sm:$0xff]  }
  0x35   :  { %2241 = vmatpush3.bf16.msra.mxu1 %v2483_v11  ;;  %2202 = vmatprep.subr.bf16.mxu0 %v2484_v12  ;;  %v2521_v11 = vld [vmem:[%s3178_s1 + $0x2e8] sm:$0xff]  }
  0x36   :  { %2242 = vmatprep.subr.bf16.mxu1 %v2485_v13  ;;  %1452 = vmatprep.mubr.bf16.mxu0 %v1969_v18  ;;  %v2522_v12 = vld [vmem:[%s3178_s1 + $0x228] sm:$0xff]   ;;  %v1975_v18 = vcombine.high %v66_v16, %v66_v16 }
  0x37   :  { %1516 = vmatprep.mubr.bf16.mxu1 %v1971_v19  ;;  %v2523_v13 = vld [vmem:[%s3178_s1 + $0x2a8] sm:$0xff]   ;;  %v1974_v19 = vcombine.low %v66_v16, %v66_v16 }
  0x38   :  { %2203 = vmatpush3.bf16.msra.mxu0 %v2486_v14  ;;  %v65_v14 = vld [vmem:[%s3179_s0 + $0x190] sm:$0xff] }
  0x39   :  { %2243 = vmatpush3.bf16.msra.mxu1 %v2487_v15  ;;  %2204 = vmatprep.subr.bf16.mxu0 %v2492_v21  ;;  %v1973_v15 = vcombine.high %v65_v14, %v65_v14  ;;  %v1972_v17 = vcombine.low %v65_v14, %v65_v14  ;;  %v2529_v21 = vld [vmem:[%s3178_s1 + $0x2f0] sm:$0xff]  }
  0x3a   :  { %2244 = vmatprep.subr.bf16.mxu1 %v2493_v23  ;;  %v2531_v23 = vld [vmem:[%s3178_s1 + $0x2b0] sm:$0xff]  }
  0x3b   :  { %1453 = vmatmul.mubr.bf16.gmra.mrb[12].mxu0 %v1968_v20  ;;  %v2528_v20 = vld [vmem:[%s3178_s1 + $0x270] sm:$0xff]  }
  0x3c   :  { %1517 = vmatmul.mubr.bf16.gmra.mrb[12].mxu1 %v1970_v22  ;;  %2205 = vmatpush3.bf16.msra.mxu0 %v2494_v24  ;;  %v2530_v22 = vld [vmem:[%s3178_s1 + $0x230] sm:$0xff]   ;;  %v2532_v24 = vld [vmem:[%s3178_s1 + $0x278] sm:$0xff]  }
  0x3d   :  { %2245 = vmatpush3.bf16.msra.mxu1 %v2495_v25  ;;  %2206 = vmatprep.subr.bf16.mxu0 %v2496_v26  ;;  %v2533_v25 = vld [vmem:[%s3178_s1 + $0x2f8] sm:$0xff]  }
  0x3e   :  { %2246 = vmatprep.subr.bf16.mxu1 %v2497_v27  ;;  %1556 = vmatprep.mubr.bf16.mxu0 %v1925_v35  ;;  %v2534_v26 = vld [vmem:[%s3178_s1 + $0x238] sm:$0xff]   ;;  %v1931_v35 = vcombine.high %v20_v32, %v28_v33 }
  0x3f   :  { %1620 = vmatprep.mubr.bf16.mxu1 %v1927_v38  ;;  %v2535_v27 = vld [vmem:[%s3178_s1 + $0x2b8] sm:$0xff]   ;;  %v2538_v38 = vld [vmem:[%s3178_s1 + $0x300] sm:$0xff]  }
  0x40   :  { %2207 = vmatpush3.bf16.msra.mxu0 %v2498_v28  ;;  %v19_v28 = vld [vmem:[%s3179_s0 + $0x20] sm:$0xff] }
  0x41   :  { %2247 = vmatpush3.bf16.msra.mxu1 %v2499_v29  ;;  %2272 = vmatprep.subr.bf16.mxu0 %v2500_v37  ;;  %v27_v29 = vld [vmem:[%s3179_s0 + $0x60] sm:$0xff] }
  0x42   :  { %2312 = vmatprep.subr.bf16.mxu1 %v2501_v39  ;;  %v1928_v30 = vcombine.low %v19_v28, %v27_v29  ;;  %v1929_v31 = vcombine.high %v19_v28, %v27_v29  ;;  %v2537_v37 = vld [vmem:[%s3178_s1 + $0x3c0] sm:$0xff]   ;;  %v22_v28 = vld [vmem:[%s3179_s0 + $0x38] sm:$0xff] }
  0x43   :  { %1557 = vmatmul.mubr.bf16.vlgmr.msra.gmra.mrb[16].mxu0 %v1924_v34  ;;  %v1930_v34 = vcombine.low %v20_v32, %v28_v33  ;;  %v2539_v39 = vld [vmem:[%s3178_s1 + $0x380] sm:$0xff]   ;;  %v37_v32 = vld [vmem:[%s3179_s0 + $0xb0] sm:$0xff] }
  0x44   :  { %1621 = vmatmul.mubr.bf16.vlgmr.msra.gmra.mrb[16].mxu1 %v1926_v36  ;;  %2273 = vmatpush3.bf16.msra.mxu0 %v2502_v40  ;;  %v2536_v36 = vld [vmem:[%s3178_s1 + $0x340] sm:$0xff]   ;;  %v2540_v40 = vld [vmem:[%s3178_s1 + $0x348] sm:$0xff]   ;;  %v45_v33 = vld [vmem:[%s3179_s0 + $0xf0] sm:$0xff] }
  0x45   :  { %2313 = vmatpush3.bf16.msra.mxu1 %v2503_v41  ;;  %2274 = vmatprep.subr.bf16.mxu0 %v2504_v42  ;;  %v2541_v41 = vld [vmem:[%s3178_s1 + $0x3c8] sm:$0xff]  }
  0x46   :  { %2314 = vmatprep.subr.bf16.mxu1 %v2505_v43  ;;  %1564 = vmatprep.mubr.bf16.mxu0 %v1941_v49  ;;  %v2542_v42 = vld [vmem:[%s3178_s1 + $0x308] sm:$0xff]   ;;  %v1947_v49 = vcombine.high %v36_v46, %v44_v47 }
  0x47   :  { %1628 = vmatprep.mubr.bf16.mxu1 %v1943_v52  ;;  %v2543_v43 = vld [vmem:[%s3178_s1 + $0x388] sm:$0xff]   ;;  %v2544_v52 = vld [vmem:[%s3178_s1 + $0x350] sm:$0xff]  }
  0x48   :  { %2275 = vmatpush3.bf16.msra.mxu0 %v2506_v44  ;;  %v35_v44 = vld [vmem:[%s3179_s0 + $0xa0] sm:$0xff] }
  0x49   :  { %2315 = vmatpush3.bf16.msra.mxu1 %v2507_v45  ;;  %2276 = vmatprep.subr.bf16.mxu0 %v2508_v54  ;;  %v43_v45 = vld [vmem:[%s3179_s0 + $0xe0] sm:$0xff]  ;;  %v2546_v54 = vld [vmem:[%s3178_s1 + $0x310] sm:$0xff]  }
  0x4a   :  { %2316 = vmatprep.subr.bf16.mxu1 %v2509_v55  ;;  %v1945_v48 = vcombine.high %v35_v44, %v43_v45  ;;  %v1944_v50 = vcombine.low %v35_v44, %v43_v45  ;;  %v2547_v55 = vld [vmem:[%s3178_s1 + $0x390] sm:$0xff]   ;;  %v1948_v44 = vcombine.low %v37_v32, %v45_v33 }
  0x4b   :  { %1565 = vmatmul.mubr.bf16.gmra.mrb[20].mxu0 %v1940_v51  ;;  %v1946_v51 = vcombine.low %v36_v46, %v44_v47 }
  0x4c   :  { %1629 = vmatmul.mubr.bf16.gmra.mrb[20].mxu1 %v1942_v53  ;;  %2277 = vmatpush3.bf16.msra.mxu0 %v2510_v56  ;;  %v2545_v53 = vld [vmem:[%s3178_s1 + $0x3d0] sm:$0xff]   ;;  %v2548_v56 = vld [vmem:[%s3178_s1 + $0x358] sm:$0xff]  }
  0x4d   :  { %2317 = vmatpush3.bf16.msra.mxu1 %v2511_v57  ;;  %2278 = vmatprep.subr.bf16.mxu0 %v2512_v58  ;;  %v2549_v57 = vld [vmem:[%s3178_s1 + $0x3d8] sm:$0xff]  }
  0x4e   :  { %2318 = vmatprep.subr.bf16.mxu1 %v2513_v59  ;;  %1572 = vmatprep.mubr.bf16.mxu0 %v1957_v0  ;;  %v2550_v58 = vld [vmem:[%s3178_s1 + $0x318] sm:$0xff]   ;;  %v60_v0 = vld [vmem:[%s3179_s0 + $0x168] sm:$0xff] }
  0x4f   :  { %1636 = vmatprep.mubr.bf16.mxu1 %v1959_v4  ;;  %v2551_v59 = vld [vmem:[%s3178_s1 + $0x398] sm:$0xff]   ;;  %v1963_v2 = vcombine.high %v52_v62, %v60_v0  ;;  %v2552_v4 = vld [vmem:[%s3178_s1 + $0x360] sm:$0xff]  }
  0x50   :  { %2279 = vmatpush3.bf16.msra.mxu0 %v2514_v60  ;;  %v51_v60 = vld [vmem:[%s3179_s0 + $0x120] sm:$0xff] }
  0x51   :  { %2319 = vmatpush3.bf16.msra.mxu1 %v2515_v61  ;;  %2280 = vmatprep.subr.bf16.mxu0 %v2516_v6  ;;  %v59_v61 = vld [vmem:[%s3179_s0 + $0x160] sm:$0xff] }
  0x52   :  { %2320 = vmatprep.subr.bf16.mxu1 %v2517_v7  ;;  %v1961_v63 = vcombine.high %v51_v60, %v59_v61  ;;  %v1960_v1 = vcombine.low %v51_v60, %v59_v61  ;;  %v2554_v6 = vld [vmem:[%s3178_s1 + $0x320] sm:$0xff]  }
  0x53   :  { %1573 = vmatmul.mubr.bf16.gmra.mrb[24].mxu0 %v1956_v3  ;;  %v1962_v3 = vcombine.low %v52_v62, %v60_v0  ;;  %v2555_v7 = vld [vmem:[%s3178_s1 + $0x3a0] sm:$0xff]  }
  0x54   :  { %1637 = vmatmul.mubr.bf16.gmra.mrb[24].mxu1 %v1958_v5  ;;  %2281 = vmatpush3.bf16.msra.mxu0 %v2518_v8  ;;  %v2553_v5 = vld [vmem:[%s3178_s1 + $0x3e0] sm:$0xff]   ;;  %v2556_v8 = vld [vmem:[%s3178_s1 + $0x368] sm:$0xff]  }
  0x55   :  { %2321 = vmatpush3.bf16.msra.mxu1 %v2519_v9  ;;  %2282 = vmatprep.subr.bf16.mxu0 %v2520_v10  ;;  %v2557_v9 = vld [vmem:[%s3178_s1 + $0x3e8] sm:$0xff]  }
  0x56   :  { %2322 = vmatprep.subr.bf16.mxu1 %v2521_v11  ;;  %1580 = vmatprep.mubr.bf16.mxu0 %v1973_v15  ;;  %v2558_v10 = vld [vmem:[%s3178_s1 + $0x328] sm:$0xff]  }
  0x57   :  { %1644 = vmatprep.mubr.bf16.mxu1 %v1975_v18  ;;  %v2559_v11 = vld [vmem:[%s3178_s1 + $0x3a8] sm:$0xff]   ;;  %v2564_v18 = vld [vmem:[%s3178_s1 + $0x370] sm:$0xff]  }
  0x58   :  { %2283 = vmatpush3.bf16.msra.mxu0 %v2522_v12  ;;  %v67_v12 = vld [vmem:[%s3179_s0 + $0x1a0] sm:$0xff] }
  0x59   :  { %2323 = vmatpush3.bf16.msra.mxu1 %v2523_v13  ;;  %2284 = vmatprep.subr.bf16.mxu0 %v2528_v20  ;;  %v68_v13 = vld [vmem:[%s3179_s0 + $0x1a8] sm:$0xff]  ;;  %v1977_v14 = vcombine.high %v67_v12, %v67_v12  ;;  %v1976_v16 = vcombine.low %v67_v12, %v67_v12  ;;  %v2566_v20 = vld [vmem:[%s3178_s1 + $0x330] sm:$0xff]  }
  0x5a   :  { %2324 = vmatprep.subr.bf16.mxu1 %v2529_v21  ;;  %v1979_v15 = vcombine.high %v68_v13, %v68_v13  ;;  %v2567_v21 = vld [vmem:[%s3178_s1 + $0x3b0] sm:$0xff]  }
  0x5b   :  { %1581 = vmatmul.mubr.bf16.gmra.mrb[28].mxu0 %v1972_v17  ;;  %v1978_v17 = vcombine.low %v68_v13, %v68_v13 }
  0x5c   :  { %1645 = vmatmul.mubr.bf16.gmra.mrb[28].mxu1 %v1974_v19  ;;  %2285 = vmatpush3.bf16.msra.mxu0 %v2530_v22  ;;  %v2565_v19 = vld [vmem:[%s3178_s1 + $0x3f0] sm:$0xff]   ;;  %v2568_v22 = vld [vmem:[%s3178_s1 + $0x378] sm:$0xff]  }
  0x5d   :  { %2325 = vmatpush3.bf16.msra.mxu1 %v2531_v23  ;;  %2286 = vmatprep.subr.bf16.mxu0 %v2532_v24  ;;  %v2569_v23 = vld [vmem:[%s3178_s1 + $0x3f8] sm:$0xff]  }
  0x5e   :  { %2326 = vmatprep.subr.bf16.mxu1 %v2533_v25  ;;  %1684 = vmatprep.mubr.bf16.mxu0 %v1929_v31  ;;  %v2570_v24 = vld [vmem:[%s3178_s1 + $0x338] sm:$0xff]  }
  0x5f   :  { %1748 = vmatprep.mubr.bf16.mxu1 %v1931_v35  ;;  %v2571_v25 = vld [vmem:[%s3178_s1 + $0x3b8] sm:$0xff]  }
  0x60   :  { %2287 = vmatpush3.bf16.msra.mxu0 %v2534_v26  ;;  %v21_v26 = vld [vmem:[%s3179_s0 + $0x30] sm:$0xff]  ;;  %v30_v31 = vld [vmem:[%s3179_s0 + $0x78] sm:$0xff] }
  0x61   :  { %2327 = vmatpush3.bf16.msra.mxu1 %v2535_v27  ;;  %2352 = vmatprep.subr.bf16.mxu0 %v2536_v36  ;;  %v29_v27 = vld [vmem:[%s3179_s0 + $0x70] sm:$0xff]  ;;  %v1935_v35 = vcombine.high %v22_v28, %v30_v31  ;;  %v1949_v36 = vcombine.high %v37_v32, %v45_v33 }
  0x62   :  { %2392 = vmatprep.subr.bf16.mxu1 %v2537_v37  ;;  %v1932_v29 = vcombine.low %v21_v26, %v29_v27  ;;  %v38_v37 = vld [vmem:[%s3179_s0 + $0xb8] sm:$0xff] }
  0x63   :  { %1685 = vmatmul.mubr.bf16.vlgmr.msra.gmra.mrb[32].mxu0 %v1928_v30  ;;  %v1933_v30 = vcombine.high %v21_v26, %v29_v27 }
  0x64   :  { %1749 = vmatmul.mubr.bf16.vlgmr.msra.gmra.mrb[32].mxu1 %v1930_v34  ;;  %2353 = vmatpush3.bf16.msra.mxu0 %v2538_v38  ;;  %v1934_v34 = vcombine.low %v22_v28, %v30_v31  ;;  %v46_v38 = vld [vmem:[%s3179_s0 + $0xf8] sm:$0xff] }
  0x65   :  { %2393 = vmatpush3.bf16.msra.mxu1 %v2539_v39  ;;  %2354 = vmatprep.subr.bf16.mxu0 %v2540_v40  ;;  %v1951_v39 = vcombine.high %v38_v37, %v46_v38  ;;  %v53_v40 = vld [vmem:[%s3179_s0 + $0x130] sm:$0xff]  ;;  %v1950_v45 = vcombine.low %v38_v37, %v46_v38 }
  0x66   :  { %2394 = vmatprep.subr.bf16.mxu1 %v2541_v41  ;;  %1692 = vmatprep.mubr.bf16.mxu0 %v1945_v48  ;;  %v61_v41 = vld [vmem:[%s3179_s0 + $0x170] sm:$0xff] }
  0x67   :  { %1756 = vmatprep.mubr.bf16.mxu1 %v1947_v49  ;;  %v1965_v46 = vcombine.high %v53_v40, %v61_v41  ;;  %v69_v48 = vld [vmem:[%s3179_s0 + $0x1b0] sm:$0xff]  ;;  %v70_v49 = vld [vmem:[%s3179_s0 + $0x1b8] sm:$0xff] }
  0x68   :  { %2355 = vmatpush3.bf16.msra.mxu0 %v2542_v42  ;;  %v54_v42 = vld [vmem:[%s3179_s0 + $0x138] sm:$0xff] }
  0x69   :  { %2395 = vmatpush3.bf16.msra.mxu1 %v2543_v43  ;;  %2356 = vmatprep.subr.bf16.mxu0 %v2544_v52  ;;  %v62_v43 = vld [vmem:[%s3179_s0 + $0x178] sm:$0xff]  ;;  %v1981_v52 = vcombine.high %v69_v48, %v69_v48 }
  0x6a   :  { %2396 = vmatprep.subr.bf16.mxu1 %v2545_v53  ;;  %v1967_v47 = vcombine.high %v54_v42, %v62_v43  ;;  %v1983_v53 = vcombine.high %v70_v49, %v70_v49 }
  0x6b   :  { %1693 = vmatmul.mubr.bf16.gmra.mrb[36].mxu0 %v1944_v50  ;;  %v1964_v50 = vcombine.low %v53_v40, %v61_v41 }
  0x6c   :  { %1757 = vmatmul.mubr.bf16.gmra.mrb[36].mxu1 %v1946_v51  ;;  %2357 = vmatpush3.bf16.msra.mxu0 %v2546_v54  ;;  %v1966_v51 = vcombine.low %v54_v42, %v62_v43  ;;  %v1980_v54 = vcombine.low %v69_v48, %v69_v48 }
  0x6d   :  { %2397 = vmatpush3.bf16.msra.mxu1 %v2547_v55  ;;  %2358 = vmatprep.subr.bf16.mxu0 %v2548_v56  ;;  %v1982_v55 = vcombine.low %v70_v49, %v70_v49 }
  0x6e   :  { %2398 = vmatprep.subr.bf16.mxu1 %v2549_v57  ;;  %1700 = vmatprep.mubr.bf16.mxu0 %v1961_v63 }
  0x6f   :  { %1764 = vmatprep.mubr.bf16.mxu1 %v1963_v2 }
  0x70   :  { %2359 = vmatpush3.bf16.msra.mxu0 %v2550_v58  ;;  %v1919_v58 = vld [vmem:[%s3180_s2] ss:$0 sm:$0xff] }
  0x71   :  { %2399 = vmatpush3.bf16.msra.mxu1 %v2551_v59  ;;  %2360 = vmatprep.subr.bf16.mxu0 %v2552_v4 }
  0x72   :  { %2400 = vmatprep.subr.bf16.mxu1 %v2553_v5 }
  0x73   :  { %1701 = vmatmul.mubr.bf16.gmra.mrb[40].mxu0 %v1960_v1 }
  0x74   :  { %1765 = vmatmul.mubr.bf16.gmra.mrb[40].mxu1 %v1962_v3  ;;  %2361 = vmatpush3.bf16.msra.mxu0 %v2554_v6 }
  0x75   :  { %2401 = vmatpush3.bf16.msra.mxu1 %v2555_v7  ;;  %2362 = vmatprep.subr.bf16.mxu0 %v2556_v8 }
  0x76   :  { %2402 = vmatprep.subr.bf16.mxu1 %v2557_v9  ;;  %1708 = vmatprep.mubr.bf16.mxu0 %v1977_v14 }
  0x77   :  { %1772 = vmatprep.mubr.bf16.mxu1 %v1979_v15 }
  0x78   :  { %2363 = vmatpush3.bf16.msra.mxu0 %v2558_v10 }
  0x79   :  { %2403 = vmatpush3.bf16.msra.mxu1 %v2559_v11  ;;  %2364 = vmatprep.subr.bf16.mxu0 %v2564_v18 }
  0x7a   :  { %2404 = vmatprep.subr.bf16.mxu1 %v2565_v19 }
  0x7b   :  { %1709 = vmatmul.mubr.bf16.gmra.mrb[44].mxu0 %v1976_v16 }
  0x7c   :  { %1773 = vmatmul.mubr.bf16.gmra.mrb[44].mxu1 %v1978_v17  ;;  %2365 = vmatpush3.bf16.msra.mxu0 %v2566_v20 }
  0x7d   :  { %2405 = vmatpush3.bf16.msra.mxu1 %v2567_v21  ;;  %2366 = vmatprep.subr.bf16.mxu0 %v2568_v22 }
  0x7e   :  { %2406 = vmatprep.subr.bf16.mxu1 %v2569_v23  ;;  %1812 = vmatprep.mubr.bf16.mxu0 %v1933_v30 }
  0x7f   :  { %1876 = vmatprep.mubr.bf16.mxu1 %v1935_v35 }
  0x80   :  { %2367 = vmatpush3.bf16.msra.mxu0 %v2570_v24 }
  0x81   :  { %2407 = vmatpush3.bf16.msra.mxu1 %v2571_v25 }
  0x83   :  { %1813 = vmatmul.mubr.bf16.vlgmr.msra.gmra.mrb[48].mxu0 %v1932_v29 }
  0x84   :  { %1877 = vmatmul.mubr.bf16.vlgmr.msra.gmra.mrb[48].mxu1 %v1934_v34  ;;  %1820 = vmatprep.mubr.bf16.mxu0 %v1949_v36 }
  0x85   :  { %1884 = vmatprep.mubr.bf16.mxu1 %v1951_v39 }
  0x8b   :  { %1821 = vmatmul.mubr.bf16.gmra.mrb[52].mxu0 %v1948_v44 }
  0x8c   :  { %1885 = vmatmul.mubr.bf16.gmra.mrb[52].mxu1 %v1950_v45  ;;  %1828 = vmatprep.mubr.bf16.mxu0 %v1965_v46 }
  0x8d   :  { %1892 = vmatprep.mubr.bf16.mxu1 %v1967_v47 }
  0x93   :  { %1829 = vmatmul.mubr.bf16.gmra.mrb[56].mxu0 %v1964_v50 }
  0x94   :  { %1893 = vmatmul.mubr.bf16.gmra.mrb[56].mxu1 %v1966_v51  ;;  %1836 = vmatprep.mubr.bf16.mxu0 %v1981_v52 }
  0x95   :  { %1900 = vmatprep.mubr.bf16.mxu1 %v1983_v53 }
  0x9b   :  { %1837 = vmatmul.mubr.bf16.gmra.mrb[60].mxu0 %v1980_v54 }
  0x9c   :  { %1901 = vmatmul.mubr.bf16.gmra.mrb[60].mxu1 %v1982_v55 }
  0xf6   :  { %v2128_v56 = vpop.f32.mrb[0].mxu0 }
  0xf7   :  { %v2168_v57 = vpop.f32.mrb[0].mxu1  ;;  %v2129_v59 = vpop.f32.mrb[1].mxu0 }
  0xf8   :  { %v2130_v60 = vadd.f32 %v2129_v59, %v2128_v56  ;;  %v2169_v61 = vpop.f32.mrb[1].mxu1  ;;  %v2131_v62 = vpop.f32.mrb[2].mxu0 }
  0xf9   :  { %v2170_v63 = vadd.f32 %v2169_v61, %v2168_v57  ;;  %v2171_v0 = vpop.f32.mrb[2].mxu1  ;;  %v2132_v1 = vpop.f32.mrb[3].mxu0 }
  0xfa   :  { %v1431_v2 = vadd.f32 %v2130_v60, %v1919_v58  ;;  %v2133_v3 = vadd.f32 %v2132_v1, %v2131_v62  ;;  %v2172_v4 = vpop.f32.mrb[3].mxu1 }
  0xfb   :  { %v2173_v5 = vadd.f32 %v2172_v4, %v2171_v0 }
  0xfc   :  { %v1495_v6 = vadd.f32 %v2170_v63, %v1431_v2  ;;  %v1434_v7 = vadd.f32 %v2133_v3, %v1919_v58 }
  0xfe   :  { %v1498_v8 = vadd.f32 %v2173_v5, %v1434_v7  ;;  %v2134_v9 = vpop.f32.mrb[4].mxu0 }
  0xff   :  { %v2174_v10 = vpop.f32.mrb[4].mxu1  ;;  %v2135_v11 = vpop.f32.mrb[5].mxu0 }
 0x100   :  { %v2136_v12 = vadd.f32 %v2135_v11, %v2134_v9  ;;  %v2175_v13 = vpop.f32.mrb[5].mxu1  ;;  %v2137_v14 = vpop.f32.mrb[6].mxu0 }
 0x101   :  { %v2176_v15 = vadd.f32 %v2175_v13, %v2174_v10  ;;  %v2177_v16 = vpop.f32.mrb[6].mxu1  ;;  %v2138_v17 = vpop.f32.mrb[7].mxu0 }
 0x102   :  { %v1439_v18 = vadd.f32 %v2136_v12, %v1919_v58  ;;  %v2139_v19 = vadd.f32 %v2138_v17, %v2137_v14  ;;  %v2178_v20 = vpop.f32.mrb[7].mxu1 }
 0x103   :  { %v2179_v21 = vadd.f32 %v2178_v20, %v2177_v16 }
 0x104   :  { %v1503_v22 = vadd.f32 %v2176_v15, %v1439_v18  ;;  %v1442_v23 = vadd.f32 %v2139_v19, %v1919_v58 }
 0x106   :  { %v1506_v24 = vadd.f32 %v2179_v21, %v1442_v23  ;;  %v2140_v25 = vpop.f32.mrb[8].mxu0 }
 0x107   :  { %v2180_v26 = vpop.f32.mrb[8].mxu1  ;;  %v2141_v27 = vpop.f32.mrb[9].mxu0 }
 0x108   :  { %v2181_v28 = vpop.f32.mrb[9].mxu1  ;;  %v2142_v29 = vadd.f32 %v2141_v27, %v2140_v25  ;;  %v2143_v31 = vpop.f32.mrb[10].mxu0 }
 0x109   :  { %v2182_v30 = vadd.f32 %v2181_v28, %v2180_v26  ;;  %v2183_v32 = vpop.f32.mrb[10].mxu1  ;;  %v2144_v33 = vpop.f32.mrb[11].mxu0 }
 0x10a   :  { %v2184_v34 = vpop.f32.mrb[11].mxu1  ;;  %v1447_v35 = vadd.f32 %v2142_v29, %v1919_v58  ;;  %v2145_v36 = vadd.f32 %v2144_v33, %v2143_v31 }
 0x10b   :  { %v2185_v37 = vadd.f32 %v2184_v34, %v2183_v32 }
 0x10c   :  { %v1511_v38 = vadd.f32 %v2182_v30, %v1447_v35  ;;  %v1450_v39 = vadd.f32 %v2145_v36, %v1919_v58 }
 0x10e   :  { %v1514_v40 = vadd.f32 %v2185_v37, %v1450_v39  ;;  %v2146_v41 = vpop.f32.mrb[12].mxu0 }
 0x10f   :  { %v2186_v42 = vpop.f32.mrb[12].mxu1  ;;  %v2147_v43 = vpop.f32.mrb[13].mxu0 }
 0x110   :  { %v2187_v44 = vpop.f32.mrb[13].mxu1  ;;  %v2148_v45 = vadd.f32 %v2147_v43, %v2146_v41  ;;  %v2149_v47 = vpop.f32.mrb[14].mxu0 }
 0x111   :  { %v2188_v46 = vadd.f32 %v2187_v44, %v2186_v42  ;;  %v2189_v48 = vpop.f32.mrb[14].mxu1  ;;  %v2150_v49 = vpop.f32.mrb[15].mxu0 }
 0x112   :  { %v2190_v50 = vpop.f32.mrb[15].mxu1  ;;  %v1455_v51 = vadd.f32 %v2148_v45, %v1919_v58 }
 0x114   :  { %v1519_v52 = vadd.f32 %v2188_v46, %v1455_v51 }
 0x116   :  { %v2208_v53 = vpop.f32.mrb[16].mxu0 }
 0x117   :  { %v2248_v54 = vpop.f32.mrb[16].mxu1  ;;  %v2209_v55 = vpop.f32.mrb[17].mxu0 }
 0x118   :  { %v2210_v56 = vadd.f32 %v2209_v55, %v2208_v53  ;;  %v2249_v57 = vpop.f32.mrb[17].mxu1  ;;  %v2211_v59 = vpop.f32.mrb[18].mxu0 }
 0x119   :  { %v2250_v60 = vadd.f32 %v2249_v57, %v2248_v54  ;;  %v2251_v61 = vpop.f32.mrb[18].mxu1  ;;  %v2212_v62 = vpop.f32.mrb[19].mxu0 }
 0x11a   :  { %v1559_v63 = vadd.f32 %v2210_v56, %v1495_v6  ;;  %v2213_v0 = vadd.f32 %v2212_v62, %v2211_v59  ;;  %v2252_v1 = vpop.f32.mrb[19].mxu1 }
 0x11b   :  { %v2253_v2 = vadd.f32 %v2252_v1, %v2251_v61 }
 0x11c   :  { %v1623_v3 = vadd.f32 %v2250_v60, %v1559_v63  ;;  %v1562_v4 = vadd.f32 %v2213_v0, %v1498_v8 }
 0x11e   :  { %v1626_v5 = vadd.f32 %v2253_v2, %v1562_v4  ;;  %v2214_v7 = vpop.f32.mrb[20].mxu0 }
 0x11f   :  { %v2254_v9 = vpop.f32.mrb[20].mxu1  ;;  %v2215_v58 = vpop.f32.mrb[21].mxu0 }
 0x120   :  { %v2216_v10 = vadd.f32 %v2215_v58, %v2214_v7  ;;  %v2255_v11 = vpop.f32.mrb[21].mxu1  ;;  %v2217_v12 = vpop.f32.mrb[22].mxu0 }
 0x121   :  { %v2256_v13 = vadd.f32 %v2255_v11, %v2254_v9  ;;  %v2257_v14 = vpop.f32.mrb[22].mxu1  ;;  %v2218_v15 = vpop.f32.mrb[23].mxu0 }
 0x122   :  { %v1567_v16 = vadd.f32 %v2216_v10, %v1503_v22  ;;  %v2219_v17 = vadd.f32 %v2218_v15, %v2217_v12  ;;  %v2258_v18 = vpop.f32.mrb[23].mxu1 }
 0x123   :  { %v2259_v19 = vadd.f32 %v2258_v18, %v2257_v14 }
 0x124   :  { %v1631_v6 = vadd.f32 %v2256_v13, %v1567_v16  ;;  %v1570_v20 = vadd.f32 %v2219_v17, %v1506_v24 }
 0x126   :  { %v1634_v21 = vadd.f32 %v2259_v19, %v1570_v20  ;;  %v2220_v23 = vpop.f32.mrb[24].mxu0 }
 0x127   :  { %v2260_v25 = vpop.f32.mrb[24].mxu1  ;;  %v2221_v8 = vpop.f32.mrb[25].mxu0 }
 0x128   :  { %v2222_v26 = vadd.f32 %v2221_v8, %v2220_v23  ;;  %v2261_v27 = vpop.f32.mrb[25].mxu1  ;;  %v2223_v28 = vpop.f32.mrb[26].mxu0 }
 0x129   :  { %v2262_v29 = vadd.f32 %v2261_v27, %v2260_v25  ;;  %v2263_v30 = vpop.f32.mrb[26].mxu1  ;;  %v2224_v31 = vpop.f32.mrb[27].mxu0 }
 0x12a   :  { %v1575_v32 = vadd.f32 %v2222_v26, %v1511_v38  ;;  %v2225_v33 = vadd.f32 %v2224_v31, %v2223_v28  ;;  %v2264_v34 = vpop.f32.mrb[27].mxu1 }
 0x12b   :  { %v2265_v35 = vadd.f32 %v2264_v34, %v2263_v30 }
 0x12c   :  { %v1639_v22 = vadd.f32 %v2262_v29, %v1575_v32  ;;  %v1578_v36 = vadd.f32 %v2225_v33, %v1514_v40 }
 0x12e   :  { %v1642_v37 = vadd.f32 %v2265_v35, %v1578_v36  ;;  %v2226_v39 = vpop.f32.mrb[28].mxu0 }
 0x12f   :  { %v2266_v41 = vpop.f32.mrb[28].mxu1  ;;  %v2227_v24 = vpop.f32.mrb[29].mxu0 }
 0x130   :  { %v2228_v42 = vadd.f32 %v2227_v24, %v2226_v39  ;;  %v2267_v43 = vpop.f32.mrb[29].mxu1  ;;  %v2229_v44 = vpop.f32.mrb[30].mxu0 }
 0x131   :  { %v2268_v45 = vadd.f32 %v2267_v43, %v2266_v41  ;;  %v2269_v46 = vpop.f32.mrb[30].mxu1  ;;  %v2230_v47 = vpop.f32.mrb[31].mxu0 }
 0x132   :  { %v1583_v48 = vadd.f32 %v2228_v42, %v1519_v52  ;;  %v2270_v49 = vpop.f32.mrb[31].mxu1 }
 0x134   :  { %v1647_v50 = vadd.f32 %v2268_v45, %v1583_v48 }
 0x136   :  { %v2288_v51 = vpop.f32.mrb[32].mxu0 }
 0x137   :  { %v2328_v38 = vpop.f32.mrb[32].mxu1  ;;  %v2289_v53 = vpop.f32.mrb[33].mxu0 }
 0x138   :  { %v2290_v54 = vadd.f32 %v2289_v53, %v2288_v51  ;;  %v2329_v55 = vpop.f32.mrb[33].mxu1  ;;  %v2291_v56 = vpop.f32.mrb[34].mxu0 }
 0x139   :  { %v2330_v40 = vadd.f32 %v2329_v55, %v2328_v38  ;;  %v2331_v57 = vpop.f32.mrb[34].mxu1  ;;  %v2292_v59 = vpop.f32.mrb[35].mxu0 }
 0x13a   :  { %v1687_v60 = vadd.f32 %v2290_v54, %v1623_v3  ;;  %v2293_v61 = vadd.f32 %v2292_v59, %v2291_v56  ;;  %v2332_v62 = vpop.f32.mrb[35].mxu1 }
 0x13b   :  { %v2333_v63 = vadd.f32 %v2332_v62, %v2331_v57 }
 0x13c   :  { %v1751_v0 = vadd.f32 %v2330_v40, %v1687_v60  ;;  %v1690_v1 = vadd.f32 %v2293_v61, %v1626_v5 }
 0x13e   :  { %v1754_v2 = vadd.f32 %v2333_v63, %v1690_v1  ;;  %v2294_v4 = vpop.f32.mrb[36].mxu0 }
 0x13f   :  { %v2334_v52 = vpop.f32.mrb[36].mxu1  ;;  %v2295_v7 = vpop.f32.mrb[37].mxu0 }
 0x140   :  { %v2335_v9 = vpop.f32.mrb[37].mxu1  ;;  %v2296_v58 = vadd.f32 %v2295_v7, %v2294_v4  ;;  %v2297_v11 = vpop.f32.mrb[38].mxu0 }
 0x141   :  { %v2336_v10 = vadd.f32 %v2335_v9, %v2334_v52  ;;  %v2337_v12 = vpop.f32.mrb[38].mxu1  ;;  %v2298_v13 = vpop.f32.mrb[39].mxu0 }
 0x142   :  { %v2338_v14 = vpop.f32.mrb[39].mxu1  ;;  %v1695_v15 = vadd.f32 %v2296_v58, %v1631_v6  ;;  %v2299_v16 = vadd.f32 %v2298_v13, %v2297_v11 }
 0x143   :  { %v2339_v17 = vadd.f32 %v2338_v14, %v2337_v12 }
 0x144   :  { %v1759_v3 = vadd.f32 %v2336_v10, %v1695_v15  ;;  %v1698_v18 = vadd.f32 %v2299_v16, %v1634_v21 }
 0x146   :  { %v1762_v19 = vadd.f32 %v2339_v17, %v1698_v18  ;;  %v2300_v20 = vpop.f32.mrb[40].mxu0 }
 0x147   :  { %v2340_v23 = vpop.f32.mrb[40].mxu1  ;;  %v2301_v5 = vpop.f32.mrb[41].mxu0 }
 0x148   :  { %v2302_v25 = vadd.f32 %v2301_v5, %v2300_v20  ;;  %v2341_v8 = vpop.f32.mrb[41].mxu1  ;;  %v2303_v26 = vpop.f32.mrb[42].mxu0 }
 0x149   :  { %v2342_v27 = vadd.f32 %v2341_v8, %v2340_v23  ;;  %v2343_v28 = vpop.f32.mrb[42].mxu1  ;;  %v2304_v29 = vpop.f32.mrb[43].mxu0 }
 0x14a   :  { %v1703_v30 = vadd.f32 %v2302_v25, %v1639_v22  ;;  %v2305_v31 = vadd.f32 %v2304_v29, %v2303_v26  ;;  %v2344_v32 = vpop.f32.mrb[43].mxu1 }
 0x14b   :  { %v2345_v33 = vadd.f32 %v2344_v32, %v2343_v28 }
 0x14c   :  { %v1767_v34 = vadd.f32 %v2342_v27, %v1703_v30  ;;  %v1706_v6 = vadd.f32 %v2305_v31, %v1642_v37 }
 0x14e   :  { %v3151_v35 = vadd.f32 %v2345_v33, %v1706_v6  ;;  %v2306_v36 = vpop.f32.mrb[44].mxu0 }
 0x14f   :  { %v2346_v21 = vpop.f32.mrb[44].mxu1  ;;  %v2307_v39 = vpop.f32.mrb[45].mxu0 }
 0x150   :  { %v2347_v41 = vpop.f32.mrb[45].mxu1  ;;  %v2308_v24 = vadd.f32 %v2307_v39, %v2306_v36  ;;  %v2309_v43 = vpop.f32.mrb[46].mxu0 }
 0x151   :  { %v2348_v42 = vadd.f32 %v2347_v41, %v2346_v21  ;;  %v2349_v44 = vpop.f32.mrb[46].mxu1  ;;  %v2310_v45 = vpop.f32.mrb[47].mxu0 }
 0x152   :  { %v2350_v46 = vpop.f32.mrb[47].mxu1  ;;  %v1711_v47 = vadd.f32 %v2308_v24, %v1647_v50 }
 0x154   :  { %v3153_v48 = vadd.f32 %v2348_v42, %v1711_v47 }
 0x156   :  { %v2368_v22 = vpop.f32.mrb[48].mxu0 }
 0x157   :  { %v2408_v49 = vpop.f32.mrb[48].mxu1  ;;  %v2369_v51 = vpop.f32.mrb[49].mxu0 }
 0x158   :  { %v2370_v38 = vadd.f32 %v2369_v51, %v2368_v22  ;;  %v2409_v37 = vpop.f32.mrb[49].mxu1  ;;  %v2371_v53 = vpop.f32.mrb[50].mxu0 }
 0x159   :  { %v2410_v54 = vadd.f32 %v2409_v37, %v2408_v49  ;;  %v2411_v55 = vpop.f32.mrb[50].mxu1  ;;  %v2372_v56 = vpop.f32.mrb[51].mxu0 }
 0x15a   :  { %v1815_v40 = vadd.f32 %v2370_v38, %v1751_v0  ;;  %v2373_v57 = vadd.f32 %v2372_v56, %v2371_v53  ;;  %v2412_v59 = vpop.f32.mrb[51].mxu1 }
 0x15b   :  { %v2413_v60 = vadd.f32 %v2412_v59, %v2411_v55 }
 0x15c   :  { %v1879_v61 = vadd.f32 %v2410_v54, %v1815_v40  ;;  %v1818_v62 = vadd.f32 %v2373_v57, %v1754_v2 }
 0x15e   :  { %1908 = vst [vmem:[%s3181_s3] sm:$0xff] %v1879_v61  ;;  %v1882_v50 = vadd.f32 %v2413_v60, %v1818_v62  ;;  %v2374_v63 = vpop.f32.mrb[52].mxu0 }
 0x15f   :  { %v2414_v1 = vpop.f32.mrb[52].mxu1  ;;  %v2375_v4 = vpop.f32.mrb[53].mxu0 }
 0x160   :  { %1909 = vst [vmem:[%s3181_s3 + $0x8] sm:$0xff] %v1882_v50  ;;  %v2376_v52 = vadd.f32 %v2375_v4, %v2374_v63  ;;  %v2415_v7 = vpop.f32.mrb[53].mxu1  ;;  %v2377_v0 = vpop.f32.mrb[54].mxu0 }
 0x161   :  { %v2416_v9 = vadd.f32 %v2415_v7, %v2414_v1  ;;  %v2417_v58 = vpop.f32.mrb[54].mxu1  ;;  %v2378_v10 = vpop.f32.mrb[55].mxu0 }
 0x162   :  { %v1823_v11 = vadd.f32 %v2376_v52, %v1759_v3  ;;  %v2379_v2 = vadd.f32 %v2378_v10, %v2377_v0  ;;  %v2418_v12 = vpop.f32.mrb[55].mxu1 }
 0x163   :  { %v2419_v13 = vadd.f32 %v2418_v12, %v2417_v58 }
 0x164   :  { %v1887_v14 = vadd.f32 %v2416_v9, %v1823_v11  ;;  %v1826_v15 = vadd.f32 %v2379_v2, %v1762_v19 }
 0x166   :  { %1910 = vst [vmem:[%s3181_s3 + $0x10] sm:$0xff] %v1887_v14  ;;  %v1890_v16 = vadd.f32 %v2419_v13, %v1826_v15  ;;  %v2380_v17 = vpop.f32.mrb[56].mxu0 }
 0x167   :  { %v2420_v18 = vpop.f32.mrb[56].mxu1  ;;  %v2381_v20 = vpop.f32.mrb[57].mxu0 }
 0x168   :  { %1911 = vst [vmem:[%s3181_s3 + $0x18] sm:$0xff] %v1890_v16  ;;  %v2382_v23 = vadd.f32 %v2381_v20, %v2380_v17  ;;  %v2421_v5 = vpop.f32.mrb[57].mxu1  ;;  %v2383_v3 = vpop.f32.mrb[58].mxu0 }
 0x169   :  { %v2422_v25 = vadd.f32 %v2421_v5, %v2420_v18  ;;  %v2423_v8 = vpop.f32.mrb[58].mxu1  ;;  %v2384_v26 = vpop.f32.mrb[59].mxu0 }
 0x16a   :  { %v1831_v27 = vadd.f32 %v2382_v23, %v1767_v34  ;;  %v2385_v19 = vadd.f32 %v2384_v26, %v2383_v3  ;;  %v2424_v28 = vpop.f32.mrb[59].mxu1 }
 0x16b   :  { %v2425_v29 = vadd.f32 %v2424_v28, %v2423_v8 }
 0x16c   :  { %v1895_v30 = vadd.f32 %v2422_v25, %v1831_v27  ;;  %v1834_v31 = vadd.f32 %v2385_v19, %v3151_v35 }
 0x16e   :  { %1912 = vst [vmem:[%s3181_s3 + $0x20] sm:$0xff] %v1895_v30  ;;  %v1898_v32 = vadd.f32 %v2425_v29, %v1834_v31  ;;  %v2386_v33 = vpop.f32.mrb[60].mxu0 }
 0x16f   :  { %v2426_v6 = vpop.f32.mrb[60].mxu1  ;;  %v2387_v36 = vpop.f32.mrb[61].mxu0 }
 0x170   :  { %1913 = vst [vmem:[%s3181_s3 + $0x28] sm:$0xff] %v1898_v32  ;;  %v2388_v21 = vadd.f32 %v2387_v36, %v2386_v33  ;;  %v2427_v34 = vpop.f32.mrb[61].mxu1  ;;  %v2389_v39 = vpop.f32.mrb[62].mxu0 }
 0x171   :  { %v2428_v41 = vadd.f32 %v2427_v34, %v2426_v6  ;;  %v2429_v24 = vpop.f32.mrb[62].mxu1  ;;  %v2390_v42 = vpop.f32.mrb[63].mxu0 }
 0x172   :  { %v1839_v35 = vadd.f32 %v2388_v21, %v3153_v48  ;;  %v2430_v43 = vpop.f32.mrb[63].mxu1 }
 0x174   :  { %v1903_v44 = vadd.f32 %v2428_v41, %v1839_v35 }
 0x176   :  { %1914 = vst [vmem:[%s3181_s3 + $0x30] sm:$0xff] %v1903_v44 }

// kernel: _lambda_.29
= control target key start
LH: loop header
LB: loop body
LE: loop exit
PB: predicated region body
PF: predicated region fallthrough
CT: control target
= control target key end

     0   :  { %s418_s1 = inlined_call_operand.vmem [shape: bf16[128,128], index: 1, kind: input, shape index: {}]   ;;  %s419_s0 = inlined_call_operand.vmem [shape: bf16[56,128], index: 0, kind: input, shape index: {}]   ;;  %s420_s2 = inlined_call_operand.vmem [shape: f32[8,128], index: 2, kind: input, shape index: {}]   ;;  %s421_s3 = inlined_call_operand.vmem [shape: bf16[56,128], index: 3, kind: output, shape index: {}]  }
   0x1   :  { %v334_v0 = vld [vmem:[%s418_s1] sm:$0xff]   ;;  %v335_v1 = vld [vmem:[%s418_s1 + $0x8] sm:$0xff]   ;;  %v336_v2 = vld [vmem:[%s418_s1 + $0x10] sm:$0xff]  }
   0x2   :  { %294 = vmatprep.subr.bf16.mxu0 %v334_v0  ;;  %318 = vmatprep.subr.bf16.mxu1 %v334_v0  ;;  %v337_v3 = vld [vmem:[%s418_s1 + $0x18] sm:$0xff]   ;;  %v342_v4 = vld [vmem:[%s419_s0] sm:$0xff]   ;;  %v343_v5 = vld [vmem:[%s419_s0 + $0x10] sm:$0xff]  }
   0x3   :  { %295 = vmatpush3.bf16.msra.mxu0 %v334_v0  ;;  %326 = vmatpush3.bf16.msra.mxu1 %v334_v0  ;;  %v338_v6 = vld [vmem:[%s418_s1 + $0x20] sm:$0xff]   ;;  %v339_v7 = vld [vmem:[%s418_s1 + $0x28] sm:$0xff]   ;;  %v340_v8 = vld [vmem:[%s418_s1 + $0x30] sm:$0xff]  }
   0x4   :  { %296 = vmatprep.subr.bf16.mxu0 %v335_v1  ;;  %319 = vmatprep.subr.bf16.mxu1 %v335_v1  ;;  %v341_v9 = vld [vmem:[%s418_s1 + $0x38] sm:$0xff]   ;;  %v344_v10 = vld [vmem:[%s419_s0 + $0x8] sm:$0xff]   ;;  %v238_v12 = vld [vmem:[%s420_s2] ss:$0 sm:$0xff] }
   0x5   :  { %310 = vmatprep.mubr.bf16.mxu0 %v342_v4  ;;  %314 = vmatprep.mubr.bf16.mxu1 %v343_v5  ;;  %v345_v11 = vld [vmem:[%s419_s0 + $0x18] ss:$0 sps:$4 sm:$0xff]  }
   0x7   :  { %297 = vmatpush3.bf16.msra.mxu0 %v335_v1  ;;  %327 = vmatpush3.bf16.msra.mxu1 %v335_v1 }
   0x8   :  { %298 = vmatprep.subr.bf16.mxu0 %v336_v2  ;;  %320 = vmatprep.subr.bf16.mxu1 %v336_v2 }
   0xb   :  { %299 = vmatpush3.bf16.msra.mxu0 %v336_v2  ;;  %328 = vmatpush3.bf16.msra.mxu1 %v336_v2 }
   0xc   :  { %300 = vmatprep.subr.bf16.mxu0 %v337_v3  ;;  %321 = vmatprep.subr.bf16.mxu1 %v337_v3 }
   0xf   :  { %301 = vmatpush3.bf16.msra.mxu0 %v337_v3  ;;  %329 = vmatpush3.bf16.msra.mxu1 %v337_v3 }
  0x10   :  { %302 = vmatprep.subr.bf16.mxu0 %v338_v6  ;;  %322 = vmatprep.subr.bf16.mxu1 %v338_v6 }
  0x13   :  { %303 = vmatpush3.bf16.msra.mxu0 %v338_v6  ;;  %330 = vmatpush3.bf16.msra.mxu1 %v338_v6 }
  0x14   :  { %304 = vmatprep.subr.bf16.mxu0 %v339_v7  ;;  %323 = vmatprep.subr.bf16.mxu1 %v339_v7 }
  0x17   :  { %305 = vmatpush3.bf16.msra.mxu0 %v339_v7  ;;  %331 = vmatpush3.bf16.msra.mxu1 %v339_v7 }
  0x18   :  { %306 = vmatprep.subr.bf16.mxu0 %v340_v8  ;;  %324 = vmatprep.subr.bf16.mxu1 %v340_v8 }
  0x1b   :  { %307 = vmatpush3.bf16.msra.mxu0 %v340_v8  ;;  %332 = vmatpush3.bf16.msra.mxu1 %v340_v8 }
  0x1c   :  { %308 = vmatprep.subr.bf16.mxu0 %v341_v9  ;;  %325 = vmatprep.subr.bf16.mxu1 %v341_v9 }
  0x1f   :  { %309 = vmatpush3.bf16.msra.mxu0 %v341_v9  ;;  %333 = vmatpush3.bf16.msra.mxu1 %v341_v9 }
  0x22   :  { %311 = vmatmul.mubr.bf16.vlgmr.msra.gmra.mrb[0].mxu0 %v344_v10  ;;  %315 = vmatmul.mubr.bf16.vlgmr.msra.gmra.mrb[0].mxu1 %v345_v11 }
  0xf5   :  { %v312_v13 = vpop.f32.mrb[0].mxu0  ;;  %v316_v14 = vpop.f32.mrb[0].mxu1 }
  0xf6   :  { %v156_v15 = vadd.f32 %v312_v13, %v238_v12  ;;  %v172_v16 = vadd.f32 %v316_v14, %v238_v12  ;;  %v147_v17 = vpop.f32.mrb[1].mxu0  ;;  %v163_v18 = vpop.f32.mrb[1].mxu1 }
  0xf7   :  { %v148_v19 = vadd.f32 %v238_v12, %v147_v17  ;;  %v313_v20 = vpop.f32.mrb[2].mxu0  ;;  %v317_v21 = vpop.f32.mrb[2].mxu1  ;;  %v164_v23 = vadd.f32 %v238_v12, %v163_v18 }
  0xf8   :  { %vm183_vm0 = vcmp.ge.f32.partialorder %v172_v16, 0.0  ;;  %v190_v22 = vmul.f32 0.2, %v172_v16  ;;  %vm179_vm1 = vcmp.ge.f32.partialorder %v156_v15, 0.0  ;;  %v186_v24 = vmul.f32 0.2, %v156_v15 }
  0xf9   :  { %v159_v26 = vadd.f32 %v313_v20, %v238_v12  ;;  %v150_v27 = vpop.f32.mrb[3].mxu0  ;;  %v166_v28 = vpop.f32.mrb[3].mxu1  ;;  %vm177_vm2 = vcmp.ge.f32.partialorder %v148_v19, 0.0  ;;  %v184_v30 = vmul.f32 0.2, %v148_v19  ;;  %vm181_vm4 = vcmp.ge.f32.partialorder %v164_v23, 0.0 }
  0xfa   :  { %v197_v25 = vsel %vm183_vm0, %v172_v16, %v190_v22  ;;  %v151_v31 = vadd.f32 %v238_v12, %v150_v27  ;;  %v188_v32 = vmul.f32 0.2, %v164_v23  ;;  %v167_v34 = vadd.f32 %v238_v12, %v166_v28 }
  0xfb   :  { %v264_v29 = vpack.c.bf16 %v197_v25, %v197_v25  ;;  %vm180_vm3 = vcmp.ge.f32.partialorder %v159_v26, 0.0  ;;  %v187_v33 = vmul.f32 0.2, %v159_v26  ;;  %v193_v36 = vsel %vm179_vm1, %v156_v15, %v186_v24 }
  0xfc   :  { %vm178_vm5 = vcmp.ge.f32.partialorder %v151_v31, 0.0  ;;  %v185_v35 = vmul.f32 0.2, %v151_v31  ;;  %vm182_vm6 = vcmp.ge.f32.partialorder %v167_v34, 0.0  ;;  %v189_v38 = vmul.f32 0.2, %v167_v34 }
  0xfd   :  { %233 = vst [vmem:[%s421_s3 + $0x18] sm:$0xf] %v264_v29  ;;  %v194_v37 = vsel %vm180_vm3, %v159_v26, %v187_v33  ;;  %v191_v39 = vsel %vm177_vm2, %v148_v19, %v184_v30  ;;  %v195_v42 = vsel %vm181_vm4, %v164_v23, %v188_v32 }
  0xfe   :  { %v273_v40 = vpack.c.bf16 %v194_v37, %v193_v36  ;;  %v192_v41 = vsel %vm178_vm5, %v151_v31, %v185_v35  ;;  %v196_v44 = vsel %vm182_vm6, %v167_v34, %v189_v38 }
  0xff   :  { %v268_v43 = vpack.c.bf16 %v192_v41, %v191_v39  ;;  %v278_v45 = vpack.c.bf16 %v196_v44, %v195_v42 }
 0x100   :  { %280 = vst [vmem:[%s421_s3 + $0x8] sm:$0xff] %v273_v40  }
 0x101   :  { %269 = vst [vmem:[%s421_s3] sm:$0xff] %v268_v43   ;;  %281 = vst [vmem:[%s421_s3 + $0x10] sm:$0xff] %v278_v45  }

// kernel: _lambda_.30
= control target key start
LH: loop header
LB: loop body
LE: loop exit
PB: predicated region body
PF: predicated region fallthrough
CT: control target
= control target key end

     0   :  { %v267_v57 = vlaneseq  ;;  %s497_s1 = inlined_call_operand.vmem [shape: bf16[256,128], index: 1, kind: input, shape index: {}]   ;;  %s498_s0 = inlined_call_operand.vmem [shape: bf16[24,256], index: 0, kind: input, shape index: {}]   ;;  %s499_s2 = inlined_call_operand.vmem [shape: f32[8,128], index: 2, kind: input, shape index: {}]   ;;  %s500_s3 = inlined_call_operand.vmem [shape: bf16[24,128], index: 3, kind: output, shape index: {}]  }
   0x1   :  { %v385_v0 = vld [vmem:[%s497_s1 + $0x40] sm:$0xff]   ;;  %v387_v2 = vld [vmem:[%s497_s1 + $0x48] sm:$0xff]   ;;  %v389_v4 = vld [vmem:[%s497_s1 + $0x50] sm:$0xff]  }
   0x2   :  { %v386_v1 = vld [vmem:[%s497_s1] sm:$0xff]   ;;  %341 = vmatprep.subr.bf16.mxu0 %v385_v0  ;;  %369 = vmatprep.subr.bf16.mxu1 %v385_v0  ;;  %v388_v3 = vld [vmem:[%s497_s1 + $0x8] sm:$0xff]   ;;  %v390_v5 = vld [vmem:[%s497_s1 + $0x10] sm:$0xff]   ;;  %v268_v58 = vshrl.u32 %v267_v57, 7 }
   0x3   :  { %342 = vmatpush3.bf16.msra.mxu0 %v386_v1  ;;  %377 = vmatpush3.bf16.msra.mxu1 %v386_v1  ;;  %v391_v6 = vld [vmem:[%s497_s1 + $0x58] sm:$0xff]   ;;  %v393_v8 = vld [vmem:[%s497_s1 + $0x60] sm:$0xff]   ;;  %v395_v10 = vld [vmem:[%s497_s1 + $0x68] sm:$0xff]  }
   0x4   :  { %343 = vmatprep.subr.bf16.mxu0 %v387_v2  ;;  %370 = vmatprep.subr.bf16.mxu1 %v387_v2  ;;  %v392_v7 = vld [vmem:[%s497_s1 + $0x18] sm:$0xff]   ;;  %v394_v9 = vld [vmem:[%s497_s1 + $0x20] sm:$0xff]   ;;  %v23_v12 = vld [vmem:[%s498_s0 + $0x10] sm:$0xff]  ;;  %v269_v60 = vsub.s32 0, %v268_v58 }
   0x5   :  { %v403_v11 = vld [vmem:[%s498_s0 + $0x4] ss:$8 sps:$4 sm:$0xff]   ;;  %v313_v13 = vcombine.high %v23_v12, %v23_v12  ;;  %v397_v15 = vld [vmem:[%s497_s1 + $0x70] sm:$0xff]   ;;  %v399_v17 = vld [vmem:[%s497_s1 + $0x78] sm:$0xff]   ;;  %v312_v20 = vcombine.low %v23_v12, %v23_v12 }
   0x6   :  { %v396_v14 = vld [vmem:[%s497_s1 + $0x28] sm:$0xff]   ;;  %201 = vmatprep.mubr.bf16.mxu0 %v403_v11  ;;  %v398_v16 = vld [vmem:[%s497_s1 + $0x30] sm:$0xff]   ;;  %v400_v18 = vld [vmem:[%s497_s1 + $0x38] sm:$0xff]  }
   0x7   :  { %344 = vmatpush3.bf16.msra.mxu0 %v388_v3  ;;  %378 = vmatpush3.bf16.msra.mxu1 %v388_v3  ;;  %v401_v19 = vld [vmem:[%s498_s0] ss:$8 sps:$4 sm:$0xff]  }
   0x8   :  { %345 = vmatprep.subr.bf16.mxu0 %v389_v4  ;;  %371 = vmatprep.subr.bf16.mxu1 %v389_v4  ;;  %v257_v59 = vld [vmem:[%s499_s2] sm:$0x1]  ;;  %v261_v63 = vld [vmem:[%s499_s2 + $0x1] sm:$0x1] }
   0x9   :  { %209 = vmatprep.mubr.bf16.mxu1 %v313_v13 }
   0xb   :  { %346 = vmatpush3.bf16.msra.mxu0 %v390_v5  ;;  %379 = vmatpush3.bf16.msra.mxu1 %v390_v5 }
   0xc   :  { %347 = vmatprep.subr.bf16.mxu0 %v391_v6  ;;  %372 = vmatprep.subr.bf16.mxu1 %v391_v6 }
   0xf   :  { %348 = vmatpush3.bf16.msra.mxu0 %v392_v7  ;;  %380 = vmatpush3.bf16.msra.mxu1 %v392_v7 }
  0x10   :  { %349 = vmatprep.subr.bf16.mxu0 %v393_v8  ;;  %373 = vmatprep.subr.bf16.mxu1 %v393_v8 }
  0x13   :  { %350 = vmatpush3.bf16.msra.mxu0 %v394_v9  ;;  %381 = vmatpush3.bf16.msra.mxu1 %v394_v9 }
  0x14   :  { %351 = vmatprep.subr.bf16.mxu0 %v395_v10  ;;  %374 = vmatprep.subr.bf16.mxu1 %v395_v10 }
  0x17   :  { %352 = vmatpush3.bf16.msra.mxu0 %v396_v14  ;;  %382 = vmatpush3.bf16.msra.mxu1 %v396_v14 }
  0x18   :  { %353 = vmatprep.subr.bf16.mxu0 %v397_v15  ;;  %375 = vmatprep.subr.bf16.mxu1 %v397_v15 }
  0x1b   :  { %354 = vmatpush3.bf16.msra.mxu0 %v398_v16  ;;  %383 = vmatpush3.bf16.msra.mxu1 %v398_v16 }
  0x1c   :  { %355 = vmatprep.subr.bf16.mxu0 %v399_v17  ;;  %376 = vmatprep.subr.bf16.mxu1 %v399_v17 }
  0x1f   :  { %356 = vmatpush3.bf16.msra.mxu0 %v400_v18  ;;  %384 = vmatpush3.bf16.msra.mxu1 %v400_v18 }
  0x22   :  { %202 = vmatmul.mubr.bf16.vlgmr.msra.gmra.mrb[0].mxu0 %v401_v19  ;;  %210 = vmatmul.mubr.bf16.vlgmr.msra.gmra.mrb[0].mxu1 %v312_v20 }
  0xf5   :  { %v357_v21 = vpop.f32.mrb[0].mxu0  ;;  %v363_v22 = vpop.f32.mrb[0].mxu1 }
  0xf6   :  { %v358_v23 = vpop.f32.mrb[1].mxu0  ;;  %v364_v24 = vpop.f32.mrb[1].mxu1 }
  0xf7   :  { %v359_v25 = vadd.f32 %v358_v23, %v357_v21  ;;  %v360_v26 = vpop.f32.mrb[2].mxu0  ;;  %v365_v27 = vadd.f32 %v364_v24, %v363_v22  ;;  %v366_v28 = vpop.f32.mrb[2].mxu1 }
  0xf8   :  { %v361_v29 = vpop.f32.mrb[3].mxu0  ;;  %v367_v30 = vpop.f32.mrb[3].mxu1 }
  0xf9   :  { %v362_v31 = vadd.f32 %v361_v29, %v360_v26  ;;  %v224_v32 = vmul.f32 %v359_v25, %v359_v25  ;;  %v226_v33 = vmul.f32 %v365_v27, %v365_v27 }
  0xfb   :  { %v222_v34 = vadd.f32 %v362_v31, %v359_v25  ;;  %v225_v35 = vmul.f32 %v362_v31, %v362_v31 }
  0xfd   :  { %v223_v36 = vadd.f32 %v365_v27, %v222_v34  ;;  %v227_v37 = vadd.f32 %v225_v35, %v224_v32 }
  0xff   :  { %v228_v38 = vadd.f32 %v227_v37, %v226_v33  ;;  %v239_v39 = vrot.slane %v223_v36, 4 }
 0x101   :  { %v240_v40 = vadd.f32 %v239_v39, %v223_v36  ;;  %v247_v41 = vrot.slane %v228_v38, 4 }
 0x103   :  { %v241_v42 = vrot.slane %v240_v40, 2  ;;  %v248_v43 = vadd.f32 %v247_v41, %v228_v38 }
 0x105   :  { %v242_v44 = vadd.f32 %v241_v42, %v240_v40  ;;  %v249_v45 = vrot.slane %v248_v43, 2 }
 0x107   :  { %v243_v46 = vrot.slane %v242_v44, 1  ;;  %v250_v47 = vadd.f32 %v249_v45, %v248_v43 }
 0x109   :  { %v244_v48 = vadd.f32 %v243_v46, %v242_v44  ;;  %v251_v49 = vrot.slane %v250_v47, 1 }
 0x10b   :  { %v245_v50 = vmul.f32 0.055555556, %v244_v48  ;;  %v252_v51 = vadd.f32 %v251_v49, %v250_v47 }
 0x10d   :  { %v253_v52 = vmul.f32 0.055555556, %v252_v51  ;;  %v254_v53 = vmul.f32 %v245_v50, %v245_v50 }
 0x10f   :  { %v255_v54 = vsub.f32 %v253_v52, %v254_v53 }
 0x111   :  { %v256_v55 = vmax.f32 %v255_v54, 0.0 }
 0x113   :  { %v258_v56 = vadd.f32 1e-05, %v256_v55 }
 0x115   :  { %406 = vrsqrt.f32 %v258_v56 }
 0x11f   :  { %v407_v61 = vpop.eup %406 }
 0x120   :  { %v260_v62 = vmul.f32 %v407_v61, %v257_v59 }
 0x122   :  { %v262_v0 = vmul.f32 %v260_v62, %v245_v50  ;;  %v270_v1 = vrot.slane %v260_v62, %v269_v60 }
 0x124   :  { %v263_v2 = vsub.f32 %v261_v63, %v262_v0  ;;  %v271_v3 = vmul.f32 %v359_v25, %v270_v1  ;;  %v272_v4 = vmul.f32 %v362_v31, %v270_v1  ;;  %v273_v5 = vmul.f32 %v365_v27, %v270_v1 }
 0x126   :  { %v277_v6 = vrot.slane %v263_v2, %v269_v60 }
 0x128   :  { %v278_v7 = vadd.f32 %v277_v6, %v271_v3  ;;  %v279_v8 = vadd.f32 %v277_v6, %v272_v4  ;;  %v280_v9 = vadd.f32 %v277_v6, %v273_v5 }
 0x12a   :  { %vm281_vm0 = vcmp.ge.f32.partialorder %v278_v7, 0.0  ;;  %vm282_vm1 = vcmp.ge.f32.partialorder %v279_v8, 0.0  ;;  %vm283_vm2 = vcmp.ge.f32.partialorder %v280_v9, 0.0  ;;  %v284_v10 = vmul.f32 0.2, %v278_v7 }
 0x12b   :  { %v285_v11 = vmul.f32 0.2, %v279_v8  ;;  %v286_v12 = vmul.f32 0.2, %v280_v9 }
 0x12c   :  { %v287_v13 = vsel %vm281_vm0, %v278_v7, %v284_v10 }
 0x12d   :  { %v288_v14 = vsel %vm282_vm1, %v279_v8, %v285_v11  ;;  %v289_v15 = vsel %vm283_vm2, %v280_v9, %v286_v12 }
 0x12e   :  { %v335_v16 = vpack.c.bf16 %v289_v15, %v289_v15  ;;  %v339_v17 = vpack.c.bf16 %v288_v14, %v287_v13 }
 0x130   :  { %340 = vst [vmem:[%s500_s3] sm:$0xff] %v339_v17   ;;  %305 = vst [vmem:[%s500_s3 + $0x8] sm:$0xf] %v335_v16 }

// kernel: _lambda_.31
= control target key start
LH: loop header
LB: loop body
LE: loop exit
PB: predicated region body
PF: predicated region fallthrough
CT: control target
= control target key end

     0   :  { %s683_s1 = inlined_call_operand.vmem [shape: bf16[512,128], index: 1, kind: input, shape index: {}]   ;;  %s684_s0 = inlined_call_operand.vmem [shape: bf16[8,512], index: 0, kind: input, shape index: {}]   ;;  %s685_s2 = inlined_call_operand.vmem [shape: f32[8,128], index: 2, kind: input, shape index: {}]   ;;  %s686_s3 = inlined_call_operand.vmem [shape: bf16[8,128], index: 3, kind: output, shape index: {}]  }
   0x1   :  { %v514_v0 = vld [vmem:[%s683_s1 + $0x40] sm:$0xff]   ;;  %v518_v4 = vld [vmem:[%s683_s1 + $0x48] sm:$0xff]   ;;  %v522_v8 = vld [vmem:[%s683_s1 + $0x50] sm:$0xff]  }
   0x2   :  { %v515_v1 = vld [vmem:[%s683_s1 + $0xc0] sm:$0xff]   ;;  %470 = vmatprep.subr.bf16.mxu0 %v514_v0  ;;  %v519_v5 = vld [vmem:[%s683_s1 + $0xc8] sm:$0xff]   ;;  %v523_v9 = vld [vmem:[%s683_s1 + $0xd0] sm:$0xff]  }
   0x3   :  { %v516_v2 = vld [vmem:[%s683_s1] sm:$0xff]   ;;  %492 = vmatprep.subr.bf16.mxu1 %v515_v1  ;;  %v520_v6 = vld [vmem:[%s683_s1 + $0x8] sm:$0xff]   ;;  %v524_v10 = vld [vmem:[%s683_s1 + $0x10] sm:$0xff]  }
   0x4   :  { %v517_v3 = vld [vmem:[%s683_s1 + $0x80] sm:$0xff]   ;;  %471 = vmatpush3.bf16.msra.mxu0 %v516_v2  ;;  %v521_v7 = vld [vmem:[%s683_s1 + $0x88] sm:$0xff]   ;;  %v525_v11 = vld [vmem:[%s683_s1 + $0x90] sm:$0xff]  }
   0x5   :  { %493 = vmatpush3.bf16.msra.mxu1 %v517_v3  ;;  %472 = vmatprep.subr.bf16.mxu0 %v518_v4  ;;  %v526_v12 = vld [vmem:[%s683_s1 + $0x58] sm:$0xff]   ;;  %v530_v16 = vld [vmem:[%s683_s1 + $0x60] sm:$0xff]   ;;  %v534_v20 = vld [vmem:[%s683_s1 + $0x68] sm:$0xff]   ;;  %v415_v4 = vlaneseq }
   0x6   :  { %494 = vmatprep.subr.bf16.mxu1 %v519_v5  ;;  %v527_v13 = vld [vmem:[%s683_s1 + $0xd8] sm:$0xff]   ;;  %v531_v17 = vld [vmem:[%s683_s1 + $0xe0] sm:$0xff]   ;;  %v535_v21 = vld [vmem:[%s683_s1 + $0xe8] sm:$0xff]  }
   0x7   :  { %v528_v14 = vld [vmem:[%s683_s1 + $0x18] sm:$0xff]   ;;  %v532_v18 = vld [vmem:[%s683_s1 + $0x20] sm:$0xff]   ;;  %v536_v22 = vld [vmem:[%s683_s1 + $0x28] sm:$0xff]   ;;  %v416_v5 = vshrl.u32 %v415_v4, 7 }
   0x8   :  { %473 = vmatpush3.bf16.msra.mxu0 %v520_v6  ;;  %v529_v15 = vld [vmem:[%s683_s1 + $0x98] sm:$0xff]   ;;  %v533_v19 = vld [vmem:[%s683_s1 + $0xa0] sm:$0xff]   ;;  %v537_v23 = vld [vmem:[%s683_s1 + $0xa8] sm:$0xff]  }
   0x9   :  { %495 = vmatpush3.bf16.msra.mxu1 %v521_v7  ;;  %474 = vmatprep.subr.bf16.mxu0 %v522_v8  ;;  %v538_v24 = vld [vmem:[%s683_s1 + $0x70] sm:$0xff]   ;;  %v542_v28 = vld [vmem:[%s683_s1 + $0x78] sm:$0xff]   ;;  %v21_v32 = vld [vmem:[%s684_s0] sm:$0xff]  ;;  %v417_v7 = vsub.s32 0, %v416_v5 }
   0xa   :  { %496 = vmatprep.subr.bf16.mxu1 %v523_v9  ;;  %v539_v25 = vld [vmem:[%s683_s1 + $0xf0] sm:$0xff]   ;;  %v543_v29 = vld [vmem:[%s683_s1 + $0xf8] sm:$0xff]   ;;  %v22_v33 = vld [vmem:[%s684_s0 + $0x8] sm:$0xff]  ;;  %v434_v34 = vcombine.low %v21_v32, %v21_v32  ;;  %v435_v35 = vcombine.high %v21_v32, %v21_v32 }
   0xb   :  { %v540_v26 = vld [vmem:[%s683_s1 + $0x30] sm:$0xff]   ;;  %v544_v30 = vld [vmem:[%s683_s1 + $0x38] sm:$0xff]   ;;  %v436_v36 = vcombine.low %v22_v33, %v22_v33  ;;  %v437_v37 = vcombine.high %v22_v33, %v22_v33  ;;  %v407_v6 = vld [vmem:[%s685_s2] sm:$0x1] }
   0xc   :  { %475 = vmatpush3.bf16.msra.mxu0 %v524_v10  ;;  %v541_v27 = vld [vmem:[%s683_s1 + $0xb0] sm:$0xff]   ;;  %v545_v31 = vld [vmem:[%s683_s1 + $0xb8] sm:$0xff]   ;;  %325 = vmatprep.mubr.bf16.mxu0 %v435_v35  ;;  %v411_v10 = vld [vmem:[%s685_s2 + $0x1] sm:$0x1] }
   0xd   :  { %497 = vmatpush3.bf16.msra.mxu1 %v525_v11  ;;  %476 = vmatprep.subr.bf16.mxu0 %v526_v12 }
   0xe   :  { %498 = vmatprep.subr.bf16.mxu1 %v527_v13  ;;  %365 = vmatprep.mubr.bf16.mxu1 %v437_v37 }
  0x10   :  { %477 = vmatpush3.bf16.msra.mxu0 %v528_v14 }
  0x11   :  { %499 = vmatpush3.bf16.msra.mxu1 %v529_v15  ;;  %478 = vmatprep.subr.bf16.mxu0 %v530_v16 }
  0x12   :  { %500 = vmatprep.subr.bf16.mxu1 %v531_v17 }
  0x14   :  { %479 = vmatpush3.bf16.msra.mxu0 %v532_v18 }
  0x15   :  { %501 = vmatpush3.bf16.msra.mxu1 %v533_v19  ;;  %480 = vmatprep.subr.bf16.mxu0 %v534_v20 }
  0x16   :  { %502 = vmatprep.subr.bf16.mxu1 %v535_v21 }
  0x18   :  { %481 = vmatpush3.bf16.msra.mxu0 %v536_v22 }
  0x19   :  { %503 = vmatpush3.bf16.msra.mxu1 %v537_v23  ;;  %482 = vmatprep.subr.bf16.mxu0 %v538_v24 }
  0x1a   :  { %504 = vmatprep.subr.bf16.mxu1 %v539_v25 }
  0x1c   :  { %483 = vmatpush3.bf16.msra.mxu0 %v540_v26 }
  0x1d   :  { %505 = vmatpush3.bf16.msra.mxu1 %v541_v27  ;;  %484 = vmatprep.subr.bf16.mxu0 %v542_v28 }
  0x1e   :  { %506 = vmatprep.subr.bf16.mxu1 %v543_v29 }
  0x20   :  { %485 = vmatpush3.bf16.msra.mxu0 %v544_v30 }
  0x21   :  { %507 = vmatpush3.bf16.msra.mxu1 %v545_v31 }
  0x23   :  { %326 = vmatmul.mubr.bf16.vlgmr.msra.gmra.mrb[0].mxu0 %v434_v34 }
  0x24   :  { %366 = vmatmul.mubr.bf16.vlgmr.msra.gmra.mrb[0].mxu1 %v436_v36 }
  0xf6   :  { %v486_v38 = vpop.f32.mrb[0].mxu0 }
  0xf7   :  { %v508_v39 = vpop.f32.mrb[0].mxu1  ;;  %v487_v40 = vpop.f32.mrb[1].mxu0 }
  0xf8   :  { %v509_v41 = vpop.f32.mrb[1].mxu1  ;;  %v488_v42 = vadd.f32 %v487_v40, %v486_v38  ;;  %v489_v44 = vpop.f32.mrb[2].mxu0 }
  0xf9   :  { %v510_v43 = vadd.f32 %v509_v41, %v508_v39  ;;  %v511_v45 = vpop.f32.mrb[2].mxu1  ;;  %v490_v46 = vpop.f32.mrb[3].mxu0 }
  0xfa   :  { %v512_v47 = vpop.f32.mrb[3].mxu1 }
  0xfb   :  { %v368_v48 = vadd.f32 %v510_v43, %v488_v42 }
  0xfd   :  { %v377_v49 = vmul.f32 %v368_v48, %v368_v48  ;;  %v389_v50 = vrot.slane %v368_v48, 4 }
  0xff   :  { %v390_v51 = vadd.f32 %v389_v50, %v368_v48  ;;  %v397_v52 = vrot.slane %v377_v49, 4 }
 0x101   :  { %v391_v53 = vrot.slane %v390_v51, 2  ;;  %v398_v54 = vadd.f32 %v397_v52, %v377_v49 }
 0x103   :  { %v392_v55 = vadd.f32 %v391_v53, %v390_v51  ;;  %v399_v56 = vrot.slane %v398_v54, 2 }
 0x105   :  { %v393_v57 = vrot.slane %v392_v55, 1  ;;  %v400_v58 = vadd.f32 %v399_v56, %v398_v54 }
 0x107   :  { %v394_v59 = vadd.f32 %v393_v57, %v392_v55  ;;  %v401_v60 = vrot.slane %v400_v58, 1 }
 0x109   :  { %v395_v61 = vmul.f32 0.125, %v394_v59  ;;  %v402_v62 = vadd.f32 %v401_v60, %v400_v58 }
 0x10b   :  { %v403_v63 = vmul.f32 0.125, %v402_v62  ;;  %v404_v0 = vmul.f32 %v395_v61, %v395_v61 }
 0x10d   :  { %v405_v1 = vsub.f32 %v403_v63, %v404_v0 }
 0x10f   :  { %v406_v2 = vmax.f32 %v405_v1, 0.0 }
 0x111   :  { %v408_v3 = vadd.f32 1e-05, %v406_v2 }
 0x113   :  { %550 = vrsqrt.f32 %v408_v3 }
 0x11d   :  { %v551_v8 = vpop.eup %550 }
 0x11e   :  { %v410_v9 = vmul.f32 %v551_v8, %v407_v6 }
 0x120   :  { %v412_v11 = vmul.f32 %v410_v9, %v395_v61  ;;  %v418_v12 = vrot.slane %v410_v9, %v417_v7 }
 0x122   :  { %v413_v13 = vsub.f32 %v411_v10, %v412_v11  ;;  %v419_v14 = vmul.f32 %v418_v12, %v368_v48 }
 0x124   :  { %v423_v15 = vrot.slane %v413_v13, %v417_v7 }
 0x126   :  { %v424_v16 = vadd.f32 %v423_v15, %v419_v14 }
 0x128   :  { %vm425_vm0 = vcmp.ge.f32.partialorder %v424_v16, 0.0  ;;  %v426_v17 = vmul.f32 0.2, %v424_v16 }
 0x12a   :  { %v427_v18 = vsel %vm425_vm0, %v424_v16, %v426_v17 }
 0x12b   :  { %v428_v19 = vpack.c.bf16 %v427_v18, %v427_v18 }
 0x12d   :  { %429 = vst [vmem:[%s686_s3] sm:$0xf] %v428_v19 }

// kernel: _lambda_.32
= control target key start
LH: loop header
LB: loop body
LE: loop exit
PB: predicated region body
PF: predicated region fallthrough
CT: control target
= control target key end

     0   :  { %s1435_s1 = inlined_call_operand.vmem [shape: bf16[1024,128], index: 1, kind: input, shape index: {}]   ;;  %s1436_s0 = inlined_call_operand.vmem [shape: bf16[24,1024], index: 0, kind: input, shape index: {}]   ;;  %s1437_s2 = inlined_call_operand.vmem [shape: f32[8,128], index: 2, kind: input, shape index: {}]   ;;  %s1438_s3 = inlined_call_operand.vmem [shape: bf16[24,128], index: 3, kind: output, shape index: {}]  }
   0x1   :  { %v1101_v0 = vld [vmem:[%s1435_s1 + $0x40] sm:$0xff]   ;;  %v1105_v4 = vld [vmem:[%s1435_s1 + $0x48] sm:$0xff]   ;;  %v1109_v8 = vld [vmem:[%s1435_s1 + $0x50] sm:$0xff]  }
   0x2   :  { %v1102_v1 = vld [vmem:[%s1435_s1 + $0xc0] sm:$0xff]   ;;  %989 = vmatprep.subr.bf16.mxu0 %v1101_v0  ;;  %v1106_v5 = vld [vmem:[%s1435_s1 + $0xc8] sm:$0xff]   ;;  %v1110_v9 = vld [vmem:[%s1435_s1 + $0xd0] sm:$0xff]  }
   0x3   :  { %v1103_v2 = vld [vmem:[%s1435_s1] sm:$0xff]   ;;  %1017 = vmatprep.subr.bf16.mxu1 %v1102_v1  ;;  %v1107_v6 = vld [vmem:[%s1435_s1 + $0x8] sm:$0xff]   ;;  %v1111_v10 = vld [vmem:[%s1435_s1 + $0x10] sm:$0xff]  }
   0x4   :  { %v1104_v3 = vld [vmem:[%s1435_s1 + $0x80] sm:$0xff]   ;;  %990 = vmatpush3.bf16.msra.mxu0 %v1103_v2  ;;  %v1108_v7 = vld [vmem:[%s1435_s1 + $0x88] sm:$0xff]   ;;  %v1112_v11 = vld [vmem:[%s1435_s1 + $0x90] sm:$0xff]  }
   0x5   :  { %1018 = vmatpush3.bf16.msra.mxu1 %v1104_v3  ;;  %991 = vmatprep.subr.bf16.mxu0 %v1105_v4  ;;  %v1113_v12 = vld [vmem:[%s1435_s1 + $0x58] sm:$0xff]   ;;  %v1117_v16 = vld [vmem:[%s1435_s1 + $0x60] sm:$0xff]   ;;  %v1121_v20 = vld [vmem:[%s1435_s1 + $0x68] sm:$0xff]  }
   0x6   :  { %1019 = vmatprep.subr.bf16.mxu1 %v1106_v5  ;;  %v1114_v13 = vld [vmem:[%s1435_s1 + $0xd8] sm:$0xff]   ;;  %v1118_v17 = vld [vmem:[%s1435_s1 + $0xe0] sm:$0xff]   ;;  %v1122_v21 = vld [vmem:[%s1435_s1 + $0xe8] sm:$0xff]  }
   0x7   :  { %v1115_v14 = vld [vmem:[%s1435_s1 + $0x18] sm:$0xff]   ;;  %v1119_v18 = vld [vmem:[%s1435_s1 + $0x20] sm:$0xff]   ;;  %v1123_v22 = vld [vmem:[%s1435_s1 + $0x28] sm:$0xff]  }
   0x8   :  { %992 = vmatpush3.bf16.msra.mxu0 %v1107_v6  ;;  %v1116_v15 = vld [vmem:[%s1435_s1 + $0x98] sm:$0xff]   ;;  %v1120_v19 = vld [vmem:[%s1435_s1 + $0xa0] sm:$0xff]   ;;  %v1124_v23 = vld [vmem:[%s1435_s1 + $0xa8] sm:$0xff]  }
   0x9   :  { %1020 = vmatpush3.bf16.msra.mxu1 %v1108_v7  ;;  %993 = vmatprep.subr.bf16.mxu0 %v1109_v8  ;;  %v1125_v24 = vld [vmem:[%s1435_s1 + $0x70] sm:$0xff]   ;;  %v1129_v28 = vld [vmem:[%s1435_s1 + $0x78] sm:$0xff]   ;;  %v21_v32 = vld [vmem:[%s1436_s0] sm:$0xff] }
   0xa   :  { %1021 = vmatprep.subr.bf16.mxu1 %v1110_v9  ;;  %v1126_v25 = vld [vmem:[%s1435_s1 + $0xf0] sm:$0xff]   ;;  %v1130_v29 = vld [vmem:[%s1435_s1 + $0xf8] sm:$0xff]   ;;  %v25_v33 = vld [vmem:[%s1436_s0 + $0x20] sm:$0xff] }
   0xb   :  { %v1127_v26 = vld [vmem:[%s1435_s1 + $0x30] sm:$0xff]   ;;  %v1131_v30 = vld [vmem:[%s1435_s1 + $0x38] sm:$0xff]   ;;  %v22_v34 = vld [vmem:[%s1436_s0 + $0x8] sm:$0xff]  ;;  %v898_v35 = vcombine.low %v21_v32, %v25_v33  ;;  %v899_v36 = vcombine.high %v21_v32, %v25_v33 }
   0xc   :  { %994 = vmatpush3.bf16.msra.mxu0 %v1111_v10  ;;  %v1128_v27 = vld [vmem:[%s1435_s1 + $0xb0] sm:$0xff]   ;;  %v1132_v31 = vld [vmem:[%s1435_s1 + $0xb8] sm:$0xff]   ;;  %v26_v37 = vld [vmem:[%s1436_s0 + $0x28] sm:$0xff] }
   0xd   :  { %1022 = vmatpush3.bf16.msra.mxu1 %v1112_v11  ;;  %995 = vmatprep.subr.bf16.mxu0 %v1113_v12  ;;  %v900_v38 = vcombine.low %v22_v34, %v26_v37  ;;  %v901_v39 = vcombine.high %v22_v34, %v26_v37  ;;  %v1133_v40 = vld [vmem:[%s1435_s1 + $0x140] sm:$0xff]   ;;  %v1137_v44 = vld [vmem:[%s1435_s1 + $0x148] sm:$0xff]   ;;  %v1141_v48 = vld [vmem:[%s1435_s1 + $0x150] sm:$0xff]  }
   0xe   :  { %1023 = vmatprep.subr.bf16.mxu1 %v1114_v13  ;;  %645 = vmatprep.mubr.bf16.mxu0 %v899_v36  ;;  %v1134_v41 = vld [vmem:[%s1435_s1 + $0x1c0] sm:$0xff]   ;;  %v1138_v45 = vld [vmem:[%s1435_s1 + $0x1c8] sm:$0xff]   ;;  %v1142_v49 = vld [vmem:[%s1435_s1 + $0x1d0] sm:$0xff]  }
   0xf   :  { %693 = vmatprep.mubr.bf16.mxu1 %v901_v39  ;;  %v1135_v42 = vld [vmem:[%s1435_s1 + $0x100] sm:$0xff]   ;;  %v1139_v46 = vld [vmem:[%s1435_s1 + $0x108] sm:$0xff]   ;;  %v1143_v50 = vld [vmem:[%s1435_s1 + $0x110] sm:$0xff]  }
  0x10   :  { %996 = vmatpush3.bf16.msra.mxu0 %v1115_v14  ;;  %v1136_v43 = vld [vmem:[%s1435_s1 + $0x180] sm:$0xff]   ;;  %v1140_v47 = vld [vmem:[%s1435_s1 + $0x188] sm:$0xff]   ;;  %v1144_v51 = vld [vmem:[%s1435_s1 + $0x190] sm:$0xff]  }
  0x11   :  { %1024 = vmatpush3.bf16.msra.mxu1 %v1116_v15  ;;  %997 = vmatprep.subr.bf16.mxu0 %v1117_v16  ;;  %v1145_v52 = vld [vmem:[%s1435_s1 + $0x158] sm:$0xff]   ;;  %v1149_v56 = vld [vmem:[%s1435_s1 + $0x160] sm:$0xff]   ;;  %v1154_v62 = vld [vmem:[%s1435_s1 + $0x168] sm:$0xff]  }
  0x12   :  { %1025 = vmatprep.subr.bf16.mxu1 %v1118_v17  ;;  %v1146_v53 = vld [vmem:[%s1435_s1 + $0x1d8] sm:$0xff]   ;;  %v1150_v57 = vld [vmem:[%s1435_s1 + $0x1e0] sm:$0xff]   ;;  %v1155_v0 = vld [vmem:[%s1435_s1 + $0x1e8] sm:$0xff]  }
  0x13   :  { %v1147_v54 = vld [vmem:[%s1435_s1 + $0x118] sm:$0xff]   ;;  %v1151_v58 = vld [vmem:[%s1435_s1 + $0x120] sm:$0xff]   ;;  %v1157_v1 = vld [vmem:[%s1435_s1 + $0x128] sm:$0xff]  }
  0x14   :  { %998 = vmatpush3.bf16.msra.mxu0 %v1119_v18  ;;  %v1148_v55 = vld [vmem:[%s1435_s1 + $0x198] sm:$0xff]   ;;  %v1152_v59 = vld [vmem:[%s1435_s1 + $0x1a0] sm:$0xff]   ;;  %v1158_v2 = vld [vmem:[%s1435_s1 + $0x1a8] sm:$0xff]  }
  0x15   :  { %1026 = vmatpush3.bf16.msra.mxu1 %v1120_v19  ;;  %999 = vmatprep.subr.bf16.mxu0 %v1121_v20  ;;  %v29_v60 = vld [vmem:[%s1436_s0 + $0x40] sm:$0xff]  ;;  %v30_v3 = vld [vmem:[%s1436_s0 + $0x48] sm:$0xff]  ;;  %v1161_v6 = vld [vmem:[%s1435_s1 + $0x170] sm:$0xff]  }
  0x16   :  { %1027 = vmatprep.subr.bf16.mxu1 %v1122_v21  ;;  %v907_v61 = vcombine.high %v29_v60, %v29_v60  ;;  %v906_v63 = vcombine.low %v29_v60, %v29_v60  ;;  %v909_v4 = vcombine.high %v30_v3, %v30_v3  ;;  %v908_v5 = vcombine.low %v30_v3, %v30_v3  ;;  %v1162_v7 = vld [vmem:[%s1435_s1 + $0x1f0] sm:$0xff]   ;;  %v1165_v10 = vld [vmem:[%s1435_s1 + $0x178] sm:$0xff]  }
  0x17   :  { %v1163_v8 = vld [vmem:[%s1435_s1 + $0x130] sm:$0xff]   ;;  %v1166_v11 = vld [vmem:[%s1435_s1 + $0x1f8] sm:$0xff]  }
  0x18   :  { %1000 = vmatpush3.bf16.msra.mxu0 %v1123_v22  ;;  %v1164_v9 = vld [vmem:[%s1435_s1 + $0x1b0] sm:$0xff]   ;;  %v1167_v12 = vld [vmem:[%s1435_s1 + $0x138] sm:$0xff]  }
  0x19   :  { %1028 = vmatpush3.bf16.msra.mxu1 %v1124_v23  ;;  %1001 = vmatprep.subr.bf16.mxu0 %v1125_v24  ;;  %v1168_v13 = vld [vmem:[%s1435_s1 + $0x1b8] sm:$0xff]   ;;  %v23_v14 = vld [vmem:[%s1436_s0 + $0x10] sm:$0xff] }
  0x1a   :  { %1029 = vmatprep.subr.bf16.mxu1 %v1126_v25  ;;  %v27_v15 = vld [vmem:[%s1436_s0 + $0x30] sm:$0xff]  ;;  %v24_v16 = vld [vmem:[%s1436_s0 + $0x18] sm:$0xff] }
  0x1b   :  { %v902_v17 = vcombine.low %v23_v14, %v27_v15  ;;  %v903_v18 = vcombine.high %v23_v14, %v27_v15  ;;  %v28_v19 = vld [vmem:[%s1436_s0 + $0x38] sm:$0xff]  ;;  %v31_v20 = vld [vmem:[%s1436_s0 + $0x50] sm:$0xff] }
  0x1c   :  { %1002 = vmatpush3.bf16.msra.mxu0 %v1127_v26  ;;  %v32_v21 = vld [vmem:[%s1436_s0 + $0x58] sm:$0xff]  ;;  %v904_v22 = vcombine.low %v24_v16, %v28_v19  ;;  %v905_v23 = vcombine.high %v24_v16, %v28_v19  ;;  %v911_v24 = vcombine.high %v31_v20, %v31_v20  ;;  %v910_v26 = vcombine.low %v31_v20, %v31_v20 }
  0x1d   :  { %1030 = vmatpush3.bf16.msra.mxu1 %v1128_v27  ;;  %1003 = vmatprep.subr.bf16.mxu0 %v1129_v28  ;;  %v913_v25 = vcombine.high %v32_v21, %v32_v21  ;;  %v912_v27 = vcombine.low %v32_v21, %v32_v21 }
  0x1e   :  { %1031 = vmatprep.subr.bf16.mxu1 %v1130_v29 }
  0x20   :  { %1004 = vmatpush3.bf16.msra.mxu0 %v1131_v30 }
  0x21   :  { %1032 = vmatpush3.bf16.msra.mxu1 %v1132_v31  ;;  %1045 = vmatprep.subr.bf16.mxu0 %v1133_v40 }
  0x22   :  { %1073 = vmatprep.subr.bf16.mxu1 %v1134_v41 }
  0x23   :  { %646 = vmatmul.mubr.bf16.vlgmr.msra.gmra.mrb[0].mxu0 %v898_v35 }
  0x24   :  { %694 = vmatmul.mubr.bf16.vlgmr.msra.gmra.mrb[0].mxu1 %v900_v38  ;;  %1046 = vmatpush3.bf16.msra.mxu0 %v1135_v42 }
  0x25   :  { %1074 = vmatpush3.bf16.msra.mxu1 %v1136_v43  ;;  %1047 = vmatprep.subr.bf16.mxu0 %v1137_v44 }
  0x26   :  { %1075 = vmatprep.subr.bf16.mxu1 %v1138_v45  ;;  %653 = vmatprep.mubr.bf16.mxu0 %v907_v61 }
  0x27   :  { %701 = vmatprep.mubr.bf16.mxu1 %v909_v4 }
  0x28   :  { %1048 = vmatpush3.bf16.msra.mxu0 %v1139_v46 }
  0x29   :  { %1076 = vmatpush3.bf16.msra.mxu1 %v1140_v47  ;;  %1049 = vmatprep.subr.bf16.mxu0 %v1141_v48 }
  0x2a   :  { %1077 = vmatprep.subr.bf16.mxu1 %v1142_v49 }
  0x2b   :  { %654 = vmatmul.mubr.bf16.gmra.mrb[4].mxu0 %v906_v63 }
  0x2c   :  { %1050 = vmatpush3.bf16.msra.mxu0 %v1143_v50  ;;  %702 = vmatmul.mubr.bf16.gmra.mrb[4].mxu1 %v908_v5 }
  0x2d   :  { %1078 = vmatpush3.bf16.msra.mxu1 %v1144_v51  ;;  %1051 = vmatprep.subr.bf16.mxu0 %v1145_v52 }
  0x2e   :  { %1079 = vmatprep.subr.bf16.mxu1 %v1146_v53  ;;  %741 = vmatprep.mubr.bf16.mxu0 %v903_v18 }
  0x2f   :  { %789 = vmatprep.mubr.bf16.mxu1 %v905_v23 }
  0x30   :  { %1052 = vmatpush3.bf16.msra.mxu0 %v1147_v54 }
  0x31   :  { %1080 = vmatpush3.bf16.msra.mxu1 %v1148_v55  ;;  %1053 = vmatprep.subr.bf16.mxu0 %v1149_v56 }
  0x32   :  { %1081 = vmatprep.subr.bf16.mxu1 %v1150_v57 }
  0x34   :  { %1054 = vmatpush3.bf16.msra.mxu0 %v1151_v58 }
  0x35   :  { %1082 = vmatpush3.bf16.msra.mxu1 %v1152_v59  ;;  %1055 = vmatprep.subr.bf16.mxu0 %v1154_v62 }
  0x36   :  { %1083 = vmatprep.subr.bf16.mxu1 %v1155_v0 }
  0x38   :  { %1056 = vmatpush3.bf16.msra.mxu0 %v1157_v1 }
  0x39   :  { %1084 = vmatpush3.bf16.msra.mxu1 %v1158_v2  ;;  %1057 = vmatprep.subr.bf16.mxu0 %v1161_v6 }
  0x3a   :  { %1085 = vmatprep.subr.bf16.mxu1 %v1162_v7 }
  0x3c   :  { %1058 = vmatpush3.bf16.msra.mxu0 %v1163_v8 }
  0x3d   :  { %1086 = vmatpush3.bf16.msra.mxu1 %v1164_v9  ;;  %1059 = vmatprep.subr.bf16.mxu0 %v1165_v10 }
  0x3e   :  { %1087 = vmatprep.subr.bf16.mxu1 %v1166_v11 }
  0x40   :  { %1060 = vmatpush3.bf16.msra.mxu0 %v1167_v12 }
  0x41   :  { %1088 = vmatpush3.bf16.msra.mxu1 %v1168_v13 }
  0x43   :  { %742 = vmatmul.mubr.bf16.vlgmr.msra.gmra.mrb[8].mxu0 %v902_v17 }
  0x44   :  { %790 = vmatmul.mubr.bf16.vlgmr.msra.gmra.mrb[8].mxu1 %v904_v22  ;;  %749 = vmatprep.mubr.bf16.mxu0 %v911_v24 }
  0x45   :  { %797 = vmatprep.mubr.bf16.mxu1 %v913_v25 }
  0x4b   :  { %750 = vmatmul.mubr.bf16.gmra.mrb[12].mxu0 %v910_v26 }
  0x4c   :  { %798 = vmatmul.mubr.bf16.gmra.mrb[12].mxu1 %v912_v27 }
  0xf6   :  { %v1005_v28 = vpop.f32.mrb[0].mxu0 }
  0xf7   :  { %v1033_v29 = vpop.f32.mrb[0].mxu1  ;;  %v1006_v30 = vpop.f32.mrb[1].mxu0 }
  0xf8   :  { %v1007_v31 = vadd.f32 %v1006_v30, %v1005_v28  ;;  %v1034_v32 = vpop.f32.mrb[1].mxu1  ;;  %v1008_v33 = vpop.f32.mrb[2].mxu0 }
  0xf9   :  { %v1035_v34 = vadd.f32 %v1034_v32, %v1033_v29  ;;  %v1036_v35 = vpop.f32.mrb[2].mxu1  ;;  %v1009_v36 = vpop.f32.mrb[3].mxu0 }
  0xfa   :  { %v1010_v37 = vadd.f32 %v1009_v36, %v1008_v33  ;;  %v1037_v38 = vpop.f32.mrb[3].mxu1 }
  0xfb   :  { %v696_v39 = vadd.f32 %v1035_v34, %v1007_v31  ;;  %v1038_v40 = vadd.f32 %v1037_v38, %v1036_v35 }
  0xfd   :  { %v699_v41 = vadd.f32 %v1038_v40, %v1010_v37 }
  0xfe   :  { %v1011_v42 = vpop.f32.mrb[4].mxu0 }
  0xff   :  { %v1012_v43 = vpop.f32.mrb[5].mxu0  ;;  %v1039_v47 = vpop.f32.mrb[4].mxu1 }
 0x100   :  { %v1013_v44 = vadd.f32 %v1012_v43, %v1011_v42  ;;  %v1014_v45 = vpop.f32.mrb[6].mxu0  ;;  %v1040_v48 = vpop.f32.mrb[5].mxu1  ;;  %v855_v42 = vlaneseq }
 0x101   :  { %v1015_v46 = vpop.f32.mrb[7].mxu0  ;;  %v1041_v49 = vadd.f32 %v1040_v48, %v1039_v47  ;;  %v1042_v50 = vpop.f32.mrb[6].mxu1  ;;  %v849_v48 = vld [vmem:[%s1437_s2 + $0x1] sm:$0x1] }
 0x102   :  { %v1043_v51 = vpop.f32.mrb[7].mxu1  ;;  %v856_v43 = vshrl.u32 %v855_v42, 7 }
 0x103   :  { %v704_v52 = vadd.f32 %v1041_v49, %v1013_v44  ;;  %v845_v44 = vld [vmem:[%s1437_s2] sm:$0x1] }
 0x104   :  { %v857_v45 = vsub.s32 0, %v856_v43 }
 0x116   :  { %v1061_v53 = vpop.f32.mrb[8].mxu0 }
 0x117   :  { %v1089_v54 = vpop.f32.mrb[8].mxu1  ;;  %v1062_v55 = vpop.f32.mrb[9].mxu0 }
 0x118   :  { %v1063_v56 = vadd.f32 %v1062_v55, %v1061_v53  ;;  %v1090_v57 = vpop.f32.mrb[9].mxu1  ;;  %v1064_v58 = vpop.f32.mrb[10].mxu0 }
 0x119   :  { %v1091_v59 = vadd.f32 %v1090_v57, %v1089_v54  ;;  %v1092_v60 = vpop.f32.mrb[10].mxu1  ;;  %v1065_v61 = vpop.f32.mrb[11].mxu0 }
 0x11a   :  { %v744_v62 = vadd.f32 %v1063_v56, %v696_v39  ;;  %v1066_v63 = vadd.f32 %v1065_v61, %v1064_v58  ;;  %v1093_v0 = vpop.f32.mrb[11].mxu1 }
 0x11b   :  { %v1094_v1 = vadd.f32 %v1093_v0, %v1092_v60 }
 0x11c   :  { %v792_v2 = vadd.f32 %v1091_v59, %v744_v62  ;;  %v747_v3 = vadd.f32 %v1066_v63, %v699_v41 }
 0x11e   :  { %v795_v4 = vadd.f32 %v1094_v1, %v747_v3  ;;  %v1067_v5 = vpop.f32.mrb[12].mxu0  ;;  %v812_v8 = vmul.f32 %v792_v2, %v792_v2 }
 0x11f   :  { %v1095_v6 = vpop.f32.mrb[12].mxu1  ;;  %v1068_v7 = vpop.f32.mrb[13].mxu0 }
 0x120   :  { %v810_v9 = vadd.f32 %v795_v4, %v792_v2  ;;  %v813_v10 = vmul.f32 %v795_v4, %v795_v4  ;;  %v1069_v11 = vadd.f32 %v1068_v7, %v1067_v5  ;;  %v1096_v12 = vpop.f32.mrb[13].mxu1  ;;  %v1070_v13 = vpop.f32.mrb[14].mxu0 }
 0x121   :  { %v1097_v14 = vadd.f32 %v1096_v12, %v1095_v6  ;;  %v1098_v15 = vpop.f32.mrb[14].mxu1  ;;  %v1071_v16 = vpop.f32.mrb[15].mxu0 }
 0x122   :  { %v815_v17 = vadd.f32 %v813_v10, %v812_v8  ;;  %v752_v18 = vadd.f32 %v1069_v11, %v704_v52  ;;  %v1099_v19 = vpop.f32.mrb[15].mxu1 }
 0x124   :  { %v800_v20 = vadd.f32 %v1097_v14, %v752_v18 }
 0x126   :  { %v811_v21 = vadd.f32 %v810_v9, %v800_v20  ;;  %v814_v22 = vmul.f32 %v800_v20, %v800_v20 }
 0x128   :  { %v816_v23 = vadd.f32 %v815_v17, %v814_v22  ;;  %v827_v24 = vrot.slane %v811_v21, 4 }
 0x12a   :  { %v828_v25 = vadd.f32 %v827_v24, %v811_v21  ;;  %v835_v26 = vrot.slane %v816_v23, 4 }
 0x12c   :  { %v829_v27 = vrot.slane %v828_v25, 2  ;;  %v836_v28 = vadd.f32 %v835_v26, %v816_v23 }
 0x12e   :  { %v830_v29 = vadd.f32 %v829_v27, %v828_v25  ;;  %v837_v30 = vrot.slane %v836_v28, 2 }
 0x130   :  { %v831_v31 = vrot.slane %v830_v29, 1  ;;  %v838_v32 = vadd.f32 %v837_v30, %v836_v28 }
 0x132   :  { %v832_v33 = vadd.f32 %v831_v31, %v830_v29  ;;  %v839_v34 = vrot.slane %v838_v32, 1 }
 0x134   :  { %v833_v35 = vmul.f32 0.055555556, %v832_v33  ;;  %v840_v36 = vadd.f32 %v839_v34, %v838_v32 }
 0x136   :  { %v841_v37 = vmul.f32 0.055555556, %v840_v36  ;;  %v842_v38 = vmul.f32 %v833_v35, %v833_v35 }
 0x138   :  { %v843_v39 = vsub.f32 %v841_v37, %v842_v38 }
 0x13a   :  { %v844_v40 = vmax.f32 %v843_v39, 0.0 }
 0x13c   :  { %v846_v41 = vadd.f32 1e-05, %v844_v40 }
 0x13e   :  { %1173 = vrsqrt.f32 %v846_v41 }
 0x148   :  { %v1174_v46 = vpop.eup %1173 }
 0x149   :  { %v848_v47 = vmul.f32 %v1174_v46, %v845_v44 }
 0x14b   :  { %v850_v49 = vmul.f32 %v848_v47, %v833_v35  ;;  %v858_v50 = vrot.slane %v848_v47, %v857_v45 }
 0x14d   :  { %v851_v51 = vsub.f32 %v849_v48, %v850_v49  ;;  %v859_v52 = vmul.f32 %v858_v50, %v792_v2  ;;  %v860_v53 = vmul.f32 %v858_v50, %v795_v4  ;;  %v861_v54 = vmul.f32 %v858_v50, %v800_v20 }
 0x14f   :  { %v865_v55 = vrot.slane %v851_v51, %v857_v45 }
 0x151   :  { %v866_v56 = vadd.f32 %v865_v55, %v859_v52  ;;  %v867_v57 = vadd.f32 %v865_v55, %v860_v53  ;;  %v868_v58 = vadd.f32 %v865_v55, %v861_v54 }
 0x153   :  { %vm869_vm0 = vcmp.ge.f32.partialorder %v866_v56, 0.0  ;;  %vm870_vm1 = vcmp.ge.f32.partialorder %v867_v57, 0.0  ;;  %vm871_vm2 = vcmp.ge.f32.partialorder %v868_v58, 0.0  ;;  %v872_v59 = vmul.f32 0.2, %v866_v56 }
 0x154   :  { %v873_v60 = vmul.f32 0.2, %v867_v57  ;;  %v874_v61 = vmul.f32 0.2, %v868_v58 }
 0x155   :  { %v875_v62 = vsel %vm869_vm0, %v866_v56, %v872_v59 }
 0x156   :  { %v876_v63 = vsel %vm870_vm1, %v867_v57, %v873_v60  ;;  %v877_v0 = vsel %vm871_vm2, %v868_v58, %v874_v61 }
 0x157   :  { %v983_v1 = vpack.c.bf16 %v877_v0, %v877_v0  ;;  %v987_v3 = vpack.c.bf16 %v876_v63, %v875_v62 }
 0x159   :  { %988 = vst [vmem:[%s1438_s3] sm:$0xff] %v987_v3   ;;  %893 = vst [vmem:[%s1438_s3 + $0x8] sm:$0xf] %v983_v1 }

// kernel: _lambda_.33
= control target key start
LH: loop header
LB: loop body
LE: loop exit
PB: predicated region body
PF: predicated region fallthrough
CT: control target
= control target key end

     0   :  { %s2664_s1 = inlined_call_operand.vmem [shape: bf16[2048,128], index: 1, kind: input, shape index: {}]   ;;  %s2665_s0 = inlined_call_operand.vmem [shape: bf16[32,2048], index: 0, kind: input, shape index: {}]   ;;  %s2666_s2 = inlined_call_operand.vmem [shape: f32[8,128], index: 2, kind: input, shape index: {}]   ;;  %s2667_s3 = inlined_call_operand.vmem [shape: f32[32,128], index: 3, kind: output, shape index: {}]  }
   0x1   :  { %v2021_v0 = vld [vmem:[%s2664_s1 + $0x40] sm:$0xff]   ;;  %v2025_v4 = vld [vmem:[%s2664_s1 + $0x48] sm:$0xff]   ;;  %v2029_v8 = vld [vmem:[%s2664_s1 + $0x50] sm:$0xff]  }
   0x2   :  { %v2022_v1 = vld [vmem:[%s2664_s1 + $0xc0] sm:$0xff]   ;;  %1797 = vmatprep.subr.bf16.mxu0 %v2021_v0  ;;  %v2026_v5 = vld [vmem:[%s2664_s1 + $0xc8] sm:$0xff]   ;;  %v2030_v9 = vld [vmem:[%s2664_s1 + $0xd0] sm:$0xff]  }
   0x3   :  { %v2023_v2 = vld [vmem:[%s2664_s1] sm:$0xff]   ;;  %1825 = vmatprep.subr.bf16.mxu1 %v2022_v1  ;;  %v2027_v6 = vld [vmem:[%s2664_s1 + $0x8] sm:$0xff]   ;;  %v2031_v10 = vld [vmem:[%s2664_s1 + $0x10] sm:$0xff]  }
   0x4   :  { %v2024_v3 = vld [vmem:[%s2664_s1 + $0x80] sm:$0xff]   ;;  %1798 = vmatpush3.bf16.msra.mxu0 %v2023_v2  ;;  %v2028_v7 = vld [vmem:[%s2664_s1 + $0x88] sm:$0xff]   ;;  %v2032_v11 = vld [vmem:[%s2664_s1 + $0x90] sm:$0xff]  }
   0x5   :  { %1826 = vmatpush3.bf16.msra.mxu1 %v2024_v3  ;;  %1799 = vmatprep.subr.bf16.mxu0 %v2025_v4  ;;  %v2033_v12 = vld [vmem:[%s2664_s1 + $0x58] sm:$0xff]   ;;  %v2037_v16 = vld [vmem:[%s2664_s1 + $0x60] sm:$0xff]   ;;  %v2041_v20 = vld [vmem:[%s2664_s1 + $0x68] sm:$0xff]  }
   0x6   :  { %1827 = vmatprep.subr.bf16.mxu1 %v2026_v5  ;;  %v2034_v13 = vld [vmem:[%s2664_s1 + $0xd8] sm:$0xff]   ;;  %v2038_v17 = vld [vmem:[%s2664_s1 + $0xe0] sm:$0xff]   ;;  %v2042_v21 = vld [vmem:[%s2664_s1 + $0xe8] sm:$0xff]  }
   0x7   :  { %v2035_v14 = vld [vmem:[%s2664_s1 + $0x18] sm:$0xff]   ;;  %v2039_v18 = vld [vmem:[%s2664_s1 + $0x20] sm:$0xff]   ;;  %v2043_v22 = vld [vmem:[%s2664_s1 + $0x28] sm:$0xff]  }
   0x8   :  { %1800 = vmatpush3.bf16.msra.mxu0 %v2027_v6  ;;  %v2036_v15 = vld [vmem:[%s2664_s1 + $0x98] sm:$0xff]   ;;  %v2040_v19 = vld [vmem:[%s2664_s1 + $0xa0] sm:$0xff]   ;;  %v2044_v23 = vld [vmem:[%s2664_s1 + $0xa8] sm:$0xff]  }
   0x9   :  { %1828 = vmatpush3.bf16.msra.mxu1 %v2028_v7  ;;  %1801 = vmatprep.subr.bf16.mxu0 %v2029_v8  ;;  %v2045_v24 = vld [vmem:[%s2664_s1 + $0x70] sm:$0xff]   ;;  %v2049_v28 = vld [vmem:[%s2664_s1 + $0x78] sm:$0xff]   ;;  %v15_v32 = vld [vmem:[%s2665_s0] sm:$0xff] }
   0xa   :  { %1829 = vmatprep.subr.bf16.mxu1 %v2030_v9  ;;  %v2046_v25 = vld [vmem:[%s2664_s1 + $0xf0] sm:$0xff]   ;;  %v2050_v29 = vld [vmem:[%s2664_s1 + $0xf8] sm:$0xff]   ;;  %v23_v33 = vld [vmem:[%s2665_s0 + $0x40] sm:$0xff] }
   0xb   :  { %v2047_v26 = vld [vmem:[%s2664_s1 + $0x30] sm:$0xff]   ;;  %v2051_v30 = vld [vmem:[%s2664_s1 + $0x38] sm:$0xff]   ;;  %v16_v34 = vld [vmem:[%s2665_s0 + $0x8] sm:$0xff]  ;;  %v1637_v35 = vcombine.low %v15_v32, %v23_v33  ;;  %v1638_v36 = vcombine.high %v15_v32, %v23_v33 }
   0xc   :  { %1802 = vmatpush3.bf16.msra.mxu0 %v2031_v10  ;;  %v2048_v27 = vld [vmem:[%s2664_s1 + $0xb0] sm:$0xff]   ;;  %v2052_v31 = vld [vmem:[%s2664_s1 + $0xb8] sm:$0xff]   ;;  %v24_v37 = vld [vmem:[%s2665_s0 + $0x48] sm:$0xff] }
   0xd   :  { %1830 = vmatpush3.bf16.msra.mxu1 %v2032_v11  ;;  %1803 = vmatprep.subr.bf16.mxu0 %v2033_v12  ;;  %v1639_v38 = vcombine.low %v16_v34, %v24_v37  ;;  %v1640_v39 = vcombine.high %v16_v34, %v24_v37  ;;  %v2053_v40 = vld [vmem:[%s2664_s1 + $0x140] sm:$0xff]   ;;  %v2057_v44 = vld [vmem:[%s2664_s1 + $0x148] sm:$0xff]   ;;  %v2061_v48 = vld [vmem:[%s2664_s1 + $0x150] sm:$0xff]  }
   0xe   :  { %1831 = vmatprep.subr.bf16.mxu1 %v2034_v13  ;;  %1268 = vmatprep.mubr.bf16.mxu0 %v1638_v36  ;;  %v2054_v41 = vld [vmem:[%s2664_s1 + $0x1c0] sm:$0xff]   ;;  %v2058_v45 = vld [vmem:[%s2664_s1 + $0x1c8] sm:$0xff]   ;;  %v2062_v49 = vld [vmem:[%s2664_s1 + $0x1d0] sm:$0xff]  }
   0xf   :  { %1317 = vmatprep.mubr.bf16.mxu1 %v1640_v39  ;;  %v2055_v42 = vld [vmem:[%s2664_s1 + $0x100] sm:$0xff]   ;;  %v2059_v46 = vld [vmem:[%s2664_s1 + $0x108] sm:$0xff]   ;;  %v2063_v50 = vld [vmem:[%s2664_s1 + $0x110] sm:$0xff]  }
  0x10   :  { %1804 = vmatpush3.bf16.msra.mxu0 %v2035_v14  ;;  %v2056_v43 = vld [vmem:[%s2664_s1 + $0x180] sm:$0xff]   ;;  %v2060_v47 = vld [vmem:[%s2664_s1 + $0x188] sm:$0xff]   ;;  %v2064_v51 = vld [vmem:[%s2664_s1 + $0x190] sm:$0xff]  }
  0x11   :  { %1832 = vmatpush3.bf16.msra.mxu1 %v2036_v15  ;;  %1805 = vmatprep.subr.bf16.mxu0 %v2037_v16  ;;  %v2065_v52 = vld [vmem:[%s2664_s1 + $0x158] sm:$0xff]   ;;  %v2069_v56 = vld [vmem:[%s2664_s1 + $0x160] sm:$0xff]   ;;  %v2073_v60 = vld [vmem:[%s2664_s1 + $0x168] sm:$0xff]  }
  0x12   :  { %1833 = vmatprep.subr.bf16.mxu1 %v2038_v17  ;;  %v2066_v53 = vld [vmem:[%s2664_s1 + $0x1d8] sm:$0xff]   ;;  %v2070_v57 = vld [vmem:[%s2664_s1 + $0x1e0] sm:$0xff]   ;;  %v2074_v61 = vld [vmem:[%s2664_s1 + $0x1e8] sm:$0xff]  }
  0x13   :  { %v2067_v54 = vld [vmem:[%s2664_s1 + $0x118] sm:$0xff]   ;;  %v2071_v58 = vld [vmem:[%s2664_s1 + $0x120] sm:$0xff]   ;;  %v2075_v1 = vld [vmem:[%s2664_s1 + $0x128] sm:$0xff]  }
  0x14   :  { %1806 = vmatpush3.bf16.msra.mxu0 %v2039_v18  ;;  %v2068_v55 = vld [vmem:[%s2664_s1 + $0x198] sm:$0xff]   ;;  %v2072_v59 = vld [vmem:[%s2664_s1 + $0x1a0] sm:$0xff]   ;;  %v2076_v3 = vld [vmem:[%s2664_s1 + $0x1a8] sm:$0xff]  }
  0x15   :  { %1834 = vmatpush3.bf16.msra.mxu1 %v2040_v19  ;;  %1807 = vmatprep.subr.bf16.mxu0 %v2041_v20  ;;  %v31_v62 = vld [vmem:[%s2665_s0 + $0x80] sm:$0xff]  ;;  %v32_v4 = vld [vmem:[%s2665_s0 + $0x88] sm:$0xff]  ;;  %v2077_v8 = vld [vmem:[%s2664_s1 + $0x170] sm:$0xff]  }
  0x16   :  { %1835 = vmatprep.subr.bf16.mxu1 %v2042_v21  ;;  %v39_v63 = vld [vmem:[%s2665_s0 + $0xc0] sm:$0xff]  ;;  %v40_v5 = vld [vmem:[%s2665_s0 + $0xc8] sm:$0xff]  ;;  %v2078_v9 = vld [vmem:[%s2664_s1 + $0x1f0] sm:$0xff]  }
  0x17   :  { %v1654_v0 = vcombine.high %v31_v62, %v39_v63  ;;  %v1653_v2 = vcombine.low %v31_v62, %v39_v63  ;;  %v1656_v6 = vcombine.high %v32_v4, %v40_v5  ;;  %v1655_v7 = vcombine.low %v32_v4, %v40_v5  ;;  %v2079_v10 = vld [vmem:[%s2664_s1 + $0x130] sm:$0xff]   ;;  %v2081_v12 = vld [vmem:[%s2664_s1 + $0x178] sm:$0xff]   ;;  %v20_v4 = vld [vmem:[%s2665_s0 + $0x28] sm:$0xff] }
  0x18   :  { %1808 = vmatpush3.bf16.msra.mxu0 %v2043_v22  ;;  %v2080_v11 = vld [vmem:[%s2664_s1 + $0x1b0] sm:$0xff]   ;;  %v2082_v13 = vld [vmem:[%s2664_s1 + $0x1f8] sm:$0xff]   ;;  %v28_v5 = vld [vmem:[%s2665_s0 + $0x68] sm:$0xff] }
  0x19   :  { %1836 = vmatpush3.bf16.msra.mxu1 %v2044_v23  ;;  %1809 = vmatprep.subr.bf16.mxu0 %v2045_v24  ;;  %v2083_v14 = vld [vmem:[%s2664_s1 + $0x138] sm:$0xff]   ;;  %v17_v16 = vld [vmem:[%s2665_s0 + $0x10] sm:$0xff]  ;;  %v2085_v24 = vld [vmem:[%s2664_s1 + $0x240] sm:$0xff]  }
  0x1a   :  { %1837 = vmatprep.subr.bf16.mxu1 %v2046_v25  ;;  %v2084_v15 = vld [vmem:[%s2664_s1 + $0x1b8] sm:$0xff]   ;;  %v25_v17 = vld [vmem:[%s2665_s0 + $0x50] sm:$0xff]  ;;  %v2086_v25 = vld [vmem:[%s2664_s1 + $0x2c0] sm:$0xff]  }
  0x1b   :  { %v18_v18 = vld [vmem:[%s2665_s0 + $0x18] sm:$0xff]  ;;  %v1641_v20 = vcombine.low %v17_v16, %v25_v17  ;;  %v1642_v21 = vcombine.high %v17_v16, %v25_v17  ;;  %v33_v32 = vld [vmem:[%s2665_s0 + $0x90] sm:$0xff]  ;;  %v35_v16 = vld [vmem:[%s2665_s0 + $0xa0] sm:$0xff] }
  0x1c   :  { %1810 = vmatpush3.bf16.msra.mxu0 %v2047_v26  ;;  %v26_v19 = vld [vmem:[%s2665_s0 + $0x58] sm:$0xff]  ;;  %v2087_v26 = vld [vmem:[%s2664_s1 + $0x200] sm:$0xff]   ;;  %v41_v33 = vld [vmem:[%s2665_s0 + $0xd0] sm:$0xff] }
  0x1d   :  { %1838 = vmatpush3.bf16.msra.mxu1 %v2048_v27  ;;  %1811 = vmatprep.subr.bf16.mxu0 %v2049_v28  ;;  %v1643_v22 = vcombine.low %v18_v18, %v26_v19  ;;  %v1644_v23 = vcombine.high %v18_v18, %v26_v19  ;;  %v2088_v27 = vld [vmem:[%s2664_s1 + $0x280] sm:$0xff]   ;;  %v2089_v28 = vld [vmem:[%s2664_s1 + $0x248] sm:$0xff]   ;;  %v1658_v34 = vcombine.high %v33_v32, %v41_v33  ;;  %v2093_v36 = vld [vmem:[%s2664_s1 + $0x250] sm:$0xff]  }
  0x1e   :  { %1839 = vmatprep.subr.bf16.mxu1 %v2050_v29  ;;  %v2090_v29 = vld [vmem:[%s2664_s1 + $0x2c8] sm:$0xff]   ;;  %v2094_v37 = vld [vmem:[%s2664_s1 + $0x2d0] sm:$0xff]   ;;  %v42_v39 = vld [vmem:[%s2665_s0 + $0xd8] sm:$0xff] }
  0x1f   :  { %v2115_v62 = vld [vmem:[%s2664_s1 + $0x238] sm:$0xff]   ;;  %v43_v17 = vld [vmem:[%s2665_s0 + $0xe0] sm:$0xff] }
  0x20   :  { %1812 = vmatpush3.bf16.msra.mxu0 %v2051_v30  ;;  %v2091_v30 = vld [vmem:[%s2664_s1 + $0x208] sm:$0xff]   ;;  %v2116_v63 = vld [vmem:[%s2664_s1 + $0x2b8] sm:$0xff]   ;;  %v1662_v18 = vcombine.high %v35_v16, %v43_v17  ;;  %v1661_v19 = vcombine.low %v35_v16, %v43_v17 }
  0x21   :  { %1840 = vmatpush3.bf16.msra.mxu1 %v2052_v31  ;;  %1853 = vmatprep.subr.bf16.mxu0 %v2053_v40  ;;  %v2092_v31 = vld [vmem:[%s2664_s1 + $0x288] sm:$0xff]  }
  0x22   :  { %1881 = vmatprep.subr.bf16.mxu1 %v2054_v41  ;;  %v2095_v41 = vld [vmem:[%s2664_s1 + $0x210] sm:$0xff]  }
  0x23   :  { %1269 = vmatmul.mubr.bf16.vlgmr.msra.gmra.mrb[0].mxu0 %v1637_v35  ;;  %v1657_v35 = vcombine.low %v33_v32, %v41_v33  ;;  %v2133_v32 = vld [vmem:[%s2664_s1 + $0x360] sm:$0xff]  }
  0x24   :  { %1318 = vmatmul.mubr.bf16.vlgmr.msra.gmra.mrb[0].mxu1 %v1639_v38  ;;  %1854 = vmatpush3.bf16.msra.mxu0 %v2055_v42  ;;  %v34_v38 = vld [vmem:[%s2665_s0 + $0x98] sm:$0xff]  ;;  %v2134_v33 = vld [vmem:[%s2664_s1 + $0x3e0] sm:$0xff]  }
  0x25   :  { %1882 = vmatpush3.bf16.msra.mxu1 %v2056_v43  ;;  %1855 = vmatprep.subr.bf16.mxu0 %v2057_v44  ;;  %v1660_v40 = vcombine.high %v34_v38, %v42_v39  ;;  %v1659_v42 = vcombine.low %v34_v38, %v42_v39  ;;  %v2096_v43 = vld [vmem:[%s2664_s1 + $0x290] sm:$0xff]   ;;  %v2097_v44 = vld [vmem:[%s2664_s1 + $0x258] sm:$0xff]   ;;  %v2139_v38 = vld [vmem:[%s2664_s1 + $0x328] sm:$0xff]  }
  0x26   :  { %1883 = vmatprep.subr.bf16.mxu1 %v2058_v45  ;;  %1276 = vmatprep.mubr.bf16.mxu0 %v1654_v0  ;;  %v2098_v45 = vld [vmem:[%s2664_s1 + $0x2d8] sm:$0xff]   ;;  %v19_v0 = vld [vmem:[%s2665_s0 + $0x20] sm:$0xff]  ;;  %v2140_v39 = vld [vmem:[%s2664_s1 + $0x3a8] sm:$0xff]  }
  0x27   :  { %1325 = vmatprep.mubr.bf16.mxu1 %v1656_v6  ;;  %v1647_v6 = vcombine.low %v20_v4, %v28_v5 }
  0x28   :  { %1856 = vmatpush3.bf16.msra.mxu0 %v2059_v46  ;;  %v2099_v46 = vld [vmem:[%s2664_s1 + $0x218] sm:$0xff]  }
  0x29   :  { %1884 = vmatpush3.bf16.msra.mxu1 %v2060_v47  ;;  %1857 = vmatprep.subr.bf16.mxu0 %v2061_v48  ;;  %v2100_v47 = vld [vmem:[%s2664_s1 + $0x298] sm:$0xff]   ;;  %v2101_v48 = vld [vmem:[%s2664_s1 + $0x260] sm:$0xff]  }
  0x2a   :  { %1885 = vmatprep.subr.bf16.mxu1 %v2062_v49  ;;  %v2102_v49 = vld [vmem:[%s2664_s1 + $0x2e0] sm:$0xff]  }
  0x2b   :  { %1277 = vmatmul.mubr.bf16.gmra.mrb[4].mxu0 %v1653_v2 }
  0x2c   :  { %1858 = vmatpush3.bf16.msra.mxu0 %v2063_v50  ;;  %1326 = vmatmul.mubr.bf16.gmra.mrb[4].mxu1 %v1655_v7  ;;  %v2103_v50 = vld [vmem:[%s2664_s1 + $0x220] sm:$0xff]   ;;  %v1648_v7 = vcombine.high %v20_v4, %v28_v5 }
  0x2d   :  { %1886 = vmatpush3.bf16.msra.mxu1 %v2064_v51  ;;  %1859 = vmatprep.subr.bf16.mxu0 %v2065_v52  ;;  %v2104_v51 = vld [vmem:[%s2664_s1 + $0x2a0] sm:$0xff]   ;;  %v2105_v52 = vld [vmem:[%s2664_s1 + $0x268] sm:$0xff]  }
  0x2e   :  { %1887 = vmatprep.subr.bf16.mxu1 %v2066_v53  ;;  %1366 = vmatprep.mubr.bf16.mxu0 %v1642_v21  ;;  %v2106_v53 = vld [vmem:[%s2664_s1 + $0x2e8] sm:$0xff]   ;;  %v2126_v21 = vld [vmem:[%s2664_s1 + $0x3d0] sm:$0xff]  }
  0x2f   :  { %1415 = vmatprep.mubr.bf16.mxu1 %v1644_v23  ;;  %v44_v23 = vld [vmem:[%s2665_s0 + $0xe8] sm:$0xff] }
  0x30   :  { %1860 = vmatpush3.bf16.msra.mxu0 %v2067_v54  ;;  %v2107_v54 = vld [vmem:[%s2664_s1 + $0x228] sm:$0xff]  }
  0x31   :  { %1888 = vmatpush3.bf16.msra.mxu1 %v2068_v55  ;;  %1861 = vmatprep.subr.bf16.mxu0 %v2069_v56  ;;  %v2108_v55 = vld [vmem:[%s2664_s1 + $0x2a8] sm:$0xff]   ;;  %v2109_v56 = vld [vmem:[%s2664_s1 + $0x270] sm:$0xff]  }
  0x32   :  { %1889 = vmatprep.subr.bf16.mxu1 %v2070_v57  ;;  %v2110_v57 = vld [vmem:[%s2664_s1 + $0x2f0] sm:$0xff]  }
  0x34   :  { %1862 = vmatpush3.bf16.msra.mxu0 %v2071_v58  ;;  %v2111_v58 = vld [vmem:[%s2664_s1 + $0x230] sm:$0xff]  }
  0x35   :  { %1890 = vmatpush3.bf16.msra.mxu1 %v2072_v59  ;;  %1863 = vmatprep.subr.bf16.mxu0 %v2073_v60  ;;  %v2112_v59 = vld [vmem:[%s2664_s1 + $0x2b0] sm:$0xff]   ;;  %v2113_v60 = vld [vmem:[%s2664_s1 + $0x278] sm:$0xff]  }
  0x36   :  { %1891 = vmatprep.subr.bf16.mxu1 %v2074_v61  ;;  %v2114_v61 = vld [vmem:[%s2664_s1 + $0x2f8] sm:$0xff]  }
  0x38   :  { %1864 = vmatpush3.bf16.msra.mxu0 %v2075_v1  ;;  %v27_v1 = vld [vmem:[%s2665_s0 + $0x60] sm:$0xff] }
  0x39   :  { %1892 = vmatpush3.bf16.msra.mxu1 %v2076_v3  ;;  %1865 = vmatprep.subr.bf16.mxu0 %v2077_v8  ;;  %v1645_v2 = vcombine.low %v19_v0, %v27_v1  ;;  %v1646_v3 = vcombine.high %v19_v0, %v27_v1  ;;  %v2117_v8 = vld [vmem:[%s2664_s1 + $0x340] sm:$0xff]  }
  0x3a   :  { %1893 = vmatprep.subr.bf16.mxu1 %v2078_v9  ;;  %v2118_v9 = vld [vmem:[%s2664_s1 + $0x3c0] sm:$0xff]  }
  0x3c   :  { %1866 = vmatpush3.bf16.msra.mxu0 %v2079_v10  ;;  %v2119_v10 = vld [vmem:[%s2664_s1 + $0x300] sm:$0xff]  }
  0x3d   :  { %1894 = vmatpush3.bf16.msra.mxu1 %v2080_v11  ;;  %1867 = vmatprep.subr.bf16.mxu0 %v2081_v12  ;;  %v2120_v11 = vld [vmem:[%s2664_s1 + $0x380] sm:$0xff]   ;;  %v2121_v12 = vld [vmem:[%s2664_s1 + $0x348] sm:$0xff]  }
  0x3e   :  { %1895 = vmatprep.subr.bf16.mxu1 %v2082_v13  ;;  %v2122_v13 = vld [vmem:[%s2664_s1 + $0x3c8] sm:$0xff]  }
  0x40   :  { %1868 = vmatpush3.bf16.msra.mxu0 %v2083_v14  ;;  %v2123_v14 = vld [vmem:[%s2664_s1 + $0x308] sm:$0xff]  }
  0x41   :  { %1896 = vmatpush3.bf16.msra.mxu1 %v2084_v15  ;;  %1909 = vmatprep.subr.bf16.mxu0 %v2085_v24  ;;  %v2124_v15 = vld [vmem:[%s2664_s1 + $0x388] sm:$0xff]  }
  0x42   :  { %1937 = vmatprep.subr.bf16.mxu1 %v2086_v25  ;;  %v2127_v25 = vld [vmem:[%s2664_s1 + $0x310] sm:$0xff]  }
  0x43   :  { %1367 = vmatmul.mubr.bf16.vlgmr.msra.gmra.mrb[8].mxu0 %v1641_v20  ;;  %v2125_v20 = vld [vmem:[%s2664_s1 + $0x350] sm:$0xff]  }
  0x44   :  { %1416 = vmatmul.mubr.bf16.vlgmr.msra.gmra.mrb[8].mxu1 %v1643_v22  ;;  %1910 = vmatpush3.bf16.msra.mxu0 %v2087_v26  ;;  %v36_v22 = vld [vmem:[%s2665_s0 + $0xa8] sm:$0xff] }
  0x45   :  { %1938 = vmatpush3.bf16.msra.mxu1 %v2088_v27  ;;  %1911 = vmatprep.subr.bf16.mxu0 %v2089_v28  ;;  %v1664_v24 = vcombine.high %v36_v22, %v44_v23  ;;  %v1663_v26 = vcombine.low %v36_v22, %v44_v23  ;;  %v2128_v27 = vld [vmem:[%s2664_s1 + $0x390] sm:$0xff]   ;;  %v2129_v28 = vld [vmem:[%s2664_s1 + $0x358] sm:$0xff]  }
  0x46   :  { %1939 = vmatprep.subr.bf16.mxu1 %v2090_v29  ;;  %1374 = vmatprep.mubr.bf16.mxu0 %v1658_v34  ;;  %v2130_v29 = vld [vmem:[%s2664_s1 + $0x3d8] sm:$0xff]   ;;  %v2135_v34 = vld [vmem:[%s2664_s1 + $0x320] sm:$0xff]  }
  0x47   :  { %1423 = vmatprep.mubr.bf16.mxu1 %v1660_v40  ;;  %v2141_v40 = vld [vmem:[%s2664_s1 + $0x370] sm:$0xff]  }
  0x48   :  { %1912 = vmatpush3.bf16.msra.mxu0 %v2091_v30  ;;  %v2131_v30 = vld [vmem:[%s2664_s1 + $0x318] sm:$0xff]  }
  0x49   :  { %1940 = vmatpush3.bf16.msra.mxu1 %v2092_v31  ;;  %1913 = vmatprep.subr.bf16.mxu0 %v2093_v36  ;;  %v2132_v31 = vld [vmem:[%s2664_s1 + $0x398] sm:$0xff]   ;;  %v2137_v36 = vld [vmem:[%s2664_s1 + $0x368] sm:$0xff]  }
  0x4a   :  { %1941 = vmatprep.subr.bf16.mxu1 %v2094_v37  ;;  %v2138_v37 = vld [vmem:[%s2664_s1 + $0x3e8] sm:$0xff]  }
  0x4b   :  { %1375 = vmatmul.mubr.bf16.gmra.mrb[12].mxu0 %v1657_v35  ;;  %v2136_v35 = vld [vmem:[%s2664_s1 + $0x3a0] sm:$0xff]  }
  0x4c   :  { %1914 = vmatpush3.bf16.msra.mxu0 %v2095_v41  ;;  %1424 = vmatmul.mubr.bf16.gmra.mrb[12].mxu1 %v1659_v42  ;;  %v2142_v41 = vld [vmem:[%s2664_s1 + $0x3f0] sm:$0xff]  }
  0x4d   :  { %1942 = vmatpush3.bf16.msra.mxu1 %v2096_v43  ;;  %1915 = vmatprep.subr.bf16.mxu0 %v2097_v44  ;;  %v2143_v42 = vld [vmem:[%s2664_s1 + $0x330] sm:$0xff]   ;;  %v2145_v44 = vld [vmem:[%s2664_s1 + $0x378] sm:$0xff]  }
  0x4e   :  { %1943 = vmatprep.subr.bf16.mxu1 %v2098_v45  ;;  %1464 = vmatprep.mubr.bf16.mxu0 %v1646_v3  ;;  %v2144_v43 = vld [vmem:[%s2664_s1 + $0x3b0] sm:$0xff]   ;;  %v2146_v45 = vld [vmem:[%s2664_s1 + $0x3f8] sm:$0xff]  }
  0x4f   :  { %1513 = vmatprep.mubr.bf16.mxu1 %v1648_v7 }
  0x50   :  { %1916 = vmatpush3.bf16.msra.mxu0 %v2099_v46  ;;  %v2147_v46 = vld [vmem:[%s2664_s1 + $0x338] sm:$0xff]  }
  0x51   :  { %1944 = vmatpush3.bf16.msra.mxu1 %v2100_v47  ;;  %1917 = vmatprep.subr.bf16.mxu0 %v2101_v48  ;;  %v2148_v47 = vld [vmem:[%s2664_s1 + $0x3b8] sm:$0xff]   ;;  %v21_v48 = vld [vmem:[%s2665_s0 + $0x30] sm:$0xff] }
  0x52   :  { %1945 = vmatprep.subr.bf16.mxu1 %v2102_v49  ;;  %v29_v49 = vld [vmem:[%s2665_s0 + $0x70] sm:$0xff] }
  0x54   :  { %1918 = vmatpush3.bf16.msra.mxu0 %v2103_v50  ;;  %v22_v50 = vld [vmem:[%s2665_s0 + $0x38] sm:$0xff] }
  0x55   :  { %1946 = vmatpush3.bf16.msra.mxu1 %v2104_v51  ;;  %1919 = vmatprep.subr.bf16.mxu0 %v2105_v52  ;;  %v1649_v51 = vcombine.low %v21_v48, %v29_v49  ;;  %v1650_v52 = vcombine.high %v21_v48, %v29_v49 }
  0x56   :  { %1947 = vmatprep.subr.bf16.mxu1 %v2106_v53  ;;  %v30_v53 = vld [vmem:[%s2665_s0 + $0x78] sm:$0xff] }
  0x58   :  { %1920 = vmatpush3.bf16.msra.mxu0 %v2107_v54  ;;  %v37_v54 = vld [vmem:[%s2665_s0 + $0xb0] sm:$0xff] }
  0x59   :  { %1948 = vmatpush3.bf16.msra.mxu1 %v2108_v55  ;;  %1921 = vmatprep.subr.bf16.mxu0 %v2109_v56  ;;  %v45_v55 = vld [vmem:[%s2665_s0 + $0xf0] sm:$0xff]  ;;  %v1651_v56 = vcombine.low %v22_v50, %v30_v53 }
  0x5a   :  { %1949 = vmatprep.subr.bf16.mxu1 %v2110_v57  ;;  %v1652_v57 = vcombine.high %v22_v50, %v30_v53 }
  0x5c   :  { %1922 = vmatpush3.bf16.msra.mxu0 %v2111_v58  ;;  %v1666_v58 = vcombine.high %v37_v54, %v45_v55 }
  0x5d   :  { %1950 = vmatpush3.bf16.msra.mxu1 %v2112_v59  ;;  %1923 = vmatprep.subr.bf16.mxu0 %v2113_v60  ;;  %v38_v59 = vld [vmem:[%s2665_s0 + $0xb8] sm:$0xff] }
  0x5e   :  { %1951 = vmatprep.subr.bf16.mxu1 %v2114_v61  ;;  %v46_v60 = vld [vmem:[%s2665_s0 + $0xf8] sm:$0xff] }
  0x5f   :  { %v1668_v61 = vcombine.high %v38_v59, %v46_v60 }
  0x60   :  { %1924 = vmatpush3.bf16.msra.mxu0 %v2115_v62  ;;  %v1665_v62 = vcombine.low %v37_v54, %v45_v55 }
  0x61   :  { %1952 = vmatpush3.bf16.msra.mxu1 %v2116_v63  ;;  %1965 = vmatprep.subr.bf16.mxu0 %v2117_v8  ;;  %v1667_v63 = vcombine.low %v38_v59, %v46_v60 }
  0x62   :  { %1993 = vmatprep.subr.bf16.mxu1 %v2118_v9 }
  0x63   :  { %1465 = vmatmul.mubr.bf16.vlgmr.msra.gmra.mrb[16].mxu0 %v1645_v2  ;;  %v1636_v2 = vld [vmem:[%s2666_s2] ss:$0 sm:$0xff] }
  0x64   :  { %1514 = vmatmul.mubr.bf16.vlgmr.msra.gmra.mrb[16].mxu1 %v1647_v6  ;;  %1966 = vmatpush3.bf16.msra.mxu0 %v2119_v10 }
  0x65   :  { %1994 = vmatpush3.bf16.msra.mxu1 %v2120_v11  ;;  %1967 = vmatprep.subr.bf16.mxu0 %v2121_v12 }
  0x66   :  { %1995 = vmatprep.subr.bf16.mxu1 %v2122_v13  ;;  %1472 = vmatprep.mubr.bf16.mxu0 %v1662_v18 }
  0x67   :  { %1521 = vmatprep.mubr.bf16.mxu1 %v1664_v24 }
  0x68   :  { %1968 = vmatpush3.bf16.msra.mxu0 %v2123_v14 }
  0x69   :  { %1996 = vmatpush3.bf16.msra.mxu1 %v2124_v15  ;;  %1969 = vmatprep.subr.bf16.mxu0 %v2125_v20 }
  0x6a   :  { %1997 = vmatprep.subr.bf16.mxu1 %v2126_v21 }
  0x6b   :  { %1473 = vmatmul.mubr.bf16.gmra.mrb[20].mxu0 %v1661_v19 }
  0x6c   :  { %1970 = vmatpush3.bf16.msra.mxu0 %v2127_v25  ;;  %1522 = vmatmul.mubr.bf16.gmra.mrb[20].mxu1 %v1663_v26 }
  0x6d   :  { %1998 = vmatpush3.bf16.msra.mxu1 %v2128_v27  ;;  %1971 = vmatprep.subr.bf16.mxu0 %v2129_v28 }
  0x6e   :  { %1999 = vmatprep.subr.bf16.mxu1 %v2130_v29  ;;  %1562 = vmatprep.mubr.bf16.mxu0 %v1650_v52 }
  0x6f   :  { %1611 = vmatprep.mubr.bf16.mxu1 %v1652_v57 }
  0x70   :  { %1972 = vmatpush3.bf16.msra.mxu0 %v2131_v30 }
  0x71   :  { %2000 = vmatpush3.bf16.msra.mxu1 %v2132_v31  ;;  %1973 = vmatprep.subr.bf16.mxu0 %v2133_v32 }
  0x72   :  { %2001 = vmatprep.subr.bf16.mxu1 %v2134_v33 }
  0x74   :  { %1974 = vmatpush3.bf16.msra.mxu0 %v2135_v34 }
  0x75   :  { %2002 = vmatpush3.bf16.msra.mxu1 %v2136_v35  ;;  %1975 = vmatprep.subr.bf16.mxu0 %v2137_v36 }
  0x76   :  { %2003 = vmatprep.subr.bf16.mxu1 %v2138_v37 }
  0x78   :  { %1976 = vmatpush3.bf16.msra.mxu0 %v2139_v38 }
  0x79   :  { %2004 = vmatpush3.bf16.msra.mxu1 %v2140_v39  ;;  %1977 = vmatprep.subr.bf16.mxu0 %v2141_v40 }
  0x7a   :  { %2005 = vmatprep.subr.bf16.mxu1 %v2142_v41 }
  0x7c   :  { %1978 = vmatpush3.bf16.msra.mxu0 %v2143_v42 }
  0x7d   :  { %2006 = vmatpush3.bf16.msra.mxu1 %v2144_v43  ;;  %1979 = vmatprep.subr.bf16.mxu0 %v2145_v44 }
  0x7e   :  { %2007 = vmatprep.subr.bf16.mxu1 %v2146_v45 }
  0x80   :  { %1980 = vmatpush3.bf16.msra.mxu0 %v2147_v46 }
  0x81   :  { %2008 = vmatpush3.bf16.msra.mxu1 %v2148_v47 }
  0x83   :  { %1563 = vmatmul.mubr.bf16.vlgmr.msra.gmra.mrb[24].mxu0 %v1649_v51 }
  0x84   :  { %1612 = vmatmul.mubr.bf16.vlgmr.msra.gmra.mrb[24].mxu1 %v1651_v56  ;;  %1570 = vmatprep.mubr.bf16.mxu0 %v1666_v58 }
  0x85   :  { %1619 = vmatprep.mubr.bf16.mxu1 %v1668_v61 }
  0x8b   :  { %1571 = vmatmul.mubr.bf16.gmra.mrb[28].mxu0 %v1665_v62 }
  0x8c   :  { %1620 = vmatmul.mubr.bf16.gmra.mrb[28].mxu1 %v1667_v63 }
  0xf6   :  { %v1813_v0 = vpop.f32.mrb[0].mxu0 }
  0xf7   :  { %v1841_v1 = vpop.f32.mrb[0].mxu1  ;;  %v1814_v3 = vpop.f32.mrb[1].mxu0 }
  0xf8   :  { %v1815_v4 = vadd.f32 %v1814_v3, %v1813_v0  ;;  %v1842_v5 = vpop.f32.mrb[1].mxu1  ;;  %v1816_v6 = vpop.f32.mrb[2].mxu0 }
  0xf9   :  { %v1843_v7 = vadd.f32 %v1842_v5, %v1841_v1  ;;  %v1844_v8 = vpop.f32.mrb[2].mxu1  ;;  %v1817_v9 = vpop.f32.mrb[3].mxu0 }
  0xfa   :  { %v1271_v10 = vadd.f32 %v1815_v4, %v1636_v2  ;;  %v1818_v11 = vadd.f32 %v1817_v9, %v1816_v6  ;;  %v1845_v12 = vpop.f32.mrb[3].mxu1 }
  0xfb   :  { %v1846_v13 = vadd.f32 %v1845_v12, %v1844_v8 }
  0xfc   :  { %v1320_v14 = vadd.f32 %v1843_v7, %v1271_v10  ;;  %v1274_v15 = vadd.f32 %v1818_v11, %v1636_v2 }
  0xfe   :  { %v1323_v16 = vadd.f32 %v1846_v13, %v1274_v15  ;;  %v1819_v17 = vpop.f32.mrb[4].mxu0 }
  0xff   :  { %v1820_v18 = vpop.f32.mrb[5].mxu0  ;;  %v1847_v21 = vpop.f32.mrb[4].mxu1 }
 0x100   :  { %v1821_v19 = vadd.f32 %v1820_v18, %v1819_v17  ;;  %v1822_v20 = vpop.f32.mrb[6].mxu0  ;;  %v1848_v25 = vpop.f32.mrb[5].mxu1 }
 0x101   :  { %v1823_v22 = vpop.f32.mrb[7].mxu0  ;;  %v1849_v26 = vadd.f32 %v1848_v25, %v1847_v21  ;;  %v1850_v27 = vpop.f32.mrb[6].mxu1 }
 0x102   :  { %v1279_v23 = vadd.f32 %v1821_v19, %v1636_v2  ;;  %v1824_v24 = vadd.f32 %v1823_v22, %v1822_v20  ;;  %v1851_v29 = vpop.f32.mrb[7].mxu1 }
 0x103   :  { %v1852_v31 = vadd.f32 %v1851_v29, %v1850_v27 }
 0x104   :  { %v1282_v28 = vadd.f32 %v1824_v24, %v1636_v2  ;;  %v1328_v30 = vadd.f32 %v1849_v26, %v1279_v23 }
 0x106   :  { %v1331_v32 = vadd.f32 %v1852_v31, %v1282_v28 }
 0x116   :  { %v1869_v33 = vpop.f32.mrb[8].mxu0 }
 0x117   :  { %v1897_v34 = vpop.f32.mrb[8].mxu1  ;;  %v1870_v35 = vpop.f32.mrb[9].mxu0 }
 0x118   :  { %v1898_v36 = vpop.f32.mrb[9].mxu1  ;;  %v1871_v37 = vadd.f32 %v1870_v35, %v1869_v33  ;;  %v1872_v39 = vpop.f32.mrb[10].mxu0 }
 0x119   :  { %v1899_v38 = vadd.f32 %v1898_v36, %v1897_v34  ;;  %v1900_v40 = vpop.f32.mrb[10].mxu1  ;;  %v1873_v41 = vpop.f32.mrb[11].mxu0 }
 0x11a   :  { %v1901_v42 = vpop.f32.mrb[11].mxu1  ;;  %v1369_v43 = vadd.f32 %v1871_v37, %v1320_v14  ;;  %v1874_v44 = vadd.f32 %v1873_v41, %v1872_v39 }
 0x11b   :  { %v1902_v45 = vadd.f32 %v1901_v42, %v1900_v40 }
 0x11c   :  { %v1418_v46 = vadd.f32 %v1899_v38, %v1369_v43  ;;  %v1372_v47 = vadd.f32 %v1874_v44, %v1323_v16 }
 0x11e   :  { %v1421_v48 = vadd.f32 %v1902_v45, %v1372_v47  ;;  %v1875_v49 = vpop.f32.mrb[12].mxu0 }
 0x11f   :  { %v1876_v50 = vpop.f32.mrb[13].mxu0  ;;  %v1903_v55 = vpop.f32.mrb[12].mxu1 }
 0x120   :  { %v1877_v51 = vadd.f32 %v1876_v50, %v1875_v49  ;;  %v1878_v52 = vpop.f32.mrb[14].mxu0  ;;  %v1904_v57 = vpop.f32.mrb[13].mxu1 }
 0x121   :  { %v1879_v53 = vpop.f32.mrb[15].mxu0  ;;  %v1905_v59 = vadd.f32 %v1904_v57, %v1903_v55  ;;  %v1906_v60 = vpop.f32.mrb[14].mxu1 }
 0x122   :  { %v1377_v54 = vadd.f32 %v1877_v51, %v1328_v30  ;;  %v1880_v56 = vadd.f32 %v1879_v53, %v1878_v52  ;;  %v1907_v61 = vpop.f32.mrb[15].mxu1 }
 0x123   :  { %v1908_v63 = vadd.f32 %v1907_v61, %v1906_v60 }
 0x124   :  { %v1380_v58 = vadd.f32 %v1880_v56, %v1331_v32  ;;  %v1426_v62 = vadd.f32 %v1905_v59, %v1377_v54 }
 0x126   :  { %v1429_v0 = vadd.f32 %v1908_v63, %v1380_v58 }
 0x136   :  { %v1925_v1 = vpop.f32.mrb[16].mxu0 }
 0x137   :  { %v1953_v2 = vpop.f32.mrb[16].mxu1  ;;  %v1926_v3 = vpop.f32.mrb[17].mxu0 }
 0x138   :  { %v1927_v4 = vadd.f32 %v1926_v3, %v1925_v1  ;;  %v1954_v5 = vpop.f32.mrb[17].mxu1  ;;  %v1928_v6 = vpop.f32.mrb[18].mxu0 }
 0x139   :  { %v1955_v7 = vadd.f32 %v1954_v5, %v1953_v2  ;;  %v1956_v8 = vpop.f32.mrb[18].mxu1  ;;  %v1929_v9 = vpop.f32.mrb[19].mxu0 }
 0x13a   :  { %v1467_v10 = vadd.f32 %v1927_v4, %v1418_v46  ;;  %v1930_v11 = vadd.f32 %v1929_v9, %v1928_v6  ;;  %v1957_v12 = vpop.f32.mrb[19].mxu1 }
 0x13b   :  { %v1958_v13 = vadd.f32 %v1957_v12, %v1956_v8 }
 0x13c   :  { %v1516_v14 = vadd.f32 %v1955_v7, %v1467_v10  ;;  %v1470_v15 = vadd.f32 %v1930_v11, %v1421_v48 }
 0x13e   :  { %v1519_v16 = vadd.f32 %v1958_v13, %v1470_v15  ;;  %v1931_v17 = vpop.f32.mrb[20].mxu0 }
 0x13f   :  { %v1932_v18 = vpop.f32.mrb[21].mxu0  ;;  %v1959_v21 = vpop.f32.mrb[20].mxu1 }
 0x140   :  { %v1933_v19 = vadd.f32 %v1932_v18, %v1931_v17  ;;  %v1934_v20 = vpop.f32.mrb[22].mxu0  ;;  %v1960_v25 = vpop.f32.mrb[21].mxu1 }
 0x141   :  { %v1935_v22 = vpop.f32.mrb[23].mxu0  ;;  %v1961_v26 = vadd.f32 %v1960_v25, %v1959_v21  ;;  %v1962_v27 = vpop.f32.mrb[22].mxu1 }
 0x142   :  { %v1475_v23 = vadd.f32 %v1933_v19, %v1426_v62  ;;  %v1936_v24 = vadd.f32 %v1935_v22, %v1934_v20  ;;  %v1963_v29 = vpop.f32.mrb[23].mxu1 }
 0x143   :  { %v1964_v31 = vadd.f32 %v1963_v29, %v1962_v27 }
 0x144   :  { %v1478_v28 = vadd.f32 %v1936_v24, %v1429_v0  ;;  %v1524_v30 = vadd.f32 %v1961_v26, %v1475_v23 }
 0x146   :  { %v1527_v32 = vadd.f32 %v1964_v31, %v1478_v28 }
 0x156   :  { %v1981_v33 = vpop.f32.mrb[24].mxu0 }
 0x157   :  { %v2009_v34 = vpop.f32.mrb[24].mxu1  ;;  %v1982_v35 = vpop.f32.mrb[25].mxu0 }
 0x158   :  { %v1983_v36 = vadd.f32 %v1982_v35, %v1981_v33  ;;  %v2010_v37 = vpop.f32.mrb[25].mxu1  ;;  %v1984_v38 = vpop.f32.mrb[26].mxu0 }
 0x159   :  { %v2011_v39 = vadd.f32 %v2010_v37, %v2009_v34  ;;  %v2012_v40 = vpop.f32.mrb[26].mxu1  ;;  %v1985_v41 = vpop.f32.mrb[27].mxu0 }
 0x15a   :  { %v1565_v42 = vadd.f32 %v1983_v36, %v1516_v14  ;;  %v1986_v43 = vadd.f32 %v1985_v41, %v1984_v38  ;;  %v2013_v44 = vpop.f32.mrb[27].mxu1 }
 0x15b   :  { %v2014_v45 = vadd.f32 %v2013_v44, %v2012_v40 }
 0x15c   :  { %v1614_v46 = vadd.f32 %v2011_v39, %v1565_v42  ;;  %v1568_v47 = vadd.f32 %v1986_v43, %v1519_v16 }
 0x15e   :  { %1628 = vst [vmem:[%s2667_s3] sm:$0xff] %v1614_v46  ;;  %v1617_v48 = vadd.f32 %v2014_v45, %v1568_v47  ;;  %v1987_v49 = vpop.f32.mrb[28].mxu0 }
 0x15f   :  { %v2015_v50 = vpop.f32.mrb[28].mxu1  ;;  %v1988_v51 = vpop.f32.mrb[29].mxu0 }
 0x160   :  { %1629 = vst [vmem:[%s2667_s3 + $0x8] sm:$0xff] %v1617_v48  ;;  %v1989_v52 = vadd.f32 %v1988_v51, %v1987_v49  ;;  %v2016_v53 = vpop.f32.mrb[29].mxu1  ;;  %v1990_v54 = vpop.f32.mrb[30].mxu0 }
 0x161   :  { %v2017_v55 = vadd.f32 %v2016_v53, %v2015_v50  ;;  %v2018_v56 = vpop.f32.mrb[30].mxu1  ;;  %v1991_v57 = vpop.f32.mrb[31].mxu0 }
 0x162   :  { %v1573_v58 = vadd.f32 %v1989_v52, %v1524_v30  ;;  %v1992_v59 = vadd.f32 %v1991_v57, %v1990_v54  ;;  %v2019_v60 = vpop.f32.mrb[31].mxu1 }
 0x163   :  { %v2020_v61 = vadd.f32 %v2019_v60, %v2018_v56 }
 0x164   :  { %v1622_v62 = vadd.f32 %v2017_v55, %v1573_v58  ;;  %v1576_v63 = vadd.f32 %v1992_v59, %v1527_v32 }
 0x166   :  { %1630 = vst [vmem:[%s2667_s3 + $0x10] sm:$0xff] %v1622_v62  ;;  %v1625_v0 = vadd.f32 %v2020_v61, %v1576_v63 }
 0x168   :  { %1631 = vst [vmem:[%s2667_s3 + $0x18] sm:$0xff] %v1625_v0 }

</bundles_post_ra>
